<compile_context>
chip_gen: v7x
topology: tpu7x:2x2x1
jax: 0.10.0
libtpu: 0.0.40
codegen_flags: <defaults>
</compile_context>

<pallas_src>
import functools

import jax
import jax.numpy as jnp
from jax.experimental import pallas as pl
from jax.experimental.pallas import tpu as pltpu


# ----------------------------------------------------------------------------
# Pallas kernels
# ----------------------------------------------------------------------------
def _gemm_bias_act_kernel(x_ref, w_ref, b_ref, o_ref, *, activation):
    # x: (TM, K) bf16 tile, w: (K, N) bf16 resident, b: (1, N) f32.
    acc = jnp.dot(x_ref[...], w_ref[...], preferred_element_type=jnp.float32)
    acc = acc + b_ref[...]
    if activation == "relu":
        acc = jnp.maximum(acc, 0.0)
    elif activation == "tanh":
        acc = jnp.tanh(acc)
    o_ref[...] = acc.astype(o_ref.dtype)


def _gemmT_bias_act_kernel(w_ref, x_ref, b_ref, o_ref, *, activation):
    # w: (R, K) bf16 resident, x: (K, TL) bf16 tile, b: (1, 1) f32 scalar.
    acc = jnp.dot(w_ref[...], x_ref[...], preferred_element_type=jnp.float32)
    acc = acc + b_ref[...]
    if activation == "relu":
        acc = jnp.maximum(acc, 0.0)
    elif activation == "tanh":
        acc = jnp.tanh(acc)
    o_ref[...] = acc.astype(o_ref.dtype)


# ----------------------------------------------------------------------------
# Wrappers
# ----------------------------------------------------------------------------
_VMEM_WORKSET_BUDGET = 20 * 1024 * 1024   # sized for v7x (64 MiB VMEM / TC);
_VMEM_LIMIT_BYTES = 32 * 1024 * 1024      # v5e/v6e (128 MiB) could go bigger.


def _round_up(x, m):
    return (x + m - 1) // m * m


def _pick_tm(mp16, K, N, budget=_VMEM_WORKSET_BUDGET):
    """Largest row tile whose double-buffered working set fits the budget."""
    fixed = K * N * 2 + N * 4                      # resident bf16 w + f32 b
    tm = 512
    while tm > 16:
        work = fixed + 2 * (tm * K * 2 + tm * N * 4)   # 2x-buffered x/out tiles
        if work <= budget:
            break
        tm //= 2
    return max(16, min(tm, mp16))


def gemm_bias_act(x, w, b, activation="none"):
    """act(x @ w + b): x (M, K), w (K, N), b (N,) -> (M, N) f32. M-tiled."""
    M, K = x.shape
    _, N = w.shape
    mp16 = _round_up(M, 16)                        # bf16 sublane packing
    tm = _pick_tm(mp16, K, N)
    grid_m = pl.cdiv(mp16, tm)
    Mp = grid_m * tm

    xb = jnp.pad(x, ((0, Mp - M), (0, 0))).astype(jnp.bfloat16)
    wb = w.astype(jnp.bfloat16)
    bf = b.astype(jnp.float32).reshape(1, N)

    kernel = functools.partial(_gemm_bias_act_kernel, activation=activation)
    out = pl.pallas_call(
        kernel,
        out_shape=jax.ShapeDtypeStruct((Mp, N), jnp.float32),
        grid=(grid_m,),
        in_specs=[
            pl.BlockSpec((tm, K), lambda i: (i, 0)),
            pl.BlockSpec((K, N), lambda i: (0, 0)),     # VMEM-resident weight
            pl.BlockSpec((1, N), lambda i: (0, 0)),     # VMEM-resident bias
        ],
        out_specs=pl.BlockSpec((tm, N), lambda i: (i, 0)),
        compiler_params=pltpu.CompilerParams(
            dimension_semantics=("parallel",),
            vmem_limit_bytes=_VMEM_LIMIT_BYTES),
    )(xb, wb, bf)
    return out[:M]


def gemmT_bias_act(w, xT, b_scalar, activation="none", tl_target=2048):
    """act(w @ xT + b): w (R, K), xT (K, M) -> (R, M) f32, lane-dense in M."""
    R, K = w.shape
    _, M = xT.shape
    Mp = _round_up(M, 128)
    tl = min(tl_target, Mp)
    grid_l = pl.cdiv(Mp, tl)
    Mp = grid_l * tl

    xb = jnp.pad(xT, ((0, 0), (0, Mp - M))).astype(jnp.bfloat16)
    wb = w.astype(jnp.bfloat16)
    bf = jnp.asarray(b_scalar, jnp.float32).reshape(1, 1)

    kernel = functools.partial(_gemmT_bias_act_kernel, activation=activation)
    out = pl.pallas_call(
        kernel,
        out_shape=jax.ShapeDtypeStruct((R, Mp), jnp.float32),
        grid=(grid_l,),
        in_specs=[
            pl.BlockSpec((R, K), lambda i: (0, 0)),     # resident phase weights
            pl.BlockSpec((K, tl), lambda i: (0, i)),
            pl.BlockSpec((1, 1), lambda i: (0, 0)),
        ],
        out_specs=pl.BlockSpec((R, tl), lambda i: (0, i)),
        compiler_params=pltpu.CompilerParams(
            dimension_semantics=("parallel",),
            vmem_limit_bytes=_VMEM_LIMIT_BYTES),
    )(wb, xb, bf)
    return out[:, :M]


# ----------------------------------------------------------------------------
# NHWC glue (plain JAX; data movement only)
# ----------------------------------------------------------------------------
def im2col_nhwc(x, k, stride, pad):
    """x: (N, H, W, C) -> (N*Ho*Wo, k*k*C), K flattened as (kh, kw, c)."""
    N, H, W, C = x.shape
    xp = jnp.pad(x, ((0, 0), (pad, pad), (pad, pad), (0, 0)))
    Ho = (H + 2 * pad - k) // stride + 1
    Wo = (W + 2 * pad - k) // stride + 1
    cols = []
    for kh in range(k):
        for kw in range(k):
            cols.append(xp[:, kh:kh + stride * (Ho - 1) + 1:stride,
                            kw:kw + stride * (Wo - 1) + 1:stride, :])
    col = jnp.stack(cols, axis=3)                  # (N, Ho, Wo, k*k, C)
    return col.reshape(N * Ho * Wo, k * k * C), Ho, Wo


# 4-phase sub-pixel decomposition of ConvTranspose2d(k=4, s=2, p=1).
# Output parity a (resp. b) uses kernel taps _TAPS[a] over 2 input rows (cols).
_TAPS = ((3, 1), (2, 0))


def _col3x3(x_nhwc):
    """3x3 im2col (stride 1) over the 1-padded input; shared by all 4 phases."""
    N, H, W, C = x_nhwc.shape
    xp = jnp.pad(x_nhwc, ((0, 0), (1, 1), (1, 1), (0, 0)))
    cols = [xp[:, eh:eh + H, ew:ew + W, :] for eh in range(3) for ew in range(3)]
    return cols, N, H, W, C


def convt_4phase_fused(x_nhwc, wt, bias, activation):
    """ConvTranspose2d(k4,s2,p1) as one GEMM: (M, 9*Cin) @ (9*Cin, 4*Cout)."""
    cols, N, H, W, Cin = _col3x3(x_nhwc)
    Cout = wt.shape[1]
    col = jnp.stack(cols, axis=3).reshape(N * H * W, 9 * Cin)   # K = (eh, ew, ci)

    # Embed each 2x2 phase kernel into the 3x3 window; columns = (phase, co).
    we = jnp.zeros((9, Cin, 4, Cout), wt.dtype)
    for a in range(2):
        for b in range(2):
            r = 2 * a + b
            for dh in range(2):
                for dw in range(2):
                    p = (a + dh) * 3 + (b + dw)
                    we = we.at[p, :, r, :].set(wt[:, :, _TAPS[a][dh], _TAPS[b][dw]])
    we = we.reshape(9 * Cin, 4 * Cout)
    be = jnp.tile(bias, 4)                                      # (4*Cout,)

    out = gemm_bias_act(col, we, be, activation)                # (N*H*W, 4*Cout)
    out = out.reshape(N, H, W, 2, 2, Cout)                      # (n,ph,pw,a,b,co)
    out = out.transpose(0, 1, 3, 2, 4, 5).reshape(N, 2 * H, 2 * W, Cout)
    return out


def convt_4phase_lane_dense(x_nhwc, wt, bias, activation):
    """Same decomposition, transposed GEMM so the 1-channel output is lane-dense."""
    cols, N, H, W, Cin = _col3x3(x_nhwc)
    colT = jnp.stack(cols, axis=0)                              # (9, N, H, W, Cin)
    colT = colT.transpose(0, 4, 1, 2, 3).reshape(9 * Cin, N * H * W)

    we = jnp.zeros((4, 9, Cin), wt.dtype)                       # (phase, p, ci)
    for a in range(2):
        for b in range(2):
            r = 2 * a + b
            for dh in range(2):
                for dw in range(2):
                    p = (a + dh) * 3 + (b + dw)
                    we = we.at[r, p, :].set(wt[:, 0, _TAPS[a][dh], _TAPS[b][dw]])
    we = we.reshape(4, 9 * Cin)

    out = gemmT_bias_act(we, colT, bias[0], activation)         # (4, N*H*W)
    out = out.reshape(2, 2, N, H, W)                            # (a, b, n, ph, pw)
    out = out.transpose(2, 3, 0, 4, 1).reshape(N, 2 * H, 2 * W, 1)
    return out


# ----------------------------------------------------------------------------
# Deterministic parameter init (shapes from AutoEncoder.__init__, cap=64, z=10)
# ----------------------------------------------------------------------------
def init_params(key, capacity=64, latent_dim=10):
    def uni(k, shape, fan_in):
        bound = 1.0 / float(fan_in) ** 0.5
        return jax.random.uniform(k, shape, jnp.float32, -bound, bound)

    ks = jax.random.split(key, 12)
    c, c2, ld = capacity, capacity * 2, latent_dim
    p = {}
    # Encoder
    p["enc_conv1_w"] = uni(ks[0], (c, 1, 4, 4), 1 * 16)          # Conv2d(1, 64)
    p["enc_conv1_b"] = uni(ks[1], (c,), 1 * 16)
    p["enc_conv2_w"] = uni(ks[2], (c2, c, 4, 4), c * 16)         # Conv2d(64, 128)
    p["enc_conv2_b"] = uni(ks[3], (c2,), c * 16)
    p["enc_fc_w"] = uni(ks[4], (ld, c2 * 7 * 7), c2 * 7 * 7)     # Linear(6272, 10)
    p["enc_fc_b"] = uni(ks[5], (ld,), c2 * 7 * 7)
    # Decoder
    p["dec_fc_w"] = uni(ks[6], (c2 * 7 * 7, ld), ld)             # Linear(10, 6272)
    p["dec_fc_b"] = uni(ks[7], (c2 * 7 * 7,), ld)
    p["dec_conv2_w"] = uni(ks[8], (c2, c, 4, 4), c2 * 16)        # ConvT(128, 64)
    p["dec_conv2_b"] = uni(ks[9], (c,), c2 * 16)
    p["dec_conv1_w"] = uni(ks[10], (c, 1, 4, 4), c * 16)         # ConvT(64, 1)
    p["dec_conv1_b"] = uni(ks[11], (1,), c * 16)
    return p


# ----------------------------------------------------------------------------
# Forward pass (== AutoEncoder.forward), NHWC internally
# ----------------------------------------------------------------------------
def autoencoder_forward(params, x, capacity=64, latent_dim=10):
    c, c2 = capacity, capacity * 2
    N = x.shape[0]
    h = jnp.transpose(x, (0, 2, 3, 1))                           # NHWC (N,28,28,1)

    # ---- Encoder ----
    # conv1: Conv2d(1 -> 64, k4, s2, p1) + ReLU   (28 -> 14)
    # TODO(synk): C_in=1 gives K=16; could be a VPU FMA loop instead of an MXU GEMM.
    col, Ho, Wo = im2col_nhwc(h, k=4, stride=2, pad=1)
    w = params["enc_conv1_w"].transpose(2, 3, 1, 0).reshape(16, c)
    h = gemm_bias_act(col, w, params["enc_conv1_b"], "relu").reshape(N, Ho, Wo, c)

    # conv2: Conv2d(64 -> 128, k4, s2, p1) + ReLU (14 -> 7)
    col, Ho, Wo = im2col_nhwc(h, k=4, stride=2, pad=1)
    w = params["enc_conv2_w"].transpose(2, 3, 1, 0).reshape(16 * c, c2)
    h = gemm_bias_act(col, w, params["enc_conv2_b"], "relu").reshape(N, Ho, Wo, c2)

    # fc: Linear(6272 -> 10); permute weight cols from PyTorch (c,h,w) to our (h,w,c).
    w = params["enc_fc_w"].reshape(latent_dim, c2, 7, 7).transpose(0, 2, 3, 1)
    w = w.reshape(latent_dim, c2 * 49)
    latent = gemm_bias_act(h.reshape(N, -1), w.T, params["enc_fc_b"], "none")

    # ---- Decoder ----
    # fc: Linear(10 -> 6272); permute output cols so the view lands as NHWC.
    w = params["dec_fc_w"].reshape(c2, 7, 7, latent_dim).transpose(1, 2, 0, 3)
    w = w.reshape(c2 * 49, latent_dim)
    b = params["dec_fc_b"].reshape(c2, 7, 7).transpose(1, 2, 0).reshape(-1)
    d = gemm_bias_act(latent, w.T, b, "none").reshape(N, 7, 7, c2)

    # convT2: ConvTranspose2d(128 -> 64, k4, s2, p1) + ReLU (7 -> 14)
    d = convt_4phase_fused(d, params["dec_conv2_w"], params["dec_conv2_b"], "relu")

    # convT1: ConvTranspose2d(64 -> 1, k4, s2, p1) + tanh (14 -> 28), lane-dense
    out = convt_4phase_lane_dense(d, params["dec_conv1_w"], params["dec_conv1_b"],
                                  "tanh")                        # (N, 28, 28, 1)

    # NHWC -> NCHW; C=1 so this is a pure reshape.
    return out.reshape(N, 1, 28, 28)


if __name__ == "__main__":
    key = jax.random.PRNGKey(0)
    pkey, xkey = jax.random.split(key)
    params = init_params(pkey)
    # Spatial size 28 is forced by the module's view(N, 128, 7, 7); small batch=2.
    x = jax.random.normal(xkey, (2, 1, 28, 28), jnp.float32)
    fwd = jax.jit(autoencoder_forward)
    recon = fwd(params, x)
    jax.block_until_ready(recon)
    assert recon.shape == (2, 1, 28, 28), recon.shape
    print("KERNEL_OK")
</pallas_src>

<mosaic_0001>
module attributes {stable_mosaic.version = 11 : i64} {
  func.func @_gemm_bias_act_kernel(%arg0: i32, %arg1: memref<400x16xbf16, #tpu.memory_space<vmem>>, %arg2: memref<16x64xbf16, #tpu.memory_space<vmem>>, %arg3: memref<1x64xf32, #tpu.memory_space<vmem>>, %arg4: memref<400x64xf32, #tpu.memory_space<vmem>>) attributes {dimension_semantics = [#tpu.dimension_semantics<parallel>], iteration_bounds = array<i64: 1>, scalar_prefetch = 0 : i64, scratch_operands = 0 : i64, tpu.core_type = #tpu.core_type<tc>, window_params = [{transform_indices = @transform_0, window_bounds = array<i64: 400, 16>}, {pipeline_mode = #tpu.pipeline_mode<synchronous>, transform_indices = @transform_1, window_bounds = array<i64: 16, 64>}, {pipeline_mode = #tpu.pipeline_mode<synchronous>, transform_indices = @transform_2, window_bounds = array<i64: 1, 64>}, {transform_indices = @transform_3, window_bounds = array<i64: 400, 64>}]} {
    %c0 = arith.constant 0 : index
    %c0_0 = arith.constant 0 : index
    %0 = vector.load %arg1[%c0, %c0_0] : memref<400x16xbf16, #tpu.memory_space<vmem>>, vector<400x16xbf16>
    %c0_1 = arith.constant 0 : index
    %c0_2 = arith.constant 0 : index
    %1 = vector.load %arg2[%c0_1, %c0_2] : memref<16x64xbf16, #tpu.memory_space<vmem>>, vector<16x64xbf16>
    %cst = arith.constant dense<0.000000e+00> : vector<400x64xf32>
    %2 = tpu.matmul %0, %1, %cst {dimension_numbers = #tpu.dot_dimension_numbers<[1], [0], [0], [1], [0, 0, 1, 1], [], []>} : vector<400x16xbf16>, vector<16x64xbf16>, vector<400x64xf32> -> vector<400x64xf32>
    %c0_3 = arith.constant 0 : index
    %c0_4 = arith.constant 0 : index
    %3 = vector.load %arg3[%c0_3, %c0_4] : memref<1x64xf32, #tpu.memory_space<vmem>>, vector<1x64xf32>
    %4 = vector.broadcast %3 : vector<1x64xf32> to vector<400x64xf32>
    %5 = arith.addf %2, %4 : vector<400x64xf32>
    %cst_5 = arith.constant 0.000000e+00 : f32
    %6 = vector.broadcast %cst_5 : f32 to vector<400x64xf32>
    %7 = arith.maximumf %5, %6 : vector<400x64xf32>
    %c0_6 = arith.constant 0 : index
    %c0_7 = arith.constant 0 : index
    %8 = vector.load %arg4[%c0_6, %c0_7] : memref<400x64xf32, #tpu.memory_space<vmem>>, vector<400x64xf32>
    tpu.vector_store %arg4[%c0_6, %c0_7], %7 {strides = array<i32>} : memref<400x64xf32, #tpu.memory_space<vmem>>, vector<400x64xf32>,
    return
  }
  func.func @transform_0(%arg0: i32) -> (i32, i32) {
    %c0_i32 = arith.constant 0 : i32
    %c0_i32_0 = arith.constant 0 : i32
    return %arg0, %c0_i32 : i32, i32
  }
  func.func @transform_1(%arg0: i32) -> (i32, i32) {
    %c0_i32 = arith.constant 0 : i32
    %c0_i32_0 = arith.constant 0 : i32
    %c0_i32_1 = arith.constant 0 : i32
    return %c0_i32, %c0_i32_0 : i32, i32
  }
  func.func @transform_2(%arg0: i32) -> (i32, i32) {
    %c0_i32 = arith.constant 0 : i32
    %c0_i32_0 = arith.constant 0 : i32
    %c0_i32_1 = arith.constant 0 : i32
    return %c0_i32, %c0_i32_0 : i32, i32
  }
  func.func @transform_3(%arg0: i32) -> (i32, i32) {
    %c0_i32 = arith.constant 0 : i32
    %c0_i32_0 = arith.constant 0 : i32
    return %arg0, %c0_i32 : i32, i32
  }
}

module attributes {stable_mosaic.version = 11 : i64} {
  func.func @_gemm_bias_act_kernel(%arg0: i32, %arg1: memref<112x1024xbf16, #tpu.memory_space<vmem>>, %arg2: memref<1024x128xbf16, #tpu.memory_space<vmem>>, %arg3: memref<1x128xf32, #tpu.memory_space<vmem>>, %arg4: memref<112x128xf32, #tpu.memory_space<vmem>>) attributes {dimension_semantics = [#tpu.dimension_semantics<parallel>], iteration_bounds = array<i64: 1>, scalar_prefetch = 0 : i64, scratch_operands = 0 : i64, tpu.core_type = #tpu.core_type<tc>, window_params = [{transform_indices = @transform_0, window_bounds = array<i64: 112, 1024>}, {pipeline_mode = #tpu.pipeline_mode<synchronous>, transform_indices = @transform_1, window_bounds = array<i64: 1024, 128>}, {pipeline_mode = #tpu.pipeline_mode<synchronous>, transform_indices = @transform_2, window_bounds = array<i64: 1, 128>}, {transform_indices = @transform_3, window_bounds = array<i64: 112, 128>}]} {
    %c0 = arith.constant 0 : index
    %c0_0 = arith.constant 0 : index
    %0 = vector.load %arg1[%c0, %c0_0] : memref<112x1024xbf16, #tpu.memory_space<vmem>>, vector<112x1024xbf16>
    %c0_1 = arith.constant 0 : index
    %c0_2 = arith.constant 0 : index
    %1 = vector.load %arg2[%c0_1, %c0_2] : memref<1024x128xbf16, #tpu.memory_space<vmem>>, vector<1024x128xbf16>
    %cst = arith.constant dense<0.000000e+00> : vector<112x128xf32>
    %2 = tpu.matmul %0, %1, %cst {dimension_numbers = #tpu.dot_dimension_numbers<[1], [0], [0], [1], [0, 0, 1, 1], [], []>} : vector<112x1024xbf16>, vector<1024x128xbf16>, vector<112x128xf32> -> vector<112x128xf32>
    %c0_3 = arith.constant 0 : index
    %c0_4 = arith.constant 0 : index
    %3 = vector.load %arg3[%c0_3, %c0_4] : memref<1x128xf32, #tpu.memory_space<vmem>>, vector<1x128xf32>
    %4 = vector.broadcast %3 : vector<1x128xf32> to vector<112x128xf32>
    %5 = arith.addf %2, %4 : vector<112x128xf32>
    %cst_5 = arith.constant 0.000000e+00 : f32
    %6 = vector.broadcast %cst_5 : f32 to vector<112x128xf32>
    %7 = arith.maximumf %5, %6 : vector<112x128xf32>
    %c0_6 = arith.constant 0 : index
    %c0_7 = arith.constant 0 : index
    %8 = vector.load %arg4[%c0_6, %c0_7] : memref<112x128xf32, #tpu.memory_space<vmem>>, vector<112x128xf32>
    tpu.vector_store %arg4[%c0_6, %c0_7], %7 {strides = array<i32>} : memref<112x128xf32, #tpu.memory_space<vmem>>, vector<112x128xf32>,
    return
  }
  func.func @transform_0(%arg0: i32) -> (i32, i32) {
    %c0_i32 = arith.constant 0 : i32
    %c0_i32_0 = arith.constant 0 : i32
    return %arg0, %c0_i32 : i32, i32
  }
  func.func @transform_1(%arg0: i32) -> (i32, i32) {
    %c0_i32 = arith.constant 0 : i32
    %c0_i32_0 = arith.constant 0 : i32
    %c0_i32_1 = arith.constant 0 : i32
    return %c0_i32, %c0_i32_0 : i32, i32
  }
  func.func @transform_2(%arg0: i32) -> (i32, i32) {
    %c0_i32 = arith.constant 0 : i32
    %c0_i32_0 = arith.constant 0 : i32
    %c0_i32_1 = arith.constant 0 : i32
    return %c0_i32, %c0_i32_0 : i32, i32
  }
  func.func @transform_3(%arg0: i32) -> (i32, i32) {
    %c0_i32 = arith.constant 0 : i32
    %c0_i32_0 = arith.constant 0 : i32
    return %arg0, %c0_i32 : i32, i32
  }
}

module attributes {stable_mosaic.version = 11 : i64} {
  func.func @_gemm_bias_act_kernel(%arg0: i32, %arg1: memref<16x6272xbf16, #tpu.memory_space<vmem>>, %arg2: memref<6272x10xbf16, #tpu.memory_space<vmem>>, %arg3: memref<1x10xf32, #tpu.memory_space<vmem>>, %arg4: memref<16x10xf32, #tpu.memory_space<vmem>>) attributes {dimension_semantics = [#tpu.dimension_semantics<parallel>], iteration_bounds = array<i64: 1>, scalar_prefetch = 0 : i64, scratch_operands = 0 : i64, tpu.core_type = #tpu.core_type<tc>, window_params = [{transform_indices = @transform_0, window_bounds = array<i64: 16, 6272>}, {pipeline_mode = #tpu.pipeline_mode<synchronous>, transform_indices = @transform_1, window_bounds = array<i64: 6272, 10>}, {pipeline_mode = #tpu.pipeline_mode<synchronous>, transform_indices = @transform_2, window_bounds = array<i64: 1, 10>}, {transform_indices = @transform_3, window_bounds = array<i64: 16, 10>}]} {
    %c0 = arith.constant 0 : index
    %c0_0 = arith.constant 0 : index
    %0 = vector.load %arg1[%c0, %c0_0] : memref<16x6272xbf16, #tpu.memory_space<vmem>>, vector<16x6272xbf16>
    %c0_1 = arith.constant 0 : index
    %c0_2 = arith.constant 0 : index
    %1 = vector.load %arg2[%c0_1, %c0_2] : memref<6272x10xbf16, #tpu.memory_space<vmem>>, vector<6272x10xbf16>
    %cst = arith.constant dense<0.000000e+00> : vector<16x10xf32>
    %2 = tpu.matmul %0, %1, %cst {dimension_numbers = #tpu.dot_dimension_numbers<[1], [0], [0], [1], [0, 0, 1, 1], [], []>} : vector<16x6272xbf16>, vector<6272x10xbf16>, vector<16x10xf32> -> vector<16x10xf32>
    %c0_3 = arith.constant 0 : index
    %c0_4 = arith.constant 0 : index
    %3 = vector.load %arg3[%c0_3, %c0_4] : memref<1x10xf32, #tpu.memory_space<vmem>>, vector<1x10xf32>
    %4 = vector.broadcast %3 : vector<1x10xf32> to vector<16x10xf32>
    %5 = arith.addf %2, %4 : vector<16x10xf32>
    %c0_5 = arith.constant 0 : index
    %c0_6 = arith.constant 0 : index
    %6 = vector.load %arg4[%c0_5, %c0_6] : memref<16x10xf32, #tpu.memory_space<vmem>>, vector<16x10xf32>
    tpu.vector_store %arg4[%c0_5, %c0_6], %5 {strides = array<i32>} : memref<16x10xf32, #tpu.memory_space<vmem>>, vector<16x10xf32>,
    return
  }
  func.func @transform_0(%arg0: i32) -> (i32, i32) {
    %c0_i32 = arith.constant 0 : i32
    %c0_i32_0 = arith.constant 0 : i32
    return %arg0, %c0_i32 : i32, i32
  }
  func.func @transform_1(%arg0: i32) -> (i32, i32) {
    %c0_i32 = arith.constant 0 : i32
    %c0_i32_0 = arith.constant 0 : i32
    %c0_i32_1 = arith.constant 0 : i32
    return %c0_i32, %c0_i32_0 : i32, i32
  }
  func.func @transform_2(%arg0: i32) -> (i32, i32) {
    %c0_i32 = arith.constant 0 : i32
    %c0_i32_0 = arith.constant 0 : i32
    %c0_i32_1 = arith.constant 0 : i32
    return %c0_i32, %c0_i32_0 : i32, i32
  }
  func.func @transform_3(%arg0: i32) -> (i32, i32) {
    %c0_i32 = arith.constant 0 : i32
    %c0_i32_0 = arith.constant 0 : i32
    return %arg0, %c0_i32 : i32, i32
  }
}

module attributes {stable_mosaic.version = 11 : i64} {
  func.func @_gemm_bias_act_kernel(%arg0: i32, %arg1: memref<16x10xbf16, #tpu.memory_space<vmem>>, %arg2: memref<10x6272xbf16, #tpu.memory_space<vmem>>, %arg3: memref<1x6272xf32, #tpu.memory_space<vmem>>, %arg4: memref<16x6272xf32, #tpu.memory_space<vmem>>) attributes {dimension_semantics = [#tpu.dimension_semantics<parallel>], iteration_bounds = array<i64: 1>, scalar_prefetch = 0 : i64, scratch_operands = 0 : i64, tpu.core_type = #tpu.core_type<tc>, window_params = [{transform_indices = @transform_0, window_bounds = array<i64: 16, 10>}, {pipeline_mode = #tpu.pipeline_mode<synchronous>, transform_indices = @transform_1, window_bounds = array<i64: 10, 6272>}, {pipeline_mode = #tpu.pipeline_mode<synchronous>, transform_indices = @transform_2, window_bounds = array<i64: 1, 6272>}, {transform_indices = @transform_3, window_bounds = array<i64: 16, 6272>}]} {
    %c0 = arith.constant 0 : index
    %c0_0 = arith.constant 0 : index
    %0 = vector.load %arg1[%c0, %c0_0] : memref<16x10xbf16, #tpu.memory_space<vmem>>, vector<16x10xbf16>
    %c0_1 = arith.constant 0 : index
    %c0_2 = arith.constant 0 : index
    %1 = vector.load %arg2[%c0_1, %c0_2] : memref<10x6272xbf16, #tpu.memory_space<vmem>>, vector<10x6272xbf16>
    %cst = arith.constant dense<0.000000e+00> : vector<16x6272xf32>
    %2 = tpu.matmul %0, %1, %cst {dimension_numbers = #tpu.dot_dimension_numbers<[1], [0], [0], [1], [0, 0, 1, 1], [], []>} : vector<16x10xbf16>, vector<10x6272xbf16>, vector<16x6272xf32> -> vector<16x6272xf32>
    %c0_3 = arith.constant 0 : index
    %c0_4 = arith.constant 0 : index
    %3 = vector.load %arg3[%c0_3, %c0_4] : memref<1x6272xf32, #tpu.memory_space<vmem>>, vector<1x6272xf32>
    %4 = vector.broadcast %3 : vector<1x6272xf32> to vector<16x6272xf32>
    %5 = arith.addf %2, %4 : vector<16x6272xf32>
    %c0_5 = arith.constant 0 : index
    %c0_6 = arith.constant 0 : index
    %6 = vector.load %arg4[%c0_5, %c0_6] : memref<16x6272xf32, #tpu.memory_space<vmem>>, vector<16x6272xf32>
    tpu.vector_store %arg4[%c0_5, %c0_6], %5 {strides = array<i32>} : memref<16x6272xf32, #tpu.memory_space<vmem>>, vector<16x6272xf32>,
    return
  }
  func.func @transform_0(%arg0: i32) -> (i32, i32) {
    %c0_i32 = arith.constant 0 : i32
    %c0_i32_0 = arith.constant 0 : i32
    return %arg0, %c0_i32 : i32, i32
  }
  func.func @transform_1(%arg0: i32) -> (i32, i32) {
    %c0_i32 = arith.constant 0 : i32
    %c0_i32_0 = arith.constant 0 : i32
    %c0_i32_1 = arith.constant 0 : i32
    return %c0_i32, %c0_i32_0 : i32, i32
  }
  func.func @transform_2(%arg0: i32) -> (i32, i32) {
    %c0_i32 = arith.constant 0 : i32
    %c0_i32_0 = arith.constant 0 : i32
    %c0_i32_1 = arith.constant 0 : i32
    return %c0_i32, %c0_i32_0 : i32, i32
  }
  func.func @transform_3(%arg0: i32) -> (i32, i32) {
    %c0_i32 = arith.constant 0 : i32
    %c0_i32_0 = arith.constant 0 : i32
    return %arg0, %c0_i32 : i32, i32
  }
}

module attributes {stable_mosaic.version = 11 : i64} {
  func.func @_gemm_bias_act_kernel(%arg0: i32, %arg1: memref<112x1152xbf16, #tpu.memory_space<vmem>>, %arg2: memref<1152x256xbf16, #tpu.memory_space<vmem>>, %arg3: memref<1x256xf32, #tpu.memory_space<vmem>>, %arg4: memref<112x256xf32, #tpu.memory_space<vmem>>) attributes {dimension_semantics = [#tpu.dimension_semantics<parallel>], iteration_bounds = array<i64: 1>, scalar_prefetch = 0 : i64, scratch_operands = 0 : i64, tpu.core_type = #tpu.core_type<tc>, window_params = [{transform_indices = @transform_0, window_bounds = array<i64: 112, 1152>}, {pipeline_mode = #tpu.pipeline_mode<synchronous>, transform_indices = @transform_1, window_bounds = array<i64: 1152, 256>}, {pipeline_mode = #tpu.pipeline_mode<synchronous>, transform_indices = @transform_2, window_bounds = array<i64: 1, 256>}, {transform_indices = @transform_3, window_bounds = array<i64: 112, 256>}]} {
    %c0 = arith.constant 0 : index
    %c0_0 = arith.constant 0 : index
    %0 = vector.load %arg1[%c0, %c0_0] : memref<112x1152xbf16, #tpu.memory_space<vmem>>, vector<112x1152xbf16>
    %c0_1 = arith.constant 0 : index
    %c0_2 = arith.constant 0 : index
    %1 = vector.load %arg2[%c0_1, %c0_2] : memref<1152x256xbf16, #tpu.memory_space<vmem>>, vector<1152x256xbf16>
    %cst = arith.constant dense<0.000000e+00> : vector<112x256xf32>
    %2 = tpu.matmul %0, %1, %cst {dimension_numbers = #tpu.dot_dimension_numbers<[1], [0], [0], [1], [0, 0, 1, 1], [], []>} : vector<112x1152xbf16>, vector<1152x256xbf16>, vector<112x256xf32> -> vector<112x256xf32>
    %c0_3 = arith.constant 0 : index
    %c0_4 = arith.constant 0 : index
    %3 = vector.load %arg3[%c0_3, %c0_4] : memref<1x256xf32, #tpu.memory_space<vmem>>, vector<1x256xf32>
    %4 = vector.broadcast %3 : vector<1x256xf32> to vector<112x256xf32>
    %5 = arith.addf %2, %4 : vector<112x256xf32>
    %cst_5 = arith.constant 0.000000e+00 : f32
    %6 = vector.broadcast %cst_5 : f32 to vector<112x256xf32>
    %7 = arith.maximumf %5, %6 : vector<112x256xf32>
    %c0_6 = arith.constant 0 : index
    %c0_7 = arith.constant 0 : index
    %8 = vector.load %arg4[%c0_6, %c0_7] : memref<112x256xf32, #tpu.memory_space<vmem>>, vector<112x256xf32>
    tpu.vector_store %arg4[%c0_6, %c0_7], %7 {strides = array<i32>} : memref<112x256xf32, #tpu.memory_space<vmem>>, vector<112x256xf32>,
    return
  }
  func.func @transform_0(%arg0: i32) -> (i32, i32) {
    %c0_i32 = arith.constant 0 : i32
    %c0_i32_0 = arith.constant 0 : i32
    return %arg0, %c0_i32 : i32, i32
  }
  func.func @transform_1(%arg0: i32) -> (i32, i32) {
    %c0_i32 = arith.constant 0 : i32
    %c0_i32_0 = arith.constant 0 : i32
    %c0_i32_1 = arith.constant 0 : i32
    return %c0_i32, %c0_i32_0 : i32, i32
  }
  func.func @transform_2(%arg0: i32) -> (i32, i32) {
    %c0_i32 = arith.constant 0 : i32
    %c0_i32_0 = arith.constant 0 : i32
    %c0_i32_1 = arith.constant 0 : i32
    return %c0_i32, %c0_i32_0 : i32, i32
  }
  func.func @transform_3(%arg0: i32) -> (i32, i32) {
    %c0_i32 = arith.constant 0 : i32
    %c0_i32_0 = arith.constant 0 : i32
    return %arg0, %c0_i32 : i32, i32
  }
}

module attributes {stable_mosaic.version = 11 : i64} {
  func.func @_gemmT_bias_act_kernel(%arg0: i32, %arg1: memref<4x576xbf16, #tpu.memory_space<vmem>>, %arg2: memref<576x512xbf16, #tpu.memory_space<vmem>>, %arg3: memref<1x1xf32, #tpu.memory_space<vmem>>, %arg4: memref<4x512xf32, #tpu.memory_space<vmem>>) attributes {dimension_semantics = [#tpu.dimension_semantics<parallel>], iteration_bounds = array<i64: 1>, scalar_prefetch = 0 : i64, scratch_operands = 0 : i64, tpu.core_type = #tpu.core_type<tc>, window_params = [{pipeline_mode = #tpu.pipeline_mode<synchronous>, transform_indices = @transform_0, window_bounds = array<i64: 4, 576>}, {transform_indices = @transform_1, window_bounds = array<i64: 576, 512>}, {pipeline_mode = #tpu.pipeline_mode<synchronous>, transform_indices = @transform_2, window_bounds = array<i64: 1, 1>}, {transform_indices = @transform_3, window_bounds = array<i64: 4, 512>}]} {
    %c0 = arith.constant 0 : index
    %c0_0 = arith.constant 0 : index
    %0 = vector.load %arg1[%c0, %c0_0] : memref<4x576xbf16, #tpu.memory_space<vmem>>, vector<4x576xbf16>
    %c0_1 = arith.constant 0 : index
    %c0_2 = arith.constant 0 : index
    %1 = vector.load %arg2[%c0_1, %c0_2] : memref<576x512xbf16, #tpu.memory_space<vmem>>, vector<576x512xbf16>
    %cst = arith.constant dense<0.000000e+00> : vector<4x512xf32>
    %2 = tpu.matmul %0, %1, %cst {dimension_numbers = #tpu.dot_dimension_numbers<[1], [0], [0], [1], [0, 0, 1, 1], [], []>} : vector<4x576xbf16>, vector<576x512xbf16>, vector<4x512xf32> -> vector<4x512xf32>
    %c0_3 = arith.constant 0 : index
    %c0_4 = arith.constant 0 : index
    %3 = vector.load %arg3[%c0_3, %c0_4] : memref<1x1xf32, #tpu.memory_space<vmem>>, vector<1x1xf32>
    %4 = vector.broadcast %3 : vector<1x1xf32> to vector<4x512xf32>
    %5 = arith.addf %2, %4 : vector<4x512xf32>
    %6 = math.tanh %5 : vector<4x512xf32>
    %c0_5 = arith.constant 0 : index
    %c0_6 = arith.constant 0 : index
    %7 = vector.load %arg4[%c0_5, %c0_6] : memref<4x512xf32, #tpu.memory_space<vmem>>, vector<4x512xf32>
    tpu.vector_store %arg4[%c0_5, %c0_6], %6 {strides = array<i32>} : memref<4x512xf32, #tpu.memory_space<vmem>>, vector<4x512xf32>,
    return
  }
  func.func @transform_0(%arg0: i32) -> (i32, i32) {
    %c0_i32 = arith.constant 0 : i32
    %c0_i32_0 = arith.constant 0 : i32
    %c0_i32_1 = arith.constant 0 : i32
    return %c0_i32, %c0_i32_0 : i32, i32
  }
  func.func @transform_1(%arg0: i32) -> (i32, i32) {
    %c0_i32 = arith.constant 0 : i32
    %c0_i32_0 = arith.constant 0 : i32
    return %c0_i32, %arg0 : i32, i32
  }
  func.func @transform_2(%arg0: i32) -> (i32, i32) {
    %c0_i32 = arith.constant 0 : i32
    %c0_i32_0 = arith.constant 0 : i32
    %c0_i32_1 = arith.constant 0 : i32
    return %c0_i32, %c0_i32_0 : i32, i32
  }
  func.func @transform_3(%arg0: i32) -> (i32, i32) {
    %c0_i32 = arith.constant 0 : i32
    %c0_i32_0 = arith.constant 0 : i32
    return %c0_i32, %arg0 : i32, i32
  }
}

</mosaic_0001>

<bundles_post_ra>
// kernel: autoencoder_forward.6
= control target key start
LH: loop header
LB: loop body
LE: loop exit
PB: predicated region body
PF: predicated region fallthrough
CT: control target
= control target key end

     0   :  { %8 = vsyncpa [#allocation3], 0  ;;  %s867_s12 = smov [#allocation2]   ;;  %s1309_s0 = inlined_call_operand.vmem [shape: bf16[400,16], index: 0, kind: input, shape index: {}]   ;;  %s1310_s1 = inlined_call_operand.vmem [shape: bf16[16,64], index: 1, kind: input, shape index: {}]   ;;  %s1311_s2 = inlined_call_operand.hbm [shape: f32[1,64], index: 2, kind: input, shape index: {}]   ;;  %s1312_s3 = inlined_call_operand.vmem [shape: f32[400,64], index: 3, kind: output, shape index: {}]  }
   0x1   :  { %s19_s13 = sshll.u32 %s867_s12, 4  ;;  %s843_s16 = scalar_lea.hbm %s1311_s2, 16  ;;  %s20_s13 = int_to_ptr.vmem [resolvable:$true] %s19_s13 }
   0x2   :  { %p844_p0 = scmp.ne.s32.totalorder %s1311_s2, %s843_s16  ;;  %p847_p1 = scmp.lt.u32.totalorder %s843_s16, %s1311_s2 }
   0x4   :  { %p849_p2 = pnand %p847_p1, %p844_p0 }
   0x6   :  { %852 = shalt.err (!%p849_p2)
}
   0x7   :  { %s853_s21 = scalar_lea.vmem %s20_s13, 16  ;;  %s857_s22 = scalar_lea.vmem %s20_s13, 32 }
   0x8   :  { %p854_p3 = scmp.ne.s32.totalorder %s20_s13, %s853_s21  ;;  %p858_p4 = scmp.lt.s32.totalorder %s20_s13, %s20_s13 }
   0x9   :  { %p859_p5 = scmp.lt.s32.totalorder %s857_s22, %s853_s21 }
   0xb   :  { %p860_p6 = por %p859_p5, %p858_p4 }
   0xd   :  { %p861_p7 = pnand %p860_p6, %p854_p3 }
   0xf   :  { %864 = shalt.err (!%p861_p7)
}
  0x10   :  { %22 = dma.hbm_to_vmem [thread:$0]  %s1311_s2, 16, %s20_s13, [#allocation3]  }
  0x11   :  { %865 = dma.done.wait [#allocation3], 16  }
  0x12   :  { %866 = vsyncadd [#allocation3], 4294967280  ;;  %v868_v0 = vmov 0.0   ;;  %vm869_vm0 = vmmov 0   ;;  %v817_v1 = vld [vmem:[%s1310_s1] sm:$0xff]   ;;  %vm217_vm1 = vcmask 130048  }
  0x13   :  { %710 = vmatprep.subr.bf16.mxu0 %v868_v0  ;;  %712 = vmatprep.mubr.msk.bf16.mxu0 %vm869_vm0, %v868_v0  ;;  %v818_v2 = vld [vmem:[%s1309_s0] sm:$0xff]   ;;  %v819_v3 = vld [vmem:[%s1309_s0 + $0x68] sm:$0xff]   ;;  %v821_v5 = vld [vmem:[%s1309_s0 + $0x70] sm:$0xff]   ;;  %vm576_vm2 = vcmask 523264  }
  0x14   :  { %812 = vmatprep.subr.bf16.mxu1 %v868_v0  ;;  %764 = vmatprep.mubr.msk.bf16.mxu1 %vm869_vm0, %v868_v0  ;;  %v820_v4 = vld [vmem:[%s1309_s0 + $0x8] sm:$0xff]   ;;  %v822_v6 = vld [vmem:[%s1309_s0 + $0x10] sm:$0xff]   ;;  %v823_v7 = vld [vmem:[%s1309_s0 + $0x78] sm:$0xff]  }
  0x15   :  { %711 = vmatpush3.bf16.msra.mxu0 %v817_v1  ;;  %813 = vmatpush3.bf16.msra.mxu1 %v817_v1  ;;  %v824_v8 = vld [vmem:[%s1309_s0 + $0x18] sm:$0xff]   ;;  %v825_v9 = vld [vmem:[%s1309_s0 + $0x80] sm:$0xff]   ;;  %v827_v11 = vld [vmem:[%s1309_s0 + $0x88] sm:$0xff]  }
  0x16   :  { %v826_v10 = vld [vmem:[%s1309_s0 + $0x20] sm:$0xff]   ;;  %v828_v12 = vld [vmem:[%s1309_s0 + $0x28] sm:$0xff]   ;;  %v829_v13 = vld [vmem:[%s1309_s0 + $0x90] sm:$0xff]  }
  0x17   :  { %v830_v14 = vld [vmem:[%s1309_s0 + $0x30] sm:$0xff]   ;;  %v831_v15 = vld [vmem:[%s1309_s0 + $0x98] sm:$0xff]   ;;  %v833_v17 = vld [vmem:[%s1309_s0 + $0xa0] sm:$0xff]  }
  0x18   :  { %713 = vmatmul.mubr.msk.bf16.vlgmr.msra.gmra.mrb[0].mxu0 %vm217_vm1, %v818_v2  ;;  %765 = vmatmul.mubr.msk.bf16.vlgmr.msra.gmra.mrb[0].mxu1 %vm217_vm1, %v819_v3  ;;  %v832_v16 = vld [vmem:[%s1309_s0 + $0x38] sm:$0xff]   ;;  %v834_v18 = vld [vmem:[%s1309_s0 + $0x40] sm:$0xff]   ;;  %v835_v19 = vld [vmem:[%s1309_s0 + $0xa8] sm:$0xff]  }
  0x19   :  { %716 = vmatprep.mubr.msk.bf16.mxu0 %vm869_vm0, %v868_v0  ;;  %768 = vmatprep.mubr.msk.bf16.mxu1 %vm869_vm0, %v868_v0  ;;  %v836_v20 = vld [vmem:[%s1309_s0 + $0x48] sm:$0xff]   ;;  %v837_v21 = vld [vmem:[%s1309_s0 + $0xb0] sm:$0xff]   ;;  %v839_v23 = vld [vmem:[%s1309_s0 + $0xb8] sm:$0xff]  }
  0x1a   :  { %v838_v22 = vld [vmem:[%s1309_s0 + $0x50] sm:$0xff]   ;;  %v840_v24 = vld [vmem:[%s1309_s0 + $0x58] sm:$0xff]   ;;  %v841_v25 = vld [vmem:[%s1309_s0 + $0xc0] sm:$0xff]  }
  0x1b   :  { %v842_v26 = vld [vmem:[%s1309_s0 + $0x60] sm:$0xff]  }
  0x1c   :  { %v1057_v27 = vld [vmem:[#allocation2] ss:$0 sm:$0xff] }
  0x20   :  { %717 = vmatmul.mubr.msk.bf16.gmra.mrb[4].mxu0 %vm217_vm1, %v820_v4  ;;  %769 = vmatmul.mubr.msk.bf16.gmra.mrb[4].mxu1 %vm217_vm1, %v821_v5 }
  0x21   :  { %720 = vmatprep.mubr.msk.bf16.mxu0 %vm869_vm0, %v868_v0  ;;  %772 = vmatprep.mubr.msk.bf16.mxu1 %vm869_vm0, %v868_v0 }
  0x28   :  { %721 = vmatmul.mubr.msk.bf16.gmra.mrb[8].mxu0 %vm217_vm1, %v822_v6  ;;  %773 = vmatmul.mubr.msk.bf16.gmra.mrb[8].mxu1 %vm217_vm1, %v823_v7 }
  0x29   :  { %724 = vmatprep.mubr.msk.bf16.mxu0 %vm869_vm0, %v868_v0  ;;  %776 = vmatprep.mubr.msk.bf16.mxu1 %vm869_vm0, %v868_v0 }
  0x30   :  { %725 = vmatmul.mubr.msk.bf16.gmra.mrb[12].mxu0 %vm217_vm1, %v824_v8  ;;  %777 = vmatmul.mubr.msk.bf16.gmra.mrb[12].mxu1 %vm217_vm1, %v825_v9 }
  0x31   :  { %728 = vmatprep.mubr.msk.bf16.mxu0 %vm869_vm0, %v868_v0  ;;  %780 = vmatprep.mubr.msk.bf16.mxu1 %vm869_vm0, %v868_v0 }
  0x38   :  { %729 = vmatmul.mubr.msk.bf16.gmra.mrb[16].mxu0 %vm217_vm1, %v826_v10  ;;  %781 = vmatmul.mubr.msk.bf16.gmra.mrb[16].mxu1 %vm217_vm1, %v827_v11 }
  0x39   :  { %732 = vmatprep.mubr.msk.bf16.mxu0 %vm869_vm0, %v868_v0  ;;  %784 = vmatprep.mubr.msk.bf16.mxu1 %vm869_vm0, %v868_v0 }
  0x40   :  { %733 = vmatmul.mubr.msk.bf16.gmra.mrb[20].mxu0 %vm217_vm1, %v828_v12  ;;  %785 = vmatmul.mubr.msk.bf16.gmra.mrb[20].mxu1 %vm217_vm1, %v829_v13 }
  0x41   :  { %736 = vmatprep.mubr.msk.bf16.mxu0 %vm869_vm0, %v868_v0  ;;  %788 = vmatprep.mubr.msk.bf16.mxu1 %vm869_vm0, %v868_v0 }
  0x48   :  { %737 = vmatmul.mubr.msk.bf16.gmra.mrb[24].mxu0 %vm217_vm1, %v830_v14  ;;  %789 = vmatmul.mubr.msk.bf16.gmra.mrb[24].mxu1 %vm217_vm1, %v831_v15 }
  0x49   :  { %740 = vmatprep.mubr.msk.bf16.mxu0 %vm869_vm0, %v868_v0  ;;  %792 = vmatprep.mubr.msk.bf16.mxu1 %vm869_vm0, %v868_v0 }
  0x50   :  { %741 = vmatmul.mubr.msk.bf16.gmra.mrb[28].mxu0 %vm217_vm1, %v832_v16  ;;  %793 = vmatmul.mubr.msk.bf16.gmra.mrb[28].mxu1 %vm217_vm1, %v833_v17 }
  0x51   :  { %744 = vmatprep.mubr.msk.bf16.mxu0 %vm869_vm0, %v868_v0  ;;  %796 = vmatprep.mubr.msk.bf16.mxu1 %vm869_vm0, %v868_v0 }
  0x58   :  { %745 = vmatmul.mubr.msk.bf16.gmra.mrb[32].mxu0 %vm217_vm1, %v834_v18  ;;  %797 = vmatmul.mubr.msk.bf16.gmra.mrb[32].mxu1 %vm217_vm1, %v835_v19 }
  0x59   :  { %748 = vmatprep.mubr.msk.bf16.mxu0 %vm869_vm0, %v868_v0  ;;  %800 = vmatprep.mubr.msk.bf16.mxu1 %vm869_vm0, %v868_v0 }
  0x60   :  { %749 = vmatmul.mubr.msk.bf16.gmra.mrb[36].mxu0 %vm217_vm1, %v836_v20  ;;  %801 = vmatmul.mubr.msk.bf16.gmra.mrb[36].mxu1 %vm217_vm1, %v837_v21 }
  0x61   :  { %752 = vmatprep.mubr.msk.bf16.mxu0 %vm869_vm0, %v868_v0  ;;  %804 = vmatprep.mubr.msk.bf16.mxu1 %vm869_vm0, %v868_v0 }
  0x68   :  { %753 = vmatmul.mubr.msk.bf16.gmra.mrb[40].mxu0 %vm217_vm1, %v838_v22  ;;  %805 = vmatmul.mubr.msk.bf16.gmra.mrb[40].mxu1 %vm217_vm1, %v839_v23 }
  0x69   :  { %756 = vmatprep.mubr.msk.bf16.mxu0 %vm869_vm0, %v868_v0  ;;  %808 = vmatprep.mubr.msk.bf16.mxu1 %vm869_vm0, %v868_v0 }
  0x70   :  { %757 = vmatmul.mubr.msk.bf16.gmra.mrb[44].mxu0 %vm217_vm1, %v840_v24  ;;  %809 = vmatmul.mubr.msk.bf16.gmra.mrb[44].mxu1 %vm217_vm1, %v841_v25 }
  0x71   :  { %760 = vmatprep.mubr.msk.bf16.mxu0 %vm869_vm0, %v868_v0 }
  0x78   :  { %761 = vmatmul.mubr.msk.bf16.gmra.mrb[48].mxu0 %vm217_vm1, %v842_v26 }
  0xeb   :  { %v327_v28 = vpop.f32.mrb[0].mxu0  ;;  %v431_v29 = vpop.f32.mrb[0].mxu1 }
  0xec   :  { %v328_v30 = vadd.f32 %v1057_v27, %v327_v28  ;;  %v714_v31 = vpop.f32.mrb[1].mxu0  ;;  %v432_v32 = vadd.f32 %v1057_v27, %v431_v29  ;;  %v766_v33 = vpop.f32.mrb[1].mxu1 }
  0xed   :  { %v330_v34 = vpop.f32.mrb[2].mxu0  ;;  %v434_v35 = vpop.f32.mrb[2].mxu1 }
  0xee   :  { %v526_v36 = vmax.f32 %v328_v30, 0.0  ;;  %v331_v37 = vadd.f32 %v1057_v27, %v330_v34  ;;  %v715_v38 = vpop.f32.mrb[3].mxu0  ;;  %v552_v39 = vmax.f32 %v432_v32, 0.0  ;;  %v435_v40 = vadd.f32 %v1057_v27, %v434_v35  ;;  %v767_v41 = vpop.f32.mrb[3].mxu1 }
  0xf0   :  { %577 = vst.msk [vmem:[%s1312_s3] sm:$0xff] %vm576_vm2, %v526_v36  ;;  %v527_v42 = vmax.f32 %v331_v37, 0.0  ;;  %603 = vst.msk [vmem:[%s1312_s3 + $0xd0] sm:$0xff] %vm576_vm2, %v552_v39  ;;  %v553_v43 = vmax.f32 %v435_v40, 0.0 }
  0xf2   :  { %578 = vst.msk [vmem:[%s1312_s3 + $0x8] sm:$0xff] %vm576_vm2, %v527_v42  ;;  %604 = vst.msk [vmem:[%s1312_s3 + $0xd8] sm:$0xff] %vm576_vm2, %v553_v43 }
  0xf3   :  { %v335_v44 = vpop.f32.mrb[4].mxu0  ;;  %v439_v45 = vpop.f32.mrb[4].mxu1 }
  0xf4   :  { %v336_v46 = vadd.f32 %v1057_v27, %v335_v44  ;;  %v718_v47 = vpop.f32.mrb[5].mxu0  ;;  %v440_v48 = vadd.f32 %v1057_v27, %v439_v45  ;;  %v770_v49 = vpop.f32.mrb[5].mxu1 }
  0xf5   :  { %v338_v50 = vpop.f32.mrb[6].mxu0  ;;  %v442_v51 = vpop.f32.mrb[6].mxu1 }
  0xf6   :  { %v528_v52 = vmax.f32 %v336_v46, 0.0  ;;  %v339_v53 = vadd.f32 %v1057_v27, %v338_v50  ;;  %v719_v54 = vpop.f32.mrb[7].mxu0  ;;  %v554_v55 = vmax.f32 %v440_v48, 0.0  ;;  %v443_v56 = vadd.f32 %v1057_v27, %v442_v51  ;;  %v771_v57 = vpop.f32.mrb[7].mxu1 }
  0xf8   :  { %579 = vst.msk [vmem:[%s1312_s3 + $0x10] sm:$0xff] %vm576_vm2, %v528_v52  ;;  %v529_v58 = vmax.f32 %v339_v53, 0.0  ;;  %605 = vst.msk [vmem:[%s1312_s3 + $0xe0] sm:$0xff] %vm576_vm2, %v554_v55  ;;  %v555_v59 = vmax.f32 %v443_v56, 0.0 }
  0xfa   :  { %580 = vst.msk [vmem:[%s1312_s3 + $0x18] sm:$0xff] %vm576_vm2, %v529_v58  ;;  %606 = vst.msk [vmem:[%s1312_s3 + $0xe8] sm:$0xff] %vm576_vm2, %v555_v59 }
  0xfb   :  { %v343_v60 = vpop.f32.mrb[8].mxu0  ;;  %v447_v61 = vpop.f32.mrb[8].mxu1 }
  0xfc   :  { %v344_v62 = vadd.f32 %v1057_v27, %v343_v60  ;;  %v722_v63 = vpop.f32.mrb[9].mxu0  ;;  %v448_v0 = vadd.f32 %v1057_v27, %v447_v61  ;;  %v774_v1 = vpop.f32.mrb[9].mxu1 }
  0xfd   :  { %v346_v2 = vpop.f32.mrb[10].mxu0  ;;  %v450_v3 = vpop.f32.mrb[10].mxu1 }
  0xfe   :  { %v530_v4 = vmax.f32 %v344_v62, 0.0  ;;  %v347_v5 = vadd.f32 %v1057_v27, %v346_v2  ;;  %v723_v6 = vpop.f32.mrb[11].mxu0  ;;  %v556_v7 = vmax.f32 %v448_v0, 0.0  ;;  %v451_v8 = vadd.f32 %v1057_v27, %v450_v3  ;;  %v775_v9 = vpop.f32.mrb[11].mxu1 }
 0x100   :  { %581 = vst.msk [vmem:[%s1312_s3 + $0x20] sm:$0xff] %vm576_vm2, %v530_v4  ;;  %v531_v10 = vmax.f32 %v347_v5, 0.0  ;;  %607 = vst.msk [vmem:[%s1312_s3 + $0xf0] sm:$0xff] %vm576_vm2, %v556_v7  ;;  %v557_v11 = vmax.f32 %v451_v8, 0.0 }
 0x102   :  { %582 = vst.msk [vmem:[%s1312_s3 + $0x28] sm:$0xff] %vm576_vm2, %v531_v10  ;;  %608 = vst.msk [vmem:[%s1312_s3 + $0xf8] sm:$0xff] %vm576_vm2, %v557_v11 }
 0x103   :  { %v351_v12 = vpop.f32.mrb[12].mxu0  ;;  %v455_v13 = vpop.f32.mrb[12].mxu1 }
 0x104   :  { %v352_v14 = vadd.f32 %v1057_v27, %v351_v12  ;;  %v726_v15 = vpop.f32.mrb[13].mxu0  ;;  %v456_v16 = vadd.f32 %v1057_v27, %v455_v13  ;;  %v778_v17 = vpop.f32.mrb[13].mxu1 }
 0x105   :  { %v354_v18 = vpop.f32.mrb[14].mxu0  ;;  %v458_v19 = vpop.f32.mrb[14].mxu1 }
 0x106   :  { %v532_v20 = vmax.f32 %v352_v14, 0.0  ;;  %v355_v21 = vadd.f32 %v1057_v27, %v354_v18  ;;  %v727_v22 = vpop.f32.mrb[15].mxu0  ;;  %v558_v23 = vmax.f32 %v456_v16, 0.0  ;;  %v459_v24 = vadd.f32 %v1057_v27, %v458_v19  ;;  %v779_v25 = vpop.f32.mrb[15].mxu1 }
 0x108   :  { %583 = vst.msk [vmem:[%s1312_s3 + $0x30] sm:$0xff] %vm576_vm2, %v532_v20  ;;  %v533_v26 = vmax.f32 %v355_v21, 0.0  ;;  %609 = vst.msk [vmem:[%s1312_s3 + $0x100] sm:$0xff] %vm576_vm2, %v558_v23  ;;  %v559_v28 = vmax.f32 %v459_v24, 0.0 }
 0x10a   :  { %584 = vst.msk [vmem:[%s1312_s3 + $0x38] sm:$0xff] %vm576_vm2, %v533_v26  ;;  %610 = vst.msk [vmem:[%s1312_s3 + $0x108] sm:$0xff] %vm576_vm2, %v559_v28 }
 0x10b   :  { %v359_v29 = vpop.f32.mrb[16].mxu0  ;;  %v463_v30 = vpop.f32.mrb[16].mxu1 }
 0x10c   :  { %v360_v31 = vadd.f32 %v1057_v27, %v359_v29  ;;  %v730_v32 = vpop.f32.mrb[17].mxu0  ;;  %v464_v33 = vadd.f32 %v1057_v27, %v463_v30  ;;  %v782_v34 = vpop.f32.mrb[17].mxu1 }
 0x10d   :  { %v362_v35 = vpop.f32.mrb[18].mxu0  ;;  %v466_v36 = vpop.f32.mrb[18].mxu1 }
 0x10e   :  { %v534_v37 = vmax.f32 %v360_v31, 0.0  ;;  %v363_v38 = vadd.f32 %v1057_v27, %v362_v35  ;;  %v731_v39 = vpop.f32.mrb[19].mxu0  ;;  %v560_v40 = vmax.f32 %v464_v33, 0.0  ;;  %v467_v41 = vadd.f32 %v1057_v27, %v466_v36  ;;  %v783_v42 = vpop.f32.mrb[19].mxu1 }
 0x110   :  { %585 = vst.msk [vmem:[%s1312_s3 + $0x40] sm:$0xff] %vm576_vm2, %v534_v37  ;;  %v535_v43 = vmax.f32 %v363_v38, 0.0  ;;  %611 = vst.msk [vmem:[%s1312_s3 + $0x110] sm:$0xff] %vm576_vm2, %v560_v40  ;;  %v561_v44 = vmax.f32 %v467_v41, 0.0 }
 0x112   :  { %586 = vst.msk [vmem:[%s1312_s3 + $0x48] sm:$0xff] %vm576_vm2, %v535_v43  ;;  %612 = vst.msk [vmem:[%s1312_s3 + $0x118] sm:$0xff] %vm576_vm2, %v561_v44 }
 0x113   :  { %v367_v45 = vpop.f32.mrb[20].mxu0  ;;  %v471_v46 = vpop.f32.mrb[20].mxu1 }
 0x114   :  { %v368_v47 = vadd.f32 %v1057_v27, %v367_v45  ;;  %v734_v48 = vpop.f32.mrb[21].mxu0  ;;  %v472_v49 = vadd.f32 %v1057_v27, %v471_v46  ;;  %v786_v50 = vpop.f32.mrb[21].mxu1 }
 0x115   :  { %v370_v51 = vpop.f32.mrb[22].mxu0  ;;  %v474_v52 = vpop.f32.mrb[22].mxu1 }
 0x116   :  { %v536_v53 = vmax.f32 %v368_v47, 0.0  ;;  %v371_v54 = vadd.f32 %v1057_v27, %v370_v51  ;;  %v735_v55 = vpop.f32.mrb[23].mxu0  ;;  %v562_v56 = vmax.f32 %v472_v49, 0.0  ;;  %v475_v57 = vadd.f32 %v1057_v27, %v474_v52  ;;  %v787_v58 = vpop.f32.mrb[23].mxu1 }
 0x118   :  { %587 = vst.msk [vmem:[%s1312_s3 + $0x50] sm:$0xff] %vm576_vm2, %v536_v53  ;;  %v537_v59 = vmax.f32 %v371_v54, 0.0  ;;  %613 = vst.msk [vmem:[%s1312_s3 + $0x120] sm:$0xff] %vm576_vm2, %v562_v56  ;;  %v563_v60 = vmax.f32 %v475_v57, 0.0 }
 0x11a   :  { %588 = vst.msk [vmem:[%s1312_s3 + $0x58] sm:$0xff] %vm576_vm2, %v537_v59  ;;  %614 = vst.msk [vmem:[%s1312_s3 + $0x128] sm:$0xff] %vm576_vm2, %v563_v60 }
 0x11b   :  { %v375_v61 = vpop.f32.mrb[24].mxu0  ;;  %v479_v62 = vpop.f32.mrb[24].mxu1 }
 0x11c   :  { %v376_v63 = vadd.f32 %v1057_v27, %v375_v61  ;;  %v738_v0 = vpop.f32.mrb[25].mxu0  ;;  %v480_v1 = vadd.f32 %v1057_v27, %v479_v62  ;;  %v790_v2 = vpop.f32.mrb[25].mxu1 }
 0x11d   :  { %v378_v3 = vpop.f32.mrb[26].mxu0  ;;  %v482_v4 = vpop.f32.mrb[26].mxu1 }
 0x11e   :  { %v538_v5 = vmax.f32 %v376_v63, 0.0  ;;  %v379_v6 = vadd.f32 %v1057_v27, %v378_v3  ;;  %v739_v7 = vpop.f32.mrb[27].mxu0  ;;  %v564_v8 = vmax.f32 %v480_v1, 0.0  ;;  %v483_v9 = vadd.f32 %v1057_v27, %v482_v4  ;;  %v791_v10 = vpop.f32.mrb[27].mxu1 }
 0x120   :  { %589 = vst.msk [vmem:[%s1312_s3 + $0x60] sm:$0xff] %vm576_vm2, %v538_v5  ;;  %v539_v11 = vmax.f32 %v379_v6, 0.0  ;;  %615 = vst.msk [vmem:[%s1312_s3 + $0x130] sm:$0xff] %vm576_vm2, %v564_v8  ;;  %v565_v12 = vmax.f32 %v483_v9, 0.0 }
 0x122   :  { %590 = vst.msk [vmem:[%s1312_s3 + $0x68] sm:$0xff] %vm576_vm2, %v539_v11  ;;  %616 = vst.msk [vmem:[%s1312_s3 + $0x138] sm:$0xff] %vm576_vm2, %v565_v12 }
 0x123   :  { %v383_v13 = vpop.f32.mrb[28].mxu0  ;;  %v487_v14 = vpop.f32.mrb[28].mxu1 }
 0x124   :  { %v384_v15 = vadd.f32 %v1057_v27, %v383_v13  ;;  %v742_v16 = vpop.f32.mrb[29].mxu0  ;;  %v488_v17 = vadd.f32 %v1057_v27, %v487_v14  ;;  %v794_v18 = vpop.f32.mrb[29].mxu1 }
 0x125   :  { %v386_v19 = vpop.f32.mrb[30].mxu0  ;;  %v490_v20 = vpop.f32.mrb[30].mxu1 }
 0x126   :  { %v540_v21 = vmax.f32 %v384_v15, 0.0  ;;  %v387_v22 = vadd.f32 %v1057_v27, %v386_v19  ;;  %v743_v23 = vpop.f32.mrb[31].mxu0  ;;  %v566_v24 = vmax.f32 %v488_v17, 0.0  ;;  %v491_v25 = vadd.f32 %v1057_v27, %v490_v20  ;;  %v795_v26 = vpop.f32.mrb[31].mxu1 }
 0x128   :  { %591 = vst.msk [vmem:[%s1312_s3 + $0x70] sm:$0xff] %vm576_vm2, %v540_v21  ;;  %v541_v28 = vmax.f32 %v387_v22, 0.0  ;;  %617 = vst.msk [vmem:[%s1312_s3 + $0x140] sm:$0xff] %vm576_vm2, %v566_v24  ;;  %v567_v29 = vmax.f32 %v491_v25, 0.0 }
 0x12a   :  { %592 = vst.msk [vmem:[%s1312_s3 + $0x78] sm:$0xff] %vm576_vm2, %v541_v28  ;;  %618 = vst.msk [vmem:[%s1312_s3 + $0x148] sm:$0xff] %vm576_vm2, %v567_v29 }
 0x12b   :  { %v391_v30 = vpop.f32.mrb[32].mxu0  ;;  %v495_v31 = vpop.f32.mrb[32].mxu1 }
 0x12c   :  { %v392_v32 = vadd.f32 %v1057_v27, %v391_v30  ;;  %v746_v33 = vpop.f32.mrb[33].mxu0  ;;  %v496_v34 = vadd.f32 %v1057_v27, %v495_v31  ;;  %v798_v35 = vpop.f32.mrb[33].mxu1 }
 0x12d   :  { %v394_v36 = vpop.f32.mrb[34].mxu0  ;;  %v498_v37 = vpop.f32.mrb[34].mxu1 }
 0x12e   :  { %v542_v38 = vmax.f32 %v392_v32, 0.0  ;;  %v395_v39 = vadd.f32 %v1057_v27, %v394_v36  ;;  %v747_v40 = vpop.f32.mrb[35].mxu0  ;;  %v568_v41 = vmax.f32 %v496_v34, 0.0  ;;  %v499_v42 = vadd.f32 %v1057_v27, %v498_v37  ;;  %v799_v43 = vpop.f32.mrb[35].mxu1 }
 0x130   :  { %593 = vst.msk [vmem:[%s1312_s3 + $0x80] sm:$0xff] %vm576_vm2, %v542_v38  ;;  %v543_v44 = vmax.f32 %v395_v39, 0.0  ;;  %619 = vst.msk [vmem:[%s1312_s3 + $0x150] sm:$0xff] %vm576_vm2, %v568_v41  ;;  %v569_v45 = vmax.f32 %v499_v42, 0.0 }
 0x132   :  { %594 = vst.msk [vmem:[%s1312_s3 + $0x88] sm:$0xff] %vm576_vm2, %v543_v44  ;;  %620 = vst.msk [vmem:[%s1312_s3 + $0x158] sm:$0xff] %vm576_vm2, %v569_v45 }
 0x133   :  { %v399_v46 = vpop.f32.mrb[36].mxu0  ;;  %v503_v47 = vpop.f32.mrb[36].mxu1 }
 0x134   :  { %v400_v48 = vadd.f32 %v1057_v27, %v399_v46  ;;  %v750_v49 = vpop.f32.mrb[37].mxu0  ;;  %v504_v50 = vadd.f32 %v1057_v27, %v503_v47  ;;  %v802_v51 = vpop.f32.mrb[37].mxu1 }
 0x135   :  { %v402_v52 = vpop.f32.mrb[38].mxu0  ;;  %v506_v53 = vpop.f32.mrb[38].mxu1 }
 0x136   :  { %v544_v54 = vmax.f32 %v400_v48, 0.0  ;;  %v403_v55 = vadd.f32 %v1057_v27, %v402_v52  ;;  %v751_v56 = vpop.f32.mrb[39].mxu0  ;;  %v570_v57 = vmax.f32 %v504_v50, 0.0  ;;  %v507_v58 = vadd.f32 %v1057_v27, %v506_v53  ;;  %v803_v59 = vpop.f32.mrb[39].mxu1 }
 0x138   :  { %595 = vst.msk [vmem:[%s1312_s3 + $0x90] sm:$0xff] %vm576_vm2, %v544_v54  ;;  %v545_v60 = vmax.f32 %v403_v55, 0.0  ;;  %621 = vst.msk [vmem:[%s1312_s3 + $0x160] sm:$0xff] %vm576_vm2, %v570_v57  ;;  %v571_v61 = vmax.f32 %v507_v58, 0.0 }
 0x13a   :  { %596 = vst.msk [vmem:[%s1312_s3 + $0x98] sm:$0xff] %vm576_vm2, %v545_v60  ;;  %622 = vst.msk [vmem:[%s1312_s3 + $0x168] sm:$0xff] %vm576_vm2, %v571_v61 }
 0x13b   :  { %v407_v62 = vpop.f32.mrb[40].mxu0  ;;  %v511_v63 = vpop.f32.mrb[40].mxu1 }
 0x13c   :  { %v408_v0 = vadd.f32 %v1057_v27, %v407_v62  ;;  %v754_v1 = vpop.f32.mrb[41].mxu0  ;;  %v512_v2 = vadd.f32 %v1057_v27, %v511_v63  ;;  %v806_v3 = vpop.f32.mrb[41].mxu1 }
 0x13d   :  { %v410_v4 = vpop.f32.mrb[42].mxu0  ;;  %v514_v5 = vpop.f32.mrb[42].mxu1 }
 0x13e   :  { %v546_v6 = vmax.f32 %v408_v0, 0.0  ;;  %v411_v7 = vadd.f32 %v1057_v27, %v410_v4  ;;  %v755_v8 = vpop.f32.mrb[43].mxu0  ;;  %v572_v9 = vmax.f32 %v512_v2, 0.0  ;;  %v515_v10 = vadd.f32 %v1057_v27, %v514_v5  ;;  %v807_v11 = vpop.f32.mrb[43].mxu1 }
 0x140   :  { %597 = vst.msk [vmem:[%s1312_s3 + $0xa0] sm:$0xff] %vm576_vm2, %v546_v6  ;;  %v547_v12 = vmax.f32 %v411_v7, 0.0  ;;  %623 = vst.msk [vmem:[%s1312_s3 + $0x170] sm:$0xff] %vm576_vm2, %v572_v9  ;;  %v573_v13 = vmax.f32 %v515_v10, 0.0 }
 0x142   :  { %598 = vst.msk [vmem:[%s1312_s3 + $0xa8] sm:$0xff] %vm576_vm2, %v547_v12  ;;  %624 = vst.msk [vmem:[%s1312_s3 + $0x178] sm:$0xff] %vm576_vm2, %v573_v13 }
 0x143   :  { %v415_v14 = vpop.f32.mrb[44].mxu0  ;;  %v519_v15 = vpop.f32.mrb[44].mxu1 }
 0x144   :  { %v416_v16 = vadd.f32 %v1057_v27, %v415_v14  ;;  %v758_v17 = vpop.f32.mrb[45].mxu0  ;;  %v520_v18 = vadd.f32 %v1057_v27, %v519_v15  ;;  %v810_v19 = vpop.f32.mrb[45].mxu1 }
 0x145   :  { %v418_v20 = vpop.f32.mrb[46].mxu0  ;;  %v522_v21 = vpop.f32.mrb[46].mxu1 }
 0x146   :  { %v548_v22 = vmax.f32 %v416_v16, 0.0  ;;  %v419_v23 = vadd.f32 %v1057_v27, %v418_v20  ;;  %v759_v24 = vpop.f32.mrb[47].mxu0  ;;  %v574_v25 = vmax.f32 %v520_v18, 0.0  ;;  %v523_v26 = vadd.f32 %v1057_v27, %v522_v21  ;;  %v811_v28 = vpop.f32.mrb[47].mxu1 }
 0x148   :  { %599 = vst.msk [vmem:[%s1312_s3 + $0xb0] sm:$0xff] %vm576_vm2, %v548_v22  ;;  %v549_v29 = vmax.f32 %v419_v23, 0.0  ;;  %625 = vst.msk [vmem:[%s1312_s3 + $0x180] sm:$0xff] %vm576_vm2, %v574_v25  ;;  %v575_v30 = vmax.f32 %v523_v26, 0.0 }
 0x14a   :  { %600 = vst.msk [vmem:[%s1312_s3 + $0xb8] sm:$0xff] %vm576_vm2, %v549_v29  ;;  %626 = vst.msk [vmem:[%s1312_s3 + $0x188] sm:$0xff] %vm576_vm2, %v575_v30 }
 0x14b   :  { %v423_v31 = vpop.f32.mrb[48].mxu0 }
 0x14c   :  { %v424_v32 = vadd.f32 %v1057_v27, %v423_v31  ;;  %v762_v33 = vpop.f32.mrb[49].mxu0 }
 0x14d   :  { %v426_v34 = vpop.f32.mrb[50].mxu0 }
 0x14e   :  { %v550_v35 = vmax.f32 %v424_v32, 0.0  ;;  %v427_v36 = vadd.f32 %v1057_v27, %v426_v34  ;;  %v763_v37 = vpop.f32.mrb[51].mxu0 }
 0x150   :  { %601 = vst.msk [vmem:[%s1312_s3 + $0xc0] sm:$0xff] %vm576_vm2, %v550_v35  ;;  %v551_v38 = vmax.f32 %v427_v36, 0.0 }
 0x152   :  { %602 = vst.msk [vmem:[%s1312_s3 + $0xc8] sm:$0xff] %vm576_vm2, %v551_v38 }
 0x153   :  { %631 = vsyncpa [#allocation3], 1 }

// kernel: autoencoder_forward.7
= control target key start
LH: loop header
LB: loop body
LE: loop exit
PB: predicated region body
PF: predicated region fallthrough
CT: control target
= control target key end

     0   :  { %s2158_s1 = inlined_call_operand.vmem [shape: bf16[1024,128], index: 1, kind: input, shape index: {}]   ;;  %s2159_s0 = inlined_call_operand.vmem [shape: bf16[112,1024], index: 0, kind: input, shape index: {}]   ;;  %s2160_s2 = inlined_call_operand.vmem [shape: f32[1,128], index: 2, kind: input, shape index: {}]   ;;  %s2161_s3 = inlined_call_operand.vmem [shape: f32[112,128], index: 3, kind: output, shape index: {}]  }
   0x1   :  { %v1611_v0 = vld [vmem:[%s2158_s1 + $0x40] sm:$0xff]   ;;  %v1615_v4 = vld [vmem:[%s2158_s1 + $0x48] sm:$0xff]   ;;  %v1619_v8 = vld [vmem:[%s2158_s1 + $0x50] sm:$0xff]  }
   0x2   :  { %v1612_v1 = vld [vmem:[%s2158_s1 + $0xc0] sm:$0xff]   ;;  %1379 = vmatprep.subr.bf16.mxu0 %v1611_v0  ;;  %v1616_v5 = vld [vmem:[%s2158_s1 + $0xc8] sm:$0xff]   ;;  %v1620_v9 = vld [vmem:[%s2158_s1 + $0xd0] sm:$0xff]  }
   0x3   :  { %v1613_v2 = vld [vmem:[%s2158_s1] sm:$0xff]   ;;  %1437 = vmatprep.subr.bf16.mxu1 %v1612_v1  ;;  %v1617_v6 = vld [vmem:[%s2158_s1 + $0x8] sm:$0xff]   ;;  %v1621_v10 = vld [vmem:[%s2158_s1 + $0x10] sm:$0xff]  }
   0x4   :  { %v1614_v3 = vld [vmem:[%s2158_s1 + $0x80] sm:$0xff]   ;;  %1380 = vmatpush3.bf16.msra.mxu0 %v1613_v2  ;;  %v1618_v7 = vld [vmem:[%s2158_s1 + $0x88] sm:$0xff]   ;;  %v1622_v11 = vld [vmem:[%s2158_s1 + $0x90] sm:$0xff]  }
   0x5   :  { %1438 = vmatpush3.bf16.msra.mxu1 %v1614_v3  ;;  %1381 = vmatprep.subr.bf16.mxu0 %v1615_v4  ;;  %v1623_v12 = vld [vmem:[%s2158_s1 + $0x58] sm:$0xff]   ;;  %v1627_v16 = vld [vmem:[%s2158_s1 + $0x60] sm:$0xff]   ;;  %v1631_v20 = vld [vmem:[%s2158_s1 + $0x68] sm:$0xff]  }
   0x6   :  { %1439 = vmatprep.subr.bf16.mxu1 %v1616_v5  ;;  %v1624_v13 = vld [vmem:[%s2158_s1 + $0xd8] sm:$0xff]   ;;  %v1628_v17 = vld [vmem:[%s2158_s1 + $0xe0] sm:$0xff]   ;;  %v1632_v21 = vld [vmem:[%s2158_s1 + $0xe8] sm:$0xff]  }
   0x7   :  { %v1625_v14 = vld [vmem:[%s2158_s1 + $0x18] sm:$0xff]   ;;  %v1629_v18 = vld [vmem:[%s2158_s1 + $0x20] sm:$0xff]   ;;  %v1633_v22 = vld [vmem:[%s2158_s1 + $0x28] sm:$0xff]  }
   0x8   :  { %1382 = vmatpush3.bf16.msra.mxu0 %v1617_v6  ;;  %v1626_v15 = vld [vmem:[%s2158_s1 + $0x98] sm:$0xff]   ;;  %v1630_v19 = vld [vmem:[%s2158_s1 + $0xa0] sm:$0xff]   ;;  %v1634_v23 = vld [vmem:[%s2158_s1 + $0xa8] sm:$0xff]  }
   0x9   :  { %1440 = vmatpush3.bf16.msra.mxu1 %v1618_v7  ;;  %1383 = vmatprep.subr.bf16.mxu0 %v1619_v8  ;;  %v1635_v24 = vld [vmem:[%s2158_s1 + $0x70] sm:$0xff]   ;;  %v1639_v28 = vld [vmem:[%s2158_s1 + $0x78] sm:$0xff]   ;;  %v15_v32 = vld [vmem:[%s2159_s0] sm:$0xff] }
   0xa   :  { %1441 = vmatprep.subr.bf16.mxu1 %v1620_v9  ;;  %v1636_v25 = vld [vmem:[%s2158_s1 + $0xf0] sm:$0xff]   ;;  %v1640_v29 = vld [vmem:[%s2158_s1 + $0xf8] sm:$0xff]   ;;  %v19_v33 = vld [vmem:[%s2159_s0 + $0x20] sm:$0xff] }
   0xb   :  { %v1637_v26 = vld [vmem:[%s2158_s1 + $0x30] sm:$0xff]   ;;  %v1641_v30 = vld [vmem:[%s2158_s1 + $0x38] sm:$0xff]   ;;  %v16_v34 = vld [vmem:[%s2159_s0 + $0x8] sm:$0xff]  ;;  %v1259_v35 = vcombine.low %v15_v32, %v19_v33  ;;  %v1260_v36 = vcombine.high %v15_v32, %v19_v33 }
   0xc   :  { %1384 = vmatpush3.bf16.msra.mxu0 %v1621_v10  ;;  %v1638_v27 = vld [vmem:[%s2158_s1 + $0xb0] sm:$0xff]   ;;  %v1642_v31 = vld [vmem:[%s2158_s1 + $0xb8] sm:$0xff]   ;;  %v20_v37 = vld [vmem:[%s2159_s0 + $0x28] sm:$0xff] }
   0xd   :  { %1442 = vmatpush3.bf16.msra.mxu1 %v1622_v11  ;;  %1385 = vmatprep.subr.bf16.mxu0 %v1623_v12  ;;  %v1261_v38 = vcombine.low %v16_v34, %v20_v37  ;;  %v1262_v39 = vcombine.high %v16_v34, %v20_v37  ;;  %v1643_v40 = vld [vmem:[%s2158_s1 + $0x140] sm:$0xff]   ;;  %v24_v47 = vld [vmem:[%s2159_s0 + $0x48] sm:$0xff]  ;;  %v1651_v56 = vld [vmem:[%s2158_s1 + $0x150] sm:$0xff]  }
   0xe   :  { %1443 = vmatprep.subr.bf16.mxu1 %v1624_v13  ;;  %902 = vmatprep.mubr.bf16.mxu0 %v1260_v36  ;;  %v1644_v41 = vld [vmem:[%s2158_s1 + $0x100] sm:$0xff]   ;;  %v28_v48 = vld [vmem:[%s2159_s0 + $0x68] sm:$0xff]  ;;  %v1652_v63 = vld [vmem:[%s2158_s1 + $0x110] sm:$0xff]  }
   0xf   :  { %991 = vmatprep.mubr.bf16.mxu1 %v1262_v39  ;;  %v1645_v42 = vld [vmem:[%s2158_s1 + $0x1c0] sm:$0xff]   ;;  %v1270_v49 = vcombine.high %v24_v47, %v28_v48  ;;  %v1647_v50 = vld [vmem:[%s2158_s1 + $0x148] sm:$0xff]   ;;  %v1269_v53 = vcombine.low %v24_v47, %v28_v48  ;;  %v1653_v0 = vld [vmem:[%s2158_s1 + $0x1d0] sm:$0xff]  }
  0x10   :  { %1386 = vmatpush3.bf16.msra.mxu0 %v1625_v14  ;;  %v1646_v43 = vld [vmem:[%s2158_s1 + $0x180] sm:$0xff]   ;;  %v1648_v52 = vld [vmem:[%s2158_s1 + $0x108] sm:$0xff]   ;;  %v1654_v1 = vld [vmem:[%s2158_s1 + $0x190] sm:$0xff]  }
  0x11   :  { %1444 = vmatpush3.bf16.msra.mxu1 %v1626_v15  ;;  %1387 = vmatprep.subr.bf16.mxu0 %v1627_v16  ;;  %v23_v44 = vld [vmem:[%s2159_s0 + $0x40] sm:$0xff]  ;;  %v1649_v54 = vld [vmem:[%s2158_s1 + $0x1c8] sm:$0xff]   ;;  %v1655_v3 = vld [vmem:[%s2158_s1 + $0x158] sm:$0xff]  }
  0x12   :  { %1445 = vmatprep.subr.bf16.mxu1 %v1628_v17  ;;  %v27_v45 = vld [vmem:[%s2159_s0 + $0x60] sm:$0xff]  ;;  %v1650_v55 = vld [vmem:[%s2158_s1 + $0x188] sm:$0xff]   ;;  %v1656_v5 = vld [vmem:[%s2158_s1 + $0x118] sm:$0xff]  }
  0x13   :  { %v1268_v46 = vcombine.high %v23_v44, %v27_v45  ;;  %v1267_v51 = vcombine.low %v23_v44, %v27_v45  ;;  %v31_v57 = vld [vmem:[%s2159_s0 + $0x80] sm:$0xff]  ;;  %v32_v59 = vld [vmem:[%s2159_s0 + $0x88] sm:$0xff]  ;;  %v1657_v12 = vld [vmem:[%s2158_s1 + $0x1d8] sm:$0xff]  }
  0x14   :  { %1388 = vmatpush3.bf16.msra.mxu0 %v1629_v18  ;;  %v35_v58 = vld [vmem:[%s2159_s0 + $0xa0] sm:$0xff]  ;;  %v36_v60 = vld [vmem:[%s2159_s0 + $0xa8] sm:$0xff]  ;;  %v1658_v13 = vld [vmem:[%s2158_s1 + $0x198] sm:$0xff]  }
  0x15   :  { %1446 = vmatpush3.bf16.msra.mxu1 %v1630_v19  ;;  %1389 = vmatprep.subr.bf16.mxu0 %v1631_v20  ;;  %v1276_v61 = vcombine.high %v31_v57, %v35_v58  ;;  %v1278_v62 = vcombine.high %v32_v59, %v36_v60  ;;  %v1275_v2 = vcombine.low %v31_v57, %v35_v58  ;;  %v39_v6 = vld [vmem:[%s2159_s0 + $0xc0] sm:$0xff]  ;;  %v40_v8 = vld [vmem:[%s2159_s0 + $0xc8] sm:$0xff]  ;;  %v1672_v47 = vld [vmem:[%s2158_s1 + $0x138] sm:$0xff]  }
  0x16   :  { %1447 = vmatprep.subr.bf16.mxu1 %v1632_v21  ;;  %v1277_v4 = vcombine.low %v32_v59, %v36_v60  ;;  %v43_v7 = vld [vmem:[%s2159_s0 + $0xe0] sm:$0xff]  ;;  %v44_v10 = vld [vmem:[%s2159_s0 + $0xe8] sm:$0xff]  ;;  %v22_v57 = vld [vmem:[%s2159_s0 + $0x38] sm:$0xff] }
  0x17   :  { %v1284_v9 = vcombine.high %v39_v6, %v43_v7  ;;  %v1286_v11 = vcombine.high %v40_v8, %v44_v10  ;;  %v1659_v14 = vld [vmem:[%s2158_s1 + $0x160] sm:$0xff]   ;;  %v1283_v16 = vcombine.low %v39_v6, %v43_v7  ;;  %v1285_v20 = vcombine.low %v40_v8, %v44_v10  ;;  %v56_v32 = vld [vmem:[%s2159_s0 + $0x148] sm:$0xff]  ;;  %v33_v6 = vld [vmem:[%s2159_s0 + $0x90] sm:$0xff] }
  0x18   :  { %1390 = vmatpush3.bf16.msra.mxu0 %v1633_v22  ;;  %v1660_v15 = vld [vmem:[%s2158_s1 + $0x120] sm:$0xff]   ;;  %v48_v22 = vld [vmem:[%s2159_s0 + $0x108] sm:$0xff]  ;;  %v37_v7 = vld [vmem:[%s2159_s0 + $0xb0] sm:$0xff] }
  0x19   :  { %1448 = vmatpush3.bf16.msra.mxu1 %v1634_v23  ;;  %1391 = vmatprep.subr.bf16.mxu0 %v1635_v24  ;;  %v1661_v17 = vld [vmem:[%s2158_s1 + $0x1e0] sm:$0xff]   ;;  %v52_v23 = vld [vmem:[%s2159_s0 + $0x128] sm:$0xff]  ;;  %v34_v8 = vld [vmem:[%s2159_s0 + $0x98] sm:$0xff] }
  0x1a   :  { %1449 = vmatprep.subr.bf16.mxu1 %v1636_v25  ;;  %v47_v18 = vld [vmem:[%s2159_s0 + $0x100] sm:$0xff]  ;;  %v1294_v24 = vcombine.high %v48_v22, %v52_v23  ;;  %v60_v33 = vld [vmem:[%s2159_s0 + $0x168] sm:$0xff]  ;;  %v1293_v36 = vcombine.low %v48_v22, %v52_v23  ;;  %v49_v22 = vld [vmem:[%s2159_s0 + $0x110] sm:$0xff] }
  0x1b   :  { %v51_v19 = vld [vmem:[%s2159_s0 + $0x120] sm:$0xff]  ;;  %v1302_v39 = vcombine.high %v56_v32, %v60_v33  ;;  %v64_v44 = vld [vmem:[%s2159_s0 + $0x188] sm:$0xff]  ;;  %v53_v23 = vld [vmem:[%s2159_s0 + $0x130] sm:$0xff] }
  0x1c   :  { %1392 = vmatpush3.bf16.msra.mxu0 %v1637_v26  ;;  %v1292_v21 = vcombine.high %v47_v18, %v51_v19  ;;  %v1662_v25 = vld [vmem:[%s2158_s1 + $0x1a0] sm:$0xff]   ;;  %v1663_v26 = vld [vmem:[%s2158_s1 + $0x168] sm:$0xff]   ;;  %v1291_v34 = vcombine.low %v47_v18, %v51_v19  ;;  %v1279_v18 = vcombine.low %v33_v6, %v37_v7 }
  0x1d   :  { %1450 = vmatpush3.bf16.msra.mxu1 %v1638_v27  ;;  %1393 = vmatprep.subr.bf16.mxu0 %v1639_v28  ;;  %v1664_v27 = vld [vmem:[%s2158_s1 + $0x128] sm:$0xff]  }
  0x1e   :  { %1451 = vmatprep.subr.bf16.mxu1 %v1640_v29  ;;  %v1665_v28 = vld [vmem:[%s2158_s1 + $0x1e8] sm:$0xff]  }
  0x1f   :  { %v1666_v29 = vld [vmem:[%s2158_s1 + $0x1a8] sm:$0xff]  }
  0x20   :  { %1394 = vmatpush3.bf16.msra.mxu0 %v1641_v30  ;;  %v55_v30 = vld [vmem:[%s2159_s0 + $0x140] sm:$0xff]  ;;  %v68_v45 = vld [vmem:[%s2159_s0 + $0x1a8] sm:$0xff] }
  0x21   :  { %1452 = vmatpush3.bf16.msra.mxu1 %v1642_v31  ;;  %1495 = vmatprep.subr.bf16.mxu0 %v1643_v40  ;;  %v59_v31 = vld [vmem:[%s2159_s0 + $0x160] sm:$0xff]  ;;  %v1669_v40 = vld [vmem:[%s2158_s1 + $0x1f0] sm:$0xff]   ;;  %v1309_v59 = vcombine.low %v64_v44, %v68_v45 }
  0x22   :  { %1553 = vmatprep.subr.bf16.mxu1 %v1645_v42  ;;  %v1300_v37 = vcombine.high %v55_v30, %v59_v31  ;;  %v63_v42 = vld [vmem:[%s2159_s0 + $0x180] sm:$0xff]  ;;  %v1299_v48 = vcombine.low %v55_v30, %v59_v31  ;;  %v57_v30 = vld [vmem:[%s2159_s0 + $0x150] sm:$0xff] }
  0x23   :  { %903 = vmatmul.mubr.bf16.vlgmr.msra.gmra.mrb[0].mxu0 %v1259_v35  ;;  %v1667_v35 = vld [vmem:[%s2158_s1 + $0x170] sm:$0xff]  }
  0x24   :  { %992 = vmatmul.mubr.bf16.vlgmr.msra.gmra.mrb[0].mxu1 %v1261_v38  ;;  %1496 = vmatpush3.bf16.msra.mxu0 %v1644_v41  ;;  %v1668_v38 = vld [vmem:[%s2158_s1 + $0x130] sm:$0xff]  }
  0x25   :  { %1554 = vmatpush3.bf16.msra.mxu1 %v1646_v43  ;;  %910 = vmatprep.mubr.bf16.mxu0 %v1268_v46  ;;  %v1670_v41 = vld [vmem:[%s2158_s1 + $0x1b0] sm:$0xff]   ;;  %v67_v43 = vld [vmem:[%s2159_s0 + $0x1a0] sm:$0xff]  ;;  %v1671_v46 = vld [vmem:[%s2158_s1 + $0x178] sm:$0xff]  }
  0x26   :  { %999 = vmatprep.mubr.bf16.mxu1 %v1270_v49  ;;  %1497 = vmatprep.subr.bf16.mxu0 %v1647_v50  ;;  %v1673_v49 = vld [vmem:[%s2158_s1 + $0x1f8] sm:$0xff]   ;;  %v1301_v50 = vcombine.low %v56_v32, %v60_v33  ;;  %v1307_v58 = vcombine.low %v63_v42, %v67_v43  ;;  %v61_v31 = vld [vmem:[%s2159_s0 + $0x170] sm:$0xff] }
  0x27   :  { %1555 = vmatprep.subr.bf16.mxu1 %v1649_v54  ;;  %v17_v54 = vld [vmem:[%s2159_s0 + $0x10] sm:$0xff]  ;;  %v58_v32 = vld [vmem:[%s2159_s0 + $0x158] sm:$0xff] }
  0x28   :  { %1498 = vmatpush3.bf16.msra.mxu0 %v1648_v52  ;;  %v1674_v52 = vld [vmem:[%s2158_s1 + $0x1b8] sm:$0xff]  }
  0x29   :  { %1556 = vmatpush3.bf16.msra.mxu1 %v1650_v55  ;;  %1499 = vmatprep.subr.bf16.mxu0 %v1651_v56  ;;  %v21_v55 = vld [vmem:[%s2159_s0 + $0x30] sm:$0xff]  ;;  %v18_v56 = vld [vmem:[%s2159_s0 + $0x18] sm:$0xff] }
  0x2a   :  { %1557 = vmatprep.subr.bf16.mxu1 %v1653_v0  ;;  %v1264_v60 = vcombine.high %v17_v54, %v21_v55  ;;  %v26_v0 = vld [vmem:[%s2159_s0 + $0x58] sm:$0xff] }
  0x2b   :  { %911 = vmatmul.mubr.bf16.gmra.mrb[4].mxu0 %v1267_v51  ;;  %v1308_v51 = vcombine.high %v63_v42, %v67_v43  ;;  %v62_v33 = vld [vmem:[%s2159_s0 + $0x178] sm:$0xff]  ;;  %v1303_v42 = vcombine.low %v57_v30, %v61_v31 }
  0x2c   :  { %1000 = vmatmul.mubr.bf16.gmra.mrb[4].mxu1 %v1269_v53  ;;  %918 = vmatprep.mubr.bf16.mxu0 %v1276_v61  ;;  %v1310_v53 = vcombine.high %v64_v44, %v68_v45  ;;  %v1266_v61 = vcombine.high %v18_v56, %v22_v57  ;;  %v1305_v43 = vcombine.low %v58_v32, %v62_v33 }
  0x2d   :  { %1007 = vmatprep.mubr.bf16.mxu1 %v1278_v62  ;;  %1500 = vmatpush3.bf16.msra.mxu0 %v1652_v63  ;;  %v25_v62 = vld [vmem:[%s2159_s0 + $0x50] sm:$0xff] }
  0x2e   :  { %1558 = vmatpush3.bf16.msra.mxu1 %v1654_v1  ;;  %1501 = vmatprep.subr.bf16.mxu0 %v1655_v3  ;;  %v29_v63 = vld [vmem:[%s2159_s0 + $0x70] sm:$0xff]  ;;  %v30_v1 = vld [vmem:[%s2159_s0 + $0x78] sm:$0xff]  ;;  %v1265_v3 = vcombine.low %v18_v56, %v22_v57 }
  0x2f   :  { %1559 = vmatprep.subr.bf16.mxu1 %v1657_v12  ;;  %v1271_v10 = vcombine.low %v25_v62, %v29_v63  ;;  %v1280_v12 = vcombine.high %v33_v6, %v37_v7 }
  0x31   :  { %1502 = vmatpush3.bf16.msra.mxu0 %v1656_v5  ;;  %v1274_v5 = vcombine.high %v26_v0, %v30_v1 }
  0x32   :  { %1560 = vmatpush3.bf16.msra.mxu1 %v1658_v13  ;;  %1503 = vmatprep.subr.bf16.mxu0 %v1659_v14  ;;  %v41_v14 = vld [vmem:[%s2159_s0 + $0xd0] sm:$0xff] }
  0x33   :  { %919 = vmatmul.mubr.bf16.gmra.mrb[8].mxu0 %v1275_v2  ;;  %1561 = vmatprep.subr.bf16.mxu1 %v1661_v17  ;;  %v1263_v2 = vcombine.low %v17_v54, %v21_v55  ;;  %v46_v17 = vld [vmem:[%s2159_s0 + $0xf8] sm:$0xff] }
  0x34   :  { %1008 = vmatmul.mubr.bf16.gmra.mrb[8].mxu1 %v1277_v4  ;;  %926 = vmatprep.mubr.bf16.mxu0 %v1284_v9  ;;  %v1272_v4 = vcombine.high %v25_v62, %v29_v63  ;;  %v38_v9 = vld [vmem:[%s2159_s0 + $0xb8] sm:$0xff] }
  0x35   :  { %1015 = vmatprep.mubr.bf16.mxu1 %v1286_v11  ;;  %1504 = vmatpush3.bf16.msra.mxu0 %v1660_v15  ;;  %v1273_v11 = vcombine.low %v26_v0, %v30_v1  ;;  %v1282_v13 = vcombine.high %v34_v8, %v38_v9  ;;  %v45_v15 = vld [vmem:[%s2159_s0 + $0xf0] sm:$0xff]  ;;  %v1281_v19 = vcombine.low %v34_v8, %v38_v9 }
  0x36   :  { %1562 = vmatpush3.bf16.msra.mxu1 %v1662_v25  ;;  %1505 = vmatprep.subr.bf16.mxu0 %v1663_v26  ;;  %v54_v25 = vld [vmem:[%s2159_s0 + $0x138] sm:$0xff]  ;;  %v1287_v26 = vcombine.low %v41_v14, %v45_v15 }
  0x37   :  { %1563 = vmatprep.subr.bf16.mxu1 %v1665_v28  ;;  %v1296_v28 = vcombine.high %v49_v22, %v53_v23 }
  0x39   :  { %1506 = vmatpush3.bf16.msra.mxu0 %v1664_v27 }
  0x3a   :  { %1564 = vmatpush3.bf16.msra.mxu1 %v1666_v29  ;;  %1507 = vmatprep.subr.bf16.mxu0 %v1667_v35 }
  0x3b   :  { %927 = vmatmul.mubr.bf16.gmra.mrb[12].mxu0 %v1283_v16  ;;  %1565 = vmatprep.subr.bf16.mxu1 %v1669_v40  ;;  %v42_v16 = vld [vmem:[%s2159_s0 + $0xd8] sm:$0xff] }
  0x3c   :  { %1016 = vmatmul.mubr.bf16.gmra.mrb[12].mxu1 %v1285_v20  ;;  %934 = vmatprep.mubr.bf16.mxu0 %v1292_v21  ;;  %v1288_v20 = vcombine.high %v41_v14, %v45_v15  ;;  %v1290_v21 = vcombine.high %v42_v16, %v46_v17  ;;  %v1289_v27 = vcombine.low %v42_v16, %v46_v17  ;;  %v66_v40 = vld [vmem:[%s2159_s0 + $0x198] sm:$0xff] }
  0x3d   :  { %1023 = vmatprep.mubr.bf16.mxu1 %v1294_v24  ;;  %1508 = vmatpush3.bf16.msra.mxu0 %v1668_v38  ;;  %v50_v24 = vld [vmem:[%s2159_s0 + $0x118] sm:$0xff]  ;;  %v65_v38 = vld [vmem:[%s2159_s0 + $0x190] sm:$0xff] }
  0x3e   :  { %1566 = vmatpush3.bf16.msra.mxu1 %v1670_v41  ;;  %1509 = vmatprep.subr.bf16.mxu0 %v1671_v46  ;;  %v1298_v29 = vcombine.high %v50_v24, %v54_v25  ;;  %v1297_v35 = vcombine.low %v50_v24, %v54_v25  ;;  %v70_v41 = vld [vmem:[%s2159_s0 + $0x1b8] sm:$0xff] }
  0x3f   :  { %1567 = vmatprep.subr.bf16.mxu1 %v1673_v49  ;;  %v1314_v45 = vcombine.high %v66_v40, %v70_v41 }
  0x41   :  { %1510 = vmatpush3.bf16.msra.mxu0 %v1672_v47  ;;  %v1313_v47 = vcombine.low %v66_v40, %v70_v41 }
  0x42   :  { %1568 = vmatpush3.bf16.msra.mxu1 %v1674_v52 }
  0x43   :  { %935 = vmatmul.mubr.bf16.gmra.mrb[16].mxu0 %v1291_v34  ;;  %v1295_v34 = vcombine.low %v49_v22, %v53_v23 }
  0x44   :  { %1024 = vmatmul.mubr.bf16.gmra.mrb[16].mxu1 %v1293_v36  ;;  %942 = vmatprep.mubr.bf16.mxu0 %v1300_v37  ;;  %v1304_v36 = vcombine.high %v57_v30, %v61_v31  ;;  %v1306_v37 = vcombine.high %v58_v32, %v62_v33 }
  0x45   :  { %1031 = vmatprep.mubr.bf16.mxu1 %v1302_v39  ;;  %v69_v39 = vld [vmem:[%s2159_s0 + $0x1b0] sm:$0xff] }
  0x46   :  { %v1312_v44 = vcombine.high %v65_v38, %v69_v39  ;;  %v1311_v46 = vcombine.low %v65_v38, %v69_v39 }
  0x4b   :  { %943 = vmatmul.mubr.bf16.gmra.mrb[20].mxu0 %v1299_v48 }
  0x4c   :  { %1032 = vmatmul.mubr.bf16.gmra.mrb[20].mxu1 %v1301_v50  ;;  %950 = vmatprep.mubr.bf16.mxu0 %v1308_v51  ;;  %v2058_v50 = vld [vmem:[%s2160_s2] ss:$0 sm:$0xff] }
  0x4d   :  { %1039 = vmatprep.mubr.bf16.mxu1 %v1310_v53 }
  0x53   :  { %951 = vmatmul.mubr.bf16.gmra.mrb[24].mxu0 %v1307_v58 }
  0x54   :  { %1040 = vmatmul.mubr.bf16.gmra.mrb[24].mxu1 %v1309_v59  ;;  %1080 = vmatprep.mubr.bf16.mxu0 %v1264_v60 }
  0x55   :  { %1169 = vmatprep.mubr.bf16.mxu1 %v1266_v61 }
  0x5b   :  { %1081 = vmatmul.mubr.bf16.vlgmr.msra.gmra.mrb[28].mxu0 %v1263_v2 }
  0x5c   :  { %1170 = vmatmul.mubr.bf16.vlgmr.msra.gmra.mrb[28].mxu1 %v1265_v3  ;;  %1088 = vmatprep.mubr.bf16.mxu0 %v1272_v4 }
  0x5d   :  { %1177 = vmatprep.mubr.bf16.mxu1 %v1274_v5 }
  0x63   :  { %1089 = vmatmul.mubr.bf16.gmra.mrb[32].mxu0 %v1271_v10 }
  0x64   :  { %1178 = vmatmul.mubr.bf16.gmra.mrb[32].mxu1 %v1273_v11  ;;  %1096 = vmatprep.mubr.bf16.mxu0 %v1280_v12 }
  0x65   :  { %1185 = vmatprep.mubr.bf16.mxu1 %v1282_v13 }
  0x6b   :  { %1097 = vmatmul.mubr.bf16.gmra.mrb[36].mxu0 %v1279_v18 }
  0x6c   :  { %1186 = vmatmul.mubr.bf16.gmra.mrb[36].mxu1 %v1281_v19  ;;  %1104 = vmatprep.mubr.bf16.mxu0 %v1288_v20 }
  0x6d   :  { %1193 = vmatprep.mubr.bf16.mxu1 %v1290_v21 }
  0x73   :  { %1105 = vmatmul.mubr.bf16.gmra.mrb[40].mxu0 %v1287_v26 }
  0x74   :  { %1194 = vmatmul.mubr.bf16.gmra.mrb[40].mxu1 %v1289_v27  ;;  %1112 = vmatprep.mubr.bf16.mxu0 %v1296_v28 }
  0x75   :  { %1201 = vmatprep.mubr.bf16.mxu1 %v1298_v29 }
  0x7b   :  { %1113 = vmatmul.mubr.bf16.gmra.mrb[44].mxu0 %v1295_v34 }
  0x7c   :  { %1202 = vmatmul.mubr.bf16.gmra.mrb[44].mxu1 %v1297_v35  ;;  %1120 = vmatprep.mubr.bf16.mxu0 %v1304_v36 }
  0x7d   :  { %1209 = vmatprep.mubr.bf16.mxu1 %v1306_v37 }
  0x83   :  { %1121 = vmatmul.mubr.bf16.gmra.mrb[48].mxu0 %v1303_v42 }
  0x84   :  { %1210 = vmatmul.mubr.bf16.gmra.mrb[48].mxu1 %v1305_v43  ;;  %1128 = vmatprep.mubr.bf16.mxu0 %v1312_v44 }
  0x85   :  { %1217 = vmatprep.mubr.bf16.mxu1 %v1314_v45 }
  0x8b   :  { %1129 = vmatmul.mubr.bf16.gmra.mrb[52].mxu0 %v1311_v46 }
  0x8c   :  { %1218 = vmatmul.mubr.bf16.gmra.mrb[52].mxu1 %v1313_v47 }
  0xf6   :  { %v1395_v48 = vpop.f32.mrb[0].mxu0 }
  0xf7   :  { %v1453_v49 = vpop.f32.mrb[0].mxu1  ;;  %v1396_v51 = vpop.f32.mrb[1].mxu0 }
  0xf8   :  { %v1397_v52 = vadd.f32 %v1396_v51, %v1395_v48  ;;  %v1454_v53 = vpop.f32.mrb[1].mxu1  ;;  %v1398_v54 = vpop.f32.mrb[2].mxu0 }
  0xf9   :  { %v1455_v55 = vadd.f32 %v1454_v53, %v1453_v49  ;;  %v1456_v56 = vpop.f32.mrb[2].mxu1  ;;  %v1399_v57 = vpop.f32.mrb[3].mxu0 }
  0xfa   :  { %v905_v58 = vadd.f32 %v1397_v52, %v2058_v50  ;;  %v1400_v59 = vadd.f32 %v1399_v57, %v1398_v54  ;;  %v1457_v60 = vpop.f32.mrb[3].mxu1 }
  0xfb   :  { %v1458_v61 = vadd.f32 %v1457_v60, %v1456_v56 }
  0xfc   :  { %v2061_v62 = vadd.f32 %v1455_v55, %v905_v58  ;;  %v908_v63 = vadd.f32 %v1400_v59, %v2058_v50 }
  0xfe   :  { %v2064_v0 = vadd.f32 %v1458_v61, %v908_v63  ;;  %v1401_v1 = vpop.f32.mrb[4].mxu0 }
  0xff   :  { %v1459_v2 = vpop.f32.mrb[4].mxu1  ;;  %v1402_v3 = vpop.f32.mrb[5].mxu0 }
 0x100   :  { %v1403_v4 = vadd.f32 %v1402_v3, %v1401_v1  ;;  %v1460_v5 = vpop.f32.mrb[5].mxu1  ;;  %v1404_v6 = vpop.f32.mrb[6].mxu0 }
 0x101   :  { %v1461_v7 = vadd.f32 %v1460_v5, %v1459_v2  ;;  %v1462_v8 = vpop.f32.mrb[6].mxu1  ;;  %v1405_v9 = vpop.f32.mrb[7].mxu0 }
 0x102   :  { %v913_v10 = vadd.f32 %v1403_v4, %v2058_v50  ;;  %v1406_v11 = vadd.f32 %v1405_v9, %v1404_v6  ;;  %v1463_v12 = vpop.f32.mrb[7].mxu1 }
 0x103   :  { %v1464_v13 = vadd.f32 %v1463_v12, %v1462_v8 }
 0x104   :  { %v2067_v14 = vadd.f32 %v1461_v7, %v913_v10  ;;  %v916_v15 = vadd.f32 %v1406_v11, %v2058_v50 }
 0x106   :  { %v2070_v16 = vadd.f32 %v1464_v13, %v916_v15  ;;  %v1407_v17 = vpop.f32.mrb[8].mxu0 }
 0x107   :  { %v1465_v18 = vpop.f32.mrb[8].mxu1  ;;  %v1408_v19 = vpop.f32.mrb[9].mxu0 }
 0x108   :  { %v1409_v20 = vadd.f32 %v1408_v19, %v1407_v17  ;;  %v1466_v21 = vpop.f32.mrb[9].mxu1  ;;  %v1410_v22 = vpop.f32.mrb[10].mxu0 }
 0x109   :  { %v1467_v23 = vadd.f32 %v1466_v21, %v1465_v18  ;;  %v1468_v24 = vpop.f32.mrb[10].mxu1  ;;  %v1411_v25 = vpop.f32.mrb[11].mxu0 }
 0x10a   :  { %v921_v26 = vadd.f32 %v1409_v20, %v2058_v50  ;;  %v1412_v27 = vadd.f32 %v1411_v25, %v1410_v22  ;;  %v1469_v28 = vpop.f32.mrb[11].mxu1 }
 0x10b   :  { %v1470_v29 = vadd.f32 %v1469_v28, %v1468_v24 }
 0x10c   :  { %v2073_v30 = vadd.f32 %v1467_v23, %v921_v26  ;;  %v924_v31 = vadd.f32 %v1412_v27, %v2058_v50 }
 0x10e   :  { %v2076_v32 = vadd.f32 %v1470_v29, %v924_v31  ;;  %v1413_v33 = vpop.f32.mrb[12].mxu0 }
 0x10f   :  { %v1471_v34 = vpop.f32.mrb[12].mxu1  ;;  %v1414_v35 = vpop.f32.mrb[13].mxu0 }
 0x110   :  { %v1415_v36 = vadd.f32 %v1414_v35, %v1413_v33  ;;  %v1472_v37 = vpop.f32.mrb[13].mxu1  ;;  %v1416_v38 = vpop.f32.mrb[14].mxu0 }
 0x111   :  { %v1473_v39 = vadd.f32 %v1472_v37, %v1471_v34  ;;  %v1474_v40 = vpop.f32.mrb[14].mxu1  ;;  %v1417_v41 = vpop.f32.mrb[15].mxu0 }
 0x112   :  { %v929_v42 = vadd.f32 %v1415_v36, %v2058_v50  ;;  %v1418_v43 = vadd.f32 %v1417_v41, %v1416_v38  ;;  %v1475_v44 = vpop.f32.mrb[15].mxu1 }
 0x113   :  { %v1476_v45 = vadd.f32 %v1475_v44, %v1474_v40 }
 0x114   :  { %v2079_v46 = vadd.f32 %v1473_v39, %v929_v42  ;;  %v932_v47 = vadd.f32 %v1418_v43, %v2058_v50 }
 0x116   :  { %v2082_v48 = vadd.f32 %v1476_v45, %v932_v47  ;;  %v1419_v49 = vpop.f32.mrb[16].mxu0 }
 0x117   :  { %v1477_v51 = vpop.f32.mrb[16].mxu1  ;;  %v1420_v52 = vpop.f32.mrb[17].mxu0 }
 0x118   :  { %v1421_v53 = vadd.f32 %v1420_v52, %v1419_v49  ;;  %v1478_v54 = vpop.f32.mrb[17].mxu1  ;;  %v1422_v55 = vpop.f32.mrb[18].mxu0 }
 0x119   :  { %v1479_v56 = vadd.f32 %v1478_v54, %v1477_v51  ;;  %v1480_v57 = vpop.f32.mrb[18].mxu1  ;;  %v1423_v58 = vpop.f32.mrb[19].mxu0 }
 0x11a   :  { %v937_v59 = vadd.f32 %v1421_v53, %v2058_v50  ;;  %v1424_v60 = vadd.f32 %v1423_v58, %v1422_v55  ;;  %v1481_v61 = vpop.f32.mrb[19].mxu1 }
 0x11b   :  { %v1482_v63 = vadd.f32 %v1481_v61, %v1480_v57 }
 0x11c   :  { %v2085_v1 = vadd.f32 %v1479_v56, %v937_v59  ;;  %v940_v2 = vadd.f32 %v1424_v60, %v2058_v50 }
 0x11e   :  { %v2088_v3 = vadd.f32 %v1482_v63, %v940_v2  ;;  %v1425_v4 = vpop.f32.mrb[20].mxu0 }
 0x11f   :  { %v1483_v5 = vpop.f32.mrb[20].mxu1  ;;  %v1426_v6 = vpop.f32.mrb[21].mxu0 }
 0x120   :  { %v1427_v7 = vadd.f32 %v1426_v6, %v1425_v4  ;;  %v1484_v8 = vpop.f32.mrb[21].mxu1  ;;  %v1428_v9 = vpop.f32.mrb[22].mxu0 }
 0x121   :  { %v1485_v10 = vadd.f32 %v1484_v8, %v1483_v5  ;;  %v1486_v11 = vpop.f32.mrb[22].mxu1  ;;  %v1429_v12 = vpop.f32.mrb[23].mxu0 }
 0x122   :  { %v945_v13 = vadd.f32 %v1427_v7, %v2058_v50  ;;  %v1430_v15 = vadd.f32 %v1429_v12, %v1428_v9  ;;  %v1487_v17 = vpop.f32.mrb[23].mxu1 }
 0x123   :  { %v1488_v18 = vadd.f32 %v1487_v17, %v1486_v11 }
 0x124   :  { %v2091_v19 = vadd.f32 %v1485_v10, %v945_v13  ;;  %v948_v20 = vadd.f32 %v1430_v15, %v2058_v50 }
 0x126   :  { %v2094_v21 = vadd.f32 %v1488_v18, %v948_v20  ;;  %v1431_v22 = vpop.f32.mrb[24].mxu0 }
 0x127   :  { %v1489_v23 = vpop.f32.mrb[24].mxu1  ;;  %v1432_v24 = vpop.f32.mrb[25].mxu0 }
 0x128   :  { %v1433_v25 = vadd.f32 %v1432_v24, %v1431_v22  ;;  %v1490_v26 = vpop.f32.mrb[25].mxu1  ;;  %v1434_v27 = vpop.f32.mrb[26].mxu0 }
 0x129   :  { %v1491_v28 = vadd.f32 %v1490_v26, %v1489_v23  ;;  %v1492_v29 = vpop.f32.mrb[26].mxu1  ;;  %v1435_v31 = vpop.f32.mrb[27].mxu0 }
 0x12a   :  { %v953_v33 = vadd.f32 %v1433_v25, %v2058_v50  ;;  %v1436_v34 = vadd.f32 %v1435_v31, %v1434_v27  ;;  %v1493_v35 = vpop.f32.mrb[27].mxu1 }
 0x12b   :  { %v1494_v36 = vadd.f32 %v1493_v35, %v1492_v29 }
 0x12c   :  { %v2097_v37 = vadd.f32 %v1491_v28, %v953_v33  ;;  %v956_v38 = vadd.f32 %v1436_v34, %v2058_v50 }
 0x12e   :  { %v2100_v39 = vadd.f32 %v1494_v36, %v956_v38  ;;  %v1511_v40 = vpop.f32.mrb[28].mxu0 }
 0x12f   :  { %v1569_v41 = vpop.f32.mrb[28].mxu1  ;;  %v1512_v42 = vpop.f32.mrb[29].mxu0 }
 0x130   :  { %v1513_v43 = vadd.f32 %v1512_v42, %v1511_v40  ;;  %v1570_v44 = vpop.f32.mrb[29].mxu1  ;;  %v1514_v45 = vpop.f32.mrb[30].mxu0 }
 0x131   :  { %v1571_v47 = vadd.f32 %v1570_v44, %v1569_v41  ;;  %v1572_v49 = vpop.f32.mrb[30].mxu1  ;;  %v1515_v51 = vpop.f32.mrb[31].mxu0 }
 0x132   :  { %v1083_v52 = vadd.f32 %v1513_v43, %v2061_v62  ;;  %v1516_v53 = vadd.f32 %v1515_v51, %v1514_v45  ;;  %v1573_v54 = vpop.f32.mrb[31].mxu1 }
 0x133   :  { %v1574_v55 = vadd.f32 %v1573_v54, %v1572_v49 }
 0x134   :  { %v1172_v56 = vadd.f32 %v1571_v47, %v1083_v52  ;;  %v1086_v57 = vadd.f32 %v1516_v53, %v2064_v0 }
 0x136   :  { %v1226_v50 = vmax.f32 %v1172_v56, 0.0  ;;  %v1175_v58 = vadd.f32 %v1574_v55, %v1086_v57  ;;  %v1517_v59 = vpop.f32.mrb[32].mxu0 }
 0x137   :  { %v1575_v60 = vpop.f32.mrb[32].mxu1  ;;  %v1518_v61 = vpop.f32.mrb[33].mxu0 }
 0x138   :  { %1240 = vst [vmem:[%s2161_s3] sm:$0xff] %v1226_v50  ;;  %v1227_v63 = vmax.f32 %v1175_v58, 0.0  ;;  %v1519_v2 = vadd.f32 %v1518_v61, %v1517_v59  ;;  %v1576_v4 = vpop.f32.mrb[33].mxu1  ;;  %v1520_v5 = vpop.f32.mrb[34].mxu0 }
 0x139   :  { %v1577_v62 = vadd.f32 %v1576_v4, %v1575_v60  ;;  %v1578_v6 = vpop.f32.mrb[34].mxu1  ;;  %v1521_v7 = vpop.f32.mrb[35].mxu0 }
 0x13a   :  { %1241 = vst [vmem:[%s2161_s3 + $0x8] sm:$0xff] %v1227_v63  ;;  %v1091_v0 = vadd.f32 %v1519_v2, %v2067_v14  ;;  %v1522_v8 = vadd.f32 %v1521_v7, %v1520_v5  ;;  %v1579_v9 = vpop.f32.mrb[35].mxu1 }
 0x13b   :  { %v1580_v10 = vadd.f32 %v1579_v9, %v1578_v6 }
 0x13c   :  { %v1180_v11 = vadd.f32 %v1577_v62, %v1091_v0  ;;  %v1094_v12 = vadd.f32 %v1522_v8, %v2070_v16 }
 0x13e   :  { %v1228_v13 = vmax.f32 %v1180_v11, 0.0  ;;  %v1183_v15 = vadd.f32 %v1580_v10, %v1094_v12  ;;  %v1523_v17 = vpop.f32.mrb[36].mxu0 }
 0x13f   :  { %v1581_v18 = vpop.f32.mrb[36].mxu1  ;;  %v1524_v20 = vpop.f32.mrb[37].mxu0 }
 0x140   :  { %1242 = vst [vmem:[%s2161_s3 + $0x10] sm:$0xff] %v1228_v13  ;;  %v1229_v22 = vmax.f32 %v1183_v15, 0.0  ;;  %v1525_v23 = vadd.f32 %v1524_v20, %v1523_v17  ;;  %v1582_v24 = vpop.f32.mrb[37].mxu1  ;;  %v1526_v25 = vpop.f32.mrb[38].mxu0 }
 0x141   :  { %v1583_v14 = vadd.f32 %v1582_v24, %v1581_v18  ;;  %v1584_v26 = vpop.f32.mrb[38].mxu1  ;;  %v1527_v27 = vpop.f32.mrb[39].mxu0 }
 0x142   :  { %1243 = vst [vmem:[%s2161_s3 + $0x18] sm:$0xff] %v1229_v22  ;;  %v1099_v16 = vadd.f32 %v1525_v23, %v2073_v30  ;;  %v1528_v28 = vadd.f32 %v1527_v27, %v1526_v25  ;;  %v1585_v29 = vpop.f32.mrb[39].mxu1 }
 0x143   :  { %v1586_v31 = vadd.f32 %v1585_v29, %v1584_v26 }
 0x144   :  { %v1188_v33 = vadd.f32 %v1583_v14, %v1099_v16  ;;  %v1102_v34 = vadd.f32 %v1528_v28, %v2076_v32 }
 0x146   :  { %v1230_v35 = vmax.f32 %v1188_v33, 0.0  ;;  %v1191_v36 = vadd.f32 %v1586_v31, %v1102_v34  ;;  %v1529_v38 = vpop.f32.mrb[40].mxu0 }
 0x147   :  { %v1587_v40 = vpop.f32.mrb[40].mxu1  ;;  %v1530_v41 = vpop.f32.mrb[41].mxu0 }
 0x148   :  { %1244 = vst [vmem:[%s2161_s3 + $0x20] sm:$0xff] %v1230_v35  ;;  %v1231_v42 = vmax.f32 %v1191_v36, 0.0  ;;  %v1531_v43 = vadd.f32 %v1530_v41, %v1529_v38  ;;  %v1588_v44 = vpop.f32.mrb[41].mxu1  ;;  %v1532_v45 = vpop.f32.mrb[42].mxu0 }
 0x149   :  { %v1589_v30 = vadd.f32 %v1588_v44, %v1587_v40  ;;  %v1590_v47 = vpop.f32.mrb[42].mxu1  ;;  %v1533_v49 = vpop.f32.mrb[43].mxu0 }
 0x14a   :  { %1245 = vst [vmem:[%s2161_s3 + $0x28] sm:$0xff] %v1231_v42  ;;  %v1107_v32 = vadd.f32 %v1531_v43, %v2079_v46  ;;  %v1534_v51 = vadd.f32 %v1533_v49, %v1532_v45  ;;  %v1591_v52 = vpop.f32.mrb[43].mxu1 }
 0x14b   :  { %v1592_v53 = vadd.f32 %v1591_v52, %v1590_v47 }
 0x14c   :  { %v1196_v54 = vadd.f32 %v1589_v30, %v1107_v32  ;;  %v1110_v55 = vadd.f32 %v1534_v51, %v2082_v48 }
 0x14e   :  { %v1232_v56 = vmax.f32 %v1196_v54, 0.0  ;;  %v1199_v57 = vadd.f32 %v1592_v53, %v1110_v55  ;;  %v1535_v50 = vpop.f32.mrb[44].mxu0 }
 0x14f   :  { %v1593_v58 = vpop.f32.mrb[44].mxu1  ;;  %v1536_v59 = vpop.f32.mrb[45].mxu0 }
 0x150   :  { %1246 = vst [vmem:[%s2161_s3 + $0x30] sm:$0xff] %v1232_v56  ;;  %v1233_v60 = vmax.f32 %v1199_v57, 0.0  ;;  %v1537_v61 = vadd.f32 %v1536_v59, %v1535_v50  ;;  %v1594_v63 = vpop.f32.mrb[45].mxu1  ;;  %v1538_v2 = vpop.f32.mrb[46].mxu0 }
 0x151   :  { %v1595_v46 = vadd.f32 %v1594_v63, %v1593_v58  ;;  %v1596_v4 = vpop.f32.mrb[46].mxu1  ;;  %v1539_v5 = vpop.f32.mrb[47].mxu0 }
 0x152   :  { %1247 = vst [vmem:[%s2161_s3 + $0x38] sm:$0xff] %v1233_v60  ;;  %v1115_v48 = vadd.f32 %v1537_v61, %v2085_v1  ;;  %v1540_v62 = vadd.f32 %v1539_v5, %v1538_v2  ;;  %v1597_v6 = vpop.f32.mrb[47].mxu1 }
 0x153   :  { %v1598_v7 = vadd.f32 %v1597_v6, %v1596_v4 }
 0x154   :  { %v1204_v0 = vadd.f32 %v1595_v46, %v1115_v48  ;;  %v1118_v8 = vadd.f32 %v1540_v62, %v2088_v3 }
 0x156   :  { %v1234_v9 = vmax.f32 %v1204_v0, 0.0  ;;  %v1207_v10 = vadd.f32 %v1598_v7, %v1118_v8  ;;  %v1541_v11 = vpop.f32.mrb[48].mxu0 }
 0x157   :  { %v1599_v12 = vpop.f32.mrb[48].mxu1  ;;  %v1542_v13 = vpop.f32.mrb[49].mxu0 }
 0x158   :  { %1248 = vst [vmem:[%s2161_s3 + $0x40] sm:$0xff] %v1234_v9  ;;  %v1235_v15 = vmax.f32 %v1207_v10, 0.0  ;;  %v1543_v17 = vadd.f32 %v1542_v13, %v1541_v11  ;;  %v1600_v18 = vpop.f32.mrb[49].mxu1  ;;  %v1544_v20 = vpop.f32.mrb[50].mxu0 }
 0x159   :  { %v1601_v1 = vadd.f32 %v1600_v18, %v1599_v12  ;;  %v1602_v22 = vpop.f32.mrb[50].mxu1  ;;  %v1545_v23 = vpop.f32.mrb[51].mxu0 }
 0x15a   :  { %1249 = vst [vmem:[%s2161_s3 + $0x48] sm:$0xff] %v1235_v15  ;;  %v1123_v3 = vadd.f32 %v1543_v17, %v2091_v19  ;;  %v1546_v24 = vadd.f32 %v1545_v23, %v1544_v20  ;;  %v1603_v25 = vpop.f32.mrb[51].mxu1 }
 0x15b   :  { %v1604_v14 = vadd.f32 %v1603_v25, %v1602_v22 }
 0x15c   :  { %v1212_v26 = vadd.f32 %v1601_v1, %v1123_v3  ;;  %v1126_v27 = vadd.f32 %v1546_v24, %v2094_v21 }
 0x15e   :  { %v1236_v16 = vmax.f32 %v1212_v26, 0.0  ;;  %v1215_v28 = vadd.f32 %v1604_v14, %v1126_v27  ;;  %v1547_v29 = vpop.f32.mrb[52].mxu0 }
 0x15f   :  { %v1605_v31 = vpop.f32.mrb[52].mxu1  ;;  %v1548_v33 = vpop.f32.mrb[53].mxu0 }
 0x160   :  { %1250 = vst [vmem:[%s2161_s3 + $0x50] sm:$0xff] %v1236_v16  ;;  %v1237_v34 = vmax.f32 %v1215_v28, 0.0  ;;  %v1549_v35 = vadd.f32 %v1548_v33, %v1547_v29  ;;  %v1606_v36 = vpop.f32.mrb[53].mxu1  ;;  %v1550_v38 = vpop.f32.mrb[54].mxu0 }
 0x161   :  { %v1607_v19 = vadd.f32 %v1606_v36, %v1605_v31  ;;  %v1608_v40 = vpop.f32.mrb[54].mxu1  ;;  %v1551_v41 = vpop.f32.mrb[55].mxu0 }
 0x162   :  { %1251 = vst [vmem:[%s2161_s3 + $0x58] sm:$0xff] %v1237_v34  ;;  %v1131_v21 = vadd.f32 %v1549_v35, %v2097_v37  ;;  %v1552_v42 = vadd.f32 %v1551_v41, %v1550_v38  ;;  %v1609_v43 = vpop.f32.mrb[55].mxu1 }
 0x163   :  { %v1610_v44 = vadd.f32 %v1609_v43, %v1608_v40 }
 0x164   :  { %v1220_v45 = vadd.f32 %v1607_v19, %v1131_v21  ;;  %v1134_v30 = vadd.f32 %v1552_v42, %v2100_v39 }
 0x166   :  { %v1238_v47 = vmax.f32 %v1220_v45, 0.0  ;;  %v1223_v49 = vadd.f32 %v1610_v44, %v1134_v30 }
 0x168   :  { %1252 = vst [vmem:[%s2161_s3 + $0x60] sm:$0xff] %v1238_v47  ;;  %v1239_v32 = vmax.f32 %v1223_v49, 0.0 }
 0x16a   :  { %1253 = vst [vmem:[%s2161_s3 + $0x68] sm:$0xff] %v1239_v32 }

// kernel: autoencoder_forward.8
= control target key start
LH: loop header
LB: loop body
LE: loop exit
PB: predicated region body
PF: predicated region fallthrough
CT: control target
= control target key end

     0   :  { %vm5953_vm0 = vmmov 0   ;;  %vm4479_vm1 = vcmask 80896   ;;  %s7330_s1 = inlined_call_operand.vmem [shape: bf16[6272,10], index: 1, kind: input, shape index: {}]   ;;  %s7331_s0 = inlined_call_operand.vmem [shape: bf16[16,6272], index: 0, kind: input, shape index: {}]   ;;  %s7332_s2 = inlined_call_operand.vmem [shape: f32[1,10], index: 2, kind: input, shape index: {}]   ;;  %s7333_s3 = inlined_call_operand.vmem [shape: f32[16,10], index: 3, kind: output, shape index: {}]  }
   0x1   :  { %v5487_v0 = vld [vmem:[%s7330_s1 + $0x40] sm:$0xff]   ;;  %v5491_v4 = vld [vmem:[%s7330_s1 + $0x48] sm:$0xff]   ;;  %v5495_v8 = vld [vmem:[%s7330_s1 + $0x50] sm:$0xff]  }
   0x2   :  { %v5488_v1 = vld [vmem:[%s7330_s1] sm:$0xff]   ;;  %4928 = vmatprep.subr.bf16.mxu0 %v5487_v0  ;;  %v5492_v5 = vld [vmem:[%s7330_s1 + $0x8] sm:$0xff]   ;;  %v5496_v9 = vld [vmem:[%s7330_s1 + $0x10] sm:$0xff]  }
   0x3   :  { %v5489_v2 = vld [vmem:[%s7330_s1 + $0xc0] sm:$0xff]   ;;  %4929 = vmatpush3.bf16.msra.mxu0 %v5488_v1  ;;  %v5493_v6 = vld [vmem:[%s7330_s1 + $0xc8] sm:$0xff]   ;;  %v5497_v10 = vld [vmem:[%s7330_s1 + $0xd0] sm:$0xff]  }
   0x4   :  { %v5490_v3 = vld [vmem:[%s7330_s1 + $0x80] sm:$0xff]   ;;  %4950 = vmatprep.subr.bf16.mxu1 %v5489_v2  ;;  %4930 = vmatprep.subr.bf16.mxu0 %v5491_v4  ;;  %v5494_v7 = vld [vmem:[%s7330_s1 + $0x88] sm:$0xff]   ;;  %v5498_v11 = vld [vmem:[%s7330_s1 + $0x90] sm:$0xff]  }
   0x5   :  { %4951 = vmatpush3.bf16.msra.mxu1 %v5490_v3  ;;  %v5499_v12 = vld [vmem:[%s7330_s1 + $0x58] sm:$0xff]   ;;  %v5503_v16 = vld [vmem:[%s7330_s1 + $0x60] sm:$0xff]   ;;  %v5507_v20 = vld [vmem:[%s7330_s1 + $0x68] sm:$0xff]  }
   0x6   :  { %4952 = vmatprep.subr.bf16.mxu1 %v5493_v6  ;;  %v5500_v13 = vld [vmem:[%s7330_s1 + $0x18] sm:$0xff]   ;;  %v5504_v17 = vld [vmem:[%s7330_s1 + $0x20] sm:$0xff]   ;;  %v5508_v21 = vld [vmem:[%s7330_s1 + $0x28] sm:$0xff]  }
   0x7   :  { %4931 = vmatpush3.bf16.msra.mxu0 %v5492_v5  ;;  %v5501_v14 = vld [vmem:[%s7330_s1 + $0xd8] sm:$0xff]   ;;  %v5505_v18 = vld [vmem:[%s7330_s1 + $0xe0] sm:$0xff]   ;;  %v5509_v22 = vld [vmem:[%s7330_s1 + $0xe8] sm:$0xff]  }
   0x8   :  { %4932 = vmatprep.subr.bf16.mxu0 %v5495_v8  ;;  %v5502_v15 = vld [vmem:[%s7330_s1 + $0x98] sm:$0xff]   ;;  %v5506_v19 = vld [vmem:[%s7330_s1 + $0xa0] sm:$0xff]   ;;  %v5510_v23 = vld [vmem:[%s7330_s1 + $0xa8] sm:$0xff]  }
   0x9   :  { %4953 = vmatpush3.bf16.msra.mxu1 %v5494_v7  ;;  %v5511_v24 = vld [vmem:[%s7330_s1 + $0x70] sm:$0xff]   ;;  %v5515_v28 = vld [vmem:[%s7330_s1 + $0x78] sm:$0xff]   ;;  %v5518_v31 = vld [vmem:[%s7331_s0] ss:$196 sps:$4 sm:$0xff]  }
   0xa   :  { %4954 = vmatprep.subr.bf16.mxu1 %v5497_v10  ;;  %v5512_v25 = vld [vmem:[%s7330_s1 + $0x30] sm:$0xff]   ;;  %v5516_v29 = vld [vmem:[%s7330_s1 + $0x38] sm:$0xff]   ;;  %v5520_v32 = vld [vmem:[%s7331_s0 + $0x4] ss:$196 sps:$4 sm:$0xff]  }
   0xb   :  { %4933 = vmatpush3.bf16.msra.mxu0 %v5496_v9  ;;  %v5513_v26 = vld [vmem:[%s7330_s1 + $0xf0] sm:$0xff]   ;;  %v5517_v30 = vld [vmem:[%s7330_s1 + $0xf8] sm:$0xff]   ;;  %3486 = vmatprep.mubr.bf16.mxu0 %v5520_v32  ;;  %v5522_v34 = vld [vmem:[%s7330_s1 + $0x140] sm:$0xff]  }
   0xc   :  { %4934 = vmatprep.subr.bf16.mxu0 %v5499_v12  ;;  %v5514_v27 = vld [vmem:[%s7330_s1 + $0xb0] sm:$0xff]   ;;  %v5521_v33 = vld [vmem:[%s7330_s1 + $0xb8] sm:$0xff]   ;;  %v5523_v35 = vld [vmem:[%s7331_s0 + $0x8] ss:$196 sps:$4 sm:$0xff]  }
   0xd   :  { %4955 = vmatpush3.bf16.msra.mxu1 %v5498_v11  ;;  %v5525_v36 = vld [vmem:[%s7331_s0 + $0xc] ss:$196 sps:$4 sm:$0xff]   ;;  %v5526_v37 = vld [vmem:[%s7330_s1 + $0x100] sm:$0xff]   ;;  %v5537_v48 = vld [vmem:[%s7330_s1 + $0x158] sm:$0xff]  }
   0xe   :  { %4956 = vmatprep.subr.bf16.mxu1 %v5501_v14  ;;  %3527 = vmatprep.mubr.bf16.mxu1 %v5525_v36  ;;  %v5527_v38 = vld [vmem:[%s7330_s1 + $0x1c0] sm:$0xff]   ;;  %v5529_v40 = vld [vmem:[%s7330_s1 + $0x148] sm:$0xff]   ;;  %v5533_v44 = vld [vmem:[%s7330_s1 + $0x150] sm:$0xff]  }
   0xf   :  { %4935 = vmatpush3.bf16.msra.mxu0 %v5500_v13  ;;  %v5528_v39 = vld [vmem:[%s7330_s1 + $0x180] sm:$0xff]   ;;  %v5530_v41 = vld [vmem:[%s7330_s1 + $0x108] sm:$0xff]   ;;  %v5534_v45 = vld [vmem:[%s7330_s1 + $0x110] sm:$0xff]  }
  0x10   :  { %4936 = vmatprep.subr.bf16.mxu0 %v5503_v16  ;;  %v5531_v42 = vld [vmem:[%s7330_s1 + $0x1c8] sm:$0xff]   ;;  %v5535_v46 = vld [vmem:[%s7330_s1 + $0x1d0] sm:$0xff]   ;;  %v5538_v49 = vld [vmem:[%s7330_s1 + $0x118] sm:$0xff]  }
  0x11   :  { %4957 = vmatpush3.bf16.msra.mxu1 %v5502_v15  ;;  %v5532_v43 = vld [vmem:[%s7330_s1 + $0x188] sm:$0xff]   ;;  %v5536_v47 = vld [vmem:[%s7330_s1 + $0x190] sm:$0xff]   ;;  %v5539_v50 = vld [vmem:[%s7330_s1 + $0x1d8] sm:$0xff]  }
  0x12   :  { %4958 = vmatprep.subr.bf16.mxu1 %v5505_v18  ;;  %v5540_v51 = vld [vmem:[%s7330_s1 + $0x198] sm:$0xff]   ;;  %v5541_v52 = vld [vmem:[%s7330_s1 + $0x160] sm:$0xff]   ;;  %v5545_v56 = vld [vmem:[%s7330_s1 + $0x168] sm:$0xff]  }
  0x13   :  { %4937 = vmatpush3.bf16.msra.mxu0 %v5504_v17  ;;  %v5542_v53 = vld [vmem:[%s7330_s1 + $0x120] sm:$0xff]   ;;  %v5546_v57 = vld [vmem:[%s7330_s1 + $0x128] sm:$0xff]   ;;  %v5549_v60 = vld [vmem:[%s7330_s1 + $0x170] sm:$0xff]  }
  0x14   :  { %4938 = vmatprep.subr.bf16.mxu0 %v5507_v20  ;;  %v5543_v54 = vld [vmem:[%s7330_s1 + $0x1e0] sm:$0xff]   ;;  %v5547_v58 = vld [vmem:[%s7330_s1 + $0x1e8] sm:$0xff]   ;;  %v5550_v61 = vld [vmem:[%s7330_s1 + $0x130] sm:$0xff]  }
  0x15   :  { %4959 = vmatpush3.bf16.msra.mxu1 %v5506_v19  ;;  %v5544_v55 = vld [vmem:[%s7330_s1 + $0x1a0] sm:$0xff]   ;;  %v5548_v59 = vld [vmem:[%s7330_s1 + $0x1a8] sm:$0xff]   ;;  %v5551_v62 = vld [vmem:[%s7330_s1 + $0x1f0] sm:$0xff]  }
  0x16   :  { %4960 = vmatprep.subr.bf16.mxu1 %v5509_v22  ;;  %v5552_v63 = vld [vmem:[%s7330_s1 + $0x1b0] sm:$0xff]   ;;  %v5553_v0 = vld [vmem:[%s7330_s1 + $0x178] sm:$0xff]   ;;  %v5560_v6 = vld [vmem:[%s7330_s1 + $0x240] sm:$0xff]  }
  0x17   :  { %4939 = vmatpush3.bf16.msra.mxu0 %v5508_v21  ;;  %v5554_v1 = vld [vmem:[%s7330_s1 + $0x138] sm:$0xff]   ;;  %v5556_v3 = vld [vmem:[%s7331_s0 + $0x10] ss:$196 sps:$4 sm:$0xff]   ;;  %v5564_v9 = vld [vmem:[%s7330_s1 + $0x200] sm:$0xff]  }
  0x18   :  { %4940 = vmatprep.subr.bf16.mxu0 %v5511_v24  ;;  %v5555_v2 = vld [vmem:[%s7330_s1 + $0x1f8] sm:$0xff]   ;;  %v5565_v10 = vld [vmem:[%s7330_s1 + $0x2c0] sm:$0xff]   ;;  %v5567_v12 = vld [vmem:[%s7330_s1 + $0x248] sm:$0xff]  }
  0x19   :  { %4961 = vmatpush3.bf16.msra.mxu1 %v5510_v23  ;;  %v5558_v4 = vld [vmem:[%s7331_s0 + $0x14] ss:$196 sps:$4 sm:$0xff]   ;;  %v5563_v8 = vld [vmem:[%s7331_s0 + $0x1c] ss:$196 sps:$4 sm:$0xff]   ;;  %v5568_v13 = vld [vmem:[%s7330_s1 + $0x208] sm:$0xff]  }
  0x1a   :  { %4962 = vmatprep.subr.bf16.mxu1 %v5513_v26  ;;  %v5559_v5 = vld [vmem:[%s7330_s1 + $0x1b8] sm:$0xff]   ;;  %v5566_v11 = vld [vmem:[%s7330_s1 + $0x280] sm:$0xff]   ;;  %v5569_v14 = vld [vmem:[%s7330_s1 + $0x2c8] sm:$0xff]  }
  0x1b   :  { %4941 = vmatpush3.bf16.msra.mxu0 %v5512_v25  ;;  %v5561_v7 = vld [vmem:[%s7331_s0 + $0x18] ss:$196 sps:$4 sm:$0xff]   ;;  %v5570_v15 = vld [vmem:[%s7330_s1 + $0x288] sm:$0xff]   ;;  %v5571_v16 = vld [vmem:[%s7330_s1 + $0x250] sm:$0xff]  }
  0x1c   :  { %4942 = vmatprep.subr.bf16.mxu0 %v5515_v28  ;;  %v5572_v17 = vld [vmem:[%s7330_s1 + $0x210] sm:$0xff]   ;;  %v5575_v20 = vld [vmem:[%s7330_s1 + $0x258] sm:$0xff]   ;;  %v5579_v24 = vld [vmem:[%s7330_s1 + $0x260] sm:$0xff]  }
  0x1d   :  { %4963 = vmatpush3.bf16.msra.mxu1 %v5514_v27  ;;  %v5573_v18 = vld [vmem:[%s7330_s1 + $0x2d0] sm:$0xff]   ;;  %v5576_v21 = vld [vmem:[%s7330_s1 + $0x218] sm:$0xff]   ;;  %v5580_v25 = vld [vmem:[%s7330_s1 + $0x220] sm:$0xff]  }
  0x1e   :  { %4964 = vmatprep.subr.bf16.mxu1 %v5517_v30  ;;  %v5574_v19 = vld [vmem:[%s7330_s1 + $0x290] sm:$0xff]   ;;  %v5577_v22 = vld [vmem:[%s7330_s1 + $0x2d8] sm:$0xff]   ;;  %v5581_v26 = vld [vmem:[%s7330_s1 + $0x2e0] sm:$0xff]  }
  0x1f   :  { %4943 = vmatpush3.bf16.msra.mxu0 %v5516_v29  ;;  %v5578_v23 = vld [vmem:[%s7330_s1 + $0x298] sm:$0xff]   ;;  %v5582_v27 = vld [vmem:[%s7330_s1 + $0x2a0] sm:$0xff]   ;;  %v5583_v28 = vld [vmem:[%s7330_s1 + $0x268] sm:$0xff]  }
  0x20   :  { %4972 = vmatprep.subr.bf16.mxu0 %v5522_v34  ;;  %v5584_v29 = vld [vmem:[%s7330_s1 + $0x228] sm:$0xff]   ;;  %v5587_v32 = vld [vmem:[%s7330_s1 + $0x270] sm:$0xff]   ;;  %v5591_v36 = vld [vmem:[%s7330_s1 + $0x278] sm:$0xff]  }
  0x21   :  { %4965 = vmatpush3.bf16.msra.mxu1 %v5521_v33  ;;  %v5585_v30 = vld [vmem:[%s7330_s1 + $0x2e8] sm:$0xff]   ;;  %v5588_v33 = vld [vmem:[%s7330_s1 + $0x230] sm:$0xff]  }
  0x22   :  { %3487 = vmatmul.mubr.bf16.vlgmr.msra.gmra.mrb[0].mxu0 %v5518_v31  ;;  %4994 = vmatprep.subr.bf16.mxu1 %v5527_v38  ;;  %v5586_v31 = vld [vmem:[%s7330_s1 + $0x2a8] sm:$0xff]   ;;  %v5589_v34 = vld [vmem:[%s7330_s1 + $0x2f0] sm:$0xff]   ;;  %v5593_v38 = vld [vmem:[%s7330_s1 + $0x2f8] sm:$0xff]  }
  0x23   :  { %4973 = vmatpush3.bf16.msra.mxu0 %v5526_v37  ;;  %3568 = vmatprep.mubr.bf16.mxu0 %v5558_v4  ;;  %v5592_v37 = vld [vmem:[%s7330_s1 + $0x238] sm:$0xff]   ;;  %v5625_v4 = vld [vmem:[%s7330_s1 + $0x370] sm:$0xff]  }
  0x24   :  { %3528 = vmatmul.mubr.bf16.vlgmr.msra.gmra.mrb[0].mxu1 %v5523_v35  ;;  %4974 = vmatprep.subr.bf16.mxu0 %v5529_v40  ;;  %v5590_v35 = vld [vmem:[%s7330_s1 + $0x2b0] sm:$0xff]   ;;  %v5596_v40 = vld [vmem:[%s7331_s0 + $0x24] ss:$196 sps:$4 sm:$0xff]  }
  0x25   :  { %4995 = vmatpush3.bf16.msra.mxu1 %v5528_v39  ;;  %3609 = vmatprep.mubr.bf16.mxu1 %v5563_v8  ;;  %v5594_v39 = vld [vmem:[%s7331_s0 + $0x20] ss:$196 sps:$4 sm:$0xff]   ;;  %v5629_v8 = vld [vmem:[%s7330_s1 + $0x378] sm:$0xff]  }
  0x26   :  { %4996 = vmatprep.subr.bf16.mxu1 %v5531_v42  ;;  %v5598_v42 = vld [vmem:[%s7330_s1 + $0x340] sm:$0xff]  }
  0x27   :  { %4975 = vmatpush3.bf16.msra.mxu0 %v5530_v41  ;;  %v5597_v41 = vld [vmem:[%s7330_s1 + $0x2b8] sm:$0xff]  }
  0x28   :  { %4976 = vmatprep.subr.bf16.mxu0 %v5533_v44  ;;  %v5601_v44 = vld [vmem:[%s7331_s0 + $0x2c] ss:$196 sps:$4 sm:$0xff]  }
  0x29   :  { %4997 = vmatpush3.bf16.msra.mxu1 %v5532_v43  ;;  %v5599_v43 = vld [vmem:[%s7331_s0 + $0x28] ss:$196 sps:$4 sm:$0xff]  }
  0x2a   :  { %4998 = vmatprep.subr.bf16.mxu1 %v5535_v46  ;;  %v5603_v46 = vld [vmem:[%s7330_s1 + $0x3c0] sm:$0xff]  }
  0x2b   :  { %4977 = vmatpush3.bf16.msra.mxu0 %v5534_v45  ;;  %v5602_v45 = vld [vmem:[%s7330_s1 + $0x300] sm:$0xff]  }
  0x2c   :  { %4978 = vmatprep.subr.bf16.mxu0 %v5537_v48  ;;  %v5605_v48 = vld [vmem:[%s7330_s1 + $0x348] sm:$0xff]  }
  0x2d   :  { %4999 = vmatpush3.bf16.msra.mxu1 %v5536_v47  ;;  %v5604_v47 = vld [vmem:[%s7330_s1 + $0x380] sm:$0xff]  }
  0x2e   :  { %5000 = vmatprep.subr.bf16.mxu1 %v5539_v50  ;;  %v5607_v50 = vld [vmem:[%s7330_s1 + $0x3c8] sm:$0xff]  }
  0x2f   :  { %4979 = vmatpush3.bf16.msra.mxu0 %v5538_v49  ;;  %v5606_v49 = vld [vmem:[%s7330_s1 + $0x308] sm:$0xff]  }
  0x30   :  { %4980 = vmatprep.subr.bf16.mxu0 %v5541_v52  ;;  %v5609_v52 = vld [vmem:[%s7330_s1 + $0x350] sm:$0xff]  }
  0x31   :  { %5001 = vmatpush3.bf16.msra.mxu1 %v5540_v51  ;;  %v5608_v51 = vld [vmem:[%s7330_s1 + $0x388] sm:$0xff]  }
  0x32   :  { %5002 = vmatprep.subr.bf16.mxu1 %v5543_v54  ;;  %v5611_v54 = vld [vmem:[%s7330_s1 + $0x3d0] sm:$0xff]  }
  0x33   :  { %4981 = vmatpush3.bf16.msra.mxu0 %v5542_v53  ;;  %v5610_v53 = vld [vmem:[%s7330_s1 + $0x310] sm:$0xff]  }
  0x34   :  { %4982 = vmatprep.subr.bf16.mxu0 %v5545_v56  ;;  %v5613_v56 = vld [vmem:[%s7330_s1 + $0x358] sm:$0xff]  }
  0x35   :  { %5003 = vmatpush3.bf16.msra.mxu1 %v5544_v55  ;;  %v5612_v55 = vld [vmem:[%s7330_s1 + $0x390] sm:$0xff]  }
  0x36   :  { %5004 = vmatprep.subr.bf16.mxu1 %v5547_v58  ;;  %v5615_v58 = vld [vmem:[%s7330_s1 + $0x3d8] sm:$0xff]  }
  0x37   :  { %4983 = vmatpush3.bf16.msra.mxu0 %v5546_v57  ;;  %v5614_v57 = vld [vmem:[%s7330_s1 + $0x318] sm:$0xff]  }
  0x38   :  { %4984 = vmatprep.subr.bf16.mxu0 %v5549_v60  ;;  %v5617_v60 = vld [vmem:[%s7330_s1 + $0x360] sm:$0xff]  }
  0x39   :  { %5005 = vmatpush3.bf16.msra.mxu1 %v5548_v59  ;;  %v5616_v59 = vld [vmem:[%s7330_s1 + $0x398] sm:$0xff]  }
  0x3a   :  { %5006 = vmatprep.subr.bf16.mxu1 %v5551_v62  ;;  %v5619_v62 = vld [vmem:[%s7330_s1 + $0x3e0] sm:$0xff]  }
  0x3b   :  { %4985 = vmatpush3.bf16.msra.mxu0 %v5550_v61  ;;  %v5618_v61 = vld [vmem:[%s7330_s1 + $0x320] sm:$0xff]  }
  0x3c   :  { %4986 = vmatprep.subr.bf16.mxu0 %v5553_v0  ;;  %v5621_v0 = vld [vmem:[%s7330_s1 + $0x368] sm:$0xff]  }
  0x3d   :  { %5007 = vmatpush3.bf16.msra.mxu1 %v5552_v63  ;;  %v5620_v63 = vld [vmem:[%s7330_s1 + $0x3a0] sm:$0xff]  }
  0x3e   :  { %5008 = vmatprep.subr.bf16.mxu1 %v5555_v2  ;;  %v5623_v2 = vld [vmem:[%s7330_s1 + $0x3e8] sm:$0xff]  }
  0x3f   :  { %4987 = vmatpush3.bf16.msra.mxu0 %v5554_v1  ;;  %v5622_v1 = vld [vmem:[%s7330_s1 + $0x328] sm:$0xff]  }
  0x40   :  { %5016 = vmatprep.subr.bf16.mxu0 %v5560_v6  ;;  %v5627_v6 = vld [vmem:[%s7330_s1 + $0x3f0] sm:$0xff]  }
  0x41   :  { %5009 = vmatpush3.bf16.msra.mxu1 %v5559_v5  ;;  %v5626_v5 = vld [vmem:[%s7330_s1 + $0x330] sm:$0xff]  }
  0x42   :  { %3569 = vmatmul.mubr.bf16.vlgmr.msra.gmra.mrb[4].mxu0 %v5556_v3  ;;  %5038 = vmatprep.subr.bf16.mxu1 %v5565_v10  ;;  %v5624_v3 = vld [vmem:[%s7330_s1 + $0x3a8] sm:$0xff]   ;;  %v5631_v10 = vld [vmem:[%s7330_s1 + $0x3f8] sm:$0xff]  }
  0x43   :  { %5017 = vmatpush3.bf16.msra.mxu0 %v5564_v9  ;;  %3650 = vmatprep.mubr.bf16.mxu0 %v5596_v40  ;;  %v5630_v9 = vld [vmem:[%s7330_s1 + $0x338] sm:$0xff]   ;;  %v5663_v40 = vld [vmem:[%s7330_s1 + $0x470] sm:$0xff]  }
  0x44   :  { %3610 = vmatmul.mubr.bf16.vlgmr.msra.gmra.mrb[4].mxu1 %v5561_v7  ;;  %5018 = vmatprep.subr.bf16.mxu0 %v5567_v12  ;;  %v5628_v7 = vld [vmem:[%s7330_s1 + $0x3b0] sm:$0xff]  }
  0x45   :  { %5039 = vmatpush3.bf16.msra.mxu1 %v5566_v11  ;;  %3691 = vmatprep.mubr.bf16.mxu1 %v5601_v44  ;;  %v5632_v11 = vld [vmem:[%s7331_s0 + $0x30] ss:$196 sps:$4 sm:$0xff]   ;;  %v5667_v44 = vld [vmem:[%s7330_s1 + $0x478] sm:$0xff]  }
  0x46   :  { %5040 = vmatprep.subr.bf16.mxu1 %v5569_v14  ;;  %v5634_v12 = vld [vmem:[%s7331_s0 + $0x34] ss:$196 sps:$4 sm:$0xff]   ;;  %v5636_v14 = vld [vmem:[%s7330_s1 + $0x440] sm:$0xff]  }
  0x47   :  { %5019 = vmatpush3.bf16.msra.mxu0 %v5568_v13  ;;  %v5635_v13 = vld [vmem:[%s7330_s1 + $0x3b8] sm:$0xff]  }
  0x48   :  { %5020 = vmatprep.subr.bf16.mxu0 %v5571_v16  ;;  %v5639_v16 = vld [vmem:[%s7331_s0 + $0x3c] ss:$196 sps:$4 sm:$0xff]  }
  0x49   :  { %5041 = vmatpush3.bf16.msra.mxu1 %v5570_v15  ;;  %v5637_v15 = vld [vmem:[%s7331_s0 + $0x38] ss:$196 sps:$4 sm:$0xff]  }
  0x4a   :  { %5042 = vmatprep.subr.bf16.mxu1 %v5573_v18  ;;  %v5641_v18 = vld [vmem:[%s7330_s1 + $0x4c0] sm:$0xff]  }
  0x4b   :  { %5021 = vmatpush3.bf16.msra.mxu0 %v5572_v17  ;;  %v5640_v17 = vld [vmem:[%s7330_s1 + $0x400] sm:$0xff]  }
  0x4c   :  { %5022 = vmatprep.subr.bf16.mxu0 %v5575_v20  ;;  %v5643_v20 = vld [vmem:[%s7330_s1 + $0x448] sm:$0xff]  }
  0x4d   :  { %5043 = vmatpush3.bf16.msra.mxu1 %v5574_v19  ;;  %v5642_v19 = vld [vmem:[%s7330_s1 + $0x480] sm:$0xff]  }
  0x4e   :  { %5044 = vmatprep.subr.bf16.mxu1 %v5577_v22  ;;  %v5645_v22 = vld [vmem:[%s7330_s1 + $0x4c8] sm:$0xff]  }
  0x4f   :  { %5023 = vmatpush3.bf16.msra.mxu0 %v5576_v21  ;;  %v5644_v21 = vld [vmem:[%s7330_s1 + $0x408] sm:$0xff]  }
  0x50   :  { %5024 = vmatprep.subr.bf16.mxu0 %v5579_v24  ;;  %v5647_v24 = vld [vmem:[%s7330_s1 + $0x450] sm:$0xff]  }
  0x51   :  { %5045 = vmatpush3.bf16.msra.mxu1 %v5578_v23  ;;  %v5646_v23 = vld [vmem:[%s7330_s1 + $0x488] sm:$0xff]  }
  0x52   :  { %5046 = vmatprep.subr.bf16.mxu1 %v5581_v26  ;;  %v5649_v26 = vld [vmem:[%s7330_s1 + $0x4d0] sm:$0xff]  }
  0x53   :  { %5025 = vmatpush3.bf16.msra.mxu0 %v5580_v25  ;;  %v5648_v25 = vld [vmem:[%s7330_s1 + $0x410] sm:$0xff]  }
  0x54   :  { %5026 = vmatprep.subr.bf16.mxu0 %v5583_v28  ;;  %v5651_v28 = vld [vmem:[%s7330_s1 + $0x458] sm:$0xff]  }
  0x55   :  { %5047 = vmatpush3.bf16.msra.mxu1 %v5582_v27  ;;  %v5650_v27 = vld [vmem:[%s7330_s1 + $0x490] sm:$0xff]  }
  0x56   :  { %5048 = vmatprep.subr.bf16.mxu1 %v5585_v30  ;;  %v5653_v30 = vld [vmem:[%s7330_s1 + $0x4d8] sm:$0xff]  }
  0x57   :  { %5027 = vmatpush3.bf16.msra.mxu0 %v5584_v29  ;;  %v5652_v29 = vld [vmem:[%s7330_s1 + $0x418] sm:$0xff]  }
  0x58   :  { %5028 = vmatprep.subr.bf16.mxu0 %v5587_v32  ;;  %v5655_v32 = vld [vmem:[%s7330_s1 + $0x460] sm:$0xff]  }
  0x59   :  { %5049 = vmatpush3.bf16.msra.mxu1 %v5586_v31  ;;  %v5654_v31 = vld [vmem:[%s7330_s1 + $0x498] sm:$0xff]  }
  0x5a   :  { %5050 = vmatprep.subr.bf16.mxu1 %v5589_v34  ;;  %v5657_v34 = vld [vmem:[%s7330_s1 + $0x4e0] sm:$0xff]  }
  0x5b   :  { %5029 = vmatpush3.bf16.msra.mxu0 %v5588_v33  ;;  %v5656_v33 = vld [vmem:[%s7330_s1 + $0x420] sm:$0xff]  }
  0x5c   :  { %5030 = vmatprep.subr.bf16.mxu0 %v5591_v36  ;;  %v5659_v36 = vld [vmem:[%s7330_s1 + $0x468] sm:$0xff]  }
  0x5d   :  { %5051 = vmatpush3.bf16.msra.mxu1 %v5590_v35  ;;  %v5658_v35 = vld [vmem:[%s7330_s1 + $0x4a0] sm:$0xff]  }
  0x5e   :  { %5052 = vmatprep.subr.bf16.mxu1 %v5593_v38  ;;  %v5661_v38 = vld [vmem:[%s7330_s1 + $0x4e8] sm:$0xff]  }
  0x5f   :  { %5031 = vmatpush3.bf16.msra.mxu0 %v5592_v37  ;;  %v5660_v37 = vld [vmem:[%s7330_s1 + $0x428] sm:$0xff]  }
  0x60   :  { %5060 = vmatprep.subr.bf16.mxu0 %v5598_v42  ;;  %v5665_v42 = vld [vmem:[%s7330_s1 + $0x4f0] sm:$0xff]  }
  0x61   :  { %5053 = vmatpush3.bf16.msra.mxu1 %v5597_v41  ;;  %v5664_v41 = vld [vmem:[%s7330_s1 + $0x430] sm:$0xff]  }
  0x62   :  { %3651 = vmatmul.mubr.bf16.vlgmr.msra.gmra.mrb[8].mxu0 %v5594_v39  ;;  %5082 = vmatprep.subr.bf16.mxu1 %v5603_v46  ;;  %v5662_v39 = vld [vmem:[%s7330_s1 + $0x4a8] sm:$0xff]   ;;  %v5669_v46 = vld [vmem:[%s7330_s1 + $0x4f8] sm:$0xff]  }
  0x63   :  { %5061 = vmatpush3.bf16.msra.mxu0 %v5602_v45  ;;  %3732 = vmatprep.mubr.bf16.mxu0 %v5634_v12  ;;  %v5668_v45 = vld [vmem:[%s7330_s1 + $0x438] sm:$0xff]   ;;  %v5701_v12 = vld [vmem:[%s7330_s1 + $0x570] sm:$0xff]  }
  0x64   :  { %3692 = vmatmul.mubr.bf16.vlgmr.msra.gmra.mrb[8].mxu1 %v5599_v43  ;;  %5062 = vmatprep.subr.bf16.mxu0 %v5605_v48  ;;  %v5666_v43 = vld [vmem:[%s7330_s1 + $0x4b0] sm:$0xff]   ;;  %v5672_v48 = vld [vmem:[%s7331_s0 + $0x44] ss:$196 sps:$4 sm:$0xff]  }
  0x65   :  { %5083 = vmatpush3.bf16.msra.mxu1 %v5604_v47  ;;  %3773 = vmatprep.mubr.bf16.mxu1 %v5639_v16  ;;  %v5670_v47 = vld [vmem:[%s7331_s0 + $0x40] ss:$196 sps:$4 sm:$0xff]   ;;  %v5705_v16 = vld [vmem:[%s7330_s1 + $0x578] sm:$0xff]  }
  0x66   :  { %5084 = vmatprep.subr.bf16.mxu1 %v5607_v50  ;;  %v5674_v50 = vld [vmem:[%s7330_s1 + $0x540] sm:$0xff]  }
  0x67   :  { %5063 = vmatpush3.bf16.msra.mxu0 %v5606_v49  ;;  %v5673_v49 = vld [vmem:[%s7330_s1 + $0x4b8] sm:$0xff]  }
  0x68   :  { %5064 = vmatprep.subr.bf16.mxu0 %v5609_v52  ;;  %v5677_v52 = vld [vmem:[%s7331_s0 + $0x4c] ss:$196 sps:$4 sm:$0xff]  }
  0x69   :  { %5085 = vmatpush3.bf16.msra.mxu1 %v5608_v51  ;;  %v5675_v51 = vld [vmem:[%s7331_s0 + $0x48] ss:$196 sps:$4 sm:$0xff]  }
  0x6a   :  { %5086 = vmatprep.subr.bf16.mxu1 %v5611_v54  ;;  %v5679_v54 = vld [vmem:[%s7330_s1 + $0x5c0] sm:$0xff]  }
  0x6b   :  { %5065 = vmatpush3.bf16.msra.mxu0 %v5610_v53  ;;  %v5678_v53 = vld [vmem:[%s7330_s1 + $0x500] sm:$0xff]  }
  0x6c   :  { %5066 = vmatprep.subr.bf16.mxu0 %v5613_v56  ;;  %v5681_v56 = vld [vmem:[%s7330_s1 + $0x548] sm:$0xff]  }
  0x6d   :  { %5087 = vmatpush3.bf16.msra.mxu1 %v5612_v55  ;;  %v5680_v55 = vld [vmem:[%s7330_s1 + $0x580] sm:$0xff]  }
  0x6e   :  { %5088 = vmatprep.subr.bf16.mxu1 %v5615_v58  ;;  %v5683_v58 = vld [vmem:[%s7330_s1 + $0x5c8] sm:$0xff]  }
  0x6f   :  { %5067 = vmatpush3.bf16.msra.mxu0 %v5614_v57  ;;  %v5682_v57 = vld [vmem:[%s7330_s1 + $0x508] sm:$0xff]  }
  0x70   :  { %5068 = vmatprep.subr.bf16.mxu0 %v5617_v60  ;;  %v5685_v60 = vld [vmem:[%s7330_s1 + $0x550] sm:$0xff]  }
  0x71   :  { %5089 = vmatpush3.bf16.msra.mxu1 %v5616_v59  ;;  %v5684_v59 = vld [vmem:[%s7330_s1 + $0x588] sm:$0xff]  }
  0x72   :  { %5090 = vmatprep.subr.bf16.mxu1 %v5619_v62  ;;  %v5687_v62 = vld [vmem:[%s7330_s1 + $0x5d0] sm:$0xff]  }
  0x73   :  { %5069 = vmatpush3.bf16.msra.mxu0 %v5618_v61  ;;  %v5686_v61 = vld [vmem:[%s7330_s1 + $0x510] sm:$0xff]  }
  0x74   :  { %5070 = vmatprep.subr.bf16.mxu0 %v5621_v0  ;;  %v5689_v0 = vld [vmem:[%s7330_s1 + $0x558] sm:$0xff]  }
  0x75   :  { %5091 = vmatpush3.bf16.msra.mxu1 %v5620_v63  ;;  %v5688_v63 = vld [vmem:[%s7330_s1 + $0x590] sm:$0xff]  }
  0x76   :  { %5092 = vmatprep.subr.bf16.mxu1 %v5623_v2  ;;  %v5691_v2 = vld [vmem:[%s7330_s1 + $0x5d8] sm:$0xff]  }
  0x77   :  { %5071 = vmatpush3.bf16.msra.mxu0 %v5622_v1  ;;  %v5690_v1 = vld [vmem:[%s7330_s1 + $0x518] sm:$0xff]  }
  0x78   :  { %5072 = vmatprep.subr.bf16.mxu0 %v5625_v4  ;;  %v5693_v4 = vld [vmem:[%s7330_s1 + $0x560] sm:$0xff]  }
  0x79   :  { %5093 = vmatpush3.bf16.msra.mxu1 %v5624_v3  ;;  %v5692_v3 = vld [vmem:[%s7330_s1 + $0x598] sm:$0xff]  }
  0x7a   :  { %5094 = vmatprep.subr.bf16.mxu1 %v5627_v6  ;;  %v5695_v6 = vld [vmem:[%s7330_s1 + $0x5e0] sm:$0xff]  }
  0x7b   :  { %5073 = vmatpush3.bf16.msra.mxu0 %v5626_v5  ;;  %v5694_v5 = vld [vmem:[%s7330_s1 + $0x520] sm:$0xff]  }
  0x7c   :  { %5074 = vmatprep.subr.bf16.mxu0 %v5629_v8  ;;  %v5697_v8 = vld [vmem:[%s7330_s1 + $0x568] sm:$0xff]  }
  0x7d   :  { %5095 = vmatpush3.bf16.msra.mxu1 %v5628_v7  ;;  %v5696_v7 = vld [vmem:[%s7330_s1 + $0x5a0] sm:$0xff]  }
  0x7e   :  { %5096 = vmatprep.subr.bf16.mxu1 %v5631_v10  ;;  %v5699_v10 = vld [vmem:[%s7330_s1 + $0x5e8] sm:$0xff]  }
  0x7f   :  { %5075 = vmatpush3.bf16.msra.mxu0 %v5630_v9  ;;  %v5698_v9 = vld [vmem:[%s7330_s1 + $0x528] sm:$0xff]  }
  0x80   :  { %5104 = vmatprep.subr.bf16.mxu0 %v5636_v14  ;;  %v5703_v14 = vld [vmem:[%s7330_s1 + $0x5f0] sm:$0xff]  }
  0x81   :  { %5097 = vmatpush3.bf16.msra.mxu1 %v5635_v13  ;;  %v5702_v13 = vld [vmem:[%s7330_s1 + $0x530] sm:$0xff]  }
  0x82   :  { %3733 = vmatmul.mubr.bf16.vlgmr.msra.gmra.mrb[12].mxu0 %v5632_v11  ;;  %5126 = vmatprep.subr.bf16.mxu1 %v5641_v18  ;;  %v5700_v11 = vld [vmem:[%s7330_s1 + $0x5a8] sm:$0xff]   ;;  %v5707_v18 = vld [vmem:[%s7330_s1 + $0x5f8] sm:$0xff]  }
  0x83   :  { %5105 = vmatpush3.bf16.msra.mxu0 %v5640_v17  ;;  %3814 = vmatprep.mubr.bf16.mxu0 %v5672_v48  ;;  %v5706_v17 = vld [vmem:[%s7330_s1 + $0x538] sm:$0xff]   ;;  %v5739_v48 = vld [vmem:[%s7330_s1 + $0x670] sm:$0xff]  }
  0x84   :  { %3774 = vmatmul.mubr.bf16.vlgmr.msra.gmra.mrb[12].mxu1 %v5637_v15  ;;  %5106 = vmatprep.subr.bf16.mxu0 %v5643_v20  ;;  %v5704_v15 = vld [vmem:[%s7330_s1 + $0x5b0] sm:$0xff]  }
  0x85   :  { %5127 = vmatpush3.bf16.msra.mxu1 %v5642_v19  ;;  %3855 = vmatprep.mubr.bf16.mxu1 %v5677_v52  ;;  %v5708_v19 = vld [vmem:[%s7331_s0 + $0x50] ss:$196 sps:$4 sm:$0xff]   ;;  %v5743_v52 = vld [vmem:[%s7330_s1 + $0x678] sm:$0xff]  }
  0x86   :  { %5128 = vmatprep.subr.bf16.mxu1 %v5645_v22  ;;  %v5710_v20 = vld [vmem:[%s7331_s0 + $0x54] ss:$196 sps:$4 sm:$0xff]   ;;  %v5712_v22 = vld [vmem:[%s7330_s1 + $0x640] sm:$0xff]  }
  0x87   :  { %5107 = vmatpush3.bf16.msra.mxu0 %v5644_v21  ;;  %v5711_v21 = vld [vmem:[%s7330_s1 + $0x5b8] sm:$0xff]  }
  0x88   :  { %5108 = vmatprep.subr.bf16.mxu0 %v5647_v24  ;;  %v5715_v24 = vld [vmem:[%s7331_s0 + $0x5c] ss:$196 sps:$4 sm:$0xff]  }
  0x89   :  { %5129 = vmatpush3.bf16.msra.mxu1 %v5646_v23  ;;  %v5713_v23 = vld [vmem:[%s7331_s0 + $0x58] ss:$196 sps:$4 sm:$0xff]  }
  0x8a   :  { %5130 = vmatprep.subr.bf16.mxu1 %v5649_v26  ;;  %v5717_v26 = vld [vmem:[%s7330_s1 + $0x6c0] sm:$0xff]  }
  0x8b   :  { %5109 = vmatpush3.bf16.msra.mxu0 %v5648_v25  ;;  %v5716_v25 = vld [vmem:[%s7330_s1 + $0x600] sm:$0xff]  }
  0x8c   :  { %5110 = vmatprep.subr.bf16.mxu0 %v5651_v28  ;;  %v5719_v28 = vld [vmem:[%s7330_s1 + $0x648] sm:$0xff]  }
  0x8d   :  { %5131 = vmatpush3.bf16.msra.mxu1 %v5650_v27  ;;  %v5718_v27 = vld [vmem:[%s7330_s1 + $0x680] sm:$0xff]  }
  0x8e   :  { %5132 = vmatprep.subr.bf16.mxu1 %v5653_v30  ;;  %v5721_v30 = vld [vmem:[%s7330_s1 + $0x6c8] sm:$0xff]  }
  0x8f   :  { %5111 = vmatpush3.bf16.msra.mxu0 %v5652_v29  ;;  %v5720_v29 = vld [vmem:[%s7330_s1 + $0x608] sm:$0xff]  }
  0x90   :  { %5112 = vmatprep.subr.bf16.mxu0 %v5655_v32  ;;  %v5723_v32 = vld [vmem:[%s7330_s1 + $0x650] sm:$0xff]  }
  0x91   :  { %5133 = vmatpush3.bf16.msra.mxu1 %v5654_v31  ;;  %v5722_v31 = vld [vmem:[%s7330_s1 + $0x688] sm:$0xff]  }
  0x92   :  { %5134 = vmatprep.subr.bf16.mxu1 %v5657_v34  ;;  %v5725_v34 = vld [vmem:[%s7330_s1 + $0x6d0] sm:$0xff]  }
  0x93   :  { %5113 = vmatpush3.bf16.msra.mxu0 %v5656_v33  ;;  %v5724_v33 = vld [vmem:[%s7330_s1 + $0x610] sm:$0xff]  }
  0x94   :  { %5114 = vmatprep.subr.bf16.mxu0 %v5659_v36  ;;  %v5727_v36 = vld [vmem:[%s7330_s1 + $0x658] sm:$0xff]  }
  0x95   :  { %5135 = vmatpush3.bf16.msra.mxu1 %v5658_v35  ;;  %v5726_v35 = vld [vmem:[%s7330_s1 + $0x690] sm:$0xff]  }
  0x96   :  { %5136 = vmatprep.subr.bf16.mxu1 %v5661_v38  ;;  %v5729_v38 = vld [vmem:[%s7330_s1 + $0x6d8] sm:$0xff]  }
  0x97   :  { %5115 = vmatpush3.bf16.msra.mxu0 %v5660_v37  ;;  %v5728_v37 = vld [vmem:[%s7330_s1 + $0x618] sm:$0xff]  }
  0x98   :  { %5116 = vmatprep.subr.bf16.mxu0 %v5663_v40  ;;  %v5731_v40 = vld [vmem:[%s7330_s1 + $0x660] sm:$0xff]  }
  0x99   :  { %5137 = vmatpush3.bf16.msra.mxu1 %v5662_v39  ;;  %v5730_v39 = vld [vmem:[%s7330_s1 + $0x698] sm:$0xff]  }
  0x9a   :  { %5138 = vmatprep.subr.bf16.mxu1 %v5665_v42  ;;  %v5733_v42 = vld [vmem:[%s7330_s1 + $0x6e0] sm:$0xff]  }
  0x9b   :  { %5117 = vmatpush3.bf16.msra.mxu0 %v5664_v41  ;;  %v5732_v41 = vld [vmem:[%s7330_s1 + $0x620] sm:$0xff]  }
  0x9c   :  { %5118 = vmatprep.subr.bf16.mxu0 %v5667_v44  ;;  %v5735_v44 = vld [vmem:[%s7330_s1 + $0x668] sm:$0xff]  }
  0x9d   :  { %5139 = vmatpush3.bf16.msra.mxu1 %v5666_v43  ;;  %v5734_v43 = vld [vmem:[%s7330_s1 + $0x6a0] sm:$0xff]  }
  0x9e   :  { %5140 = vmatprep.subr.bf16.mxu1 %v5669_v46  ;;  %v5737_v46 = vld [vmem:[%s7330_s1 + $0x6e8] sm:$0xff]  }
  0x9f   :  { %5119 = vmatpush3.bf16.msra.mxu0 %v5668_v45  ;;  %v5736_v45 = vld [vmem:[%s7330_s1 + $0x628] sm:$0xff]  }
  0xa0   :  { %5148 = vmatprep.subr.bf16.mxu0 %v5674_v50  ;;  %v5741_v50 = vld [vmem:[%s7330_s1 + $0x6f0] sm:$0xff]  }
  0xa1   :  { %5141 = vmatpush3.bf16.msra.mxu1 %v5673_v49  ;;  %v5740_v49 = vld [vmem:[%s7330_s1 + $0x630] sm:$0xff]  }
  0xa2   :  { %3815 = vmatmul.mubr.bf16.vlgmr.msra.gmra.mrb[16].mxu0 %v5670_v47  ;;  %5170 = vmatprep.subr.bf16.mxu1 %v5679_v54  ;;  %v5738_v47 = vld [vmem:[%s7330_s1 + $0x6a8] sm:$0xff]   ;;  %v5745_v54 = vld [vmem:[%s7330_s1 + $0x6f8] sm:$0xff]  }
  0xa3   :  { %5149 = vmatpush3.bf16.msra.mxu0 %v5678_v53  ;;  %3896 = vmatprep.mubr.bf16.mxu0 %v5710_v20  ;;  %v5744_v53 = vld [vmem:[%s7330_s1 + $0x638] sm:$0xff]  }
  0xa4   :  { %3856 = vmatmul.mubr.bf16.vlgmr.msra.gmra.mrb[16].mxu1 %v5675_v51  ;;  %5150 = vmatprep.subr.bf16.mxu0 %v5681_v56  ;;  %v5742_v51 = vld [vmem:[%s7330_s1 + $0x6b0] sm:$0xff]   ;;  %v5748_v56 = vld [vmem:[%s7331_s0 + $0x64] ss:$196 sps:$4 sm:$0xff]   ;;  %v5765_v20 = vld [vmem:[%s7330_s1 + $0x758] sm:$0xff]  }
  0xa5   :  { %5171 = vmatpush3.bf16.msra.mxu1 %v5680_v55  ;;  %3937 = vmatprep.mubr.bf16.mxu1 %v5715_v24  ;;  %v5746_v55 = vld [vmem:[%s7331_s0 + $0x60] ss:$196 sps:$4 sm:$0xff]  }
  0xa6   :  { %5172 = vmatprep.subr.bf16.mxu1 %v5683_v58  ;;  %v5750_v58 = vld [vmem:[%s7330_s1 + $0x740] sm:$0xff]  }
  0xa7   :  { %5151 = vmatpush3.bf16.msra.mxu0 %v5682_v57  ;;  %v5749_v57 = vld [vmem:[%s7330_s1 + $0x6b8] sm:$0xff]   ;;  %v5769_v24 = vld [vmem:[%s7330_s1 + $0x760] sm:$0xff]  }
  0xa8   :  { %5152 = vmatprep.subr.bf16.mxu0 %v5685_v60  ;;  %v5753_v60 = vld [vmem:[%s7331_s0 + $0x6c] ss:$196 sps:$4 sm:$0xff]  }
  0xa9   :  { %5173 = vmatpush3.bf16.msra.mxu1 %v5684_v59  ;;  %v5751_v59 = vld [vmem:[%s7331_s0 + $0x68] ss:$196 sps:$4 sm:$0xff]  }
  0xaa   :  { %5174 = vmatprep.subr.bf16.mxu1 %v5687_v62  ;;  %v5755_v62 = vld [vmem:[%s7330_s1 + $0x7c0] sm:$0xff]  }
  0xab   :  { %5153 = vmatpush3.bf16.msra.mxu0 %v5686_v61  ;;  %v5754_v61 = vld [vmem:[%s7330_s1 + $0x700] sm:$0xff]  }
  0xac   :  { %5154 = vmatprep.subr.bf16.mxu0 %v5689_v0 }
  0xad   :  { %5175 = vmatpush3.bf16.msra.mxu1 %v5688_v63  ;;  %v5756_v63 = vld [vmem:[%s7330_s1 + $0x780] sm:$0xff]  }
  0xae   :  { %5176 = vmatprep.subr.bf16.mxu1 %v5691_v2 }
  0xaf   :  { %5155 = vmatpush3.bf16.msra.mxu0 %v5690_v1  ;;  %v5757_v1 = vld [vmem:[%s7330_s1 + $0x748] sm:$0xff]  }
  0xb0   :  { %5156 = vmatprep.subr.bf16.mxu0 %v5693_v4 }
  0xb1   :  { %5177 = vmatpush3.bf16.msra.mxu1 %v5692_v3  ;;  %v5758_v3 = vld [vmem:[%s7330_s1 + $0x708] sm:$0xff]  }
  0xb2   :  { %5178 = vmatprep.subr.bf16.mxu1 %v5695_v6  ;;  %v5759_v6 = vld [vmem:[%s7330_s1 + $0x7c8] sm:$0xff]  }
  0xb3   :  { %5157 = vmatpush3.bf16.msra.mxu0 %v5694_v5 }
  0xb4   :  { %5158 = vmatprep.subr.bf16.mxu0 %v5697_v8  ;;  %v5760_v8 = vld [vmem:[%s7330_s1 + $0x788] sm:$0xff]  }
  0xb5   :  { %5179 = vmatpush3.bf16.msra.mxu1 %v5696_v7 }
  0xb6   :  { %5180 = vmatprep.subr.bf16.mxu1 %v5699_v10  ;;  %v5761_v10 = vld [vmem:[%s7330_s1 + $0x750] sm:$0xff]  }
  0xb7   :  { %5159 = vmatpush3.bf16.msra.mxu0 %v5698_v9 }
  0xb8   :  { %5160 = vmatprep.subr.bf16.mxu0 %v5701_v12 }
  0xb9   :  { %5181 = vmatpush3.bf16.msra.mxu1 %v5700_v11 }
  0xba   :  { %5182 = vmatprep.subr.bf16.mxu1 %v5703_v14 }
  0xbb   :  { %5161 = vmatpush3.bf16.msra.mxu0 %v5702_v13  ;;  %v5762_v13 = vld [vmem:[%s7330_s1 + $0x710] sm:$0xff]  }
  0xbc   :  { %5162 = vmatprep.subr.bf16.mxu0 %v5705_v16  ;;  %v5763_v16 = vld [vmem:[%s7330_s1 + $0x7d0] sm:$0xff]  }
  0xbd   :  { %5183 = vmatpush3.bf16.msra.mxu1 %v5704_v15 }
  0xbe   :  { %5184 = vmatprep.subr.bf16.mxu1 %v5707_v18  ;;  %v5764_v18 = vld [vmem:[%s7330_s1 + $0x790] sm:$0xff]  }
  0xbf   :  { %5163 = vmatpush3.bf16.msra.mxu0 %v5706_v17 }
  0xc0   :  { %5192 = vmatprep.subr.bf16.mxu0 %v5712_v22  ;;  %v5767_v22 = vld [vmem:[%s7330_s1 + $0x7d8] sm:$0xff]  }
  0xc1   :  { %5185 = vmatpush3.bf16.msra.mxu1 %v5711_v21  ;;  %v5766_v21 = vld [vmem:[%s7330_s1 + $0x718] sm:$0xff]  }
  0xc2   :  { %3897 = vmatmul.mubr.bf16.vlgmr.msra.gmra.mrb[20].mxu0 %v5708_v19  ;;  %5214 = vmatprep.subr.bf16.mxu1 %v5717_v26  ;;  %v5771_v26 = vld [vmem:[%s7330_s1 + $0x7e0] sm:$0xff]  }
  0xc3   :  { %5193 = vmatpush3.bf16.msra.mxu0 %v5716_v25  ;;  %3978 = vmatprep.mubr.bf16.mxu0 %v5748_v56  ;;  %v5770_v25 = vld [vmem:[%s7330_s1 + $0x720] sm:$0xff]  }
  0xc4   :  { %3938 = vmatmul.mubr.bf16.vlgmr.msra.gmra.mrb[20].mxu1 %v5713_v23  ;;  %5194 = vmatprep.subr.bf16.mxu0 %v5719_v28  ;;  %v5768_v23 = vld [vmem:[%s7330_s1 + $0x798] sm:$0xff]   ;;  %v4486_v28 = vld [vmem:[%s7332_s2] ss:$0 sm:$0xff] }
  0xc5   :  { %5215 = vmatpush3.bf16.msra.mxu1 %v5718_v27  ;;  %4019 = vmatprep.mubr.bf16.mxu1 %v5753_v60  ;;  %v5772_v27 = vld [vmem:[%s7330_s1 + $0x7a0] sm:$0xff]   ;;  %v5797_v60 = vld [vmem:[%s7330_s1 + $0x8c8] sm:$0xff]  }
  0xc6   :  { %5216 = vmatprep.subr.bf16.mxu1 %v5721_v30  ;;  %v5773_v30 = vld [vmem:[%s7330_s1 + $0x768] sm:$0xff]  }
  0xc7   :  { %5195 = vmatpush3.bf16.msra.mxu0 %v5720_v29 }
  0xc8   :  { %5196 = vmatprep.subr.bf16.mxu0 %v5723_v32  ;;  %v5774_v32 = vld [vmem:[%s7330_s1 + $0x728] sm:$0xff]  }
  0xc9   :  { %5217 = vmatpush3.bf16.msra.mxu1 %v5722_v31 }
  0xca   :  { %5218 = vmatprep.subr.bf16.mxu1 %v5725_v34  ;;  %v5775_v34 = vld [vmem:[%s7330_s1 + $0x7e8] sm:$0xff]  }
  0xcb   :  { %5197 = vmatpush3.bf16.msra.mxu0 %v5724_v33 }
  0xcc   :  { %5198 = vmatprep.subr.bf16.mxu0 %v5727_v36  ;;  %v5776_v36 = vld [vmem:[%s7330_s1 + $0x7a8] sm:$0xff]  }
  0xcd   :  { %5219 = vmatpush3.bf16.msra.mxu1 %v5726_v35 }
  0xce   :  { %5220 = vmatprep.subr.bf16.mxu1 %v5729_v38  ;;  %v5778_v38 = vld [vmem:[%s7330_s1 + $0x730] sm:$0xff]  }
  0xcf   :  { %5199 = vmatpush3.bf16.msra.mxu0 %v5728_v37  ;;  %v5777_v37 = vld [vmem:[%s7330_s1 + $0x770] sm:$0xff]  }
  0xd0   :  { %5200 = vmatprep.subr.bf16.mxu0 %v5731_v40  ;;  %v5780_v40 = vld [vmem:[%s7330_s1 + $0x7b0] sm:$0xff]  }
  0xd1   :  { %5221 = vmatpush3.bf16.msra.mxu1 %v5730_v39  ;;  %v5779_v39 = vld [vmem:[%s7330_s1 + $0x7f0] sm:$0xff]  }
  0xd2   :  { %5222 = vmatprep.subr.bf16.mxu1 %v5733_v42  ;;  %v5782_v42 = vld [vmem:[%s7330_s1 + $0x738] sm:$0xff]  }
  0xd3   :  { %5201 = vmatpush3.bf16.msra.mxu0 %v5732_v41  ;;  %v5781_v41 = vld [vmem:[%s7330_s1 + $0x778] sm:$0xff]  }
  0xd4   :  { %5202 = vmatprep.subr.bf16.mxu0 %v5735_v44  ;;  %v5784_v44 = vld [vmem:[%s7331_s0 + $0x70] ss:$196 sps:$4 sm:$0xff]  }
  0xd5   :  { %5223 = vmatpush3.bf16.msra.mxu1 %v5734_v43  ;;  %v5783_v43 = vld [vmem:[%s7330_s1 + $0x7f8] sm:$0xff]  }
  0xd6   :  { %5224 = vmatprep.subr.bf16.mxu1 %v5737_v46  ;;  %v5787_v46 = vld [vmem:[%s7330_s1 + $0x7b8] sm:$0xff]  }
  0xd7   :  { %5203 = vmatpush3.bf16.msra.mxu0 %v5736_v45  ;;  %v5786_v45 = vld [vmem:[%s7331_s0 + $0x74] ss:$196 sps:$4 sm:$0xff]  }
  0xd8   :  { %5204 = vmatprep.subr.bf16.mxu0 %v5739_v48  ;;  %v5789_v48 = vld [vmem:[%s7331_s0 + $0x78] ss:$196 sps:$4 sm:$0xff]  }
  0xd9   :  { %5225 = vmatpush3.bf16.msra.mxu1 %v5738_v47  ;;  %v5788_v47 = vld [vmem:[%s7330_s1 + $0x840] sm:$0xff]  }
  0xda   :  { %5226 = vmatprep.subr.bf16.mxu1 %v5741_v50  ;;  %v5792_v50 = vld [vmem:[%s7330_s1 + $0x800] sm:$0xff]  }
  0xdb   :  { %5205 = vmatpush3.bf16.msra.mxu0 %v5740_v49  ;;  %v5791_v49 = vld [vmem:[%s7331_s0 + $0x7c] ss:$196 sps:$4 sm:$0xff]  }
  0xdc   :  { %5206 = vmatprep.subr.bf16.mxu0 %v5743_v52 }
  0xdd   :  { %5227 = vmatpush3.bf16.msra.mxu1 %v5742_v51  ;;  %v5793_v51 = vld [vmem:[%s7330_s1 + $0x8c0] sm:$0xff]  }
  0xde   :  { %5228 = vmatprep.subr.bf16.mxu1 %v5745_v54 }
  0xdf   :  { %5207 = vmatpush3.bf16.msra.mxu0 %v5744_v53  ;;  %v5794_v53 = vld [vmem:[%s7330_s1 + $0x880] sm:$0xff]  }
  0xe0   :  { %5236 = vmatprep.subr.bf16.mxu0 %v5750_v58  ;;  %v5796_v58 = vld [vmem:[%s7330_s1 + $0x808] sm:$0xff]  }
  0xe1   :  { %5229 = vmatpush3.bf16.msra.mxu1 %v5749_v57 }
  0xe2   :  { %3979 = vmatmul.mubr.bf16.vlgmr.msra.gmra.mrb[24].mxu0 %v5746_v55  ;;  %5258 = vmatprep.subr.bf16.mxu1 %v5755_v62  ;;  %v5795_v55 = vld [vmem:[%s7330_s1 + $0x848] sm:$0xff]  }
  0xe3   :  { %5237 = vmatpush3.bf16.msra.mxu0 %v5754_v61  ;;  %4060 = vmatprep.mubr.bf16.mxu0 %v5786_v45 }
  0xe4   :  { %4020 = vmatmul.mubr.bf16.vlgmr.msra.gmra.mrb[24].mxu1 %v5751_v59  ;;  %5238 = vmatprep.subr.bf16.mxu0 %v5757_v1 }
  0xe5   :  { %5259 = vmatpush3.bf16.msra.mxu1 %v5756_v63  ;;  %4101 = vmatprep.mubr.bf16.mxu1 %v5791_v49 }
  0xe6   :  { %5260 = vmatprep.subr.bf16.mxu1 %v5759_v6  ;;  %v5800_v6 = vld [vmem:[%s7330_s1 + $0x810] sm:$0xff]  }
  0xe7   :  { %5239 = vmatpush3.bf16.msra.mxu0 %v5758_v3 }
  0xe8   :  { %5240 = vmatprep.subr.bf16.mxu0 %v5761_v10 }
  0xe9   :  { %5261 = vmatpush3.bf16.msra.mxu1 %v5760_v8  ;;  %v5801_v8 = vld [vmem:[%s7330_s1 + $0x8d0] sm:$0xff]  }
  0xea   :  { %5262 = vmatprep.subr.bf16.mxu1 %v5763_v16  ;;  %v5806_v16 = vld [vmem:[%s7330_s1 + $0x898] sm:$0xff]  }
  0xeb   :  { %5241 = vmatpush3.bf16.msra.mxu0 %v5762_v13 }
  0xec   :  { %5242 = vmatprep.subr.bf16.mxu0 %v5765_v20  ;;  %v5810_v20 = vld [vmem:[%s7330_s1 + $0x8a0] sm:$0xff]  }
  0xed   :  { %5263 = vmatpush3.bf16.msra.mxu1 %v5764_v18  ;;  %v5808_v18 = vld [vmem:[%s7330_s1 + $0x820] sm:$0xff]  }
  0xee   :  { %5264 = vmatprep.subr.bf16.mxu1 %v5767_v22  ;;  %v5812_v22 = vld [vmem:[%s7330_s1 + $0x828] sm:$0xff]  }
  0xef   :  { %5243 = vmatpush3.bf16.msra.mxu0 %v5766_v21  ;;  %v5811_v21 = vld [vmem:[%s7330_s1 + $0x868] sm:$0xff]  }
  0xf0   :  { %5244 = vmatprep.subr.bf16.mxu0 %v5769_v24  ;;  %v5814_v24 = vld [vmem:[%s7330_s1 + $0x8a8] sm:$0xff]  }
  0xf1   :  { %5265 = vmatpush3.bf16.msra.mxu1 %v5768_v23  ;;  %v5813_v23 = vld [vmem:[%s7330_s1 + $0x8e8] sm:$0xff]  }
  0xf2   :  { %5266 = vmatprep.subr.bf16.mxu1 %v5771_v26  ;;  %v5816_v26 = vld [vmem:[%s7330_s1 + $0x830] sm:$0xff]  }
  0xf3   :  { %5245 = vmatpush3.bf16.msra.mxu0 %v5770_v25  ;;  %v5815_v25 = vld [vmem:[%s7330_s1 + $0x870] sm:$0xff]  }
  0xf4   :  { %5246 = vmatprep.subr.bf16.mxu0 %v5773_v30  ;;  %v5820_v30 = vld [vmem:[%s7330_s1 + $0x838] sm:$0xff]  }
  0xf5   :  { %v4944_v0 = vpop.f32.mrb[0].mxu0  ;;  %5267 = vmatpush3.bf16.msra.mxu1 %v5772_v27  ;;  %v5817_v27 = vld [vmem:[%s7330_s1 + $0x8f0] sm:$0xff]  }
  0xf6   :  { %v4945_v2 = vpop.f32.mrb[1].mxu0  ;;  %5268 = vmatprep.subr.bf16.mxu1 %v5775_v34  ;;  %v5825_v34 = vld [vmem:[%s7330_s1 + $0x8b8] sm:$0xff]  }
  0xf7   :  { %v4946_v4 = vadd.f32 %v4945_v2, %v4944_v0  ;;  %v4947_v5 = vpop.f32.mrb[2].mxu0  ;;  %v4966_v7 = vpop.f32.mrb[0].mxu1  ;;  %5247 = vmatpush3.bf16.msra.mxu0 %v5774_v32  ;;  %v5798_v0 = vld [vmem:[%s7330_s1 + $0x888] sm:$0xff]   ;;  %v5799_v2 = vld [vmem:[%s7330_s1 + $0x850] sm:$0xff]   ;;  %v5822_v32 = vld [vmem:[%s7331_s0 + $0x80] ss:$196 sps:$4 sm:$0xff]  }
  0xf8   :  { %v4948_v9 = vpop.f32.mrb[3].mxu0  ;;  %v4967_v12 = vpop.f32.mrb[1].mxu1  ;;  %5248 = vmatprep.subr.bf16.mxu0 %v5777_v37  ;;  %v5829_v37 = vld [vmem:[%s7331_s0 + $0x8c] ss:$196 sps:$4 sm:$0xff]  }
  0xf9   :  { %v4949_v11 = vadd.f32 %v4948_v9, %v4947_v5  ;;  %v4968_v14 = vadd.f32 %v4967_v12, %v4966_v7  ;;  %v4969_v15 = vpop.f32.mrb[2].mxu1  ;;  %v3489_v29 = vadd.f32 %v4946_v4, %v4486_v28  ;;  %5269 = vmatpush3.bf16.msra.mxu1 %v5776_v36  ;;  %v5803_v12 = vld [vmem:[%s7330_s1 + $0x858] sm:$0xff]   ;;  %v5827_v36 = vld [vmem:[%s7331_s0 + $0x88] ss:$196 sps:$4 sm:$0xff]  }
  0xfa   :  { %v4970_v17 = vpop.f32.mrb[3].mxu1  ;;  %5270 = vmatprep.subr.bf16.mxu1 %v5779_v39  ;;  %v5831_v39 = vld [vmem:[%s7330_s1 + $0x9c0] sm:$0xff]  }
  0xfb   :  { %v4971_v19 = vadd.f32 %v4970_v17, %v4969_v15  ;;  %v3492_v31 = vadd.f32 %v4949_v11, %v4486_v28  ;;  %v3530_v33 = vadd.f32 %v4968_v14, %v3489_v29  ;;  %5249 = vmatpush3.bf16.msra.mxu0 %v5778_v38  ;;  %v5802_v11 = vld [vmem:[%s7330_s1 + $0x890] sm:$0xff]   ;;  %v5804_v14 = vld [vmem:[%s7330_s1 + $0x818] sm:$0xff]   ;;  %v5807_v17 = vld [vmem:[%s7330_s1 + $0x860] sm:$0xff]  }
  0xfc   :  { %5250 = vmatprep.subr.bf16.mxu0 %v5781_v41  ;;  %v5805_v15 = vld [vmem:[%s7330_s1 + $0x8d8] sm:$0xff]   ;;  %v5818_v28 = vld [vmem:[%s7330_s1 + $0x8b0] sm:$0xff]   ;;  %v5830_v38 = vld [vmem:[%s7330_s1 + $0x900] sm:$0xff]  }
  0xfd   :  { %v3533_v35 = vadd.f32 %v4971_v19, %v3492_v31  ;;  %5271 = vmatpush3.bf16.msra.mxu1 %v5780_v40  ;;  %v5809_v19 = vld [vmem:[%s7330_s1 + $0x8e0] sm:$0xff]   ;;  %v5819_v29 = vld [vmem:[%s7330_s1 + $0x878] sm:$0xff]  }
  0xfe   :  { %5272 = vmatprep.subr.bf16.mxu1 %v5783_v43  ;;  %v5821_v31 = vld [vmem:[%s7330_s1 + $0x8f8] sm:$0xff]   ;;  %v5832_v41 = vld [vmem:[%s7330_s1 + $0x980] sm:$0xff]   ;;  %v5833_v43 = vld [vmem:[%s7330_s1 + $0x948] sm:$0xff]  }
  0xff   :  { %5251 = vmatpush3.bf16.msra.mxu0 %v5782_v42 }
 0x100   :  { %5280 = vmatprep.subr.bf16.mxu0 %v5788_v47 }
 0x101   :  { %5273 = vmatpush3.bf16.msra.mxu1 %v5787_v46  ;;  %v5834_v46 = vld [vmem:[%s7330_s1 + $0x908] sm:$0xff]  }
 0x102   :  { %4061 = vmatmul.mubr.bf16.vlgmr.msra.gmra.mrb[28].mxu0 %v5784_v44  ;;  %5302 = vmatprep.subr.bf16.mxu1 %v5793_v51  ;;  %v5836_v51 = vld [vmem:[%s7330_s1 + $0x988] sm:$0xff]  }
 0x103   :  { %5281 = vmatpush3.bf16.msra.mxu0 %v5792_v50 }
 0x104   :  { %4102 = vmatmul.mubr.bf16.vlgmr.msra.gmra.mrb[28].mxu1 %v5789_v48  ;;  %5282 = vmatprep.subr.bf16.mxu0 %v5795_v55  ;;  %v5835_v48 = vld [vmem:[%s7330_s1 + $0x9c8] sm:$0xff]  }
 0x105   :  { %5303 = vmatpush3.bf16.msra.mxu1 %v5794_v53  ;;  %4183 = vmatprep.mubr.bf16.mxu1 %v5829_v37  ;;  %v5874_v37 = vld [vmem:[%s7330_s1 + $0xa88] sm:$0xff]  }
 0x106   :  { %5304 = vmatprep.subr.bf16.mxu1 %v5797_v60  ;;  %v5839_v60 = vld [vmem:[%s7330_s1 + $0x9d0] sm:$0xff]  }
 0x107   :  { %5283 = vmatpush3.bf16.msra.mxu0 %v5796_v58 }
 0x108   :  { %5284 = vmatprep.subr.bf16.mxu0 %v5799_v2  ;;  %v5842_v2 = vld [vmem:[%s7330_s1 + $0x918] sm:$0xff]  }
 0x109   :  { %5305 = vmatpush3.bf16.msra.mxu1 %v5798_v0  ;;  %v5841_v0 = vld [vmem:[%s7330_s1 + $0x958] sm:$0xff]  }
 0x10a   :  { %5306 = vmatprep.subr.bf16.mxu1 %v5801_v8  ;;  %v5848_v8 = vld [vmem:[%s7330_s1 + $0x9a0] sm:$0xff]  }
 0x10b   :  { %5285 = vmatpush3.bf16.msra.mxu0 %v5800_v6  ;;  %v5846_v6 = vld [vmem:[%s7330_s1 + $0x920] sm:$0xff]  }
 0x10c   :  { %5286 = vmatprep.subr.bf16.mxu0 %v5803_v12  ;;  %v5852_v12 = vld [vmem:[%s7330_s1 + $0x9a8] sm:$0xff]  }
 0x10d   :  { %5307 = vmatpush3.bf16.msra.mxu1 %v5802_v11  ;;  %v5851_v11 = vld [vmem:[%s7330_s1 + $0x9e8] sm:$0xff]  }
 0x10e   :  { %5308 = vmatprep.subr.bf16.mxu1 %v5805_v15  ;;  %v5855_v15 = vld [vmem:[%s7330_s1 + $0x9f0] sm:$0xff]  }
 0x10f   :  { %5287 = vmatpush3.bf16.msra.mxu0 %v5804_v14  ;;  %v5854_v14 = vld [vmem:[%s7330_s1 + $0x930] sm:$0xff]  }
 0x110   :  { %5288 = vmatprep.subr.bf16.mxu0 %v5807_v17  ;;  %v5857_v17 = vld [vmem:[%s7330_s1 + $0x978] sm:$0xff]  }
 0x111   :  { %5309 = vmatpush3.bf16.msra.mxu1 %v5806_v16  ;;  %v5856_v16 = vld [vmem:[%s7330_s1 + $0x9b0] sm:$0xff]  }
 0x112   :  { %5310 = vmatprep.subr.bf16.mxu1 %v5809_v19  ;;  %v5859_v19 = vld [vmem:[%s7330_s1 + $0x9f8] sm:$0xff]  }
 0x113   :  { %5289 = vmatpush3.bf16.msra.mxu0 %v5808_v18  ;;  %v5858_v18 = vld [vmem:[%s7330_s1 + $0x938] sm:$0xff]  }
 0x114   :  { %5290 = vmatprep.subr.bf16.mxu0 %v5811_v21  ;;  %v5862_v21 = vld [vmem:[%s7331_s0 + $0x94] ss:$196 sps:$4 sm:$0xff]  }
 0x115   :  { %v4988_v52 = vpop.f32.mrb[4].mxu0  ;;  %5311 = vmatpush3.bf16.msra.mxu1 %v5810_v20  ;;  %v5860_v20 = vld [vmem:[%s7331_s0 + $0x90] ss:$196 sps:$4 sm:$0xff]  }
 0x116   :  { %v4989_v54 = vpop.f32.mrb[5].mxu0  ;;  %5312 = vmatprep.subr.bf16.mxu1 %v5813_v23  ;;  %v5864_v23 = vld [vmem:[%s7330_s1 + $0xa40] sm:$0xff]  }
 0x117   :  { %v4990_v56 = vadd.f32 %v4989_v54, %v4988_v52  ;;  %v4991_v57 = vpop.f32.mrb[6].mxu0  ;;  %v5010_v62 = vpop.f32.mrb[4].mxu1  ;;  %5291 = vmatpush3.bf16.msra.mxu0 %v5812_v22  ;;  %v5837_v54 = vld [vmem:[%s7330_s1 + $0x950] sm:$0xff]   ;;  %v5863_v22 = vld [vmem:[%s7330_s1 + $0x9b8] sm:$0xff]  }
 0x118   :  { %v4992_v59 = vpop.f32.mrb[7].mxu0  ;;  %v5011_v1 = vpop.f32.mrb[5].mxu1  ;;  %5292 = vmatprep.subr.bf16.mxu0 %v5815_v25  ;;  %v5867_v25 = vld [vmem:[%s7331_s0 + $0x9c] ss:$196 sps:$4 sm:$0xff]  }
 0x119   :  { %v3571_v61 = vadd.f32 %v4990_v56, %v3530_v33  ;;  %v4993_v63 = vadd.f32 %v4992_v59, %v4991_v57  ;;  %v5012_v4 = vadd.f32 %v5011_v1, %v5010_v62  ;;  %v5013_v5 = vpop.f32.mrb[6].mxu1  ;;  %5313 = vmatpush3.bf16.msra.mxu1 %v5814_v24  ;;  %v5824_v33 = vld [vmem:[%s7331_s0 + $0x84] ss:$196 sps:$4 sm:$0xff]   ;;  %v5838_v57 = vld [vmem:[%s7330_s1 + $0x910] sm:$0xff]   ;;  %v5865_v24 = vld [vmem:[%s7331_s0 + $0x98] ss:$196 sps:$4 sm:$0xff]  }
 0x11a   :  { %v5014_v7 = vpop.f32.mrb[7].mxu1  ;;  %5314 = vmatprep.subr.bf16.mxu1 %v5817_v27  ;;  %4142 = vmatprep.mubr.bf16.mxu0 %v5824_v33  ;;  %v5869_v27 = vld [vmem:[%s7330_s1 + $0xac0] sm:$0xff]  }
 0x11b   :  { %v3574_v3 = vadd.f32 %v4993_v63, %v3533_v35  ;;  %v6874_v9 = vadd.f32 %v5012_v4, %v3571_v61  ;;  %v5015_v10 = vadd.f32 %v5014_v7, %v5013_v5  ;;  %5293 = vmatpush3.bf16.msra.mxu0 %v5816_v26  ;;  %v5826_v35 = vld [vmem:[%s7330_s1 + $0x940] sm:$0xff]   ;;  %v5840_v63 = vld [vmem:[%s7330_s1 + $0x990] sm:$0xff]   ;;  %v5844_v4 = vld [vmem:[%s7330_s1 + $0x998] sm:$0xff]  }
 0x11c   :  { %5294 = vmatprep.subr.bf16.mxu0 %v5819_v29  ;;  %v5845_v5 = vld [vmem:[%s7330_s1 + $0x960] sm:$0xff]  }
 0x11d   :  { %v6882_v13 = vadd.f32 %v5015_v10, %v3574_v3  ;;  %5315 = vmatpush3.bf16.msra.mxu1 %v5818_v28  ;;  %v5843_v3 = vld [vmem:[%s7330_s1 + $0x9d8] sm:$0xff]   ;;  %v5847_v7 = vld [vmem:[%s7330_s1 + $0x9e0] sm:$0xff]   ;;  %v5850_v10 = vld [vmem:[%s7330_s1 + $0x928] sm:$0xff]  }
 0x11e   :  { %5316 = vmatprep.subr.bf16.mxu1 %v5821_v31  ;;  %v5868_v26 = vld [vmem:[%s7330_s1 + $0xa00] sm:$0xff]  }
 0x11f   :  { %5295 = vmatpush3.bf16.msra.mxu0 %v5820_v30  ;;  %v5870_v28 = vld [vmem:[%s7330_s1 + $0xa80] sm:$0xff]   ;;  %v5871_v30 = vld [vmem:[%s7330_s1 + $0xa48] sm:$0xff]  }
 0x120   :  { %5324 = vmatprep.subr.bf16.mxu0 %v5826_v35  ;;  %v5873_v35 = vld [vmem:[%s7330_s1 + $0xac8] sm:$0xff]  }
 0x121   :  { %5317 = vmatpush3.bf16.msra.mxu1 %v5825_v34 }
 0x122   :  { %4143 = vmatmul.mubr.bf16.vlgmr.msra.gmra.mrb[32].mxu0 %v5822_v32  ;;  %5346 = vmatprep.subr.bf16.mxu1 %v5831_v39  ;;  %v5872_v32 = vld [vmem:[%s7330_s1 + $0xa08] sm:$0xff]  }
 0x123   :  { %5325 = vmatpush3.bf16.msra.mxu0 %v5830_v38  ;;  %4224 = vmatprep.mubr.bf16.mxu0 %v5862_v21 }
 0x124   :  { %4184 = vmatmul.mubr.bf16.vlgmr.msra.gmra.mrb[32].mxu1 %v5827_v36  ;;  %5326 = vmatprep.subr.bf16.mxu0 %v5833_v43  ;;  %v5876_v43 = vld [vmem:[%s7330_s1 + $0xa10] sm:$0xff]  }
 0x125   :  { %5347 = vmatpush3.bf16.msra.mxu1 %v5832_v41  ;;  %4265 = vmatprep.mubr.bf16.mxu1 %v5867_v25 }
 0x126   :  { %5348 = vmatprep.subr.bf16.mxu1 %v5835_v48 }
 0x127   :  { %5327 = vmatpush3.bf16.msra.mxu0 %v5834_v46  ;;  %v5877_v46 = vld [vmem:[%s7330_s1 + $0xad0] sm:$0xff]  }
 0x128   :  { %5328 = vmatprep.subr.bf16.mxu0 %v5837_v54 }
 0x129   :  { %5349 = vmatpush3.bf16.msra.mxu1 %v5836_v51 }
 0x12a   :  { %5350 = vmatprep.subr.bf16.mxu1 %v5839_v60  ;;  %v5886_v60 = vld [vmem:[%s7330_s1 + $0xaa0] sm:$0xff]  }
 0x12b   :  { %5329 = vmatpush3.bf16.msra.mxu0 %v5838_v57  ;;  %v5883_v57 = vld [vmem:[%s7330_s1 + $0xa60] sm:$0xff]  }
 0x12c   :  { %5330 = vmatprep.subr.bf16.mxu0 %v5841_v0  ;;  %v5890_v0 = vld [vmem:[%s7330_s1 + $0xaa8] sm:$0xff]  }
 0x12d   :  { %5351 = vmatpush3.bf16.msra.mxu1 %v5840_v63  ;;  %v5889_v63 = vld [vmem:[%s7330_s1 + $0xae8] sm:$0xff]  }
 0x12e   :  { %5352 = vmatprep.subr.bf16.mxu1 %v5843_v3  ;;  %v5893_v3 = vld [vmem:[%s7330_s1 + $0xaf0] sm:$0xff]  }
 0x12f   :  { %5331 = vmatpush3.bf16.msra.mxu0 %v5842_v2  ;;  %v5892_v2 = vld [vmem:[%s7330_s1 + $0xa30] sm:$0xff]  }
 0x130   :  { %5332 = vmatprep.subr.bf16.mxu0 %v5845_v5  ;;  %v5895_v5 = vld [vmem:[%s7330_s1 + $0xa78] sm:$0xff]  }
 0x131   :  { %5353 = vmatpush3.bf16.msra.mxu1 %v5844_v4  ;;  %v5894_v4 = vld [vmem:[%s7330_s1 + $0xab0] sm:$0xff]  }
 0x132   :  { %5354 = vmatprep.subr.bf16.mxu1 %v5847_v7  ;;  %v5897_v7 = vld [vmem:[%s7330_s1 + $0xaf8] sm:$0xff]  }
 0x133   :  { %5333 = vmatpush3.bf16.msra.mxu0 %v5846_v6  ;;  %v5896_v6 = vld [vmem:[%s7330_s1 + $0xa38] sm:$0xff]  }
 0x135   :  { %v5032_v40 = vpop.f32.mrb[8].mxu0  ;;  %5355 = vmatpush3.bf16.msra.mxu1 %v5848_v8  ;;  %v5898_v8 = vld [vmem:[%s7331_s0 + $0xa0] ss:$196 sps:$4 sm:$0xff]  }
 0x136   :  { %v5033_v42 = vpop.f32.mrb[9].mxu0  ;;  %5356 = vmatprep.subr.bf16.mxu1 %v5851_v11  ;;  %v5902_v11 = vld [vmem:[%s7330_s1 + $0xb40] sm:$0xff]  }
 0x137   :  { %v5034_v44 = vadd.f32 %v5033_v42, %v5032_v40  ;;  %v5035_v45 = vpop.f32.mrb[10].mxu0  ;;  %v5054_v47 = vpop.f32.mrb[8].mxu1  ;;  %v5875_v40 = vld [vmem:[%s7330_s1 + $0xa50] sm:$0xff]  }
 0x138   :  { %v5036_v50 = vpop.f32.mrb[11].mxu0  ;;  %v5055_v53 = vpop.f32.mrb[9].mxu1 }
 0x139   :  { %v3653_v49 = vadd.f32 %v5034_v44, %v6874_v9  ;;  %v5037_v52 = vadd.f32 %v5036_v50, %v5035_v45  ;;  %v5056_v55 = vadd.f32 %v5055_v53, %v5054_v47  ;;  %v5057_v56 = vpop.f32.mrb[10].mxu1  ;;  %v5849_v9 = vld [vmem:[%s7330_s1 + $0x968] sm:$0xff]   ;;  %5357 = vmatpush3.bf16.msra.mxu1 %v5852_v12  ;;  %v5880_v53 = vld [vmem:[%s7330_s1 + $0xa18] sm:$0xff]  }
 0x13a   :  { %v5058_v59 = vpop.f32.mrb[11].mxu1  ;;  %5334 = vmatprep.subr.bf16.mxu0 %v5849_v9  ;;  %5358 = vmatprep.subr.bf16.mxu1 %v5855_v15  ;;  %v5900_v9 = vld [vmem:[%s7331_s0 + $0xa4] ss:$196 sps:$4 sm:$0xff]  }
 0x13b   :  { %v3656_v58 = vadd.f32 %v5037_v52, %v6882_v13  ;;  %v6988_v61 = vadd.f32 %v5056_v55, %v3653_v49  ;;  %v5059_v62 = vadd.f32 %v5058_v59, %v5057_v56  ;;  %5335 = vmatpush3.bf16.msra.mxu0 %v5850_v10  ;;  %v5853_v13 = vld [vmem:[%s7330_s1 + $0x970] sm:$0xff]   ;;  %v5879_v52 = vld [vmem:[%s7330_s1 + $0xa58] sm:$0xff]   ;;  %v5885_v59 = vld [vmem:[%s7330_s1 + $0xae0] sm:$0xff]  }
 0x13c   :  { %5336 = vmatprep.subr.bf16.mxu0 %v5853_v13  ;;  %v5878_v49 = vld [vmem:[%s7330_s1 + $0xa90] sm:$0xff]   ;;  %v5881_v55 = vld [vmem:[%s7330_s1 + $0xad8] sm:$0xff]   ;;  %v5903_v12 = vld [vmem:[%s7331_s0 + $0xa8] ss:$196 sps:$4 sm:$0xff]  }
 0x13d   :  { %v6996_v1 = vadd.f32 %v5059_v62, %v3656_v58  ;;  %5359 = vmatpush3.bf16.msra.mxu1 %v5856_v16  ;;  %v5882_v56 = vld [vmem:[%s7330_s1 + $0xa98] sm:$0xff]   ;;  %v5884_v58 = vld [vmem:[%s7330_s1 + $0xa20] sm:$0xff]   ;;  %v5888_v62 = vld [vmem:[%s7330_s1 + $0xa28] sm:$0xff]  }
 0x13e   :  { %5360 = vmatprep.subr.bf16.mxu1 %v5859_v19  ;;  %v5901_v10 = vld [vmem:[%s7330_s1 + $0xab8] sm:$0xff]   ;;  %v5905_v13 = vld [vmem:[%s7331_s0 + $0xac] ss:$196 sps:$4 sm:$0xff]   ;;  %v5907_v15 = vld [vmem:[%s7330_s1 + $0xbc0] sm:$0xff]  }
 0x13f   :  { %5337 = vmatpush3.bf16.msra.mxu0 %v5854_v14  ;;  %v5906_v14 = vld [vmem:[%s7330_s1 + $0xb00] sm:$0xff]   ;;  %v5909_v19 = vld [vmem:[%s7330_s1 + $0xb48] sm:$0xff]  }
 0x140   :  { %5338 = vmatprep.subr.bf16.mxu0 %v5857_v17  ;;  %v5908_v17 = vld [vmem:[%s7330_s1 + $0xb80] sm:$0xff]  }
 0x141   :  { %5361 = vmatpush3.bf16.msra.mxu1 %v5863_v22  ;;  %v5910_v22 = vld [vmem:[%s7330_s1 + $0xb08] sm:$0xff]  }
 0x142   :  { %5390 = vmatprep.subr.bf16.mxu1 %v5869_v27 }
 0x143   :  { %5339 = vmatpush3.bf16.msra.mxu0 %v5858_v18 }
 0x144   :  { %5368 = vmatprep.subr.bf16.mxu0 %v5864_v23  ;;  %4266 = vmatmul.mubr.bf16.vlgmr.msra.gmra.mrb[36].mxu1 %v5865_v24  ;;  %v5911_v24 = vld [vmem:[%s7330_s1 + $0xbc8] sm:$0xff]  }
 0x145   :  { %5391 = vmatpush3.bf16.msra.mxu1 %v5870_v28  ;;  %4347 = vmatprep.mubr.bf16.mxu1 %v5905_v13  ;;  %v5912_v28 = vld [vmem:[%s7330_s1 + $0xb88] sm:$0xff]  }
 0x146   :  { %4225 = vmatmul.mubr.bf16.vlgmr.msra.gmra.mrb[36].mxu0 %v5860_v20  ;;  %5392 = vmatprep.subr.bf16.mxu1 %v5873_v35 }
 0x147   :  { %5369 = vmatpush3.bf16.msra.mxu0 %v5868_v26  ;;  %4306 = vmatprep.mubr.bf16.mxu0 %v5900_v9 }
 0x148   :  { %5370 = vmatprep.subr.bf16.mxu0 %v5871_v30  ;;  %v5913_v30 = vld [vmem:[%s7330_s1 + $0xb50] sm:$0xff]  }
 0x149   :  { %5393 = vmatpush3.bf16.msra.mxu1 %v5874_v37 }
 0x14a   :  { %5394 = vmatprep.subr.bf16.mxu1 %v5877_v46  ;;  %v5922_v46 = vld [vmem:[%s7330_s1 + $0xb20] sm:$0xff]  }
 0x14b   :  { %5371 = vmatpush3.bf16.msra.mxu0 %v5872_v32 }
 0x14c   :  { %5372 = vmatprep.subr.bf16.mxu0 %v5875_v40  ;;  %v5917_v40 = vld [vmem:[%s7330_s1 + $0xb58] sm:$0xff]  }
 0x14d   :  { %5395 = vmatpush3.bf16.msra.mxu1 %v5878_v49  ;;  %v5925_v49 = vld [vmem:[%s7330_s1 + $0xb68] sm:$0xff]  }
 0x14e   :  { %5396 = vmatprep.subr.bf16.mxu1 %v5881_v55  ;;  %v5931_v55 = vld [vmem:[%s7330_s1 + $0xbf0] sm:$0xff]  }
 0x14f   :  { %5373 = vmatpush3.bf16.msra.mxu0 %v5876_v43  ;;  %v5919_v43 = vld [vmem:[%s7330_s1 + $0xbd8] sm:$0xff]  }
 0x150   :  { %5374 = vmatprep.subr.bf16.mxu0 %v5879_v52  ;;  %v5928_v52 = vld [vmem:[%s7330_s1 + $0xba8] sm:$0xff]  }
 0x151   :  { %5397 = vmatpush3.bf16.msra.mxu1 %v5882_v56  ;;  %v5932_v56 = vld [vmem:[%s7330_s1 + $0xbb0] sm:$0xff]  }
 0x152   :  { %5398 = vmatprep.subr.bf16.mxu1 %v5885_v59  ;;  %v5935_v59 = vld [vmem:[%s7330_s1 + $0xbf8] sm:$0xff]  }
 0x153   :  { %5375 = vmatpush3.bf16.msra.mxu0 %v5880_v53  ;;  %v5929_v53 = vld [vmem:[%s7330_s1 + $0xb70] sm:$0xff]  }
 0x154   :  { %5376 = vmatprep.subr.bf16.mxu0 %v5883_v57  ;;  %v5933_v57 = vld [vmem:[%s7330_s1 + $0xb78] sm:$0xff]  }
 0x155   :  { %v5076_v29 = vpop.f32.mrb[12].mxu0  ;;  %5399 = vmatpush3.bf16.msra.mxu1 %v5886_v60  ;;  %v5936_v60 = vld [vmem:[%s7331_s0 + $0xb0] ss:$196 sps:$4 sm:$0xff]  }
 0x156   :  { %v5077_v31 = vpop.f32.mrb[13].mxu0  ;;  %5400 = vmatprep.subr.bf16.mxu1 %v5889_v63  ;;  %v5952_v63 = vmov 0.0  }
 0x157   :  { %v5078_v33 = vadd.f32 %v5077_v31, %v5076_v29  ;;  %v5079_v34 = vpop.f32.mrb[14].mxu0  ;;  %v5098_v36 = vpop.f32.mrb[12].mxu1  ;;  %5377 = vmatpush3.bf16.msra.mxu0 %v5884_v58  ;;  %v5934_v58 = vld [vmem:[%s7330_s1 + $0xb38] sm:$0xff]  }
 0x158   :  { %v5080_v39 = vpop.f32.mrb[15].mxu0  ;;  %v5099_v42 = vpop.f32.mrb[13].mxu1 }
 0x159   :  { %v3735_v38 = vadd.f32 %v5078_v33, %v6988_v61  ;;  %v5081_v41 = vadd.f32 %v5080_v39, %v5079_v34  ;;  %v5100_v44 = vadd.f32 %v5099_v42, %v5098_v36  ;;  %v5101_v45 = vpop.f32.mrb[14].mxu1  ;;  %v5887_v61 = vld [vmem:[%s7330_s1 + $0xa68] sm:$0xff]   ;;  %5401 = vmatpush3.bf16.msra.mxu1 %v5890_v0  ;;  %v5914_v34 = vld [vmem:[%s7330_s1 + $0xb10] sm:$0xff]   ;;  %v5918_v42 = vld [vmem:[%s7330_s1 + $0xb18] sm:$0xff]  }
 0x15a   :  { %v5102_v48 = vpop.f32.mrb[15].mxu1  ;;  %5378 = vmatprep.subr.bf16.mxu0 %v5887_v61  ;;  %5402 = vmatprep.subr.bf16.mxu1 %v5893_v3  ;;  %v5915_v36 = vld [vmem:[%s7330_s1 + $0xbd0] sm:$0xff]   ;;  %v5940_v0 = vld [vmem:[%s7331_s0 + $0xb8] ss:$196 sps:$4 sm:$0xff]   ;;  %v5944_v3 = vld [vmem:[%s7330_s1 + $0xc08] sm:$0xff]  }
 0x15b   :  { %v3738_v47 = vadd.f32 %v5081_v41, %v6996_v1  ;;  %v7105_v50 = vadd.f32 %v5100_v44, %v3735_v38  ;;  %v5103_v51 = vadd.f32 %v5102_v48, %v5101_v45  ;;  %5379 = vmatpush3.bf16.msra.mxu0 %v5888_v62  ;;  %v5891_v1 = vld [vmem:[%s7330_s1 + $0xa70] sm:$0xff]   ;;  %v5920_v44 = vld [vmem:[%s7330_s1 + $0xb98] sm:$0xff]   ;;  %v5921_v45 = vld [vmem:[%s7330_s1 + $0xb60] sm:$0xff]  }
 0x15c   :  { %5380 = vmatprep.subr.bf16.mxu0 %v5891_v1  ;;  %v5916_v39 = vld [vmem:[%s7330_s1 + $0xb90] sm:$0xff]   ;;  %v5924_v48 = vld [vmem:[%s7330_s1 + $0xba0] sm:$0xff]   ;;  %v5939_v62 = vld [vmem:[%s7330_s1 + $0xbb8] sm:$0xff]  }
 0x15d   :  { %v7113_v54 = vadd.f32 %v5103_v51, %v3738_v47  ;;  %5403 = vmatpush3.bf16.msra.mxu1 %v5894_v4  ;;  %v5923_v47 = vld [vmem:[%s7330_s1 + $0xbe0] sm:$0xff]   ;;  %v5927_v51 = vld [vmem:[%s7330_s1 + $0xbe8] sm:$0xff]   ;;  %v5938_v61 = vld [vmem:[%s7331_s0 + $0xb4] ss:$196 sps:$4 sm:$0xff]  }
 0x15e   :  { %5404 = vmatprep.subr.bf16.mxu1 %v5897_v7  ;;  %v5942_v1 = vld [vmem:[%s7331_s0 + $0xbc] ss:$196 sps:$4 sm:$0xff]  }
 0x15f   :  { %5381 = vmatpush3.bf16.msra.mxu0 %v5892_v2  ;;  %v5943_v2 = vld [vmem:[%s7330_s1 + $0xc00] sm:$0xff]  }
 0x160   :  { %5382 = vmatprep.subr.bf16.mxu0 %v5895_v5 }
 0x161   :  { %5405 = vmatpush3.bf16.msra.mxu1 %v5901_v10  ;;  %v5945_v10 = vld [vmem:[%s7330_s1 + $0xc10] sm:$0xff]  }
 0x162   :  { %5434 = vmatprep.subr.bf16.mxu1 %v5907_v15 }
 0x163   :  { %5383 = vmatpush3.bf16.msra.mxu0 %v5896_v6 }
 0x164   :  { %5412 = vmatprep.subr.bf16.mxu0 %v5902_v11  ;;  %4348 = vmatmul.mubr.bf16.vlgmr.msra.gmra.mrb[40].mxu1 %v5903_v12 }
 0x165   :  { %5435 = vmatpush3.bf16.msra.mxu1 %v5908_v17  ;;  %4429 = vmatprep.mubr.bf16.mxu1 %v5942_v1 }
 0x166   :  { %4307 = vmatmul.mubr.bf16.vlgmr.msra.gmra.mrb[40].mxu0 %v5898_v8  ;;  %5436 = vmatprep.subr.bf16.mxu1 %v5911_v24  ;;  %v5949_v24 = vld [vmem:[%s7330_s1 + $0xc30] sm:$0xff]  }
 0x167   :  { %5413 = vmatpush3.bf16.msra.mxu0 %v5906_v14  ;;  %4388 = vmatprep.mubr.bf16.mxu0 %v5938_v61 }
 0x168   :  { %5414 = vmatprep.subr.bf16.mxu0 %v5909_v19 }
 0x169   :  { %5437 = vmatpush3.bf16.msra.mxu1 %v5912_v28 }
 0x16a   :  { %5438 = vmatprep.subr.bf16.mxu1 %v5915_v36 }
 0x16b   :  { %5415 = vmatpush3.bf16.msra.mxu0 %v5910_v22  ;;  %v5947_v22 = vld [vmem:[%s7330_s1 + $0xc20] sm:$0xff]  }
 0x16c   :  { %5416 = vmatprep.subr.bf16.mxu0 %v5913_v30 }
 0x16d   :  { %5439 = vmatpush3.bf16.msra.mxu1 %v5916_v39 }
 0x16e   :  { %5440 = vmatprep.subr.bf16.mxu1 %v5919_v43 }
 0x16f   :  { %5417 = vmatpush3.bf16.msra.mxu0 %v5914_v34 }
 0x170   :  { %5418 = vmatprep.subr.bf16.mxu0 %v5917_v40 }
 0x171   :  { %5441 = vmatpush3.bf16.msra.mxu1 %v5920_v44 }
 0x172   :  { %5442 = vmatprep.subr.bf16.mxu1 %v5923_v47 }
 0x173   :  { %5419 = vmatpush3.bf16.msra.mxu0 %v5918_v42 }
 0x174   :  { %5420 = vmatprep.subr.bf16.mxu0 %v5921_v45 }
 0x175   :  { %v5120_v16 = vpop.f32.mrb[16].mxu0  ;;  %5443 = vmatpush3.bf16.msra.mxu1 %v5924_v48 }
 0x176   :  { %v5121_v18 = vpop.f32.mrb[17].mxu0  ;;  %5444 = vmatprep.subr.bf16.mxu1 %v5927_v51 }
 0x177   :  { %v5122_v20 = vadd.f32 %v5121_v18, %v5120_v16  ;;  %v5123_v21 = vpop.f32.mrb[18].mxu0  ;;  %v5142_v26 = vpop.f32.mrb[16].mxu1  ;;  %5421 = vmatpush3.bf16.msra.mxu0 %v5922_v46 }
 0x178   :  { %v5124_v23 = vpop.f32.mrb[19].mxu0  ;;  %v5143_v29 = vpop.f32.mrb[17].mxu1  ;;  %5422 = vmatprep.subr.bf16.mxu0 %v5925_v49 }
 0x179   :  { %v3817_v25 = vadd.f32 %v5122_v20, %v7105_v50  ;;  %v5125_v27 = vadd.f32 %v5124_v23, %v5123_v21  ;;  %v5144_v32 = vadd.f32 %v5143_v29, %v5142_v26  ;;  %v5145_v33 = vpop.f32.mrb[18].mxu1  ;;  %v5926_v50 = vld [vmem:[%s7330_s1 + $0xb28] sm:$0xff]   ;;  %5445 = vmatpush3.bf16.msra.mxu1 %v5928_v52  ;;  %v5946_v20 = vld [vmem:[%s7330_s1 + $0xc18] sm:$0xff]   ;;  %v5951_v26 = vld [vmem:[%s7331_s0 + $0xc0] ss:$196 sps:$4 sm:$0xff]  }
 0x17a   :  { %v5146_v35 = vpop.f32.mrb[19].mxu1  ;;  %5446 = vmatprep.subr.bf16.mxu1 %v5931_v55  ;;  %v5948_v23 = vld [vmem:[%s7330_s1 + $0xc28] sm:$0xff]  }
 0x17b   :  { %v3820_v31 = vadd.f32 %v5125_v27, %v7113_v54  ;;  %v7216_v37 = vadd.f32 %v5144_v32, %v3817_v25  ;;  %v5147_v38 = vadd.f32 %v5146_v35, %v5145_v33  ;;  %5423 = vmatpush3.bf16.msra.mxu0 %v5926_v50  ;;  %v5930_v54 = vld [vmem:[%s7330_s1 + $0xb30] sm:$0xff]   ;;  %v5950_v25 = vld [vmem:[%s7330_s1 + $0xc38] sm:$0xff]  }
 0x17c   :  { %5424 = vmatprep.subr.bf16.mxu0 %v5929_v53 }
 0x17d   :  { %v7224_v41 = vadd.f32 %v5147_v38, %v3820_v31  ;;  %5447 = vmatpush3.bf16.msra.mxu1 %v5932_v56 }
 0x17e   :  { %5448 = vmatprep.subr.bf16.mxu1 %v5935_v59 }
 0x17f   :  { %5425 = vmatpush3.bf16.msra.mxu0 %v5930_v54 }
 0x180   :  { %5426 = vmatprep.subr.bf16.mxu0 %v5933_v57 }
 0x181   :  { %5449 = vmatpush3.bf16.msra.mxu1 %v5939_v62 }
 0x183   :  { %5427 = vmatpush3.bf16.msra.mxu0 %v5934_v58 }
 0x184   :  { %5465 = vmatprep.subr.bf16.mxu0 %v5952_v63  ;;  %4430 = vmatmul.mubr.bf16.vlgmr.msra.gmra.mrb[44].mxu1 %v5940_v0 }
 0x186   :  { %4389 = vmatmul.mubr.bf16.vlgmr.msra.gmra.mrb[44].mxu0 %v5936_v60 }
 0x187   :  { %5481 = vmatprep.mubr.msk.bf16.mxu0 %vm5953_vm0, %v5952_v63  ;;  %5466 = vmatpush3.bf16.msra.mxu0 %v5943_v2 }
 0x188   :  { %5467 = vmatprep.subr.bf16.mxu0 %v5952_v63 }
 0x18b   :  { %5468 = vmatpush3.bf16.msra.mxu0 %v5944_v3 }
 0x18c   :  { %5469 = vmatprep.subr.bf16.mxu0 %v5952_v63 }
 0x18f   :  { %5470 = vmatpush3.bf16.msra.mxu0 %v5945_v10 }
 0x190   :  { %5471 = vmatprep.subr.bf16.mxu0 %v5952_v63 }
 0x193   :  { %5472 = vmatpush3.bf16.msra.mxu0 %v5946_v20 }
 0x194   :  { %5473 = vmatprep.subr.bf16.mxu0 %v5952_v63 }
 0x195   :  { %v5164_v4 = vpop.f32.mrb[20].mxu0 }
 0x196   :  { %v5165_v5 = vpop.f32.mrb[21].mxu0 }
 0x197   :  { %v5166_v6 = vadd.f32 %v5165_v5, %v5164_v4  ;;  %v5167_v7 = vpop.f32.mrb[22].mxu0  ;;  %v5186_v8 = vpop.f32.mrb[20].mxu1  ;;  %5474 = vmatpush3.bf16.msra.mxu0 %v5947_v22 }
 0x198   :  { %v5168_v9 = vpop.f32.mrb[23].mxu0  ;;  %v5187_v13 = vpop.f32.mrb[21].mxu1  ;;  %5475 = vmatprep.subr.bf16.mxu0 %v5952_v63 }
 0x199   :  { %v3899_v11 = vadd.f32 %v5166_v6, %v7216_v37  ;;  %v5169_v12 = vadd.f32 %v5168_v9, %v5167_v7  ;;  %v5188_v14 = vadd.f32 %v5187_v13, %v5186_v8  ;;  %v5189_v15 = vpop.f32.mrb[22].mxu1 }
 0x19a   :  { %v5190_v17 = vpop.f32.mrb[23].mxu1 }
 0x19b   :  { %v3902_v16 = vadd.f32 %v5169_v12, %v7224_v41  ;;  %v3940_v18 = vadd.f32 %v5188_v14, %v3899_v11  ;;  %v5191_v19 = vadd.f32 %v5190_v17, %v5189_v15  ;;  %5476 = vmatpush3.bf16.msra.mxu0 %v5948_v23 }
 0x19c   :  { %5477 = vmatprep.subr.bf16.mxu0 %v5952_v63 }
 0x19d   :  { %v3943_v21 = vadd.f32 %v5191_v19, %v3902_v16 }
 0x19f   :  { %5478 = vmatpush3.bf16.msra.mxu0 %v5949_v24 }
 0x1a0   :  { %5479 = vmatprep.subr.bf16.mxu0 %v5952_v63 }
 0x1a3   :  { %5480 = vmatpush3.bf16.msra.mxu0 %v5950_v25 }
 0x1a6   :  { %5482 = vmatmul.mubr.bf16.vlgmr.msra.gmra.mrb[48].mxu0 %v5951_v26 }
 0x1b5   :  { %v5208_v27 = vpop.f32.mrb[24].mxu0 }
 0x1b6   :  { %v5209_v28 = vpop.f32.mrb[25].mxu0 }
 0x1b7   :  { %v5210_v29 = vadd.f32 %v5209_v28, %v5208_v27  ;;  %v5211_v30 = vpop.f32.mrb[26].mxu0  ;;  %v5230_v31 = vpop.f32.mrb[24].mxu1 }
 0x1b8   :  { %v5212_v32 = vpop.f32.mrb[27].mxu0  ;;  %v5231_v35 = vpop.f32.mrb[25].mxu1 }
 0x1b9   :  { %v3981_v33 = vadd.f32 %v5210_v29, %v3940_v18  ;;  %v5213_v34 = vadd.f32 %v5212_v32, %v5211_v30  ;;  %v5232_v36 = vadd.f32 %v5231_v35, %v5230_v31  ;;  %v5233_v37 = vpop.f32.mrb[26].mxu1 }
 0x1ba   :  { %v5234_v39 = vpop.f32.mrb[27].mxu1 }
 0x1bb   :  { %v3984_v38 = vadd.f32 %v5213_v34, %v3943_v21  ;;  %v4022_v40 = vadd.f32 %v5232_v36, %v3981_v33  ;;  %v5235_v41 = vadd.f32 %v5234_v39, %v5233_v37 }
 0x1bd   :  { %v4025_v42 = vadd.f32 %v5235_v41, %v3984_v38 }
 0x1d5   :  { %v5252_v43 = vpop.f32.mrb[28].mxu0 }
 0x1d6   :  { %v5253_v44 = vpop.f32.mrb[29].mxu0 }
 0x1d7   :  { %v5254_v45 = vadd.f32 %v5253_v44, %v5252_v43  ;;  %v5255_v46 = vpop.f32.mrb[30].mxu0  ;;  %v5274_v47 = vpop.f32.mrb[28].mxu1 }
 0x1d8   :  { %v5256_v48 = vpop.f32.mrb[31].mxu0  ;;  %v5275_v51 = vpop.f32.mrb[29].mxu1 }
 0x1d9   :  { %v4063_v49 = vadd.f32 %v5254_v45, %v4022_v40  ;;  %v5257_v50 = vadd.f32 %v5256_v48, %v5255_v46  ;;  %v5276_v52 = vadd.f32 %v5275_v51, %v5274_v47  ;;  %v5277_v53 = vpop.f32.mrb[30].mxu1 }
 0x1da   :  { %v5278_v55 = vpop.f32.mrb[31].mxu1 }
 0x1db   :  { %v4066_v54 = vadd.f32 %v5257_v50, %v4025_v42  ;;  %v4104_v56 = vadd.f32 %v5276_v52, %v4063_v49  ;;  %v5279_v57 = vadd.f32 %v5278_v55, %v5277_v53 }
 0x1dd   :  { %v4107_v58 = vadd.f32 %v5279_v57, %v4066_v54 }
 0x1f5   :  { %v5296_v59 = vpop.f32.mrb[32].mxu0 }
 0x1f6   :  { %v5297_v60 = vpop.f32.mrb[33].mxu0 }
 0x1f7   :  { %v5298_v61 = vadd.f32 %v5297_v60, %v5296_v59  ;;  %v5299_v62 = vpop.f32.mrb[34].mxu0  ;;  %v5318_v1 = vpop.f32.mrb[32].mxu1 }
 0x1f8   :  { %v5300_v63 = vpop.f32.mrb[35].mxu0  ;;  %v5319_v3 = vpop.f32.mrb[33].mxu1 }
 0x1f9   :  { %v4145_v0 = vadd.f32 %v5298_v61, %v4104_v56  ;;  %v5301_v2 = vadd.f32 %v5300_v63, %v5299_v62  ;;  %v5320_v5 = vadd.f32 %v5319_v3, %v5318_v1  ;;  %v5321_v6 = vpop.f32.mrb[34].mxu1 }
 0x1fa   :  { %v5322_v7 = vpop.f32.mrb[35].mxu1 }
 0x1fb   :  { %v4148_v4 = vadd.f32 %v5301_v2, %v4107_v58  ;;  %v4186_v8 = vadd.f32 %v5320_v5, %v4145_v0  ;;  %v5323_v9 = vadd.f32 %v5322_v7, %v5321_v6 }
 0x1fd   :  { %v4189_v10 = vadd.f32 %v5323_v9, %v4148_v4 }
 0x217   :  { %v5362_v15 = vpop.f32.mrb[36].mxu1 }
 0x218   :  { %v5363_v19 = vpop.f32.mrb[37].mxu1 }
 0x219   :  { %v5340_v11 = vpop.f32.mrb[36].mxu0  ;;  %v5364_v20 = vadd.f32 %v5363_v19, %v5362_v15  ;;  %v5365_v21 = vpop.f32.mrb[38].mxu1 }
 0x21a   :  { %v5341_v12 = vpop.f32.mrb[37].mxu0  ;;  %v5366_v23 = vpop.f32.mrb[39].mxu1 }
 0x21b   :  { %v5342_v13 = vadd.f32 %v5341_v12, %v5340_v11  ;;  %v5343_v14 = vpop.f32.mrb[38].mxu0  ;;  %v5367_v25 = vadd.f32 %v5366_v23, %v5365_v21 }
 0x21c   :  { %v5344_v16 = vpop.f32.mrb[39].mxu0 }
 0x21d   :  { %v4227_v17 = vadd.f32 %v5342_v13, %v4186_v8  ;;  %v5345_v18 = vadd.f32 %v5344_v16, %v5343_v14 }
 0x21f   :  { %v4230_v22 = vadd.f32 %v5345_v18, %v4189_v10  ;;  %v4268_v24 = vadd.f32 %v5364_v20, %v4227_v17 }
 0x221   :  { %v4271_v26 = vadd.f32 %v5367_v25, %v4230_v22 }
 0x237   :  { %v5406_v31 = vpop.f32.mrb[40].mxu1 }
 0x238   :  { %v5407_v35 = vpop.f32.mrb[41].mxu1 }
 0x239   :  { %v5384_v27 = vpop.f32.mrb[40].mxu0  ;;  %v5408_v36 = vadd.f32 %v5407_v35, %v5406_v31  ;;  %v5409_v37 = vpop.f32.mrb[42].mxu1 }
 0x23a   :  { %v5385_v28 = vpop.f32.mrb[41].mxu0  ;;  %v5410_v39 = vpop.f32.mrb[43].mxu1 }
 0x23b   :  { %v5386_v29 = vadd.f32 %v5385_v28, %v5384_v27  ;;  %v5387_v30 = vpop.f32.mrb[42].mxu0  ;;  %v5411_v41 = vadd.f32 %v5410_v39, %v5409_v37 }
 0x23c   :  { %v5388_v32 = vpop.f32.mrb[43].mxu0 }
 0x23d   :  { %v4309_v33 = vadd.f32 %v5386_v29, %v4268_v24  ;;  %v5389_v34 = vadd.f32 %v5388_v32, %v5387_v30 }
 0x23f   :  { %v4312_v38 = vadd.f32 %v5389_v34, %v4271_v26  ;;  %v4350_v40 = vadd.f32 %v5408_v36, %v4309_v33 }
 0x241   :  { %v4353_v42 = vadd.f32 %v5411_v41, %v4312_v38 }
 0x257   :  { %v5450_v47 = vpop.f32.mrb[44].mxu1 }
 0x258   :  { %v5451_v51 = vpop.f32.mrb[45].mxu1 }
 0x259   :  { %v5428_v43 = vpop.f32.mrb[44].mxu0  ;;  %v5452_v52 = vadd.f32 %v5451_v51, %v5450_v47  ;;  %v5453_v53 = vpop.f32.mrb[46].mxu1 }
 0x25a   :  { %v5429_v44 = vpop.f32.mrb[45].mxu0  ;;  %v5454_v55 = vpop.f32.mrb[47].mxu1 }
 0x25b   :  { %v5430_v45 = vadd.f32 %v5429_v44, %v5428_v43  ;;  %v5431_v46 = vpop.f32.mrb[46].mxu0  ;;  %v5455_v56 = vadd.f32 %v5454_v55, %v5453_v53 }
 0x25c   :  { %v5432_v48 = vpop.f32.mrb[47].mxu0 }
 0x25d   :  { %v4391_v49 = vadd.f32 %v5430_v45, %v4350_v40  ;;  %v5433_v50 = vadd.f32 %v5432_v48, %v5431_v46 }
 0x25f   :  { %v4394_v54 = vadd.f32 %v5433_v50, %v4353_v42  ;;  %v4432_v57 = vadd.f32 %v5452_v52, %v4391_v49 }
 0x261   :  { %v4435_v58 = vadd.f32 %v5455_v56, %v4394_v54 }
 0x279   :  { %v4472_v59 = vpop.f32.mrb[48].mxu0 }
 0x27a   :  { %v4473_v60 = vadd.f32 %v4472_v59, %v4432_v57  ;;  %v5483_v61 = vpop.f32.mrb[49].mxu0 }
 0x27b   :  { %v4475_v62 = vpop.f32.mrb[50].mxu0 }
 0x27c   :  { %4480 = vst.msk [vmem:[%s7333_s3] sm:$0xff] %vm4479_vm1, %v4473_v60  ;;  %v4476_v63 = vadd.f32 %v4475_v62, %v4435_v58  ;;  %v5484_v0 = vpop.f32.mrb[51].mxu0 }
 0x27e   :  { %4481 = vst.msk [vmem:[%s7333_s3 + $0x8] sm:$0xff] %vm4479_vm1, %v4476_v63 }

// kernel: autoencoder_forward.9
= control target key start
LH: loop header
LB: loop body
LE: loop exit
PB: predicated region body
PF: predicated region fallthrough
CT: control target
= control target key end

     0   :  { %vm532_vm0 = vcmask 1044480   ;;  %v2040_v1 = vmov 0   ;;  %vm528_vm1 = vcmask 80896   ;;  %vm2042_vm2 = vmmov 0   ;;  %s2717_s1 = inlined_call_operand.vmem [shape: bf16[10,6272], index: 1, kind: input, shape index: {}]   ;;  %s2718_s0 = inlined_call_operand.vmem [shape: bf16[16,10], index: 0, kind: input, shape index: {}]   ;;  %s2719_s2 = inlined_call_operand.vmem [shape: f32[1,6272], index: 2, kind: input, shape index: {}]   ;;  %s2720_s3 = inlined_call_operand.vmem [shape: f32[16,6272], index: 3, kind: output, shape index: {}]  }
   0x1   :  { %v1966_v0 = vld [vmem:[%s2717_s1 + $0x4] ss:$196 sps:$4 sm:$0x1f]   ;;  %712 = vmatprep.mubr.bf16.mxu0 %v2040_v1  ;;  %755 = vmatprep.mubr.bf16.mxu1 %v2040_v1  ;;  %v1970_v5 = vld [vmem:[%s2717_s1 + $0x14] ss:$196 sps:$4 sm:$0x1f]  }
   0x2   :  { %v1968_v2 = vld [vmem:[%s2717_s1] ss:$196 sps:$4 sm:$0x1f]   ;;  %1906 = vmatprep.subr.msk.bf16.mxu0 %vm532_vm0, %v1966_v0  ;;  %v1972_v6 = vld [vmem:[%s2717_s1 + $0xc] ss:$196 sps:$4 sm:$0x1f]  }
   0x3   :  { %v2074_v3 = vld [vmem:[%s2718_s0] sm:$0xff]   ;;  %v534_v4 = vsel %vm532_vm0, %v1968_v2, 0  ;;  %v1974_v7 = vld [vmem:[%s2717_s1 + $0x10] ss:$196 sps:$4 sm:$0x1f]   ;;  %1908 = vmatprep.subr.msk.bf16.mxu1 %vm532_vm0, %v1972_v6 }
   0x4   :  { %681 = vmatpush1.bf16.msra.mxu0 %v534_v4  ;;  %v1975_v8 = vld [vmem:[%s2717_s1 + $0x8] ss:$196 sps:$4 sm:$0x1f]   ;;  %v1976_v9 = vld [vmem:[%s2717_s1 + $0x1c] ss:$196 sps:$4 sm:$0x1f]  }
   0x5   :  { %1910 = vmatprep.subr.msk.bf16.mxu0 %vm532_vm0, %v1970_v5  ;;  %v546_v10 = vsel %vm532_vm0, %v1974_v7, 0  ;;  %v540_v11 = vsel %vm532_vm0, %v1975_v8, 0  ;;  %v1978_v12 = vld [vmem:[%s2717_s1 + $0x18] ss:$196 sps:$4 sm:$0x1f]  }
   0x6   :  { %724 = vmatpush1.bf16.msra.mxu1 %v540_v11  ;;  %v1979_v13 = vld [vmem:[%s2717_s1 + $0x24] ss:$196 sps:$4 sm:$0x1f]   ;;  %v552_v14 = vsel %vm532_vm0, %v1978_v12, 0  ;;  %v2041_v12 = vmov 0.0  }
   0x7   :  { %1907 = vmatmul.mubr.msk.bf16.vlgmr.msra.gmra.mrb[0].mxu0 %vm528_vm1, %v2074_v3  ;;  %1912 = vmatprep.subr.msk.bf16.mxu1 %vm532_vm0, %v1976_v9  ;;  %v1981_v15 = vld [vmem:[%s2717_s1 + $0x20] ss:$196 sps:$4 sm:$0x1f]   ;;  %v1982_v16 = vld [vmem:[%s2717_s1 + $0x2c] ss:$196 sps:$4 sm:$0x1f]  }
   0x8   :  { %767 = vmatpush1.bf16.msra.mxu0 %v546_v10  ;;  %798 = vmatprep.mubr.bf16.mxu0 %v2040_v1  ;;  %v1984_v17 = vld [vmem:[%s2717_s1 + $0x28] ss:$196 sps:$4 sm:$0x1f]   ;;  %v558_v18 = vsel %vm532_vm0, %v1981_v15, 0  ;;  %v81_v15 = vlaneseq }
   0x9   :  { %1914 = vmatprep.subr.msk.bf16.mxu0 %vm532_vm0, %v1979_v13  ;;  %1909 = vmatmul.mubr.msk.bf16.vlgmr.msra.gmra.mrb[0].mxu1 %vm528_vm1, %v2074_v3  ;;  %v1985_v19 = vld [vmem:[%s2717_s1 + $0x34] ss:$196 sps:$4 sm:$0x1f]   ;;  %v564_v20 = vsel %vm532_vm0, %v1984_v17, 0 }
   0xa   :  { %810 = vmatpush1.bf16.msra.mxu1 %v552_v14  ;;  %841 = vmatprep.mubr.bf16.mxu1 %v2040_v1  ;;  %v1987_v21 = vld [vmem:[%s2717_s1 + $0x30] ss:$196 sps:$4 sm:$0x1f]   ;;  %v1988_v22 = vld [vmem:[%s2717_s1 + $0x3c] ss:$196 sps:$4 sm:$0x1f]  }
   0xb   :  { %1916 = vmatprep.subr.msk.bf16.mxu1 %vm532_vm0, %v1982_v16  ;;  %v1990_v23 = vld [vmem:[%s2717_s1 + $0x38] ss:$196 sps:$4 sm:$0x1f]   ;;  %v570_v24 = vsel %vm532_vm0, %v1987_v21, 0  ;;  %v82_v16 = vshrl.u32 %v81_v15, 7 }
   0xc   :  { %v1991_v25 = vld [vmem:[%s2717_s1 + $0x44] ss:$196 sps:$4 sm:$0x1f]   ;;  %v576_v26 = vsel %vm532_vm0, %v1990_v23, 0 }
   0xd   :  { %v1993_v27 = vld [vmem:[%s2717_s1 + $0x40] ss:$196 sps:$4 sm:$0x1f]   ;;  %v1994_v28 = vld [vmem:[%s2717_s1 + $0x4c] ss:$196 sps:$4 sm:$0x1f]  }
   0xe   :  { %v1996_v29 = vld [vmem:[%s2717_s1 + $0x48] ss:$196 sps:$4 sm:$0x1f]   ;;  %v582_v30 = vsel %vm532_vm0, %v1993_v27, 0  ;;  %v2338_v17 = vsub.s32 0, %v82_v16 }
   0xf   :  { %1911 = vmatmul.mubr.msk.bf16.vlgmr.msra.gmra.mrb[4].mxu0 %vm528_vm1, %v2074_v3  ;;  %v1997_v31 = vld [vmem:[%s2717_s1 + $0x54] ss:$196 sps:$4 sm:$0x1f]   ;;  %v588_v32 = vsel %vm532_vm0, %v1996_v29, 0 }
  0x10   :  { %853 = vmatpush1.bf16.msra.mxu0 %v558_v18  ;;  %884 = vmatprep.mubr.bf16.mxu0 %v2040_v1  ;;  %v1999_v33 = vld [vmem:[%s2717_s1 + $0x50] ss:$196 sps:$4 sm:$0x1f]   ;;  %v2000_v34 = vld [vmem:[%s2717_s1 + $0x5c] ss:$196 sps:$4 sm:$0x1f]  }
  0x11   :  { %1918 = vmatprep.subr.msk.bf16.mxu0 %vm532_vm0, %v1985_v19  ;;  %1913 = vmatmul.mubr.msk.bf16.vlgmr.msra.gmra.mrb[4].mxu1 %vm528_vm1, %v2074_v3  ;;  %v2002_v35 = vld [vmem:[%s2717_s1 + $0x58] ss:$196 sps:$4 sm:$0x1f]   ;;  %v594_v36 = vsel %vm532_vm0, %v1999_v33, 0  ;;  %v2343_v18 = vsub.s32 1, %v82_v16 }
  0x12   :  { %896 = vmatpush1.bf16.msra.mxu1 %v564_v20  ;;  %927 = vmatprep.mubr.bf16.mxu1 %v2040_v1  ;;  %v2003_v37 = vld [vmem:[%s2717_s1 + $0x64] ss:$196 sps:$4 sm:$0x1f]   ;;  %v2006_v39 = vld [vmem:[%s2717_s1 + $0x6c] ss:$196 sps:$4 sm:$0x1f]  }
  0x13   :  { %1920 = vmatprep.subr.msk.bf16.mxu1 %vm532_vm0, %v1988_v22  ;;  %v2005_v38 = vld [vmem:[%s2717_s1 + $0x60] ss:$196 sps:$4 sm:$0x1f]   ;;  %v600_v40 = vsel %vm532_vm0, %v2002_v35, 0  ;;  %v2346_v20 = vsub.s32 2, %v82_v16  ;;  %v2349_v22 = vsub.s32 3, %v82_v16 }
  0x14   :  { %v606_v41 = vsel %vm532_vm0, %v2005_v38, 0  ;;  %v2008_v42 = vld [vmem:[%s2717_s1 + $0x68] ss:$196 sps:$4 sm:$0x1f]   ;;  %v2367_v38 = vsub.s32 6, %v82_v16 }
  0x15   :  { %v2009_v43 = vld [vmem:[%s2717_s1 + $0x74] ss:$196 sps:$4 sm:$0x1f]   ;;  %v612_v45 = vsel %vm532_vm0, %v2008_v42, 0  ;;  %v2373_v42 = vsub.s32 7, %v82_v16 }
  0x16   :  { %v2011_v44 = vld [vmem:[%s2717_s1 + $0x70] ss:$196 sps:$4 sm:$0x1f]   ;;  %v2012_v46 = vld [vmem:[%s2717_s1 + $0x7c] ss:$196 sps:$4 sm:$0x1f]  }
  0x17   :  { %1915 = vmatmul.mubr.msk.bf16.vlgmr.msra.gmra.mrb[8].mxu0 %vm528_vm1, %v2074_v3  ;;  %v2014_v47 = vld [vmem:[%s2717_s1 + $0x78] ss:$196 sps:$4 sm:$0x1f]   ;;  %v618_v48 = vsel %vm532_vm0, %v2011_v44, 0 }
  0x18   :  { %939 = vmatpush1.bf16.msra.mxu0 %v570_v24  ;;  %970 = vmatprep.mubr.bf16.mxu0 %v2040_v1  ;;  %v2015_v49 = vld [vmem:[%s2717_s1 + $0x84] ss:$196 sps:$4 sm:$0x1f]   ;;  %v624_v50 = vsel %vm532_vm0, %v2014_v47, 0 }
  0x19   :  { %1922 = vmatprep.subr.msk.bf16.mxu0 %vm532_vm0, %v1991_v25  ;;  %1917 = vmatmul.mubr.msk.bf16.vlgmr.msra.gmra.mrb[8].mxu1 %vm528_vm1, %v2074_v3  ;;  %v2017_v51 = vld [vmem:[%s2717_s1 + $0x80] ss:$196 sps:$4 sm:$0x1f]   ;;  %v2018_v52 = vld [vmem:[%s2717_s1 + $0x8c] ss:$196 sps:$4 sm:$0x1f]  }
  0x1a   :  { %982 = vmatpush1.bf16.msra.mxu1 %v576_v26  ;;  %1013 = vmatprep.mubr.bf16.mxu1 %v2040_v1  ;;  %v2020_v53 = vld [vmem:[%s2717_s1 + $0x88] ss:$196 sps:$4 sm:$0x1f]   ;;  %v630_v54 = vsel %vm532_vm0, %v2017_v51, 0  ;;  %v2352_v26 = vsub.s32 4, %v82_v16 }
  0x1b   :  { %1924 = vmatprep.subr.msk.bf16.mxu1 %vm532_vm0, %v1994_v28  ;;  %v2021_v55 = vld [vmem:[%s2717_s1 + $0x94] ss:$196 sps:$4 sm:$0x1f]   ;;  %v636_v57 = vsel %vm532_vm0, %v2020_v53, 0  ;;  %v68_v53 = vld [vmem:[%s2719_s2 + $0x8] sm:$0xff] }
  0x1c   :  { %v2023_v56 = vld [vmem:[%s2717_s1 + $0x90] ss:$196 sps:$4 sm:$0x1f]   ;;  %v2024_v58 = vld [vmem:[%s2717_s1 + $0x9c] ss:$196 sps:$4 sm:$0x1f]  }
  0x1d   :  { %v642_v59 = vsel %vm532_vm0, %v2023_v56, 0  ;;  %v2026_v60 = vld [vmem:[%s2717_s1 + $0x98] ss:$196 sps:$4 sm:$0x1f]  }
  0x1e   :  { %v2027_v61 = vld [vmem:[%s2717_s1 + $0xa4] ss:$196 sps:$4 sm:$0x1f]   ;;  %v648_v63 = vsel %vm532_vm0, %v2026_v60, 0  ;;  %v116_v60 = vrot.slane %v68_v53, %v2338_v17 }
  0x1f   :  { %1919 = vmatmul.mubr.msk.bf16.vlgmr.msra.gmra.mrb[12].mxu0 %vm528_vm1, %v2074_v3  ;;  %v2029_v62 = vld [vmem:[%s2717_s1 + $0xa0] ss:$196 sps:$4 sm:$0x1f]   ;;  %v2030_v0 = vld [vmem:[%s2717_s1 + $0xac] ss:$196 sps:$4 sm:$0x1f]  }
  0x20   :  { %1025 = vmatpush1.bf16.msra.mxu0 %v582_v30  ;;  %1056 = vmatprep.mubr.bf16.mxu0 %v2040_v1  ;;  %v2032_v2 = vld [vmem:[%s2717_s1 + $0xa8] ss:$196 sps:$4 sm:$0x1f]   ;;  %v654_v4 = vsel %vm532_vm0, %v2029_v62, 0  ;;  %v2355_v30 = vsub.s32 5, %v82_v16 }
  0x21   :  { %1926 = vmatprep.subr.msk.bf16.mxu0 %vm532_vm0, %v1997_v31  ;;  %1921 = vmatmul.mubr.msk.bf16.vlgmr.msra.gmra.mrb[12].mxu1 %vm528_vm1, %v2074_v3  ;;  %v2033_v5 = vld [vmem:[%s2717_s1 + $0xb4] ss:$196 sps:$4 sm:$0x1f]   ;;  %v660_v6 = vsel %vm532_vm0, %v2032_v2, 0 }
  0x22   :  { %1068 = vmatpush1.bf16.msra.mxu1 %v588_v32  ;;  %1099 = vmatprep.mubr.bf16.mxu1 %v2040_v1  ;;  %v2035_v7 = vld [vmem:[%s2717_s1 + $0xb0] ss:$196 sps:$4 sm:$0x1f]   ;;  %v2036_v8 = vld [vmem:[%s2717_s1 + $0xbc] ss:$196 sps:$4 sm:$0x1f]  }
  0x23   :  { %1928 = vmatprep.subr.msk.bf16.mxu1 %vm532_vm0, %v2000_v34  ;;  %v666_v9 = vsel %vm532_vm0, %v2035_v7, 0  ;;  %v2038_v10 = vld [vmem:[%s2717_s1 + $0xb8] ss:$196 sps:$4 sm:$0x1f]  }
  0x24   :  { %v672_v11 = vsel %vm532_vm0, %v2038_v10, 0  ;;  %v2039_v13 = vld [vmem:[%s2717_s1 + $0xc0] ss:$196 sps:$4 sm:$0x1f]  }
  0x25   :  { %v678_v14 = vsel %vm532_vm0, %v2039_v13, 0 }
  0x27   :  { %1923 = vmatmul.mubr.msk.bf16.vlgmr.msra.gmra.mrb[16].mxu0 %vm528_vm1, %v2074_v3 }
  0x28   :  { %1111 = vmatpush1.bf16.msra.mxu0 %v594_v36  ;;  %1142 = vmatprep.mubr.bf16.mxu0 %v2040_v1 }
  0x29   :  { %1930 = vmatprep.subr.msk.bf16.mxu0 %vm532_vm0, %v2003_v37  ;;  %1925 = vmatmul.mubr.msk.bf16.vlgmr.msra.gmra.mrb[16].mxu1 %vm528_vm1, %v2074_v3 }
  0x2a   :  { %1154 = vmatpush1.bf16.msra.mxu1 %v600_v40  ;;  %1185 = vmatprep.mubr.bf16.mxu1 %v2040_v1 }
  0x2b   :  { %1932 = vmatprep.subr.msk.bf16.mxu1 %vm532_vm0, %v2006_v39 }
  0x2f   :  { %1927 = vmatmul.mubr.msk.bf16.vlgmr.msra.gmra.mrb[20].mxu0 %vm528_vm1, %v2074_v3 }
  0x30   :  { %1197 = vmatpush1.bf16.msra.mxu0 %v606_v41  ;;  %1228 = vmatprep.mubr.bf16.mxu0 %v2040_v1 }
  0x31   :  { %1934 = vmatprep.subr.msk.bf16.mxu0 %vm532_vm0, %v2009_v43  ;;  %1929 = vmatmul.mubr.msk.bf16.vlgmr.msra.gmra.mrb[20].mxu1 %vm528_vm1, %v2074_v3 }
  0x32   :  { %1240 = vmatpush1.bf16.msra.mxu1 %v612_v45  ;;  %1271 = vmatprep.mubr.bf16.mxu1 %v2040_v1 }
  0x33   :  { %1936 = vmatprep.subr.msk.bf16.mxu1 %vm532_vm0, %v2012_v46 }
  0x37   :  { %1931 = vmatmul.mubr.msk.bf16.vlgmr.msra.gmra.mrb[24].mxu0 %vm528_vm1, %v2074_v3 }
  0x38   :  { %1283 = vmatpush1.bf16.msra.mxu0 %v618_v48  ;;  %1314 = vmatprep.mubr.bf16.mxu0 %v2040_v1 }
  0x39   :  { %1938 = vmatprep.subr.msk.bf16.mxu0 %vm532_vm0, %v2015_v49  ;;  %1933 = vmatmul.mubr.msk.bf16.vlgmr.msra.gmra.mrb[24].mxu1 %vm528_vm1, %v2074_v3 }
  0x3a   :  { %1326 = vmatpush1.bf16.msra.mxu1 %v624_v50  ;;  %1357 = vmatprep.mubr.bf16.mxu1 %v2040_v1 }
  0x3b   :  { %1940 = vmatprep.subr.msk.bf16.mxu1 %vm532_vm0, %v2018_v52 }
  0x3f   :  { %1935 = vmatmul.mubr.msk.bf16.vlgmr.msra.gmra.mrb[28].mxu0 %vm528_vm1, %v2074_v3 }
  0x40   :  { %1369 = vmatpush1.bf16.msra.mxu0 %v630_v54  ;;  %1400 = vmatprep.mubr.bf16.mxu0 %v2040_v1 }
  0x41   :  { %1942 = vmatprep.subr.msk.bf16.mxu0 %vm532_vm0, %v2021_v55  ;;  %1937 = vmatmul.mubr.msk.bf16.vlgmr.msra.gmra.mrb[28].mxu1 %vm528_vm1, %v2074_v3 }
  0x42   :  { %1412 = vmatpush1.bf16.msra.mxu1 %v636_v57  ;;  %1443 = vmatprep.mubr.bf16.mxu1 %v2040_v1 }
  0x43   :  { %1944 = vmatprep.subr.msk.bf16.mxu1 %vm532_vm0, %v2024_v58 }
  0x47   :  { %1939 = vmatmul.mubr.msk.bf16.vlgmr.msra.gmra.mrb[32].mxu0 %vm528_vm1, %v2074_v3 }
  0x48   :  { %1455 = vmatpush1.bf16.msra.mxu0 %v642_v59  ;;  %1486 = vmatprep.mubr.bf16.mxu0 %v2040_v1 }
  0x49   :  { %1946 = vmatprep.subr.msk.bf16.mxu0 %vm532_vm0, %v2027_v61  ;;  %1941 = vmatmul.mubr.msk.bf16.vlgmr.msra.gmra.mrb[32].mxu1 %vm528_vm1, %v2074_v3 }
  0x4a   :  { %1498 = vmatpush1.bf16.msra.mxu1 %v648_v63  ;;  %1529 = vmatprep.mubr.bf16.mxu1 %v2040_v1  ;;  %v120_v63 = vrot.slane %v68_v53, %v2343_v18 }
  0x4b   :  { %1948 = vmatprep.subr.msk.bf16.mxu1 %vm532_vm0, %v2030_v0 }
  0x4f   :  { %1943 = vmatmul.mubr.msk.bf16.vlgmr.msra.gmra.mrb[36].mxu0 %vm528_vm1, %v2074_v3 }
  0x50   :  { %1541 = vmatpush1.bf16.msra.mxu0 %v654_v4  ;;  %1572 = vmatprep.mubr.bf16.mxu0 %v2040_v1 }
  0x51   :  { %1950 = vmatprep.subr.msk.bf16.mxu0 %vm532_vm0, %v2033_v5  ;;  %1945 = vmatmul.mubr.msk.bf16.vlgmr.msra.gmra.mrb[36].mxu1 %vm528_vm1, %v2074_v3 }
  0x52   :  { %1584 = vmatpush1.bf16.msra.mxu1 %v660_v6  ;;  %1615 = vmatprep.mubr.bf16.mxu1 %v2040_v1 }
  0x53   :  { %1952 = vmatprep.subr.msk.bf16.mxu1 %vm532_vm0, %v2036_v8  ;;  %v124_v8 = vrot.slane %v68_v53, %v2346_v20 }
  0x57   :  { %1947 = vmatmul.mubr.msk.bf16.vlgmr.msra.gmra.mrb[40].mxu0 %vm528_vm1, %v2074_v3 }
  0x58   :  { %1627 = vmatpush1.bf16.msra.mxu0 %v666_v9  ;;  %1658 = vmatprep.mubr.bf16.mxu0 %v2040_v1 }
  0x59   :  { %1957 = vmatprep.subr.bf16.mxu0 %v2041_v12  ;;  %1949 = vmatmul.mubr.msk.bf16.vlgmr.msra.gmra.mrb[40].mxu1 %vm528_vm1, %v2074_v3 }
  0x5a   :  { %1670 = vmatpush1.bf16.msra.mxu1 %v672_v11  ;;  %1701 = vmatprep.mubr.bf16.mxu1 %v2040_v1  ;;  %v67_v1 = vld [vmem:[%s2719_s2] sm:$0xff]  ;;  %v128_v11 = vrot.slane %v68_v53, %v2349_v22 }
  0x5b   :  { %v84_v19 = vrot.slane %v67_v1, %v2338_v17  ;;  %v88_v21 = vrot.slane %v67_v1, %v2343_v18  ;;  %v92_v25 = vrot.slane %v67_v1, %v2346_v20  ;;  %v96_v29 = vrot.slane %v67_v1, %v2349_v22 }
  0x5c   :  { %v100_v37 = vrot.slane %v67_v1, %v2352_v26  ;;  %v104_v41 = vrot.slane %v67_v1, %v2355_v30  ;;  %v108_v49 = vrot.slane %v67_v1, %v2367_v38  ;;  %v112_v52 = vrot.slane %v67_v1, %v2373_v42 }
  0x5f   :  { %1951 = vmatmul.mubr.msk.bf16.vlgmr.msra.gmra.mrb[44].mxu0 %vm528_vm1, %v2074_v3 }
  0x60   :  { %1958 = vmatpush3.bf16.msra.mxu0 %v678_v14  ;;  %1959 = vmatprep.mubr.msk.bf16.mxu0 %vm2042_vm2, %v2041_v12 }
  0x61   :  { %1953 = vmatmul.mubr.msk.bf16.vlgmr.msra.gmra.mrb[44].mxu1 %vm528_vm1, %v2074_v3 }
  0x67   :  { %1960 = vmatmul.mubr.msk.bf16.vlgmr.msra.gmra.mrb[48].mxu0 %vm528_vm1, %v2074_v3 }
  0xda   :  { %v714_v23 = vpop.f32.mrb[0].mxu0 }
  0xdb   :  { %v715_v3 = vadd.f32 %v714_v23, %v84_v19  ;;  %v716_v24 = vpop.f32.mrb[1].mxu0 }
  0xdc   :  { %v717_v27 = vadd.f32 %v716_v24, %v88_v21  ;;  %v718_v28 = vpop.f32.mrb[2].mxu0  ;;  %v757_v34 = vpop.f32.mrb[0].mxu1 }
  0xdd   :  { %1753 = vst [vmem:[%s2720_s3] sm:$0xff] %v715_v3  ;;  %v719_v31 = vadd.f32 %v718_v28, %v84_v19  ;;  %v720_v32 = vpop.f32.mrb[3].mxu0  ;;  %v758_v35 = vadd.f32 %v757_v34, %v92_v25  ;;  %v759_v36 = vpop.f32.mrb[1].mxu1  ;;  %v132_v19 = vrot.slane %v68_v53, %v2352_v26  ;;  %v136_v3 = vrot.slane %v68_v53, %v2355_v30 }
  0xde   :  { %1754 = vst [vmem:[%s2720_s3 + $0x8] sm:$0xff] %v717_v27  ;;  %v721_v33 = vadd.f32 %v720_v32, %v88_v21  ;;  %v760_v39 = vadd.f32 %v759_v36, %v96_v29  ;;  %v761_v40 = vpop.f32.mrb[2].mxu1  ;;  %v140_v32 = vrot.slane %v68_v53, %v2367_v38  ;;  %v69_v36 = vld [vmem:[%s2719_s2 + $0x10] sm:$0xff] }
  0xdf   :  { %1802 = vst [vmem:[%s2720_s3 + $0x188] sm:$0xff] %v719_v31  ;;  %1755 = vst [vmem:[%s2720_s3 + $0x10] sm:$0xff] %v758_v35  ;;  %v762_v43 = vadd.f32 %v761_v40, %v92_v25  ;;  %v763_v44 = vpop.f32.mrb[3].mxu1  ;;  %v144_v35 = vrot.slane %v68_v53, %v2373_v42 }
  0xe0   :  { %1803 = vst [vmem:[%s2720_s3 + $0x190] sm:$0xff] %v721_v33  ;;  %1756 = vst [vmem:[%s2720_s3 + $0x18] sm:$0xff] %v760_v39  ;;  %v764_v45 = vadd.f32 %v763_v44, %v96_v29 }
  0xe1   :  { %1804 = vst [vmem:[%s2720_s3 + $0x198] sm:$0xff] %v762_v43 }
  0xe2   :  { %v800_v46 = vpop.f32.mrb[4].mxu0  ;;  %1805 = vst [vmem:[%s2720_s3 + $0x1a0] sm:$0xff] %v764_v45  ;;  %v148_v45 = vrot.slane %v69_v36, %v2338_v17 }
  0xe3   :  { %v801_v47 = vadd.f32 %v800_v46, %v100_v37  ;;  %v802_v48 = vpop.f32.mrb[5].mxu0 }
  0xe4   :  { %v803_v50 = vadd.f32 %v802_v48, %v104_v41  ;;  %v804_v51 = vpop.f32.mrb[6].mxu0  ;;  %v843_v57 = vpop.f32.mrb[4].mxu1  ;;  %v152_v48 = vrot.slane %v69_v36, %v2343_v18 }
  0xe5   :  { %1757 = vst [vmem:[%s2720_s3 + $0x20] sm:$0xff] %v801_v47  ;;  %v805_v54 = vadd.f32 %v804_v51, %v100_v37  ;;  %v806_v55 = vpop.f32.mrb[7].mxu0  ;;  %v844_v58 = vadd.f32 %v843_v57, %v108_v49  ;;  %v845_v59 = vpop.f32.mrb[5].mxu1 }
  0xe6   :  { %1758 = vst [vmem:[%s2720_s3 + $0x28] sm:$0xff] %v803_v50  ;;  %v807_v56 = vadd.f32 %v806_v55, %v104_v41  ;;  %v846_v61 = vadd.f32 %v845_v59, %v112_v52  ;;  %v847_v62 = vpop.f32.mrb[6].mxu1  ;;  %v156_v55 = vrot.slane %v69_v36, %v2346_v20 }
  0xe7   :  { %1806 = vst [vmem:[%s2720_s3 + $0x1a8] sm:$0xff] %v805_v54  ;;  %1759 = vst [vmem:[%s2720_s3 + $0x30] sm:$0xff] %v844_v58  ;;  %v848_v0 = vadd.f32 %v847_v62, %v108_v49  ;;  %v849_v2 = vpop.f32.mrb[7].mxu1  ;;  %v160_v58 = vrot.slane %v69_v36, %v2349_v22 }
  0xe8   :  { %1807 = vst [vmem:[%s2720_s3 + $0x1b0] sm:$0xff] %v807_v56  ;;  %1760 = vst [vmem:[%s2720_s3 + $0x38] sm:$0xff] %v846_v61  ;;  %v850_v4 = vadd.f32 %v849_v2, %v112_v52  ;;  %v164_v2 = vrot.slane %v69_v36, %v2352_v26 }
  0xe9   :  { %1808 = vst [vmem:[%s2720_s3 + $0x1b8] sm:$0xff] %v848_v0 }
  0xea   :  { %v886_v5 = vpop.f32.mrb[8].mxu0  ;;  %1809 = vst [vmem:[%s2720_s3 + $0x1c0] sm:$0xff] %v850_v4 }
  0xeb   :  { %v887_v6 = vadd.f32 %v886_v5, %v116_v60  ;;  %v888_v7 = vpop.f32.mrb[9].mxu0 }
  0xec   :  { %v889_v9 = vadd.f32 %v888_v7, %v120_v63  ;;  %v890_v10 = vpop.f32.mrb[10].mxu0  ;;  %v929_v15 = vpop.f32.mrb[8].mxu1 }
  0xed   :  { %1761 = vst [vmem:[%s2720_s3 + $0x40] sm:$0xff] %v887_v6  ;;  %v891_v12 = vadd.f32 %v890_v10, %v116_v60  ;;  %v892_v13 = vpop.f32.mrb[11].mxu0  ;;  %v930_v16 = vadd.f32 %v929_v15, %v124_v8  ;;  %v931_v1 = vpop.f32.mrb[9].mxu1  ;;  %v168_v6 = vrot.slane %v69_v36, %v2355_v30 }
  0xee   :  { %1762 = vst [vmem:[%s2720_s3 + $0x48] sm:$0xff] %v889_v9  ;;  %v893_v14 = vadd.f32 %v892_v13, %v120_v63  ;;  %v932_v21 = vadd.f32 %v931_v1, %v128_v11  ;;  %v933_v23 = vpop.f32.mrb[10].mxu1  ;;  %v172_v13 = vrot.slane %v69_v36, %v2367_v38  ;;  %v70_v1 = vld [vmem:[%s2719_s2 + $0x18] sm:$0xff] }
  0xef   :  { %1810 = vst [vmem:[%s2720_s3 + $0x1c8] sm:$0xff] %v891_v12  ;;  %1763 = vst [vmem:[%s2720_s3 + $0x50] sm:$0xff] %v930_v16  ;;  %v934_v24 = vadd.f32 %v933_v23, %v124_v8  ;;  %v935_v25 = vpop.f32.mrb[11].mxu1  ;;  %v176_v16 = vrot.slane %v69_v36, %v2373_v42 }
  0xf0   :  { %1811 = vst [vmem:[%s2720_s3 + $0x1d0] sm:$0xff] %v893_v14  ;;  %1764 = vst [vmem:[%s2720_s3 + $0x58] sm:$0xff] %v932_v21  ;;  %v936_v27 = vadd.f32 %v935_v25, %v128_v11 }
  0xf1   :  { %1812 = vst [vmem:[%s2720_s3 + $0x1d8] sm:$0xff] %v934_v24 }
  0xf2   :  { %v972_v28 = vpop.f32.mrb[12].mxu0  ;;  %1813 = vst [vmem:[%s2720_s3 + $0x1e0] sm:$0xff] %v936_v27  ;;  %v180_v27 = vrot.slane %v70_v1, %v2338_v17 }
  0xf3   :  { %v973_v29 = vadd.f32 %v972_v28, %v132_v19  ;;  %v974_v31 = vpop.f32.mrb[13].mxu0 }
  0xf4   :  { %v975_v33 = vadd.f32 %v974_v31, %v136_v3  ;;  %v976_v34 = vpop.f32.mrb[14].mxu0  ;;  %v1015_v41 = vpop.f32.mrb[12].mxu1  ;;  %v184_v31 = vrot.slane %v70_v1, %v2343_v18 }
  0xf5   :  { %1765 = vst [vmem:[%s2720_s3 + $0x60] sm:$0xff] %v973_v29  ;;  %v977_v37 = vadd.f32 %v976_v34, %v132_v19  ;;  %v978_v39 = vpop.f32.mrb[15].mxu0  ;;  %v1016_v43 = vadd.f32 %v1015_v41, %v140_v32  ;;  %v1017_v44 = vpop.f32.mrb[13].mxu1 }
  0xf6   :  { %1766 = vst [vmem:[%s2720_s3 + $0x68] sm:$0xff] %v975_v33  ;;  %v979_v40 = vadd.f32 %v978_v39, %v136_v3  ;;  %v1018_v46 = vadd.f32 %v1017_v44, %v144_v35  ;;  %v1019_v47 = vpop.f32.mrb[14].mxu1  ;;  %v188_v39 = vrot.slane %v70_v1, %v2346_v20 }
  0xf7   :  { %1814 = vst [vmem:[%s2720_s3 + $0x1e8] sm:$0xff] %v977_v37  ;;  %1767 = vst [vmem:[%s2720_s3 + $0x70] sm:$0xff] %v1016_v43  ;;  %v1020_v49 = vadd.f32 %v1019_v47, %v140_v32  ;;  %v1021_v50 = vpop.f32.mrb[15].mxu1  ;;  %v192_v43 = vrot.slane %v70_v1, %v2349_v22 }
  0xf8   :  { %1815 = vst [vmem:[%s2720_s3 + $0x1f0] sm:$0xff] %v979_v40  ;;  %1768 = vst [vmem:[%s2720_s3 + $0x78] sm:$0xff] %v1018_v46  ;;  %v1022_v51 = vadd.f32 %v1021_v50, %v144_v35  ;;  %v196_v50 = vrot.slane %v70_v1, %v2352_v26 }
  0xf9   :  { %1816 = vst [vmem:[%s2720_s3 + $0x1f8] sm:$0xff] %v1020_v49 }
  0xfa   :  { %v1058_v52 = vpop.f32.mrb[16].mxu0  ;;  %1817 = vst [vmem:[%s2720_s3 + $0x200] sm:$0xff] %v1022_v51 }
  0xfb   :  { %v1059_v53 = vadd.f32 %v1058_v52, %v148_v45  ;;  %v1060_v54 = vpop.f32.mrb[17].mxu0 }
  0xfc   :  { %v1061_v56 = vadd.f32 %v1060_v54, %v152_v48  ;;  %v1062_v57 = vpop.f32.mrb[18].mxu0  ;;  %v1101_v62 = vpop.f32.mrb[16].mxu1 }
  0xfd   :  { %1769 = vst [vmem:[%s2720_s3 + $0x80] sm:$0xff] %v1059_v53  ;;  %v1063_v59 = vadd.f32 %v1062_v57, %v148_v45  ;;  %v1064_v60 = vpop.f32.mrb[19].mxu0  ;;  %v1102_v63 = vadd.f32 %v1101_v62, %v156_v55  ;;  %v1103_v0 = vpop.f32.mrb[17].mxu1  ;;  %v200_v53 = vrot.slane %v70_v1, %v2355_v30 }
  0xfe   :  { %1770 = vst [vmem:[%s2720_s3 + $0x88] sm:$0xff] %v1061_v56  ;;  %v1065_v61 = vadd.f32 %v1064_v60, %v152_v48  ;;  %v1104_v4 = vadd.f32 %v1103_v0, %v160_v58  ;;  %v1105_v5 = vpop.f32.mrb[18].mxu1  ;;  %v204_v60 = vrot.slane %v70_v1, %v2367_v38  ;;  %v71_v0 = vld [vmem:[%s2719_s2 + $0x20] sm:$0xff] }
  0xff   :  { %1818 = vst [vmem:[%s2720_s3 + $0x208] sm:$0xff] %v1063_v59  ;;  %1771 = vst [vmem:[%s2720_s3 + $0x90] sm:$0xff] %v1102_v63  ;;  %v1106_v7 = vadd.f32 %v1105_v5, %v156_v55  ;;  %v1107_v8 = vpop.f32.mrb[19].mxu1  ;;  %v208_v63 = vrot.slane %v70_v1, %v2373_v42 }
 0x100   :  { %1819 = vst [vmem:[%s2720_s3 + $0x210] sm:$0xff] %v1065_v61  ;;  %1772 = vst [vmem:[%s2720_s3 + $0x98] sm:$0xff] %v1104_v4  ;;  %v1108_v9 = vadd.f32 %v1107_v8, %v160_v58 }
 0x101   :  { %1820 = vst [vmem:[%s2720_s3 + $0x218] sm:$0xff] %v1106_v7 }
 0x102   :  { %v1144_v10 = vpop.f32.mrb[20].mxu0  ;;  %1821 = vst [vmem:[%s2720_s3 + $0x220] sm:$0xff] %v1108_v9  ;;  %v212_v9 = vrot.slane %v71_v0, %v2338_v17 }
 0x103   :  { %v1145_v11 = vadd.f32 %v1144_v10, %v164_v2  ;;  %v1146_v12 = vpop.f32.mrb[21].mxu0 }
 0x104   :  { %v1147_v14 = vadd.f32 %v1146_v12, %v168_v6  ;;  %v1148_v15 = vpop.f32.mrb[22].mxu0  ;;  %v1187_v3 = vpop.f32.mrb[20].mxu1  ;;  %v216_v12 = vrot.slane %v71_v0, %v2343_v18 }
 0x105   :  { %1773 = vst [vmem:[%s2720_s3 + $0xa0] sm:$0xff] %v1145_v11  ;;  %v1149_v19 = vadd.f32 %v1148_v15, %v164_v2  ;;  %v1150_v21 = vpop.f32.mrb[23].mxu0  ;;  %v1188_v24 = vadd.f32 %v1187_v3, %v172_v13  ;;  %v1189_v25 = vpop.f32.mrb[21].mxu1 }
 0x106   :  { %1774 = vst [vmem:[%s2720_s3 + $0xa8] sm:$0xff] %v1147_v14  ;;  %v1151_v23 = vadd.f32 %v1150_v21, %v168_v6  ;;  %v1190_v28 = vadd.f32 %v1189_v25, %v176_v16  ;;  %v1191_v29 = vpop.f32.mrb[22].mxu1  ;;  %v220_v21 = vrot.slane %v71_v0, %v2346_v20 }
 0x107   :  { %1822 = vst [vmem:[%s2720_s3 + $0x228] sm:$0xff] %v1149_v19  ;;  %1775 = vst [vmem:[%s2720_s3 + $0xb0] sm:$0xff] %v1188_v24  ;;  %v1192_v32 = vadd.f32 %v1191_v29, %v172_v13  ;;  %v1193_v33 = vpop.f32.mrb[23].mxu1  ;;  %v224_v24 = vrot.slane %v71_v0, %v2349_v22 }
 0x108   :  { %1823 = vst [vmem:[%s2720_s3 + $0x230] sm:$0xff] %v1151_v23  ;;  %1776 = vst [vmem:[%s2720_s3 + $0xb8] sm:$0xff] %v1190_v28  ;;  %v1194_v34 = vadd.f32 %v1193_v33, %v176_v16  ;;  %v228_v33 = vrot.slane %v71_v0, %v2352_v26 }
 0x109   :  { %1824 = vst [vmem:[%s2720_s3 + $0x238] sm:$0xff] %v1192_v32 }
 0x10a   :  { %v1230_v35 = vpop.f32.mrb[24].mxu0  ;;  %1825 = vst [vmem:[%s2720_s3 + $0x240] sm:$0xff] %v1194_v34 }
 0x10b   :  { %v1231_v36 = vadd.f32 %v1230_v35, %v180_v27  ;;  %v1232_v37 = vpop.f32.mrb[25].mxu0 }
 0x10c   :  { %v1233_v40 = vadd.f32 %v1232_v37, %v184_v31  ;;  %v1234_v41 = vpop.f32.mrb[26].mxu0  ;;  %v1273_v47 = vpop.f32.mrb[24].mxu1 }
 0x10d   :  { %1777 = vst [vmem:[%s2720_s3 + $0xc0] sm:$0xff] %v1231_v36  ;;  %v1235_v44 = vadd.f32 %v1234_v41, %v180_v27  ;;  %v1236_v45 = vpop.f32.mrb[27].mxu0  ;;  %v1274_v48 = vadd.f32 %v1273_v47, %v188_v39  ;;  %v1275_v49 = vpop.f32.mrb[25].mxu1  ;;  %v232_v36 = vrot.slane %v71_v0, %v2355_v30 }
 0x10e   :  { %1778 = vst [vmem:[%s2720_s3 + $0xc8] sm:$0xff] %v1233_v40  ;;  %v1237_v46 = vadd.f32 %v1236_v45, %v184_v31  ;;  %v1276_v51 = vadd.f32 %v1275_v49, %v192_v43  ;;  %v1277_v52 = vpop.f32.mrb[26].mxu1  ;;  %v236_v45 = vrot.slane %v71_v0, %v2367_v38  ;;  %v72_v49 = vld [vmem:[%s2719_s2 + $0x28] sm:$0xff] }
 0x10f   :  { %1826 = vst [vmem:[%s2720_s3 + $0x248] sm:$0xff] %v1235_v44  ;;  %1779 = vst [vmem:[%s2720_s3 + $0xd0] sm:$0xff] %v1274_v48  ;;  %v1278_v54 = vadd.f32 %v1277_v52, %v188_v39  ;;  %v1279_v55 = vpop.f32.mrb[27].mxu1  ;;  %v240_v48 = vrot.slane %v71_v0, %v2373_v42 }
 0x110   :  { %1827 = vst [vmem:[%s2720_s3 + $0x250] sm:$0xff] %v1237_v46  ;;  %1780 = vst [vmem:[%s2720_s3 + $0xd8] sm:$0xff] %v1276_v51  ;;  %v1280_v56 = vadd.f32 %v1279_v55, %v192_v43 }
 0x111   :  { %1828 = vst [vmem:[%s2720_s3 + $0x258] sm:$0xff] %v1278_v54 }
 0x112   :  { %v1316_v57 = vpop.f32.mrb[28].mxu0  ;;  %1829 = vst [vmem:[%s2720_s3 + $0x260] sm:$0xff] %v1280_v56  ;;  %v244_v56 = vrot.slane %v72_v49, %v2338_v17 }
 0x113   :  { %v1317_v58 = vadd.f32 %v1316_v57, %v196_v50  ;;  %v1318_v59 = vpop.f32.mrb[29].mxu0 }
 0x114   :  { %v1319_v61 = vadd.f32 %v1318_v59, %v200_v53  ;;  %v1320_v62 = vpop.f32.mrb[30].mxu0  ;;  %v1359_v6 = vpop.f32.mrb[28].mxu1  ;;  %v248_v59 = vrot.slane %v72_v49, %v2343_v18  ;;  %v252_v18 = vrot.slane %v72_v49, %v2346_v20 }
 0x115   :  { %1781 = vst [vmem:[%s2720_s3 + $0xe0] sm:$0xff] %v1317_v58  ;;  %v1321_v2 = vadd.f32 %v1320_v62, %v196_v50  ;;  %v1322_v4 = vpop.f32.mrb[31].mxu0  ;;  %v1360_v7 = vadd.f32 %v1359_v6, %v204_v60  ;;  %v1361_v8 = vpop.f32.mrb[29].mxu1 }
 0x116   :  { %1782 = vst [vmem:[%s2720_s3 + $0xe8] sm:$0xff] %v1319_v61  ;;  %v1323_v5 = vadd.f32 %v1322_v4, %v200_v53  ;;  %v1362_v10 = vadd.f32 %v1361_v8, %v208_v63  ;;  %v1363_v11 = vpop.f32.mrb[30].mxu1 }
 0x117   :  { %1830 = vst [vmem:[%s2720_s3 + $0x268] sm:$0xff] %v1321_v2  ;;  %1783 = vst [vmem:[%s2720_s3 + $0xf0] sm:$0xff] %v1360_v7  ;;  %v1364_v13 = vadd.f32 %v1363_v11, %v204_v60  ;;  %v1365_v14 = vpop.f32.mrb[31].mxu1 }
 0x118   :  { %1831 = vst [vmem:[%s2720_s3 + $0x270] sm:$0xff] %v1323_v5  ;;  %1784 = vst [vmem:[%s2720_s3 + $0xf8] sm:$0xff] %v1362_v10  ;;  %v1366_v15 = vadd.f32 %v1365_v14, %v208_v63  ;;  %v256_v5 = vrot.slane %v72_v49, %v2349_v22  ;;  %v260_v22 = vrot.slane %v72_v49, %v2352_v26 }
 0x119   :  { %1832 = vst [vmem:[%s2720_s3 + $0x278] sm:$0xff] %v1364_v13  ;;  %v264_v13 = vrot.slane %v72_v49, %v2355_v30  ;;  %v268_v30 = vrot.slane %v72_v49, %v2367_v38 }
 0x11a   :  { %v1402_v16 = vpop.f32.mrb[32].mxu0  ;;  %1833 = vst [vmem:[%s2720_s3 + $0x280] sm:$0xff] %v1366_v15 }
 0x11b   :  { %v1403_v1 = vadd.f32 %v1402_v16, %v212_v9  ;;  %v1404_v19 = vpop.f32.mrb[33].mxu0 }
 0x11c   :  { %v1405_v23 = vadd.f32 %v1404_v19, %v216_v12  ;;  %v1406_v3 = vpop.f32.mrb[34].mxu0  ;;  %v1445_v29 = vpop.f32.mrb[32].mxu1 }
 0x11d   :  { %1785 = vst [vmem:[%s2720_s3 + $0x100] sm:$0xff] %v1403_v1  ;;  %v1407_v25 = vadd.f32 %v1406_v3, %v212_v9  ;;  %v1408_v27 = vpop.f32.mrb[35].mxu0  ;;  %v1446_v31 = vadd.f32 %v1445_v29, %v220_v21  ;;  %v1447_v32 = vpop.f32.mrb[33].mxu1  ;;  %v272_v3 = vrot.slane %v72_v49, %v2373_v42 }
 0x11e   :  { %1786 = vst [vmem:[%s2720_s3 + $0x108] sm:$0xff] %v1405_v23  ;;  %v1409_v28 = vadd.f32 %v1408_v27, %v216_v12  ;;  %v1448_v34 = vadd.f32 %v1447_v32, %v224_v24  ;;  %v1449_v35 = vpop.f32.mrb[34].mxu1  ;;  %v1855_v32 = vld [vmem:[%s2719_s2 + $0x30] ss:$0 sm:$0xff] }
 0x11f   :  { %1834 = vst [vmem:[%s2720_s3 + $0x288] sm:$0xff] %v1407_v25  ;;  %1787 = vst [vmem:[%s2720_s3 + $0x110] sm:$0xff] %v1446_v31  ;;  %v1450_v37 = vadd.f32 %v1449_v35, %v220_v21  ;;  %v1451_v39 = vpop.f32.mrb[35].mxu1 }
 0x120   :  { %1835 = vst [vmem:[%s2720_s3 + $0x290] sm:$0xff] %v1409_v28  ;;  %1788 = vst [vmem:[%s2720_s3 + $0x118] sm:$0xff] %v1448_v34  ;;  %v1452_v40 = vadd.f32 %v1451_v39, %v224_v24 }
 0x121   :  { %1836 = vst [vmem:[%s2720_s3 + $0x298] sm:$0xff] %v1450_v37 }
 0x122   :  { %v1488_v41 = vpop.f32.mrb[36].mxu0  ;;  %1837 = vst [vmem:[%s2720_s3 + $0x2a0] sm:$0xff] %v1452_v40 }
 0x123   :  { %v1489_v43 = vadd.f32 %v1488_v41, %v228_v33  ;;  %v1490_v44 = vpop.f32.mrb[37].mxu0 }
 0x124   :  { %v1491_v46 = vadd.f32 %v1490_v44, %v232_v36  ;;  %v1492_v47 = vpop.f32.mrb[38].mxu0  ;;  %v1531_v53 = vpop.f32.mrb[36].mxu1 }
 0x125   :  { %1789 = vst [vmem:[%s2720_s3 + $0x120] sm:$0xff] %v1489_v43  ;;  %v1493_v50 = vadd.f32 %v1492_v47, %v228_v33  ;;  %v1494_v51 = vpop.f32.mrb[39].mxu0  ;;  %v1532_v54 = vadd.f32 %v1531_v53, %v236_v45  ;;  %v1533_v55 = vpop.f32.mrb[37].mxu1 }
 0x126   :  { %1790 = vst [vmem:[%s2720_s3 + $0x128] sm:$0xff] %v1491_v46  ;;  %v1495_v52 = vadd.f32 %v1494_v51, %v232_v36  ;;  %v1534_v57 = vadd.f32 %v1533_v55, %v240_v48  ;;  %v1535_v58 = vpop.f32.mrb[38].mxu1 }
 0x127   :  { %1838 = vst [vmem:[%s2720_s3 + $0x2a8] sm:$0xff] %v1493_v50  ;;  %1791 = vst [vmem:[%s2720_s3 + $0x130] sm:$0xff] %v1532_v54  ;;  %v1536_v60 = vadd.f32 %v1535_v58, %v236_v45  ;;  %v1537_v61 = vpop.f32.mrb[39].mxu1 }
 0x128   :  { %1839 = vst [vmem:[%s2720_s3 + $0x2b0] sm:$0xff] %v1495_v52  ;;  %1792 = vst [vmem:[%s2720_s3 + $0x138] sm:$0xff] %v1534_v57  ;;  %v1538_v62 = vadd.f32 %v1537_v61, %v240_v48 }
 0x129   :  { %1840 = vst [vmem:[%s2720_s3 + $0x2b8] sm:$0xff] %v1536_v60 }
 0x12a   :  { %v1574_v17 = vpop.f32.mrb[40].mxu0  ;;  %1841 = vst [vmem:[%s2720_s3 + $0x2c0] sm:$0xff] %v1538_v62 }
 0x12b   :  { %v1575_v63 = vadd.f32 %v1574_v17, %v244_v56  ;;  %v1576_v0 = vpop.f32.mrb[41].mxu0 }
 0x12c   :  { %v1577_v2 = vadd.f32 %v1576_v0, %v248_v59  ;;  %v1578_v4 = vpop.f32.mrb[42].mxu0  ;;  %v1617_v20 = vpop.f32.mrb[40].mxu1 }
 0x12d   :  { %1793 = vst [vmem:[%s2720_s3 + $0x140] sm:$0xff] %v1575_v63  ;;  %v1579_v6 = vadd.f32 %v1578_v4, %v244_v56  ;;  %v1580_v7 = vpop.f32.mrb[43].mxu0  ;;  %v1618_v9 = vadd.f32 %v1617_v20, %v252_v18  ;;  %v1619_v10 = vpop.f32.mrb[41].mxu1 }
 0x12e   :  { %1794 = vst [vmem:[%s2720_s3 + $0x148] sm:$0xff] %v1577_v2  ;;  %v1581_v8 = vadd.f32 %v1580_v7, %v248_v59  ;;  %v1620_v11 = vadd.f32 %v1619_v10, %v256_v5  ;;  %v1621_v12 = vpop.f32.mrb[42].mxu1 }
 0x12f   :  { %1842 = vst [vmem:[%s2720_s3 + $0x2c8] sm:$0xff] %v1579_v6  ;;  %1795 = vst [vmem:[%s2720_s3 + $0x150] sm:$0xff] %v1618_v9  ;;  %v1622_v14 = vadd.f32 %v1621_v12, %v252_v18  ;;  %v1623_v15 = vpop.f32.mrb[43].mxu1 }
 0x130   :  { %1843 = vst [vmem:[%s2720_s3 + $0x2d0] sm:$0xff] %v1581_v8  ;;  %1796 = vst [vmem:[%s2720_s3 + $0x158] sm:$0xff] %v1620_v11  ;;  %v1624_v16 = vadd.f32 %v1623_v15, %v256_v5 }
 0x131   :  { %1844 = vst [vmem:[%s2720_s3 + $0x2d8] sm:$0xff] %v1622_v14 }
 0x132   :  { %v1660_v26 = vpop.f32.mrb[44].mxu0  ;;  %1845 = vst [vmem:[%s2720_s3 + $0x2e0] sm:$0xff] %v1624_v16 }
 0x133   :  { %v1661_v1 = vadd.f32 %v1660_v26, %v260_v22  ;;  %v1662_v19 = vpop.f32.mrb[45].mxu0 }
 0x134   :  { %v1663_v21 = vadd.f32 %v1662_v19, %v264_v13  ;;  %v1664_v23 = vpop.f32.mrb[46].mxu0  ;;  %v1703_v38 = vpop.f32.mrb[44].mxu1 }
 0x135   :  { %1797 = vst [vmem:[%s2720_s3 + $0x160] sm:$0xff] %v1661_v1  ;;  %v1665_v24 = vadd.f32 %v1664_v23, %v260_v22  ;;  %v1666_v25 = vpop.f32.mrb[47].mxu0  ;;  %v1704_v28 = vadd.f32 %v1703_v38, %v268_v30  ;;  %v1705_v29 = vpop.f32.mrb[45].mxu1 }
 0x136   :  { %1798 = vst [vmem:[%s2720_s3 + $0x168] sm:$0xff] %v1663_v21  ;;  %v1667_v27 = vadd.f32 %v1666_v25, %v264_v13  ;;  %v1706_v42 = vadd.f32 %v1705_v29, %v272_v3  ;;  %v1707_v31 = vpop.f32.mrb[46].mxu1 }
 0x137   :  { %1846 = vst [vmem:[%s2720_s3 + $0x2e8] sm:$0xff] %v1665_v24  ;;  %1799 = vst [vmem:[%s2720_s3 + $0x170] sm:$0xff] %v1704_v28  ;;  %v1708_v33 = vadd.f32 %v1707_v31, %v268_v30  ;;  %v1709_v34 = vpop.f32.mrb[47].mxu1 }
 0x138   :  { %1847 = vst [vmem:[%s2720_s3 + $0x2f0] sm:$0xff] %v1667_v27  ;;  %1800 = vst [vmem:[%s2720_s3 + $0x178] sm:$0xff] %v1706_v42  ;;  %v1710_v35 = vadd.f32 %v1709_v34, %v272_v3 }
 0x139   :  { %1848 = vst [vmem:[%s2720_s3 + $0x2f8] sm:$0xff] %v1708_v33 }
 0x13a   :  { %v1746_v36 = vpop.f32.mrb[48].mxu0  ;;  %1849 = vst [vmem:[%s2720_s3 + $0x300] sm:$0xff] %v1710_v35 }
 0x13b   :  { %v1747_v37 = vadd.f32 %v1855_v32, %v1746_v36  ;;  %v1961_v39 = vpop.f32.mrb[49].mxu0 }
 0x13c   :  { %v1749_v40 = vpop.f32.mrb[50].mxu0 }
 0x13d   :  { %1801 = vst [vmem:[%s2720_s3 + $0x180] sm:$0xff] %v1747_v37  ;;  %v1750_v41 = vadd.f32 %v1855_v32, %v1749_v40  ;;  %v1962_v43 = vpop.f32.mrb[51].mxu0 }
 0x13f   :  { %1850 = vst [vmem:[%s2720_s3 + $0x308] sm:$0xff] %v1750_v41 }

// kernel: tile.8
= control target key start
LH: loop header
LB: loop body
LE: loop exit
PB: predicated region body
PF: predicated region fallthrough
CT: control target
= control target key end

     0   :  { %s22_s0 = inlined_call_operand.vmem [shape: f32[64], index: 0, kind: input, shape index: {}]   ;;  %s23_s1 = inlined_call_operand.vmem [shape: f32[4,64], index: 1, kind: output, shape index: {}]  }
   0x1   :  { %v4_v0 = vld [vmem:[%s22_s0] ss:$0 sm:$0xff] }
   0x2   :  { %5 = vst [vmem:[%s23_s1] sm:$0xf] %v4_v0 }

// kernel: tile.9
= control target key start
LH: loop header
LB: loop body
LE: loop exit
PB: predicated region body
PF: predicated region fallthrough
CT: control target
= control target key end

     0   :  { %s6_s8 = smov 3  ;;  %vm8_vm0 = vcmask 523264   ;;  %s30_s9 = smov 64   ;;  %vm15_vm1 = vcmask 1048064   ;;  %s50_s0 = inlined_call_operand.vmem [shape: f32[4,64], index: 0, kind: input, shape index: {}]   ;;  %s51_s1 = inlined_call_operand.vmem [shape: f32[1,256], index: 1, kind: output, shape index: {}]  }
   0x1   :  { %v4_v0 = vld [vmem:[%s50_s0] sm:$0xf]  ;;  %s11_s0 = smov 3 }
   0x2   :  { %5 = vst [vmem:[#allocation1] sm:$0xf] %v4_v0 }
   0x9   :  { %v12_v1 = vld [vmem:[#allocation1 + $0x1] ss:$2 sm:%s11_s0]   ;;  %v7_v2 = vld [vmem:[#allocation1] ss:$2 sm:%s6_s8]  }
   0xa   :  { %13 = vrot.lane.b32.xlu0 %v12_v1, %s30_s9  ;;  %9 = vst.msk [vmem:[#allocation0] ss:$8 sm:$0x3] %vm8_vm0, %v7_v2  }
  0x7c   :  { %v14_v3 = vpop.permute.xlu0 %13  }
  0x7d   :  { %16 = vst.msk [vmem:[#allocation0] ss:$8 sm:$0x3] %vm15_vm1, %v14_v3  }
  0x84   :  { %v20_v4 = vld [vmem:[#allocation0] sm:$0x1]  ;;  %v24_v5 = vld [vmem:[#allocation0 + $0x8] sm:$0x1] }
  0x85   :  { %22 = vst [vmem:[%s51_s1] sm:$0x1] %v20_v4  ;;  %28 = vst [vmem:[%s51_s1 + $0x1] sm:$0x1] %v24_v5 }

// kernel: autoencoder_forward.10
= control target key start
LH: loop header
LB: loop body
LE: loop exit
PB: predicated region body
PF: predicated region fallthrough
CT: control target
= control target key end

     0   :  { %s3521_s1 = inlined_call_operand.vmem [shape: bf16[1152,256], index: 1, kind: input, shape index: {}]   ;;  %s3522_s0 = inlined_call_operand.vmem [shape: bf16[112,1152], index: 0, kind: input, shape index: {}]   ;;  %s3523_s2 = inlined_call_operand.vmem [shape: f32[1,256], index: 2, kind: input, shape index: {}]   ;;  %s3524_s3 = inlined_call_operand.vmem [shape: f32[112,256], index: 3, kind: output, shape index: {}]  }
   0x1   :  { %v2238_v0 = vld [vmem:[%s3521_s1 + $0x4] ss:$8 sps:$4 sm:$0xff]   ;;  %v2242_v2 = vld [vmem:[%s3521_s1] ss:$8 sps:$4 sm:$0xff]   ;;  %v2244_v4 = vld [vmem:[%s3521_s1 + $0x14] ss:$8 sps:$4 sm:$0xff]  }
   0x2   :  { %v2240_v1 = vld [vmem:[%s3521_s1 + $0x204] ss:$8 sps:$4 sm:$0xff]   ;;  %1283 = vmatprep.subr.bf16.mxu1 %v2238_v0  ;;  %v2243_v3 = vld [vmem:[%s3521_s1 + $0x200] ss:$8 sps:$4 sm:$0xff]   ;;  %v2246_v5 = vld [vmem:[%s3521_s1 + $0x214] ss:$8 sps:$4 sm:$0xff]  }
   0x3   :  { %1489 = vmatprep.subr.bf16.mxu0 %v2240_v1  ;;  %1284 = vmatpush1.bf16.msra.mxu1 %v2242_v2  ;;  %v2248_v6 = vld [vmem:[%s3521_s1 + $0x10] ss:$8 sps:$4 sm:$0xff]   ;;  %v2250_v8 = vld [vmem:[%s3521_s1 + $0x24] ss:$8 sps:$4 sm:$0xff]   ;;  %v2254_v10 = vld [vmem:[%s3521_s1 + $0x20] ss:$8 sps:$4 sm:$0xff]  }
   0x4   :  { %1490 = vmatpush1.bf16.msra.mxu0 %v2243_v3  ;;  %1285 = vmatprep.subr.bf16.mxu1 %v2244_v4  ;;  %v2249_v7 = vld [vmem:[%s3521_s1 + $0x210] ss:$8 sps:$4 sm:$0xff]   ;;  %v2252_v9 = vld [vmem:[%s3521_s1 + $0x224] ss:$8 sps:$4 sm:$0xff]   ;;  %v2255_v11 = vld [vmem:[%s3521_s1 + $0x220] ss:$8 sps:$4 sm:$0xff]  }
   0x5   :  { %1491 = vmatprep.subr.bf16.mxu0 %v2246_v5  ;;  %v2256_v12 = vld [vmem:[%s3521_s1 + $0x34] ss:$8 sps:$4 sm:$0xff]   ;;  %v2260_v14 = vld [vmem:[%s3521_s1 + $0x30] ss:$8 sps:$4 sm:$0xff]   ;;  %v2262_v16 = vld [vmem:[%s3521_s1 + $0x44] ss:$8 sps:$4 sm:$0xff]  }
   0x6   :  { %v2258_v13 = vld [vmem:[%s3521_s1 + $0x234] ss:$8 sps:$4 sm:$0xff]   ;;  %v2261_v15 = vld [vmem:[%s3521_s1 + $0x230] ss:$8 sps:$4 sm:$0xff]   ;;  %v2264_v17 = vld [vmem:[%s3521_s1 + $0x244] ss:$8 sps:$4 sm:$0xff]  }
   0x7   :  { %1286 = vmatpush1.bf16.msra.mxu1 %v2248_v6  ;;  %v2266_v18 = vld [vmem:[%s3521_s1 + $0x40] ss:$8 sps:$4 sm:$0xff]   ;;  %v2268_v20 = vld [vmem:[%s3521_s1 + $0x54] ss:$8 sps:$4 sm:$0xff]   ;;  %v2272_v22 = vld [vmem:[%s3521_s1 + $0x50] ss:$8 sps:$4 sm:$0xff]  }
   0x8   :  { %1492 = vmatpush1.bf16.msra.mxu0 %v2249_v7  ;;  %1287 = vmatprep.subr.bf16.mxu1 %v2250_v8  ;;  %v2267_v19 = vld [vmem:[%s3521_s1 + $0x240] ss:$8 sps:$4 sm:$0xff]   ;;  %v2270_v21 = vld [vmem:[%s3521_s1 + $0x254] ss:$8 sps:$4 sm:$0xff]   ;;  %v2273_v23 = vld [vmem:[%s3521_s1 + $0x250] ss:$8 sps:$4 sm:$0xff]  }
   0x9   :  { %1493 = vmatprep.subr.bf16.mxu0 %v2252_v9  ;;  %v2274_v24 = vld [vmem:[%s3521_s1 + $0x64] ss:$8 sps:$4 sm:$0xff]   ;;  %v2278_v26 = vld [vmem:[%s3521_s1 + $0x60] ss:$8 sps:$4 sm:$0xff]   ;;  %v2280_v28 = vld [vmem:[%s3521_s1 + $0x74] ss:$8 sps:$4 sm:$0xff]  }
   0xa   :  { %v2276_v25 = vld [vmem:[%s3521_s1 + $0x264] ss:$8 sps:$4 sm:$0xff]   ;;  %v2279_v27 = vld [vmem:[%s3521_s1 + $0x260] ss:$8 sps:$4 sm:$0xff]   ;;  %v2282_v29 = vld [vmem:[%s3521_s1 + $0x274] ss:$8 sps:$4 sm:$0xff]  }
   0xb   :  { %1288 = vmatpush1.bf16.msra.mxu1 %v2254_v10  ;;  %v2284_v30 = vld [vmem:[%s3521_s1 + $0x70] ss:$8 sps:$4 sm:$0xff]   ;;  %v2286_v32 = vld [vmem:[%s3521_s1 + $0x84] ss:$8 sps:$4 sm:$0xff]   ;;  %v2290_v34 = vld [vmem:[%s3521_s1 + $0x80] ss:$8 sps:$4 sm:$0xff]  }
   0xc   :  { %1494 = vmatpush1.bf16.msra.mxu0 %v2255_v11  ;;  %1289 = vmatprep.subr.bf16.mxu1 %v2256_v12  ;;  %v2285_v31 = vld [vmem:[%s3521_s1 + $0x270] ss:$8 sps:$4 sm:$0xff]   ;;  %v2288_v33 = vld [vmem:[%s3521_s1 + $0x284] ss:$8 sps:$4 sm:$0xff]   ;;  %v2291_v35 = vld [vmem:[%s3521_s1 + $0x280] ss:$8 sps:$4 sm:$0xff]  }
   0xd   :  { %1495 = vmatprep.subr.bf16.mxu0 %v2258_v13  ;;  %v2292_v36 = vld [vmem:[%s3521_s1 + $0x94] ss:$8 sps:$4 sm:$0xff]   ;;  %v2296_v38 = vld [vmem:[%s3521_s1 + $0x90] ss:$8 sps:$4 sm:$0xff]   ;;  %v2298_v40 = vld [vmem:[%s3521_s1 + $0xa4] ss:$8 sps:$4 sm:$0xff]  }
   0xe   :  { %v2294_v37 = vld [vmem:[%s3521_s1 + $0x294] ss:$8 sps:$4 sm:$0xff]   ;;  %v2297_v39 = vld [vmem:[%s3521_s1 + $0x290] ss:$8 sps:$4 sm:$0xff]   ;;  %v2300_v41 = vld [vmem:[%s3521_s1 + $0x2a4] ss:$8 sps:$4 sm:$0xff]  }
   0xf   :  { %1290 = vmatpush1.bf16.msra.mxu1 %v2260_v14  ;;  %v2302_v42 = vld [vmem:[%s3521_s1 + $0xa0] ss:$8 sps:$4 sm:$0xff]   ;;  %v2304_v44 = vld [vmem:[%s3521_s1 + $0xb4] ss:$8 sps:$4 sm:$0xff]   ;;  %v2308_v46 = vld [vmem:[%s3521_s1 + $0xb0] ss:$8 sps:$4 sm:$0xff]  }
  0x10   :  { %1496 = vmatpush1.bf16.msra.mxu0 %v2261_v15  ;;  %1291 = vmatprep.subr.bf16.mxu1 %v2262_v16  ;;  %v2303_v43 = vld [vmem:[%s3521_s1 + $0x2a0] ss:$8 sps:$4 sm:$0xff]   ;;  %v2306_v45 = vld [vmem:[%s3521_s1 + $0x2b4] ss:$8 sps:$4 sm:$0xff]   ;;  %v2309_v47 = vld [vmem:[%s3521_s1 + $0x2b0] ss:$8 sps:$4 sm:$0xff]  }
  0x11   :  { %1497 = vmatprep.subr.bf16.mxu0 %v2264_v17  ;;  %v2336_v48 = vld [vmem:[%s3522_s0 + $0x4] ss:$36 sps:$4 sm:$0xff]   ;;  %v2342_v51 = vld [vmem:[%s3522_s0 + $0x14] ss:$36 sps:$4 sm:$0xff]   ;;  %v2364_v10 = vld [vmem:[%s3522_s0 + $0x5c] ss:$36 sps:$4 sm:$0xff]  }
  0x12   :  { %v2310_v49 = vld [vmem:[%s3521_s1 + $0xc4] ss:$8 sps:$4 sm:$0xff]   ;;  %1315 = vmatprep.mubr.bf16.mxu1 %v2336_v48  ;;  %v2314_v52 = vld [vmem:[%s3521_s1 + $0xc0] ss:$8 sps:$4 sm:$0xff]   ;;  %v2316_v54 = vld [vmem:[%s3521_s1 + $0xd4] ss:$8 sps:$4 sm:$0xff]   ;;  %1521 = vmatprep.mubr.bf16.mxu0 %v2342_v51 }
  0x13   :  { %1292 = vmatpush1.bf16.msra.mxu1 %v2266_v18  ;;  %v2312_v50 = vld [vmem:[%s3521_s1 + $0x2c4] ss:$8 sps:$4 sm:$0xff]   ;;  %v2315_v53 = vld [vmem:[%s3521_s1 + $0x2c0] ss:$8 sps:$4 sm:$0xff]   ;;  %v2318_v55 = vld [vmem:[%s3521_s1 + $0x2d4] ss:$8 sps:$4 sm:$0xff]  }
  0x14   :  { %1498 = vmatpush1.bf16.msra.mxu0 %v2267_v19  ;;  %1293 = vmatprep.subr.bf16.mxu1 %v2268_v20  ;;  %v2320_v56 = vld [vmem:[%s3521_s1 + $0xd0] ss:$8 sps:$4 sm:$0xff]   ;;  %v2322_v58 = vld [vmem:[%s3521_s1 + $0xe4] ss:$8 sps:$4 sm:$0xff]   ;;  %v2326_v60 = vld [vmem:[%s3521_s1 + $0xe0] ss:$8 sps:$4 sm:$0xff]  }
  0x15   :  { %1499 = vmatprep.subr.bf16.mxu0 %v2270_v21  ;;  %v2321_v57 = vld [vmem:[%s3521_s1 + $0x2d0] ss:$8 sps:$4 sm:$0xff]   ;;  %v2324_v59 = vld [vmem:[%s3521_s1 + $0x2e4] ss:$8 sps:$4 sm:$0xff]   ;;  %v2327_v61 = vld [vmem:[%s3521_s1 + $0x2e0] ss:$8 sps:$4 sm:$0xff]  }
  0x16   :  { %v2328_v62 = vld [vmem:[%s3521_s1 + $0xf4] ss:$8 sps:$4 sm:$0xff]   ;;  %v2332_v0 = vld [vmem:[%s3521_s1 + $0xf0] ss:$8 sps:$4 sm:$0xff]   ;;  %v2339_v2 = vld [vmem:[%s3521_s1 + $0x104] ss:$8 sps:$4 sm:$0xff]  }
  0x17   :  { %1294 = vmatpush1.bf16.msra.mxu1 %v2272_v22  ;;  %v2330_v63 = vld [vmem:[%s3521_s1 + $0x2f4] ss:$8 sps:$4 sm:$0xff]   ;;  %v2333_v1 = vld [vmem:[%s3521_s1 + $0x2f0] ss:$8 sps:$4 sm:$0xff]   ;;  %v2770_v3 = vld [vmem:[%s3521_s1 + $0x304] ss:$8 sps:$4 sm:$0xff]  }
  0x18   :  { %1500 = vmatpush1.bf16.msra.mxu0 %v2273_v23  ;;  %1295 = vmatprep.subr.bf16.mxu1 %v2274_v24  ;;  %v2334_v4 = vld [vmem:[%s3522_s0] ss:$36 sps:$4 sm:$0xff]   ;;  %v2340_v6 = vld [vmem:[%s3522_s0 + $0x10] ss:$36 sps:$4 sm:$0xff]   ;;  %v2368_v18 = vld [vmem:[%s3522_s0 + $0x58] ss:$36 sps:$4 sm:$0xff]  }
  0x19   :  { %1501 = vmatprep.subr.bf16.mxu0 %v2276_v25  ;;  %v2337_v5 = vld [vmem:[%s3521_s1 + $0x100] ss:$8 sps:$4 sm:$0xff]   ;;  %v2348_v8 = vld [vmem:[%s3521_s1 + $0x114] ss:$8 sps:$4 sm:$0xff]   ;;  %v2366_v11 = vld [vmem:[%s3522_s0 + $0x4c] ss:$36 sps:$4 sm:$0xff]  }
  0x1a   :  { %v2784_v7 = vld [vmem:[%s3521_s1 + $0x300] ss:$8 sps:$4 sm:$0xff]   ;;  %v2793_v9 = vld [vmem:[%s3521_s1 + $0x314] ss:$8 sps:$4 sm:$0xff]   ;;  %v2346_v12 = vld [vmem:[%s3521_s1 + $0x110] ss:$8 sps:$4 sm:$0xff]  }
  0x1b   :  { %1296 = vmatpush1.bf16.msra.mxu1 %v2278_v26  ;;  %v2807_v13 = vld [vmem:[%s3521_s1 + $0x310] ss:$8 sps:$4 sm:$0xff]   ;;  %v2354_v14 = vld [vmem:[%s3521_s1 + $0x124] ss:$8 sps:$4 sm:$0xff]   ;;  %v2352_v16 = vld [vmem:[%s3521_s1 + $0x120] ss:$8 sps:$4 sm:$0xff]  }
  0x1c   :  { %1502 = vmatpush1.bf16.msra.mxu0 %v2279_v27  ;;  %1297 = vmatprep.subr.bf16.mxu1 %v2280_v28  ;;  %v2817_v15 = vld [vmem:[%s3521_s1 + $0x324] ss:$8 sps:$4 sm:$0xff]   ;;  %v2825_v17 = vld [vmem:[%s3521_s1 + $0x320] ss:$8 sps:$4 sm:$0xff]   ;;  %v2360_v20 = vld [vmem:[%s3521_s1 + $0x134] ss:$8 sps:$4 sm:$0xff]  }
  0x1d   :  { %1503 = vmatprep.subr.bf16.mxu0 %v2282_v29  ;;  %v2369_v19 = vld [vmem:[%s3522_s0 + $0x48] ss:$36 sps:$4 sm:$0xff]   ;;  %v2841_v21 = vld [vmem:[%s3521_s1 + $0x334] ss:$8 sps:$4 sm:$0xff]   ;;  %v2358_v24 = vld [vmem:[%s3521_s1 + $0x130] ss:$8 sps:$4 sm:$0xff]  }
  0x1e   :  { %v2382_v22 = vld [vmem:[%s3522_s0 + $0xa4] ss:$36 sps:$4 sm:$0xff]   ;;  %v2384_v23 = vld [vmem:[%s3522_s0 + $0x94] ss:$36 sps:$4 sm:$0xff]  }
  0x1f   :  { %1298 = vmatpush1.bf16.msra.mxu1 %v2284_v30  ;;  %v2855_v25 = vld [vmem:[%s3521_s1 + $0x330] ss:$8 sps:$4 sm:$0xff]   ;;  %v2372_v26 = vld [vmem:[%s3521_s1 + $0x144] ss:$8 sps:$4 sm:$0xff]   ;;  %v2370_v28 = vld [vmem:[%s3521_s1 + $0x140] ss:$8 sps:$4 sm:$0xff]  }
  0x20   :  { %1504 = vmatpush1.bf16.msra.mxu0 %v2285_v31  ;;  %1299 = vmatprep.subr.bf16.mxu1 %v2286_v32  ;;  %v2865_v27 = vld [vmem:[%s3521_s1 + $0x344] ss:$8 sps:$4 sm:$0xff]   ;;  %v2873_v29 = vld [vmem:[%s3521_s1 + $0x340] ss:$8 sps:$4 sm:$0xff]   ;;  %v2387_v31 = vld [vmem:[%s3522_s0 + $0x90] ss:$36 sps:$4 sm:$0xff]  }
  0x21   :  { %1505 = vmatprep.subr.bf16.mxu0 %v2288_v33  ;;  %v2386_v30 = vld [vmem:[%s3522_s0 + $0xa0] ss:$36 sps:$4 sm:$0xff]   ;;  %v2378_v32 = vld [vmem:[%s3521_s1 + $0x154] ss:$8 sps:$4 sm:$0xff]   ;;  %v2394_v48 = vld [vmem:[%s3521_s1 + $0x170] ss:$8 sps:$4 sm:$0xff]  }
  0x22   :  { %v2889_v33 = vld [vmem:[%s3521_s1 + $0x354] ss:$8 sps:$4 sm:$0xff]   ;;  %v2961_v51 = vld [vmem:[%s3521_s1 + $0x384] ss:$8 sps:$4 sm:$0xff]  }
  0x23   :  { %1300 = vmatpush1.bf16.msra.mxu1 %v2290_v34  ;;  %v2400_v34 = vld [vmem:[%s3522_s0 + $0xec] ss:$36 sps:$4 sm:$0xff]  }
  0x24   :  { %1506 = vmatpush1.bf16.msra.mxu0 %v2291_v35  ;;  %1301 = vmatprep.subr.bf16.mxu1 %v2292_v36  ;;  %v2402_v35 = vld [vmem:[%s3522_s0 + $0xdc] ss:$36 sps:$4 sm:$0xff]   ;;  %v2376_v36 = vld [vmem:[%s3521_s1 + $0x150] ss:$8 sps:$4 sm:$0xff]  }
  0x25   :  { %1507 = vmatprep.subr.bf16.mxu0 %v2294_v37  ;;  %v2903_v37 = vld [vmem:[%s3521_s1 + $0x350] ss:$8 sps:$4 sm:$0xff]  }
  0x27   :  { %1302 = vmatpush1.bf16.msra.mxu1 %v2296_v38  ;;  %v2390_v38 = vld [vmem:[%s3521_s1 + $0x164] ss:$8 sps:$4 sm:$0xff]  }
  0x28   :  { %1508 = vmatpush1.bf16.msra.mxu0 %v2297_v39  ;;  %1303 = vmatprep.subr.bf16.mxu1 %v2298_v40  ;;  %v2913_v39 = vld [vmem:[%s3521_s1 + $0x364] ss:$8 sps:$4 sm:$0xff]   ;;  %v2388_v40 = vld [vmem:[%s3521_s1 + $0x160] ss:$8 sps:$4 sm:$0xff]  }
  0x29   :  { %1509 = vmatprep.subr.bf16.mxu0 %v2300_v41  ;;  %v2921_v41 = vld [vmem:[%s3521_s1 + $0x360] ss:$8 sps:$4 sm:$0xff]  }
  0x2b   :  { %1304 = vmatpush1.bf16.msra.mxu1 %v2302_v42  ;;  %v2404_v42 = vld [vmem:[%s3522_s0 + $0xe8] ss:$36 sps:$4 sm:$0xff]  }
  0x2c   :  { %1510 = vmatpush1.bf16.msra.mxu0 %v2303_v43  ;;  %1305 = vmatprep.subr.bf16.mxu1 %v2304_v44  ;;  %v2405_v43 = vld [vmem:[%s3522_s0 + $0xd8] ss:$36 sps:$4 sm:$0xff]  }
  0x2d   :  { %1511 = vmatprep.subr.bf16.mxu0 %v2306_v45  ;;  %v2396_v44 = vld [vmem:[%s3521_s1 + $0x174] ss:$8 sps:$4 sm:$0xff]  }
  0x2e   :  { %v2937_v45 = vld [vmem:[%s3521_s1 + $0x374] ss:$8 sps:$4 sm:$0xff]  }
  0x2f   :  { %1306 = vmatpush1.bf16.msra.mxu1 %v2308_v46  ;;  %v2418_v46 = vld [vmem:[%s3522_s0 + $0x134] ss:$36 sps:$4 sm:$0xff]  }
  0x30   :  { %1512 = vmatpush1.bf16.msra.mxu0 %v2309_v47  ;;  %1307 = vmatprep.subr.bf16.mxu1 %v2310_v49  ;;  %v2420_v47 = vld [vmem:[%s3522_s0 + $0x124] ss:$36 sps:$4 sm:$0xff]   ;;  %v2951_v49 = vld [vmem:[%s3521_s1 + $0x370] ss:$8 sps:$4 sm:$0xff]  }
  0x31   :  { %1513 = vmatprep.subr.bf16.mxu0 %v2312_v50  ;;  %v2408_v50 = vld [vmem:[%s3521_s1 + $0x184] ss:$8 sps:$4 sm:$0xff]  }
  0x33   :  { %1308 = vmatpush1.bf16.msra.mxu1 %v2314_v52  ;;  %v2406_v52 = vld [vmem:[%s3521_s1 + $0x180] ss:$8 sps:$4 sm:$0xff]  }
  0x34   :  { %1514 = vmatpush1.bf16.msra.mxu0 %v2315_v53  ;;  %1309 = vmatprep.subr.bf16.mxu1 %v2316_v54  ;;  %v2969_v53 = vld [vmem:[%s3521_s1 + $0x380] ss:$8 sps:$4 sm:$0xff]   ;;  %v2422_v54 = vld [vmem:[%s3522_s0 + $0x130] ss:$36 sps:$4 sm:$0xff]  }
  0x35   :  { %1515 = vmatprep.subr.bf16.mxu0 %v2318_v55  ;;  %v2423_v55 = vld [vmem:[%s3522_s0 + $0x120] ss:$36 sps:$4 sm:$0xff]  }
  0x37   :  { %1310 = vmatpush1.bf16.msra.mxu1 %v2320_v56  ;;  %v2414_v56 = vld [vmem:[%s3521_s1 + $0x194] ss:$8 sps:$4 sm:$0xff]  }
  0x38   :  { %1516 = vmatpush1.bf16.msra.mxu0 %v2321_v57  ;;  %1311 = vmatprep.subr.bf16.mxu1 %v2322_v58  ;;  %v2985_v57 = vld [vmem:[%s3521_s1 + $0x394] ss:$8 sps:$4 sm:$0xff]  }
  0x39   :  { %1517 = vmatprep.subr.bf16.mxu0 %v2324_v59  ;;  %v2436_v58 = vld [vmem:[%s3522_s0 + $0x17c] ss:$36 sps:$4 sm:$0xff]   ;;  %v2438_v59 = vld [vmem:[%s3522_s0 + $0x16c] ss:$36 sps:$4 sm:$0xff]  }
  0x3b   :  { %1312 = vmatpush1.bf16.msra.mxu1 %v2326_v60  ;;  %v2412_v60 = vld [vmem:[%s3521_s1 + $0x190] ss:$8 sps:$4 sm:$0xff]  }
  0x3c   :  { %1518 = vmatpush1.bf16.msra.mxu0 %v2327_v61  ;;  %1313 = vmatprep.subr.bf16.mxu1 %v2328_v62  ;;  %v2999_v61 = vld [vmem:[%s3521_s1 + $0x390] ss:$8 sps:$4 sm:$0xff]   ;;  %v2426_v62 = vld [vmem:[%s3521_s1 + $0x1a4] ss:$8 sps:$4 sm:$0xff]  }
  0x3d   :  { %1519 = vmatprep.subr.bf16.mxu0 %v2330_v63  ;;  %v3009_v63 = vld [vmem:[%s3521_s1 + $0x3a4] ss:$8 sps:$4 sm:$0xff]  }
  0x3f   :  { %1314 = vmatpush1.bf16.msra.mxu1 %v2332_v0  ;;  %v2424_v0 = vld [vmem:[%s3521_s1 + $0x1a0] ss:$8 sps:$4 sm:$0xff]  }
  0x40   :  { %1520 = vmatpush1.bf16.msra.mxu0 %v2333_v1  ;;  %1386 = vmatprep.subr.bf16.mxu1 %v2339_v2  ;;  %v3017_v1 = vld [vmem:[%s3521_s1 + $0x3a0] ss:$8 sps:$4 sm:$0xff]   ;;  %v2440_v2 = vld [vmem:[%s3522_s0 + $0x178] ss:$36 sps:$4 sm:$0xff]  }
  0x41   :  { %1592 = vmatprep.subr.bf16.mxu0 %v2770_v3 }
  0x42   :  { %1316 = vmatmul.mubr.bf16.vlgmr.msra.gmra.mrb[0].mxu1 %v2334_v4  ;;  %v2441_v4 = vld [vmem:[%s3522_s0 + $0x168] ss:$36 sps:$4 sm:$0xff]  }
  0x43   :  { %1522 = vmatmul.mubr.bf16.vlgmr.msra.gmra.mrb[0].mxu0 %v2340_v6  ;;  %1387 = vmatpush1.bf16.msra.mxu1 %v2337_v5  ;;  %v2432_v5 = vld [vmem:[%s3521_s1 + $0x1b4] ss:$8 sps:$4 sm:$0xff]  }
  0x44   :  { %1593 = vmatpush1.bf16.msra.mxu0 %v2784_v7  ;;  %1388 = vmatprep.subr.bf16.mxu1 %v2348_v8  ;;  %v3033_v6 = vld [vmem:[%s3521_s1 + $0x3b4] ss:$8 sps:$4 sm:$0xff]   ;;  %v2454_v8 = vld [vmem:[%s3522_s0 + $0x1c4] ss:$36 sps:$4 sm:$0xff]  }
  0x45   :  { %1594 = vmatprep.subr.bf16.mxu0 %v2793_v9  ;;  %1531 = vmatprep.mubr.bf16.mxu0 %v2364_v10  ;;  %v2456_v10 = vld [vmem:[%s3522_s0 + $0x1b4] ss:$36 sps:$4 sm:$0xff]  }
  0x46   :  { %1325 = vmatprep.mubr.bf16.mxu1 %v2366_v11  ;;  %v2430_v11 = vld [vmem:[%s3521_s1 + $0x1b0] ss:$8 sps:$4 sm:$0xff]  }
  0x47   :  { %1389 = vmatpush1.bf16.msra.mxu1 %v2346_v12  ;;  %v3047_v12 = vld [vmem:[%s3521_s1 + $0x3b0] ss:$8 sps:$4 sm:$0xff]  }
  0x48   :  { %1595 = vmatpush1.bf16.msra.mxu0 %v2807_v13  ;;  %1390 = vmatprep.subr.bf16.mxu1 %v2354_v14  ;;  %v2444_v14 = vld [vmem:[%s3521_s1 + $0x1c4] ss:$8 sps:$4 sm:$0xff]  }
  0x49   :  { %1596 = vmatprep.subr.bf16.mxu0 %v2817_v15 }
  0x4a   :  { %1326 = vmatmul.mubr.bf16.gmra.mrb[4].mxu1 %v2369_v19  ;;  %v3065_v19 = vld [vmem:[%s3521_s1 + $0x3c0] ss:$8 sps:$4 sm:$0xff]  }
  0x4b   :  { %1532 = vmatmul.mubr.bf16.gmra.mrb[4].mxu0 %v2368_v18  ;;  %1391 = vmatpush1.bf16.msra.mxu1 %v2352_v16  ;;  %v3057_v16 = vld [vmem:[%s3521_s1 + $0x3c4] ss:$8 sps:$4 sm:$0xff]   ;;  %v2442_v18 = vld [vmem:[%s3521_s1 + $0x1c0] ss:$8 sps:$4 sm:$0xff]  }
  0x4c   :  { %1597 = vmatpush1.bf16.msra.mxu0 %v2825_v17  ;;  %1392 = vmatprep.subr.bf16.mxu1 %v2360_v20  ;;  %v2458_v20 = vld [vmem:[%s3522_s0 + $0x1c0] ss:$36 sps:$4 sm:$0xff]  }
  0x4d   :  { %1598 = vmatprep.subr.bf16.mxu0 %v2841_v21  ;;  %1541 = vmatprep.mubr.bf16.mxu0 %v2382_v22  ;;  %v2459_v22 = vld [vmem:[%s3522_s0 + $0x1b0] ss:$36 sps:$4 sm:$0xff]  }
  0x4e   :  { %1335 = vmatprep.mubr.bf16.mxu1 %v2384_v23  ;;  %v2450_v23 = vld [vmem:[%s3521_s1 + $0x1d4] ss:$8 sps:$4 sm:$0xff]  }
  0x4f   :  { %1393 = vmatpush1.bf16.msra.mxu1 %v2358_v24  ;;  %v3081_v24 = vld [vmem:[%s3521_s1 + $0x3d4] ss:$8 sps:$4 sm:$0xff]  }
  0x50   :  { %1599 = vmatpush1.bf16.msra.mxu0 %v2855_v25  ;;  %1394 = vmatprep.subr.bf16.mxu1 %v2372_v26  ;;  %v2474_v26 = vld [vmem:[%s3522_s0 + $0xc] ss:$36 sps:$4 sm:$0xff]  }
  0x51   :  { %1600 = vmatprep.subr.bf16.mxu0 %v2865_v27 }
  0x52   :  { %1336 = vmatmul.mubr.bf16.gmra.mrb[8].mxu1 %v2387_v31  ;;  %v3096_v31 = vld [vmem:[%s3521_s1 + $0x3d0] ss:$8 sps:$4 sm:$0xff]  }
  0x53   :  { %1542 = vmatmul.mubr.bf16.gmra.mrb[8].mxu0 %v2386_v30  ;;  %1395 = vmatpush1.bf16.msra.mxu1 %v2370_v28  ;;  %v2477_v28 = vld [vmem:[%s3522_s0 + $0x1c] ss:$36 sps:$4 sm:$0xff]   ;;  %v2448_v30 = vld [vmem:[%s3521_s1 + $0x1d0] ss:$8 sps:$4 sm:$0xff]  }
  0x54   :  { %1601 = vmatpush1.bf16.msra.mxu0 %v2873_v29  ;;  %1396 = vmatprep.subr.bf16.mxu1 %v2378_v32  ;;  %v2462_v32 = vld [vmem:[%s3521_s1 + $0x1e4] ss:$8 sps:$4 sm:$0xff]  }
  0x55   :  { %1602 = vmatprep.subr.bf16.mxu0 %v2889_v33  ;;  %1551 = vmatprep.mubr.bf16.mxu0 %v2400_v34  ;;  %v3105_v34 = vld [vmem:[%s3521_s1 + $0x3e4] ss:$8 sps:$4 sm:$0xff]  }
  0x56   :  { %1345 = vmatprep.mubr.bf16.mxu1 %v2402_v35  ;;  %v2460_v35 = vld [vmem:[%s3521_s1 + $0x1e0] ss:$8 sps:$4 sm:$0xff]  }
  0x57   :  { %1397 = vmatpush1.bf16.msra.mxu1 %v2376_v36  ;;  %v3113_v36 = vld [vmem:[%s3521_s1 + $0x3e0] ss:$8 sps:$4 sm:$0xff]  }
  0x58   :  { %1603 = vmatpush1.bf16.msra.mxu0 %v2903_v37  ;;  %1398 = vmatprep.subr.bf16.mxu1 %v2390_v38  ;;  %v2468_v38 = vld [vmem:[%s3521_s1 + $0x1f4] ss:$8 sps:$4 sm:$0xff]  }
  0x59   :  { %1604 = vmatprep.subr.bf16.mxu0 %v2913_v39 }
  0x5a   :  { %1346 = vmatmul.mubr.bf16.gmra.mrb[12].mxu1 %v2405_v43  ;;  %v3132_v43 = vld [vmem:[%s3521_s1 + $0x3f0] ss:$8 sps:$4 sm:$0xff]  }
  0x5b   :  { %1552 = vmatmul.mubr.bf16.gmra.mrb[12].mxu0 %v2404_v42  ;;  %1399 = vmatpush1.bf16.msra.mxu1 %v2388_v40  ;;  %v3123_v40 = vld [vmem:[%s3521_s1 + $0x3f4] ss:$8 sps:$4 sm:$0xff]   ;;  %v2466_v42 = vld [vmem:[%s3521_s1 + $0x1f0] ss:$8 sps:$4 sm:$0xff]  }
  0x5c   :  { %1605 = vmatpush1.bf16.msra.mxu0 %v2921_v41  ;;  %1400 = vmatprep.subr.bf16.mxu1 %v2396_v44  ;;  %v2480_v44 = vld [vmem:[%s3521_s1 + $0x404] ss:$8 sps:$4 sm:$0xff]  }
  0x5d   :  { %1606 = vmatprep.subr.bf16.mxu0 %v2937_v45  ;;  %1561 = vmatprep.mubr.bf16.mxu0 %v2418_v46  ;;  %v2472_v46 = vld [vmem:[%s3522_s0 + $0x8] ss:$36 sps:$4 sm:$0xff]  }
  0x5e   :  { %1355 = vmatprep.mubr.bf16.mxu1 %v2420_v47  ;;  %v2475_v47 = vld [vmem:[%s3522_s0 + $0x18] ss:$36 sps:$4 sm:$0xff]  }
  0x5f   :  { %1401 = vmatpush1.bf16.msra.mxu1 %v2394_v48  ;;  %v2478_v48 = vld [vmem:[%s3521_s1 + $0x400] ss:$8 sps:$4 sm:$0xff]  }
  0x60   :  { %1607 = vmatpush1.bf16.msra.mxu0 %v2951_v49  ;;  %1402 = vmatprep.subr.bf16.mxu1 %v2408_v50  ;;  %v2483_v50 = vld [vmem:[%s3521_s1 + $0x414] ss:$8 sps:$4 sm:$0xff]  }
  0x61   :  { %1608 = vmatprep.subr.bf16.mxu0 %v2961_v51 }
  0x62   :  { %1356 = vmatmul.mubr.bf16.gmra.mrb[16].mxu1 %v2423_v55  ;;  %v2481_v55 = vld [vmem:[%s3521_s1 + $0x410] ss:$8 sps:$4 sm:$0xff]  }
  0x63   :  { %1562 = vmatmul.mubr.bf16.gmra.mrb[16].mxu0 %v2422_v54  ;;  %1403 = vmatpush1.bf16.msra.mxu1 %v2406_v52  ;;  %v2484_v52 = vld [vmem:[%s3522_s0 + $0x54] ss:$36 sps:$4 sm:$0xff]   ;;  %v2486_v54 = vld [vmem:[%s3522_s0 + $0x64] ss:$36 sps:$4 sm:$0xff]  }
  0x64   :  { %1609 = vmatpush1.bf16.msra.mxu0 %v2969_v53  ;;  %1404 = vmatprep.subr.bf16.mxu1 %v2414_v56  ;;  %v2488_v56 = vld [vmem:[%s3522_s0 + $0x50] ss:$36 sps:$4 sm:$0xff]  }
  0x65   :  { %1610 = vmatprep.subr.bf16.mxu0 %v2985_v57  ;;  %1571 = vmatprep.mubr.bf16.mxu0 %v2436_v58  ;;  %v2495_v58 = vld [vmem:[%s3521_s1 + $0x434] ss:$8 sps:$4 sm:$0xff]  }
  0x66   :  { %1365 = vmatprep.mubr.bf16.mxu1 %v2438_v59  ;;  %v2496_v59 = vld [vmem:[%s3522_s0 + $0x9c] ss:$36 sps:$4 sm:$0xff]  }
  0x67   :  { %1405 = vmatpush1.bf16.msra.mxu1 %v2412_v60  ;;  %v2493_v60 = vld [vmem:[%s3521_s1 + $0x430] ss:$8 sps:$4 sm:$0xff]  }
  0x68   :  { %1611 = vmatpush1.bf16.msra.mxu0 %v2999_v61  ;;  %1406 = vmatprep.subr.bf16.mxu1 %v2426_v62  ;;  %v2500_v62 = vld [vmem:[%s3522_s0 + $0x98] ss:$36 sps:$4 sm:$0xff]  }
  0x69   :  { %1612 = vmatprep.subr.bf16.mxu0 %v3009_v63 }
  0x6a   :  { %1366 = vmatmul.mubr.bf16.gmra.mrb[20].mxu1 %v2441_v4  ;;  %v2516_v4 = vld [vmem:[%s3521_s1 + $0x464] ss:$8 sps:$4 sm:$0xff]  }
  0x6b   :  { %1572 = vmatmul.mubr.bf16.gmra.mrb[20].mxu0 %v2440_v2  ;;  %1407 = vmatpush1.bf16.msra.mxu1 %v2424_v0  ;;  %v2507_v0 = vld [vmem:[%s3521_s1 + $0x454] ss:$8 sps:$4 sm:$0xff]   ;;  %v2508_v2 = vld [vmem:[%s3522_s0 + $0xe4] ss:$36 sps:$4 sm:$0xff]  }
  0x6c   :  { %1613 = vmatpush1.bf16.msra.mxu0 %v3017_v1  ;;  %1408 = vmatprep.subr.bf16.mxu1 %v2432_v5  ;;  %v2512_v5 = vld [vmem:[%s3522_s0 + $0xe0] ss:$36 sps:$4 sm:$0xff]  }
  0x6d   :  { %1614 = vmatprep.subr.bf16.mxu0 %v3033_v6  ;;  %1581 = vmatprep.mubr.bf16.mxu0 %v2454_v8  ;;  %v2519_v8 = vld [vmem:[%s3521_s1 + $0x474] ss:$8 sps:$4 sm:$0xff]  }
  0x6e   :  { %1375 = vmatprep.mubr.bf16.mxu1 %v2456_v10  ;;  %v2520_v10 = vld [vmem:[%s3522_s0 + $0x12c] ss:$36 sps:$4 sm:$0xff]  }
  0x6f   :  { %1409 = vmatpush1.bf16.msra.mxu1 %v2430_v11  ;;  %v2522_v11 = vld [vmem:[%s3522_s0 + $0x128] ss:$36 sps:$4 sm:$0xff]  }
  0x70   :  { %1615 = vmatpush1.bf16.msra.mxu0 %v3047_v12  ;;  %1410 = vmatprep.subr.bf16.mxu1 %v2444_v14  ;;  %v2523_v14 = vld [vmem:[%s3522_s0 + $0x20] ss:$36 sps:$4 sm:$0xff]  }
  0x71   :  { %1616 = vmatprep.subr.bf16.mxu0 %v3057_v16 }
  0x72   :  { %1376 = vmatmul.mubr.bf16.gmra.mrb[24].mxu1 %v2459_v22  ;;  %v2544_v22 = vld [vmem:[%s3522_s0 + $0x1d0] ss:$36 sps:$4 sm:$0xff]  }
  0x73   :  { %1582 = vmatmul.mubr.bf16.gmra.mrb[24].mxu0 %v2458_v20  ;;  %1411 = vmatpush1.bf16.msra.mxu1 %v2442_v18  ;;  %v2540_v18 = vld [vmem:[%s3522_s0 + $0x188] ss:$36 sps:$4 sm:$0xff]  }
  0x74   :  { %1617 = vmatpush1.bf16.msra.mxu0 %v3065_v19  ;;  %1412 = vmatprep.subr.bf16.mxu1 %v2450_v23  ;;  %v2543_v20 = vld [vmem:[%s3522_s0 + $0x1c8] ss:$36 sps:$4 sm:$0xff]  }
  0x75   :  { %1618 = vmatprep.subr.bf16.mxu0 %v3081_v24  ;;  %1418 = vmatprep.mubr.bf16.mxu1 %v2474_v26 }
  0x76   :  { %1624 = vmatprep.mubr.bf16.mxu0 %v2477_v28 }
  0x77   :  { %1413 = vmatpush1.bf16.msra.mxu1 %v2448_v30 }
  0x78   :  { %1619 = vmatpush1.bf16.msra.mxu0 %v3096_v31  ;;  %1414 = vmatprep.subr.bf16.mxu1 %v2462_v32 }
  0x79   :  { %1620 = vmatprep.subr.bf16.mxu0 %v3105_v34 }
  0x7b   :  { %1415 = vmatpush1.bf16.msra.mxu1 %v2460_v35 }
  0x7c   :  { %1621 = vmatpush1.bf16.msra.mxu0 %v3113_v36  ;;  %1416 = vmatprep.subr.bf16.mxu1 %v2468_v38 }
  0x7d   :  { %1622 = vmatprep.subr.bf16.mxu0 %v3123_v40 }
  0x7f   :  { %1417 = vmatpush1.bf16.msra.mxu1 %v2466_v42 }
  0x80   :  { %1623 = vmatpush1.bf16.msra.mxu0 %v3132_v43  ;;  %2065 = vmatprep.subr.bf16.mxu1 %v2770_v3  ;;  %v2492_v3 = vld [vmem:[%s3521_s1 + $0x424] ss:$8 sps:$4 sm:$0xff]  }
  0x81   :  { %1695 = vmatprep.subr.bf16.mxu0 %v2480_v44 }
  0x82   :  { %1419 = vmatmul.mubr.bf16.vlgmr.msra.gmra.mrb[0].mxu1 %v2472_v46 }
  0x83   :  { %1625 = vmatmul.mubr.bf16.vlgmr.msra.gmra.mrb[0].mxu0 %v2475_v47  ;;  %2081 = vmatpush1.bf16.msra.mxu1 %v2784_v7  ;;  %v2489_v7 = vld [vmem:[%s3522_s0 + $0x60] ss:$36 sps:$4 sm:$0xff]  }
  0x84   :  { %1696 = vmatpush1.bf16.msra.mxu0 %v2478_v48  ;;  %2066 = vmatprep.subr.bf16.mxu1 %v2793_v9  ;;  %v2490_v9 = vld [vmem:[%s3521_s1 + $0x420] ss:$8 sps:$4 sm:$0xff]  }
  0x85   :  { %1697 = vmatprep.subr.bf16.mxu0 %v2483_v50  ;;  %1428 = vmatprep.mubr.bf16.mxu1 %v2484_v52 }
  0x86   :  { %1634 = vmatprep.mubr.bf16.mxu0 %v2486_v54  ;;  %v231_v54 = vlaneseq }
  0x87   :  { %2082 = vmatpush1.bf16.msra.mxu1 %v2807_v13  ;;  %v2498_v13 = vld [vmem:[%s3522_s0 + $0xac] ss:$36 sps:$4 sm:$0xff]  }
  0x88   :  { %1698 = vmatpush1.bf16.msra.mxu0 %v2481_v55  ;;  %2067 = vmatprep.subr.bf16.mxu1 %v2817_v15  ;;  %v2504_v15 = vld [vmem:[%s3521_s1 + $0x444] ss:$8 sps:$4 sm:$0xff]  }
  0x89   :  { %1699 = vmatprep.subr.bf16.mxu0 %v2492_v3 }
  0x8a   :  { %1429 = vmatmul.mubr.bf16.gmra.mrb[4].mxu1 %v2488_v56 }
  0x8b   :  { %1635 = vmatmul.mubr.bf16.gmra.mrb[4].mxu0 %v2489_v7  ;;  %2083 = vmatpush1.bf16.msra.mxu1 %v2825_v17  ;;  %v2501_v17 = vld [vmem:[%s3522_s0 + $0xa8] ss:$36 sps:$4 sm:$0xff]   ;;  %v232_v7 = vshrl.u32 %v231_v54, 7 }
  0x8c   :  { %1700 = vmatpush1.bf16.msra.mxu0 %v2490_v9  ;;  %2068 = vmatprep.subr.bf16.mxu1 %v2841_v21  ;;  %v2502_v21 = vld [vmem:[%s3521_s1 + $0x440] ss:$8 sps:$4 sm:$0xff]  }
  0x8d   :  { %1701 = vmatprep.subr.bf16.mxu0 %v2495_v58  ;;  %1438 = vmatprep.mubr.bf16.mxu1 %v2496_v59  ;;  %v233_v58 = vsub.s32 0, %v232_v7  ;;  %v229_v59 = vld [vmem:[%s3523_s2] sm:$0x3] }
  0x8e   :  { %1644 = vmatprep.mubr.bf16.mxu0 %v2498_v13  ;;  %v237_v13 = vsub.s32 1, %v232_v7 }
  0x8f   :  { %2084 = vmatpush1.bf16.msra.mxu1 %v2855_v25  ;;  %v2510_v25 = vld [vmem:[%s3522_s0 + $0xf4] ss:$36 sps:$4 sm:$0xff]  }
  0x90   :  { %1702 = vmatpush1.bf16.msra.mxu0 %v2493_v60  ;;  %2069 = vmatprep.subr.bf16.mxu1 %v2865_v27  ;;  %v2505_v27 = vld [vmem:[%s3521_s1 + $0x450] ss:$8 sps:$4 sm:$0xff]  }
  0x91   :  { %1703 = vmatprep.subr.bf16.mxu0 %v2504_v15 }
  0x92   :  { %1439 = vmatmul.mubr.bf16.gmra.mrb[8].mxu1 %v2500_v62 }
  0x93   :  { %1645 = vmatmul.mubr.bf16.gmra.mrb[8].mxu0 %v2501_v17  ;;  %2085 = vmatpush1.bf16.msra.mxu1 %v2873_v29  ;;  %v2513_v29 = vld [vmem:[%s3522_s0 + $0xf0] ss:$36 sps:$4 sm:$0xff]   ;;  %v3350_v17 = vrot.slane %v229_v59, %v233_v58 }
  0x94   :  { %1704 = vmatpush1.bf16.msra.mxu0 %v2502_v21  ;;  %2070 = vmatprep.subr.bf16.mxu1 %v2889_v33  ;;  %v2514_v33 = vld [vmem:[%s3521_s1 + $0x460] ss:$8 sps:$4 sm:$0xff]  }
  0x95   :  { %1705 = vmatprep.subr.bf16.mxu0 %v2507_v0  ;;  %1448 = vmatprep.mubr.bf16.mxu1 %v2508_v2  ;;  %v3354_v0 = vrot.slane %v229_v59, %v237_v13 }
  0x96   :  { %1654 = vmatprep.mubr.bf16.mxu0 %v2510_v25 }
  0x97   :  { %2086 = vmatpush1.bf16.msra.mxu1 %v2903_v37  ;;  %v2517_v37 = vld [vmem:[%s3521_s1 + $0x470] ss:$8 sps:$4 sm:$0xff]  }
  0x98   :  { %1706 = vmatpush1.bf16.msra.mxu0 %v2505_v27  ;;  %2071 = vmatprep.subr.bf16.mxu1 %v2913_v39  ;;  %v2545_v39 = vmov 0  }
  0x99   :  { %1707 = vmatprep.subr.bf16.mxu0 %v2516_v4 }
  0x9a   :  { %1449 = vmatmul.mubr.bf16.gmra.mrb[12].mxu1 %v2512_v5 }
  0x9b   :  { %1655 = vmatmul.mubr.bf16.gmra.mrb[12].mxu0 %v2513_v29  ;;  %2087 = vmatpush1.bf16.msra.mxu1 %v2921_v41  ;;  %v2524_v41 = vld [vmem:[%s3522_s0 + $0x174] ss:$36 sps:$4 sm:$0xff]  }
  0x9c   :  { %1708 = vmatpush1.bf16.msra.mxu0 %v2514_v33  ;;  %2072 = vmatprep.subr.bf16.mxu1 %v2937_v45  ;;  %v2526_v45 = vld [vmem:[%s3522_s0 + $0x170] ss:$36 sps:$4 sm:$0xff]  }
  0x9d   :  { %1709 = vmatprep.subr.bf16.mxu0 %v2519_v8  ;;  %1458 = vmatprep.mubr.bf16.mxu1 %v2520_v10 }
  0x9e   :  { %1727 = vmatprep.mubr.bf16.mxu0 %v2545_v39 }
  0x9f   :  { %2088 = vmatpush1.bf16.msra.mxu1 %v2951_v49  ;;  %v2527_v49 = vld [vmem:[%s3522_s0 + $0x68] ss:$36 sps:$4 sm:$0xff]  }
  0xa0   :  { %1710 = vmatpush1.bf16.msra.mxu0 %v2517_v37  ;;  %2073 = vmatprep.subr.bf16.mxu1 %v2961_v51  ;;  %v2528_v51 = vld [vmem:[%s3522_s0 + $0x1bc] ss:$36 sps:$4 sm:$0xff]  }
  0xa2   :  { %1459 = vmatmul.mubr.bf16.gmra.mrb[16].mxu1 %v2522_v11 }
  0xa3   :  { %1728 = vmatmul.mubr.bf16.vlgmr.msra.gmra.mrb[0].mxu0 %v2523_v14  ;;  %2089 = vmatpush1.bf16.msra.mxu1 %v2969_v53  ;;  %v2530_v53 = vld [vmem:[%s3522_s0 + $0x1b8] ss:$36 sps:$4 sm:$0xff]  }
  0xa4   :  { %1468 = vmatprep.mubr.bf16.mxu1 %v2524_v41  ;;  %2074 = vmatprep.subr.bf16.mxu1 %v2985_v57  ;;  %v2531_v57 = vld [vmem:[%s3522_s0 + $0xb0] ss:$36 sps:$4 sm:$0xff]  }
  0xa5   :  { %1737 = vmatprep.mubr.bf16.mxu0 %v2545_v39 }
  0xa7   :  { %2090 = vmatpush1.bf16.msra.mxu1 %v2999_v61  ;;  %v2535_v61 = vld [vmem:[%s3522_s0 + $0x13c] ss:$36 sps:$4 sm:$0xff]  }
  0xa8   :  { %2075 = vmatprep.subr.bf16.mxu1 %v3009_v63  ;;  %v2532_v63 = vld [vmem:[%s3522_s0 + $0xf8] ss:$36 sps:$4 sm:$0xff]  }
  0xaa   :  { %1469 = vmatmul.mubr.bf16.gmra.mrb[20].mxu1 %v2526_v45 }
  0xab   :  { %1738 = vmatmul.mubr.bf16.gmra.mrb[4].mxu0 %v2527_v49  ;;  %2091 = vmatpush1.bf16.msra.mxu1 %v3017_v1  ;;  %v2533_v1 = vld [vmem:[%s3522_s0 + $0x138] ss:$36 sps:$4 sm:$0xff]  }
  0xac   :  { %1478 = vmatprep.mubr.bf16.mxu1 %v2528_v51  ;;  %2076 = vmatprep.subr.bf16.mxu1 %v3033_v6  ;;  %v2536_v6 = vld [vmem:[%s3522_s0 + $0x140] ss:$36 sps:$4 sm:$0xff]  }
  0xad   :  { %1747 = vmatprep.mubr.bf16.mxu0 %v2545_v39 }
  0xaf   :  { %2092 = vmatpush1.bf16.msra.mxu1 %v3047_v12  ;;  %v2537_v12 = vld [vmem:[%s3522_s0 + $0x184] ss:$36 sps:$4 sm:$0xff]  }
  0xb0   :  { %2077 = vmatprep.subr.bf16.mxu1 %v3057_v16  ;;  %v2539_v16 = vld [vmem:[%s3522_s0 + $0x180] ss:$36 sps:$4 sm:$0xff]  }
  0xb2   :  { %1479 = vmatmul.mubr.bf16.gmra.mrb[24].mxu1 %v2530_v53 }
  0xb3   :  { %1748 = vmatmul.mubr.bf16.gmra.mrb[8].mxu0 %v2531_v57  ;;  %2093 = vmatpush1.bf16.msra.mxu1 %v3065_v19  ;;  %v2541_v19 = vld [vmem:[%s3522_s0 + $0x1cc] ss:$36 sps:$4 sm:$0xff]  }
  0xb4   :  { %1757 = vmatprep.mubr.bf16.mxu0 %v2545_v39  ;;  %2078 = vmatprep.subr.bf16.mxu1 %v3081_v24 }
  0xb5   :  { %1664 = vmatprep.mubr.bf16.mxu1 %v2535_v61 }
  0xb7   :  { %2094 = vmatpush1.bf16.msra.mxu1 %v3096_v31 }
  0xb8   :  { %2079 = vmatprep.subr.bf16.mxu1 %v3105_v34 }
  0xbb   :  { %1758 = vmatmul.mubr.bf16.gmra.mrb[12].mxu0 %v2532_v63  ;;  %2095 = vmatpush1.bf16.msra.mxu1 %v3113_v36 }
  0xbc   :  { %1767 = vmatprep.mubr.bf16.mxu0 %v2545_v39  ;;  %2080 = vmatprep.subr.bf16.mxu1 %v3123_v40 }
  0xbf   :  { %2096 = vmatpush1.bf16.msra.mxu1 %v3132_v43 }
  0xc2   :  { %1665 = vmatmul.mubr.bf16.vlgmr.msra.gmra.mrb[28].mxu1 %v2533_v1 }
  0xc3   :  { %1768 = vmatmul.mubr.bf16.gmra.mrb[28].mxu0 %v2536_v6  ;;  %1674 = vmatprep.mubr.bf16.mxu1 %v2537_v12 }
  0xc4   :  { %1777 = vmatprep.mubr.bf16.mxu0 %v2545_v39 }
  0xca   :  { %1675 = vmatmul.mubr.bf16.gmra.mrb[32].mxu1 %v2539_v16 }
  0xcb   :  { %1778 = vmatmul.mubr.bf16.gmra.mrb[32].mxu0 %v2540_v18  ;;  %1684 = vmatprep.mubr.bf16.mxu1 %v2541_v19 }
  0xcc   :  { %1787 = vmatprep.mubr.bf16.mxu0 %v2545_v39 }
  0xd2   :  { %1685 = vmatmul.mubr.bf16.gmra.mrb[36].mxu1 %v2543_v20 }
  0xd3   :  { %1788 = vmatmul.mubr.bf16.gmra.mrb[36].mxu0 %v2544_v22 }
 0x136   :  { %v1563_v23 = vpop.f32.mrb[16].mxu0 }
 0x137   :  { %v1565_v24 = vpop.f32.mrb[17].mxu0 }
 0x138   :  { %v1567_v26 = vpop.f32.mrb[18].mxu0 }
 0x139   :  { %v3315_v28 = vpop.f32.mrb[19].mxu0 }
 0x13e   :  { %v3317_v30 = vpop.f32.mrb[20].mxu0 }
 0x13f   :  { %v3319_v31 = vpop.f32.mrb[21].mxu0 }
 0x140   :  { %v3321_v32 = vpop.f32.mrb[22].mxu0 }
 0x141   :  { %v3323_v34 = vpop.f32.mrb[23].mxu0 }
 0x146   :  { %v3325_v35 = vpop.f32.mrb[24].mxu0 }
 0x147   :  { %v3327_v36 = vpop.f32.mrb[25].mxu0 }
 0x148   :  { %v3329_v38 = vpop.f32.mrb[26].mxu0 }
 0x149   :  { %v3331_v40 = vpop.f32.mrb[27].mxu0 }
 0x155   :  { %v1420_v42 = vpop.f32.mrb[0].mxu1 }
 0x156   :  { %v1422_v43 = vpop.f32.mrb[1].mxu1  ;;  %v2097_v2 = vadd.f32 %v1420_v42, %v3350_v17 }
 0x157   :  { %v1424_v44 = vpop.f32.mrb[2].mxu1  ;;  %v2099_v25 = vadd.f32 %v1422_v43, %v3354_v0 }
 0x158   :  { %v1426_v46 = vpop.f32.mrb[3].mxu1  ;;  %v2101_v5 = vadd.f32 %v1424_v44, %v3350_v17 }
 0x159   :  { %v2103_v37 = vadd.f32 %v1426_v46, %v3354_v0 }
 0x15d   :  { %v1430_v47 = vpop.f32.mrb[4].mxu1 }
 0x15e   :  { %v1432_v48 = vpop.f32.mrb[5].mxu1  ;;  %v2105_v22 = vadd.f32 %v1430_v47, %v3350_v17 }
 0x15f   :  { %v1434_v50 = vpop.f32.mrb[6].mxu1 }
 0x160   :  { %v1436_v52 = vpop.f32.mrb[7].mxu1  ;;  %v2109_v42 = vadd.f32 %v1434_v50, %v3350_v17 }
 0x161   :  { %v2111_v47 = vadd.f32 %v1436_v52, %v3354_v0 }
 0x165   :  { %v3333_v55 = vpop.f32.mrb[8].mxu1 }
 0x166   :  { %v3335_v3 = vpop.f32.mrb[9].mxu1 }
 0x167   :  { %v3337_v56 = vpop.f32.mrb[10].mxu1 }
 0x168   :  { %v3339_v9 = vpop.f32.mrb[11].mxu1 }
 0x16d   :  { %v3344_v60 = vpop.f32.mrb[12].mxu1 }
 0x16e   :  { %v3346_v15 = vpop.f32.mrb[13].mxu1 }
 0x16f   :  { %v3348_v62 = vpop.f32.mrb[14].mxu1 }
 0x170   :  { %v3352_v21 = vpop.f32.mrb[15].mxu1 }
 0x175   :  { %v1460_v27 = vpop.f32.mrb[16].mxu1 }
 0x176   :  { %v1729_v4 = vpop.f32.mrb[0].mxu0  ;;  %v2129_v29 = vadd.f32 %v1460_v27, %v3350_v17  ;;  %v1462_v8 = vpop.f32.mrb[17].mxu1 }
 0x177   :  { %v2098_v33 = vadd.f32 %v2097_v2, %v1729_v4  ;;  %v1731_v10 = vpop.f32.mrb[1].mxu0  ;;  %v2133_v39 = vadd.f32 %v1462_v8, %v3354_v0  ;;  %v1464_v14 = vpop.f32.mrb[18].mxu1 }
 0x178   :  { %v2100_v11 = vadd.f32 %v2099_v25, %v1731_v10  ;;  %v1733_v41 = vpop.f32.mrb[2].mxu0  ;;  %v2137_v49 = vadd.f32 %v1464_v14, %v3350_v17  ;;  %v1466_v53 = vpop.f32.mrb[19].mxu1  ;;  %v3363_v61 = vadd.f32 %v2129_v29, %v1563_v23  ;;  %v2107_v23 = vadd.f32 %v1432_v48, %v3354_v0 }
 0x179   :  { %v1798_v45 = vmax.f32 %v2098_v33, 0.0  ;;  %v2102_v51 = vadd.f32 %v2101_v5, %v1733_v41  ;;  %v1735_v57 = vpop.f32.mrb[3].mxu0  ;;  %v2141_v1 = vadd.f32 %v1466_v53, %v3354_v0  ;;  %v3366_v12 = vadd.f32 %v2133_v39, %v1565_v24 }
 0x17a   :  { %v1799_v63 = vmax.f32 %v2100_v11, 0.0  ;;  %v2104_v6 = vadd.f32 %v2103_v37, %v1735_v57  ;;  %v3371_v18 = vadd.f32 %v2137_v49, %v1567_v26  ;;  %v2115_v37 = vadd.f32 %v3335_v3, %v3354_v0 }
 0x17b   :  { %1826 = vst [vmem:[%s3524_s3] sm:$0xff] %v1798_v45  ;;  %v1800_v16 = vmax.f32 %v2102_v51, 0.0  ;;  %v3377_v20 = vadd.f32 %v2141_v1, %v3315_v28  ;;  %v2119_v45 = vadd.f32 %v3339_v9, %v3354_v0 }
 0x17c   :  { %1827 = vst [vmem:[%s3524_s3 + $0x8] sm:$0xff] %v1799_v63  ;;  %v1801_v19 = vmax.f32 %v2104_v6, 0.0 }
 0x17d   :  { %1828 = vst [vmem:[%s3524_s3 + $0x10] sm:$0xff] %v1800_v16  ;;  %v1470_v24 = vpop.f32.mrb[20].mxu1 }
 0x17e   :  { %1829 = vst [vmem:[%s3524_s3 + $0x18] sm:$0xff] %v1801_v19  ;;  %v1739_v26 = vpop.f32.mrb[4].mxu0  ;;  %v2145_v43 = vadd.f32 %v1470_v24, %v3350_v17  ;;  %v1472_v44 = vpop.f32.mrb[21].mxu1 }
 0x17f   :  { %v2106_v28 = vadd.f32 %v2105_v22, %v1739_v26  ;;  %v1741_v46 = vpop.f32.mrb[5].mxu0  ;;  %v2149_v54 = vadd.f32 %v1472_v44, %v3354_v0  ;;  %v1474_v58 = vpop.f32.mrb[22].mxu1 }
 0x180   :  { %v2108_v7 = vadd.f32 %v2107_v23, %v1741_v46  ;;  %v1743_v48 = vpop.f32.mrb[6].mxu0  ;;  %v2153_v13 = vadd.f32 %v1474_v58, %v3350_v17  ;;  %v1476_v25 = vpop.f32.mrb[23].mxu1  ;;  %v3393_v50 = vadd.f32 %v2145_v43, %v3317_v30  ;;  %v2123_v43 = vadd.f32 %v3346_v15, %v3354_v0 }
 0x181   :  { %v1802_v59 = vmax.f32 %v2106_v28, 0.0  ;;  %v2110_v2 = vadd.f32 %v2109_v42, %v1743_v48  ;;  %v1745_v27 = vpop.f32.mrb[7].mxu0  ;;  %v2157_v5 = vadd.f32 %v1476_v25, %v3354_v0  ;;  %v3397_v52 = vadd.f32 %v2149_v54, %v3319_v31 }
 0x182   :  { %v1803_v4 = vmax.f32 %v2108_v7, 0.0  ;;  %v2112_v29 = vadd.f32 %v2111_v47, %v1745_v27  ;;  %v3403_v8 = vadd.f32 %v2153_v13, %v3321_v32  ;;  %v2113_v31 = vadd.f32 %v3333_v55, %v3350_v17 }
 0x183   :  { %1830 = vst [vmem:[%s3524_s3 + $0x20] sm:$0xff] %v1802_v59  ;;  %v1804_v33 = vmax.f32 %v2110_v2, 0.0  ;;  %v3409_v10 = vadd.f32 %v2157_v5, %v3323_v34  ;;  %v2117_v34 = vadd.f32 %v3337_v56, %v3350_v17  ;;  %v2125_v28 = vadd.f32 %v3348_v62, %v3350_v17 }
 0x184   :  { %1831 = vst [vmem:[%s3524_s3 + $0x28] sm:$0xff] %v1803_v4  ;;  %v1805_v30 = vmax.f32 %v2112_v29, 0.0 }
 0x185   :  { %1832 = vst [vmem:[%s3524_s3 + $0x30] sm:$0xff] %v1804_v33  ;;  %v1480_v32 = vpop.f32.mrb[24].mxu1 }
 0x186   :  { %1833 = vst [vmem:[%s3524_s3 + $0x38] sm:$0xff] %v1805_v30  ;;  %v1749_v39 = vpop.f32.mrb[8].mxu0  ;;  %v2161_v11 = vadd.f32 %v1480_v32, %v3350_v17  ;;  %v1482_v55 = vpop.f32.mrb[25].mxu1 }
 0x187   :  { %v2114_v14 = vadd.f32 %v2113_v31, %v1749_v39  ;;  %v1751_v41 = vpop.f32.mrb[9].mxu0  ;;  %v2165_v49 = vadd.f32 %v1482_v55, %v3354_v0  ;;  %v1484_v51 = vpop.f32.mrb[26].mxu1 }
 0x188   :  { %v2116_v3 = vadd.f32 %v2115_v37, %v1751_v41  ;;  %v1753_v53 = vpop.f32.mrb[10].mxu0  ;;  %v2169_v63 = vadd.f32 %v1484_v51, %v3350_v17  ;;  %v1486_v6 = vpop.f32.mrb[27].mxu1  ;;  %v3429_v56 = vadd.f32 %v2161_v11, %v3325_v35 }
 0x189   :  { %v1806_v57 = vmax.f32 %v2114_v14, 0.0  ;;  %v2118_v1 = vadd.f32 %v2117_v34, %v1753_v53  ;;  %v1755_v16 = vpop.f32.mrb[11].mxu0  ;;  %v2173_v22 = vadd.f32 %v1486_v6, %v3354_v0  ;;  %v3433_v9 = vadd.f32 %v2165_v49, %v3327_v36 }
 0x18a   :  { %v1807_v19 = vmax.f32 %v2116_v3, 0.0  ;;  %v2120_v23 = vadd.f32 %v2119_v45, %v1755_v16  ;;  %v3439_v26 = vadd.f32 %v2169_v63, %v3329_v38  ;;  %v2121_v36 = vadd.f32 %v3344_v60, %v3350_v17 }
 0x18b   :  { %1834 = vst [vmem:[%s3524_s3 + $0x40] sm:$0xff] %v1806_v57  ;;  %v1808_v24 = vmax.f32 %v2118_v1, 0.0  ;;  %v3445_v42 = vadd.f32 %v2173_v22, %v3331_v40  ;;  %v2127_v60 = vadd.f32 %v3352_v21, %v3354_v0 }
 0x18c   :  { %1835 = vst [vmem:[%s3524_s3 + $0x48] sm:$0xff] %v1807_v19  ;;  %v1809_v35 = vmax.f32 %v2120_v23, 0.0 }
 0x18d   :  { %1836 = vst [vmem:[%s3524_s3 + $0x50] sm:$0xff] %v1808_v24 }
 0x18e   :  { %1837 = vst [vmem:[%s3524_s3 + $0x58] sm:$0xff] %v1809_v35  ;;  %v1759_v38 = vpop.f32.mrb[12].mxu0 }
 0x18f   :  { %v2122_v40 = vadd.f32 %v2121_v36, %v1759_v38  ;;  %v1761_v44 = vpop.f32.mrb[13].mxu0 }
 0x190   :  { %v2124_v46 = vadd.f32 %v2123_v43, %v1761_v44  ;;  %v1763_v47 = vpop.f32.mrb[14].mxu0 }
 0x191   :  { %v1810_v54 = vmax.f32 %v2122_v40, 0.0  ;;  %v2126_v7 = vadd.f32 %v2125_v28, %v1763_v47  ;;  %v1765_v58 = vpop.f32.mrb[15].mxu0 }
 0x192   :  { %v1811_v48 = vmax.f32 %v2124_v46, 0.0  ;;  %v2128_v15 = vadd.f32 %v2127_v60, %v1765_v58 }
 0x193   :  { %1838 = vst [vmem:[%s3524_s3 + $0x60] sm:$0xff] %v1810_v54  ;;  %v1812_v59 = vmax.f32 %v2126_v7, 0.0 }
 0x194   :  { %1839 = vst [vmem:[%s3524_s3 + $0x68] sm:$0xff] %v1811_v48  ;;  %v1813_v62 = vmax.f32 %v2128_v15, 0.0 }
 0x195   :  { %1840 = vst [vmem:[%s3524_s3 + $0x70] sm:$0xff] %v1812_v59  ;;  %v1666_v17 = vpop.f32.mrb[28].mxu1 }
 0x196   :  { %1841 = vst [vmem:[%s3524_s3 + $0x78] sm:$0xff] %v1813_v62  ;;  %v1769_v21 = vpop.f32.mrb[28].mxu0  ;;  %v2131_v0 = vadd.f32 %v3363_v61, %v1666_v17  ;;  %v1668_v13 = vpop.f32.mrb[29].mxu1 }
 0x197   :  { %v1771_v2 = vpop.f32.mrb[29].mxu0  ;;  %v2135_v25 = vadd.f32 %v3366_v12, %v1668_v13  ;;  %v1670_v27 = vpop.f32.mrb[30].mxu1 }
 0x198   :  { %v1773_v4 = vpop.f32.mrb[30].mxu0  ;;  %v2132_v5 = vadd.f32 %v2131_v0, %v1769_v21  ;;  %v2139_v29 = vadd.f32 %v3371_v18, %v1670_v27  ;;  %v1672_v33 = vpop.f32.mrb[31].mxu1 }
 0x199   :  { %v1775_v30 = vpop.f32.mrb[31].mxu0  ;;  %v2136_v31 = vadd.f32 %v2135_v25, %v1771_v2  ;;  %v2143_v37 = vadd.f32 %v3377_v20, %v1672_v33 }
 0x19a   :  { %v1814_v32 = vmax.f32 %v2132_v5, 0.0  ;;  %v2140_v39 = vadd.f32 %v2139_v29, %v1773_v4 }
 0x19b   :  { %v1815_v34 = vmax.f32 %v2136_v31, 0.0  ;;  %v2144_v11 = vadd.f32 %v2143_v37, %v1775_v30 }
 0x19c   :  { %1842 = vst [vmem:[%s3524_s3 + $0x80] sm:$0xff] %v1814_v32  ;;  %v1816_v61 = vmax.f32 %v2140_v39, 0.0 }
 0x19d   :  { %1843 = vst [vmem:[%s3524_s3 + $0x88] sm:$0xff] %v1815_v34  ;;  %v1817_v12 = vmax.f32 %v2144_v11, 0.0  ;;  %v1676_v18 = vpop.f32.mrb[32].mxu1 }
 0x19e   :  { %v1779_v14 = vpop.f32.mrb[32].mxu0  ;;  %1844 = vst [vmem:[%s3524_s3 + $0x90] sm:$0xff] %v1816_v61  ;;  %v2147_v20 = vadd.f32 %v3393_v50, %v1676_v18  ;;  %v1678_v55 = vpop.f32.mrb[33].mxu1 }
 0x19f   :  { %v1781_v41 = vpop.f32.mrb[33].mxu0  ;;  %1845 = vst [vmem:[%s3524_s3 + $0x98] sm:$0xff] %v1817_v12  ;;  %v2151_v45 = vadd.f32 %v3397_v52, %v1678_v55  ;;  %v1680_v49 = vpop.f32.mrb[34].mxu1 }
 0x1a0   :  { %v1783_v3 = vpop.f32.mrb[34].mxu0  ;;  %v2148_v51 = vadd.f32 %v2147_v20, %v1779_v14  ;;  %v2155_v53 = vadd.f32 %v3403_v8, %v1680_v49  ;;  %v1682_v57 = vpop.f32.mrb[35].mxu1 }
 0x1a1   :  { %v1785_v63 = vpop.f32.mrb[35].mxu0  ;;  %v2152_v1 = vadd.f32 %v2151_v45, %v1781_v41  ;;  %v2159_v6 = vadd.f32 %v3409_v10, %v1682_v57 }
 0x1a2   :  { %v1818_v16 = vmax.f32 %v2148_v51, 0.0  ;;  %v2156_v50 = vadd.f32 %v2155_v53, %v1783_v3 }
 0x1a3   :  { %v1819_v19 = vmax.f32 %v2152_v1, 0.0  ;;  %v2160_v22 = vadd.f32 %v2159_v6, %v1785_v63 }
 0x1a4   :  { %1846 = vst [vmem:[%s3524_s3 + $0xa0] sm:$0xff] %v1818_v16  ;;  %v1820_v23 = vmax.f32 %v2156_v50, 0.0 }
 0x1a5   :  { %1847 = vst [vmem:[%s3524_s3 + $0xa8] sm:$0xff] %v1819_v19  ;;  %v1821_v52 = vmax.f32 %v2160_v22, 0.0  ;;  %v1686_v8 = vpop.f32.mrb[36].mxu1 }
 0x1a6   :  { %v1789_v24 = vpop.f32.mrb[36].mxu0  ;;  %1848 = vst [vmem:[%s3524_s3 + $0xb0] sm:$0xff] %v1820_v23  ;;  %v2163_v10 = vadd.f32 %v3429_v56, %v1686_v8  ;;  %v1688_v35 = vpop.f32.mrb[37].mxu1 }
 0x1a7   :  { %v1791_v36 = vpop.f32.mrb[37].mxu0  ;;  %1849 = vst [vmem:[%s3524_s3 + $0xb8] sm:$0xff] %v1821_v52  ;;  %v2167_v43 = vadd.f32 %v3433_v9, %v1688_v35  ;;  %v1690_v38 = vpop.f32.mrb[38].mxu1 }
 0x1a8   :  { %v1793_v28 = vpop.f32.mrb[38].mxu0  ;;  %v2164_v40 = vadd.f32 %v2163_v10, %v1789_v24  ;;  %v2171_v44 = vadd.f32 %v3439_v26, %v1690_v38  ;;  %v1692_v60 = vpop.f32.mrb[39].mxu1 }
 0x1a9   :  { %v1795_v46 = vpop.f32.mrb[39].mxu0  ;;  %v2168_v47 = vadd.f32 %v2167_v43, %v1791_v36  ;;  %v2175_v54 = vadd.f32 %v3445_v42, %v1692_v60 }
 0x1aa   :  { %v1822_v7 = vmax.f32 %v2164_v40, 0.0  ;;  %v2172_v56 = vadd.f32 %v2171_v44, %v1793_v28 }
 0x1ab   :  { %v1823_v58 = vmax.f32 %v2168_v47, 0.0  ;;  %v2176_v48 = vadd.f32 %v2175_v54, %v1795_v46 }
 0x1ac   :  { %1850 = vst [vmem:[%s3524_s3 + $0xc0] sm:$0xff] %v1822_v7  ;;  %v1824_v15 = vmax.f32 %v2172_v56, 0.0 }
 0x1ad   :  { %1851 = vst [vmem:[%s3524_s3 + $0xc8] sm:$0xff] %v1823_v58  ;;  %v1825_v9 = vmax.f32 %v2176_v48, 0.0 }
 0x1ae   :  { %1852 = vst [vmem:[%s3524_s3 + $0xd0] sm:$0xff] %v1824_v15 }
 0x1af   :  { %1853 = vst [vmem:[%s3524_s3 + $0xd8] sm:$0xff] %v1825_v9 }

// kernel: autoencoder_forward.11
= control target key start
LH: loop header
LB: loop body
LE: loop exit
PB: predicated region body
PF: predicated region fallthrough
CT: control target
= control target key end

     0   :  { %v1587_v22 = vmov 0   ;;  %v1588_v38 = vmov 1983009808   ;;  %v179_v40 = vlaneseq  ;;  %vm923_vm0 = vcmask 523264   ;;  %s2065_s1 = inlined_call_operand.vmem [shape: bf16[576,512], index: 1, kind: input, shape index: {}]   ;;  %s2066_s2 = inlined_call_operand.<no memory space> [shape: f32[1,1], index: 2, kind: input, shape index: {}]   ;;  %s2067_s0 = inlined_call_operand.vmem [shape: bf16[4,576], index: 0, kind: input, shape index: {}]   ;;  %s2068_s3 = inlined_call_operand.vmem [shape: f32[4,512], index: 3, kind: output, shape index: {}]  }
   0x1   :  { %v1362_v0 = vld [vmem:[%s2065_s1 + $0x4] ss:$16 sps:$4 sm:$0xff]   ;;  %v1364_v1 = vld [vmem:[%s2065_s1 + $0xc] ss:$16 sps:$4 sm:$0xff]   ;;  %v1366_v2 = vld [vmem:[%s2065_s1] ss:$16 sps:$4 sm:$0xff]   ;;  %1361 = vset.pattern.permute.xlu0 %v1587_v22  ;;  %v8_v26 = vstv %s2066_s2  ;;  %v177_v39 = vunpack.c.l.s4 %v1588_v38 }
   0x2   :  { %927 = vmatprep.subr.bf16.mxu0 %v1362_v0  ;;  %v1367_v3 = vld [vmem:[%s2065_s1 + $0x8] ss:$16 sps:$4 sm:$0xff]   ;;  %1050 = vmatprep.subr.bf16.mxu1 %v1364_v1  ;;  %v1368_v4 = vld [vmem:[%s2065_s1 + $0x24] ss:$16 sps:$4 sm:$0xff]   ;;  %v1370_v5 = vld [vmem:[%s2065_s1 + $0x2c] ss:$16 sps:$4 sm:$0xff]  }
   0x3   :  { %928 = vmatpush1.bf16.msra.mxu0 %v1366_v2  ;;  %1051 = vmatpush1.bf16.msra.mxu1 %v1367_v3  ;;  %v1372_v6 = vld [vmem:[%s2065_s1 + $0x20] ss:$16 sps:$4 sm:$0xff]   ;;  %v1373_v7 = vld [vmem:[%s2065_s1 + $0x28] ss:$16 sps:$4 sm:$0xff]   ;;  %v1374_v8 = vld [vmem:[%s2065_s1 + $0x44] ss:$16 sps:$4 sm:$0xff]   ;;  %v178_v44 = vunpack.c.0.s8 %v177_v39 }
   0x4   :  { %929 = vmatprep.subr.bf16.mxu0 %v1368_v4  ;;  %1052 = vmatprep.subr.bf16.mxu1 %v1370_v5  ;;  %v1376_v9 = vld [vmem:[%s2065_s1 + $0x4c] ss:$16 sps:$4 sm:$0xff]   ;;  %v1378_v10 = vld [vmem:[%s2065_s1 + $0x40] ss:$16 sps:$4 sm:$0xff]   ;;  %v1379_v11 = vld [vmem:[%s2065_s1 + $0x48] ss:$16 sps:$4 sm:$0xff]  }
   0x5   :  { %v1380_v12 = vld [vmem:[%s2065_s1 + $0x64] ss:$16 sps:$4 sm:$0xff]   ;;  %v1382_v13 = vld [vmem:[%s2065_s1 + $0x6c] ss:$16 sps:$4 sm:$0xff]   ;;  %v1384_v14 = vld [vmem:[%s2065_s1 + $0x60] ss:$16 sps:$4 sm:$0xff]  }
   0x6   :  { %v1385_v15 = vld [vmem:[%s2065_s1 + $0x68] ss:$16 sps:$4 sm:$0xff]   ;;  %v1386_v16 = vld [vmem:[%s2065_s1 + $0x84] ss:$16 sps:$4 sm:$0xff]   ;;  %v1388_v17 = vld [vmem:[%s2065_s1 + $0x8c] ss:$16 sps:$4 sm:$0xff]  }
   0x7   :  { %930 = vmatpush1.bf16.msra.mxu0 %v1372_v6  ;;  %1053 = vmatpush1.bf16.msra.mxu1 %v1373_v7  ;;  %v1390_v18 = vld [vmem:[%s2065_s1 + $0x80] ss:$16 sps:$4 sm:$0xff]   ;;  %v1391_v19 = vld [vmem:[%s2065_s1 + $0x88] ss:$16 sps:$4 sm:$0xff]   ;;  %v1392_v20 = vld [vmem:[%s2065_s1 + $0xa4] ss:$16 sps:$4 sm:$0xff]  }
   0x8   :  { %931 = vmatprep.subr.bf16.mxu0 %v1374_v8  ;;  %1054 = vmatprep.subr.bf16.mxu1 %v1376_v9  ;;  %v1394_v21 = vld [vmem:[%s2065_s1 + $0xac] ss:$16 sps:$4 sm:$0xff]   ;;  %v1396_v23 = vld [vmem:[%s2065_s1 + $0xa0] ss:$16 sps:$4 sm:$0xff]   ;;  %v1397_v24 = vld [vmem:[%s2065_s1 + $0xa8] ss:$16 sps:$4 sm:$0xff]  }
   0x9   :  { %v1398_v25 = vld [vmem:[%s2065_s1 + $0xc4] ss:$16 sps:$4 sm:$0xff]   ;;  %v1400_v27 = vld [vmem:[%s2065_s1 + $0xcc] ss:$16 sps:$4 sm:$0xff]   ;;  %9 = vst [vmem:[#allocation2] sm:$0x1] %v8_v26 }
   0xa   :  { %v1402_v28 = vld [vmem:[%s2065_s1 + $0xc0] ss:$16 sps:$4 sm:$0xff]   ;;  %v1403_v29 = vld [vmem:[%s2065_s1 + $0xc8] ss:$16 sps:$4 sm:$0xff]   ;;  %v1404_v30 = vld [vmem:[%s2065_s1 + $0xe4] ss:$16 sps:$4 sm:$0xff]  }
   0xb   :  { %932 = vmatpush1.bf16.msra.mxu0 %v1378_v10  ;;  %1055 = vmatpush1.bf16.msra.mxu1 %v1379_v11  ;;  %v1406_v31 = vld [vmem:[%s2065_s1 + $0xec] ss:$16 sps:$4 sm:$0xff]   ;;  %v1408_v32 = vld [vmem:[%s2065_s1 + $0xe0] ss:$16 sps:$4 sm:$0xff]   ;;  %v1409_v33 = vld [vmem:[%s2065_s1 + $0xe8] ss:$16 sps:$4 sm:$0xff]  }
   0xc   :  { %933 = vmatprep.subr.bf16.mxu0 %v1380_v12  ;;  %1056 = vmatprep.subr.bf16.mxu1 %v1382_v13  ;;  %v1410_v34 = vld [vmem:[%s2065_s1 + $0x104] ss:$16 sps:$4 sm:$0xff]   ;;  %v1412_v35 = vld [vmem:[%s2065_s1 + $0x10c] ss:$16 sps:$4 sm:$0xff]   ;;  %v1414_v36 = vld [vmem:[%s2065_s1 + $0x100] ss:$16 sps:$4 sm:$0xff]  }
   0xd   :  { %v1415_v37 = vld [vmem:[%s2065_s1 + $0x108] ss:$16 sps:$4 sm:$0xff]   ;;  %v1416_v41 = vld [vmem:[%s2065_s1 + $0x124] ss:$16 sps:$4 sm:$0xff]   ;;  %v1418_v42 = vld [vmem:[%s2065_s1 + $0x12c] ss:$16 sps:$4 sm:$0xff]  }
   0xe   :  { %v1420_v43 = vld [vmem:[%s2065_s1 + $0x120] ss:$16 sps:$4 sm:$0xff]   ;;  %v180_v45 = vshrl.u32 %v179_v40, 7  ;;  %v1421_v46 = vld [vmem:[%s2065_s1 + $0x128] ss:$16 sps:$4 sm:$0xff]  }
   0xf   :  { %934 = vmatpush1.bf16.msra.mxu0 %v1384_v14  ;;  %1057 = vmatpush1.bf16.msra.mxu1 %v1385_v15  ;;  %v1422_v47 = vld [vmem:[%s2065_s1 + $0x144] ss:$16 sps:$4 sm:$0xff]   ;;  %v1424_v48 = vld [vmem:[%s2065_s1 + $0x14c] ss:$16 sps:$4 sm:$0xff]   ;;  %v1426_v49 = vld [vmem:[%s2065_s1 + $0x140] ss:$16 sps:$4 sm:$0xff]  }
  0x10   :  { %935 = vmatprep.subr.bf16.mxu0 %v1386_v16  ;;  %1058 = vmatprep.subr.bf16.mxu1 %v1388_v17  ;;  %v1427_v50 = vld [vmem:[%s2065_s1 + $0x148] ss:$16 sps:$4 sm:$0xff]   ;;  %v181_v51 = vsub.s32 %v178_v44, %v180_v45  ;;  %v1428_v52 = vld [vmem:[%s2065_s1 + $0x164] ss:$16 sps:$4 sm:$0xff]   ;;  %v1430_v53 = vld [vmem:[%s2065_s1 + $0x16c] ss:$16 sps:$4 sm:$0xff]  }
  0x11   :  { %v17_v54 = vld [vmem:[%s2067_s0] sm:$0xff]  ;;  %v1433_v57 = vld [vmem:[%s2065_s1 + $0x168] ss:$16 sps:$4 sm:$0xff]   ;;  %v1436_v59 = vld [vmem:[%s2065_s1 + $0x18c] ss:$16 sps:$4 sm:$0xff]  }
  0x12   :  { %v1432_v55 = vld [vmem:[%s2065_s1 + $0x160] ss:$16 sps:$4 sm:$0xff]   ;;  %v182_v56 = vrot.slane %v17_v54, %v181_v51  ;;  %v1434_v58 = vld [vmem:[%s2065_s1 + $0x184] ss:$16 sps:$4 sm:$0xff]   ;;  %v1439_v62 = vld [vmem:[%s2065_s1 + $0x188] ss:$16 sps:$4 sm:$0xff]   ;;  %v175_v9 = vcombine.high %v17_v54, %v17_v54 }
  0x13   :  { %936 = vmatpush1.bf16.msra.mxu0 %v1390_v18  ;;  %1059 = vmatpush1.bf16.msra.mxu1 %v1391_v19  ;;  %v1438_v61 = vld [vmem:[%s2065_s1 + $0x180] ss:$16 sps:$4 sm:$0xff]   ;;  %v1440_v63 = vld [vmem:[%s2065_s1 + $0x1a4] ss:$16 sps:$4 sm:$0xff]   ;;  %v1442_v0 = vld [vmem:[%s2065_s1 + $0x1ac] ss:$16 sps:$4 sm:$0xff]  }
  0x14   :  { %937 = vmatprep.subr.bf16.mxu0 %v1392_v20  ;;  %1060 = vmatprep.subr.bf16.mxu1 %v1394_v21  ;;  %v190_v60 = vcombine.high %v182_v56, %v182_v56  ;;  %v1444_v1 = vld [vmem:[%s2065_s1 + $0x1a0] ss:$16 sps:$4 sm:$0xff]   ;;  %v1445_v2 = vld [vmem:[%s2065_s1 + $0x1a8] ss:$16 sps:$4 sm:$0xff]   ;;  %v1446_v3 = vld [vmem:[%s2065_s1 + $0x1c4] ss:$16 sps:$4 sm:$0xff]   ;;  %v1814_v14 = vrot.slane %v175_v9, %v181_v51 }
  0x15   :  { %v1448_v4 = vld [vmem:[%s2065_s1 + $0x1cc] ss:$16 sps:$4 sm:$0xff]   ;;  %v1450_v5 = vld [vmem:[%s2065_s1 + $0x1c0] ss:$16 sps:$4 sm:$0xff]   ;;  %v1451_v6 = vld [vmem:[%s2065_s1 + $0x1c8] ss:$16 sps:$4 sm:$0xff]  }
  0x16   :  { %959 = vmatprep.mubr.bf16.mxu0 %v190_v60  ;;  %1082 = vmatprep.mubr.bf16.mxu1 %v190_v60  ;;  %v1452_v7 = vld [vmem:[%s2065_s1 + $0x1e4] ss:$16 sps:$4 sm:$0xff]   ;;  %v1454_v8 = vld [vmem:[%s2065_s1 + $0x1ec] ss:$16 sps:$4 sm:$0xff]   ;;  %v1456_v10 = vld [vmem:[%s2065_s1 + $0x1e0] ss:$16 sps:$4 sm:$0xff]   ;;  %v191_v19 = vcombine.high %v1814_v14, %v1814_v14 }
  0x17   :  { %938 = vmatpush1.bf16.msra.mxu0 %v1396_v23  ;;  %1061 = vmatpush1.bf16.msra.mxu1 %v1397_v24  ;;  %v1457_v11 = vld [vmem:[%s2065_s1 + $0x1e8] ss:$16 sps:$4 sm:$0xff]   ;;  %v1461_v12 = vld [vmem:[%s2065_s1 + $0x204] ss:$16 sps:$4 sm:$0xff]   ;;  %v1464_v13 = vld [vmem:[%s2065_s1 + $0x20c] ss:$16 sps:$4 sm:$0xff]  }
  0x18   :  { %939 = vmatprep.subr.bf16.mxu0 %v1398_v25  ;;  %1062 = vmatprep.subr.bf16.mxu1 %v1400_v27  ;;  %v1459_v15 = vld [vmem:[%s2065_s1 + $0x200] ss:$16 sps:$4 sm:$0xff]   ;;  %v1462_v16 = vld [vmem:[%s2065_s1 + $0x208] ss:$16 sps:$4 sm:$0xff]   ;;  %v1467_v17 = vld [vmem:[%s2065_s1 + $0x224] ss:$16 sps:$4 sm:$0xff]  }
  0x19   :  { %v1470_v18 = vld [vmem:[%s2065_s1 + $0x22c] ss:$16 sps:$4 sm:$0xff]   ;;  %v1465_v20 = vld [vmem:[%s2065_s1 + $0x220] ss:$16 sps:$4 sm:$0xff]   ;;  %v1468_v21 = vld [vmem:[%s2065_s1 + $0x228] ss:$16 sps:$4 sm:$0xff]  }
  0x1a   :  { %v1473_v23 = vld [vmem:[%s2065_s1 + $0x244] ss:$16 sps:$4 sm:$0xff]   ;;  %v1476_v24 = vld [vmem:[%s2065_s1 + $0x24c] ss:$16 sps:$4 sm:$0xff]   ;;  %v1471_v25 = vld [vmem:[%s2065_s1 + $0x240] ss:$16 sps:$4 sm:$0xff]  }
  0x1b   :  { %940 = vmatpush1.bf16.msra.mxu0 %v1402_v28  ;;  %1063 = vmatpush1.bf16.msra.mxu1 %v1403_v29  ;;  %v1474_v26 = vld [vmem:[%s2065_s1 + $0x248] ss:$16 sps:$4 sm:$0xff]   ;;  %v1479_v27 = vld [vmem:[%s2065_s1 + $0x264] ss:$16 sps:$4 sm:$0xff]   ;;  %v1482_v28 = vld [vmem:[%s2065_s1 + $0x26c] ss:$16 sps:$4 sm:$0xff]  }
  0x1c   :  { %941 = vmatprep.subr.bf16.mxu0 %v1404_v30  ;;  %1064 = vmatprep.subr.bf16.mxu1 %v1406_v31  ;;  %v1477_v29 = vld [vmem:[%s2065_s1 + $0x260] ss:$16 sps:$4 sm:$0xff]   ;;  %v1480_v30 = vld [vmem:[%s2065_s1 + $0x268] ss:$16 sps:$4 sm:$0xff]   ;;  %v1485_v31 = vld [vmem:[%s2065_s1 + $0x284] ss:$16 sps:$4 sm:$0xff]  }
  0x1d   :  { %v1492_v38 = vld [vmem:[%s2065_s1 + $0x2a8] ss:$16 sps:$4 sm:$0xff]   ;;  %v1497_v39 = vld [vmem:[%s2065_s1 + $0x2c4] ss:$16 sps:$4 sm:$0xff]   ;;  %v1500_v40 = vld [vmem:[%s2065_s1 + $0x2cc] ss:$16 sps:$4 sm:$0xff]  }
  0x1e   :  { %v1506_v44 = vld [vmem:[%s2065_s1 + $0x2ec] ss:$16 sps:$4 sm:$0xff]   ;;  %v1501_v45 = vld [vmem:[%s2065_s1 + $0x2e0] ss:$16 sps:$4 sm:$0xff]   ;;  %v1515_v51 = vld [vmem:[%s2065_s1 + $0x324] ss:$16 sps:$4 sm:$0xff]  }
  0x1f   :  { %942 = vmatpush1.bf16.msra.mxu0 %v1408_v32  ;;  %1065 = vmatpush1.bf16.msra.mxu1 %v1409_v33  ;;  %v1488_v32 = vld [vmem:[%s2065_s1 + $0x28c] ss:$16 sps:$4 sm:$0xff]   ;;  %v1483_v33 = vld [vmem:[%s2065_s1 + $0x280] ss:$16 sps:$4 sm:$0xff]   ;;  %v1527_v60 = vld [vmem:[%s2065_s1 + $0x364] ss:$16 sps:$4 sm:$0xff]  }
  0x20   :  { %943 = vmatprep.subr.bf16.mxu0 %v1410_v34  ;;  %1066 = vmatprep.subr.bf16.mxu1 %v1412_v35  ;;  %v1486_v34 = vld [vmem:[%s2065_s1 + $0x288] ss:$16 sps:$4 sm:$0xff]   ;;  %v1491_v35 = vld [vmem:[%s2065_s1 + $0x2a4] ss:$16 sps:$4 sm:$0xff]   ;;  %v1513_v54 = vld [vmem:[%s2065_s1 + $0x320] ss:$16 sps:$4 sm:$0xff]  }
  0x21   :  { %v1548_v9 = vld [vmem:[%s2065_s1 + $0x3cc] ss:$16 sps:$4 sm:$0xff]  }
  0x23   :  { %944 = vmatpush1.bf16.msra.mxu0 %v1414_v36  ;;  %1067 = vmatpush1.bf16.msra.mxu1 %v1415_v37  ;;  %v1494_v36 = vld [vmem:[%s2065_s1 + $0x2ac] ss:$16 sps:$4 sm:$0xff]   ;;  %v1489_v37 = vld [vmem:[%s2065_s1 + $0x2a0] ss:$16 sps:$4 sm:$0xff]  }
  0x24   :  { %945 = vmatprep.subr.bf16.mxu0 %v1416_v41  ;;  %1068 = vmatprep.subr.bf16.mxu1 %v1418_v42  ;;  %v1495_v41 = vld [vmem:[%s2065_s1 + $0x2c0] ss:$16 sps:$4 sm:$0xff]   ;;  %v1498_v42 = vld [vmem:[%s2065_s1 + $0x2c8] ss:$16 sps:$4 sm:$0xff]  }
  0x27   :  { %946 = vmatpush1.bf16.msra.mxu0 %v1420_v43  ;;  %1069 = vmatpush1.bf16.msra.mxu1 %v1421_v46  ;;  %v1503_v43 = vld [vmem:[%s2065_s1 + $0x2e4] ss:$16 sps:$4 sm:$0xff]   ;;  %v1504_v46 = vld [vmem:[%s2065_s1 + $0x2e8] ss:$16 sps:$4 sm:$0xff]  }
  0x28   :  { %947 = vmatprep.subr.bf16.mxu0 %v1422_v47  ;;  %1070 = vmatprep.subr.bf16.mxu1 %v1424_v48  ;;  %v1509_v47 = vld [vmem:[%s2065_s1 + $0x304] ss:$16 sps:$4 sm:$0xff]   ;;  %v1512_v48 = vld [vmem:[%s2065_s1 + $0x30c] ss:$16 sps:$4 sm:$0xff]  }
  0x2b   :  { %948 = vmatpush1.bf16.msra.mxu0 %v1426_v49  ;;  %1071 = vmatpush1.bf16.msra.mxu1 %v1427_v50  ;;  %v1507_v49 = vld [vmem:[%s2065_s1 + $0x300] ss:$16 sps:$4 sm:$0xff]   ;;  %v1510_v50 = vld [vmem:[%s2065_s1 + $0x308] ss:$16 sps:$4 sm:$0xff]  }
  0x2c   :  { %949 = vmatprep.subr.bf16.mxu0 %v1428_v52  ;;  %1072 = vmatprep.subr.bf16.mxu1 %v1430_v53  ;;  %v1518_v52 = vld [vmem:[%s2065_s1 + $0x32c] ss:$16 sps:$4 sm:$0xff]   ;;  %v1191_v53 = vld [vmem:[#allocation2] ss:$0 sm:$0xff] }
  0x2d   :  { %170 = vperm.xlu0 %1361, %v1191_v53  }
  0x2f   :  { %950 = vmatpush1.bf16.msra.mxu0 %v1432_v55  ;;  %1073 = vmatpush1.bf16.msra.mxu1 %v1433_v57  ;;  %v1516_v55 = vld [vmem:[%s2065_s1 + $0x328] ss:$16 sps:$4 sm:$0xff]   ;;  %v1524_v57 = vld [vmem:[%s2065_s1 + $0x34c] ss:$16 sps:$4 sm:$0xff]  }
  0x30   :  { %951 = vmatprep.subr.bf16.mxu0 %v1434_v58  ;;  %1074 = vmatprep.subr.bf16.mxu1 %v1436_v59  ;;  %v1519_v58 = vld [vmem:[%s2065_s1 + $0x340] ss:$16 sps:$4 sm:$0xff]   ;;  %v1522_v59 = vld [vmem:[%s2065_s1 + $0x348] ss:$16 sps:$4 sm:$0xff]  }
  0x33   :  { %952 = vmatpush1.bf16.msra.mxu0 %v1438_v61  ;;  %1075 = vmatpush1.bf16.msra.mxu1 %v1439_v62  ;;  %v1530_v61 = vld [vmem:[%s2065_s1 + $0x36c] ss:$16 sps:$4 sm:$0xff]   ;;  %v1525_v62 = vld [vmem:[%s2065_s1 + $0x360] ss:$16 sps:$4 sm:$0xff]  }
  0x34   :  { %953 = vmatprep.subr.bf16.mxu0 %v1440_v63  ;;  %1076 = vmatprep.subr.bf16.mxu1 %v1442_v0  ;;  %v1528_v63 = vld [vmem:[%s2065_s1 + $0x368] ss:$16 sps:$4 sm:$0xff]   ;;  %v1533_v0 = vld [vmem:[%s2065_s1 + $0x384] ss:$16 sps:$4 sm:$0xff]  }
  0x37   :  { %954 = vmatpush1.bf16.msra.mxu0 %v1444_v1  ;;  %1077 = vmatpush1.bf16.msra.mxu1 %v1445_v2  ;;  %v1536_v1 = vld [vmem:[%s2065_s1 + $0x38c] ss:$16 sps:$4 sm:$0xff]   ;;  %v1531_v2 = vld [vmem:[%s2065_s1 + $0x380] ss:$16 sps:$4 sm:$0xff]  }
  0x38   :  { %955 = vmatprep.subr.bf16.mxu0 %v1446_v3  ;;  %1078 = vmatprep.subr.bf16.mxu1 %v1448_v4  ;;  %v1534_v3 = vld [vmem:[%s2065_s1 + $0x388] ss:$16 sps:$4 sm:$0xff]   ;;  %v1539_v4 = vld [vmem:[%s2065_s1 + $0x3a4] ss:$16 sps:$4 sm:$0xff]  }
  0x3b   :  { %956 = vmatpush1.bf16.msra.mxu0 %v1450_v5  ;;  %1079 = vmatpush1.bf16.msra.mxu1 %v1451_v6  ;;  %v1542_v5 = vld [vmem:[%s2065_s1 + $0x3ac] ss:$16 sps:$4 sm:$0xff]   ;;  %v1537_v6 = vld [vmem:[%s2065_s1 + $0x3a0] ss:$16 sps:$4 sm:$0xff]  }
  0x3c   :  { %957 = vmatprep.subr.bf16.mxu0 %v1452_v7  ;;  %1080 = vmatprep.subr.bf16.mxu1 %v1454_v8  ;;  %v1540_v7 = vld [vmem:[%s2065_s1 + $0x3a8] ss:$16 sps:$4 sm:$0xff]   ;;  %v1545_v8 = vld [vmem:[%s2065_s1 + $0x3c4] ss:$16 sps:$4 sm:$0xff]  }
  0x3f   :  { %958 = vmatpush1.bf16.msra.mxu0 %v1456_v10  ;;  %1081 = vmatpush1.bf16.msra.mxu1 %v1457_v11  ;;  %v1543_v10 = vld [vmem:[%s2065_s1 + $0x3c0] ss:$16 sps:$4 sm:$0xff]   ;;  %v1546_v11 = vld [vmem:[%s2065_s1 + $0x3c8] ss:$16 sps:$4 sm:$0xff]  }
  0x40   :  { %968 = vmatprep.subr.bf16.mxu0 %v1461_v12  ;;  %1091 = vmatprep.subr.bf16.mxu1 %v1464_v13  ;;  %v1551_v12 = vld [vmem:[%s2065_s1 + $0x3e4] ss:$16 sps:$4 sm:$0xff]   ;;  %v1554_v13 = vld [vmem:[%s2065_s1 + $0x3ec] ss:$16 sps:$4 sm:$0xff]  }
  0x42   :  { %960 = vmatmul.mubr.bf16.vlgmr.msra.gmra.mrb[0].mxu0 %v182_v56  ;;  %1083 = vmatmul.mubr.bf16.vlgmr.msra.gmra.mrb[0].mxu1 %v182_v56  ;;  %v1521_v56 = vld [vmem:[%s2065_s1 + $0x344] ss:$16 sps:$4 sm:$0xff]  }
  0x43   :  { %969 = vmatpush1.bf16.msra.mxu0 %v1459_v15  ;;  %1092 = vmatpush1.bf16.msra.mxu1 %v1462_v16  ;;  %v1549_v15 = vld [vmem:[%s2065_s1 + $0x3e0] ss:$16 sps:$4 sm:$0xff]   ;;  %v1552_v16 = vld [vmem:[%s2065_s1 + $0x3e8] ss:$16 sps:$4 sm:$0xff]  }
  0x44   :  { %970 = vmatprep.subr.bf16.mxu0 %v1467_v17  ;;  %1093 = vmatprep.subr.bf16.mxu1 %v1470_v18  ;;  %v1557_v17 = vld [vmem:[%s2065_s1 + $0x404] ss:$16 sps:$4 sm:$0xff]   ;;  %v1560_v18 = vld [vmem:[%s2065_s1 + $0x40c] ss:$16 sps:$4 sm:$0xff]  }
  0x45   :  { %1000 = vmatprep.mubr.bf16.mxu0 %v191_v19  ;;  %1123 = vmatprep.mubr.bf16.mxu1 %v191_v19  ;;  %v1555_v19 = vld [vmem:[%s2065_s1 + $0x400] ss:$16 sps:$4 sm:$0xff]  }
  0x47   :  { %971 = vmatpush1.bf16.msra.mxu0 %v1465_v20  ;;  %1094 = vmatpush1.bf16.msra.mxu1 %v1468_v21  ;;  %v1558_v20 = vld [vmem:[%s2065_s1 + $0x408] ss:$16 sps:$4 sm:$0xff]   ;;  %v1563_v21 = vld [vmem:[%s2065_s1 + $0x424] ss:$16 sps:$4 sm:$0xff]  }
  0x48   :  { %972 = vmatprep.subr.bf16.mxu0 %v1473_v23  ;;  %1095 = vmatprep.subr.bf16.mxu1 %v1476_v24  ;;  %v1566_v23 = vld [vmem:[%s2065_s1 + $0x42c] ss:$16 sps:$4 sm:$0xff]   ;;  %v1561_v24 = vld [vmem:[%s2065_s1 + $0x420] ss:$16 sps:$4 sm:$0xff]  }
  0x4b   :  { %973 = vmatpush1.bf16.msra.mxu0 %v1471_v25  ;;  %1096 = vmatpush1.bf16.msra.mxu1 %v1474_v26  ;;  %v1564_v25 = vld [vmem:[%s2065_s1 + $0x428] ss:$16 sps:$4 sm:$0xff]   ;;  %v1569_v26 = vld [vmem:[%s2065_s1 + $0x444] ss:$16 sps:$4 sm:$0xff]  }
  0x4c   :  { %974 = vmatprep.subr.bf16.mxu0 %v1479_v27  ;;  %1097 = vmatprep.subr.bf16.mxu1 %v1482_v28  ;;  %v1567_v27 = vld [vmem:[%s2065_s1 + $0x440] ss:$16 sps:$4 sm:$0xff]   ;;  %v1570_v28 = vld [vmem:[%s2065_s1 + $0x448] ss:$16 sps:$4 sm:$0xff]  }
  0x4f   :  { %975 = vmatpush1.bf16.msra.mxu0 %v1477_v29  ;;  %1098 = vmatpush1.bf16.msra.mxu1 %v1480_v30  ;;  %v1575_v29 = vld [vmem:[%s2065_s1 + $0x464] ss:$16 sps:$4 sm:$0xff]   ;;  %v1573_v30 = vld [vmem:[%s2065_s1 + $0x460] ss:$16 sps:$4 sm:$0xff]  }
  0x50   :  { %976 = vmatprep.subr.bf16.mxu0 %v1485_v31  ;;  %1099 = vmatprep.subr.bf16.mxu1 %v1488_v32  ;;  %v1576_v31 = vld [vmem:[%s2065_s1 + $0x468] ss:$16 sps:$4 sm:$0xff]  }
  0x51   :  { %v1192_v32 = vld.sshfl [vmem:[%s2067_s0 + $0x8] sm:$0x3 pattern:$0x76325410] }
  0x53   :  { %977 = vmatpush1.bf16.msra.mxu0 %v1483_v33  ;;  %1100 = vmatpush1.bf16.msra.mxu1 %v1486_v34 }
  0x54   :  { %978 = vmatprep.subr.bf16.mxu0 %v1491_v35  ;;  %1101 = vmatprep.subr.bf16.mxu1 %v1494_v36 }
  0x57   :  { %979 = vmatpush1.bf16.msra.mxu0 %v1489_v37  ;;  %1102 = vmatpush1.bf16.msra.mxu1 %v1492_v38 }
  0x58   :  { %980 = vmatprep.subr.bf16.mxu0 %v1497_v39  ;;  %1103 = vmatprep.subr.bf16.mxu1 %v1500_v40 }
  0x5b   :  { %981 = vmatpush1.bf16.msra.mxu0 %v1495_v41  ;;  %1104 = vmatpush1.bf16.msra.mxu1 %v1498_v42 }
  0x5c   :  { %982 = vmatprep.subr.bf16.mxu0 %v1503_v43  ;;  %1105 = vmatprep.subr.bf16.mxu1 %v1506_v44 }
  0x5f   :  { %983 = vmatpush1.bf16.msra.mxu0 %v1501_v45  ;;  %1106 = vmatpush1.bf16.msra.mxu1 %v1504_v46 }
  0x60   :  { %984 = vmatprep.subr.bf16.mxu0 %v1509_v47  ;;  %1107 = vmatprep.subr.bf16.mxu1 %v1512_v48 }
  0x63   :  { %985 = vmatpush1.bf16.msra.mxu0 %v1507_v49  ;;  %1108 = vmatpush1.bf16.msra.mxu1 %v1510_v50 }
  0x64   :  { %986 = vmatprep.subr.bf16.mxu0 %v1515_v51  ;;  %1109 = vmatprep.subr.bf16.mxu1 %v1518_v52 }
  0x67   :  { %987 = vmatpush1.bf16.msra.mxu0 %v1513_v54  ;;  %1110 = vmatpush1.bf16.msra.mxu1 %v1516_v55 }
  0x68   :  { %988 = vmatprep.subr.bf16.mxu0 %v1521_v56  ;;  %1111 = vmatprep.subr.bf16.mxu1 %v1524_v57 }
  0x6b   :  { %989 = vmatpush1.bf16.msra.mxu0 %v1519_v58  ;;  %1112 = vmatpush1.bf16.msra.mxu1 %v1522_v59 }
  0x6c   :  { %990 = vmatprep.subr.bf16.mxu0 %v1527_v60  ;;  %1113 = vmatprep.subr.bf16.mxu1 %v1530_v61 }
  0x6f   :  { %991 = vmatpush1.bf16.msra.mxu0 %v1525_v62  ;;  %1114 = vmatpush1.bf16.msra.mxu1 %v1528_v63 }
  0x70   :  { %992 = vmatprep.subr.bf16.mxu0 %v1533_v0  ;;  %1115 = vmatprep.subr.bf16.mxu1 %v1536_v1 }
  0x73   :  { %993 = vmatpush1.bf16.msra.mxu0 %v1531_v2  ;;  %1116 = vmatpush1.bf16.msra.mxu1 %v1534_v3 }
  0x74   :  { %994 = vmatprep.subr.bf16.mxu0 %v1539_v4  ;;  %1117 = vmatprep.subr.bf16.mxu1 %v1542_v5 }
  0x77   :  { %995 = vmatpush1.bf16.msra.mxu0 %v1537_v6  ;;  %1118 = vmatpush1.bf16.msra.mxu1 %v1540_v7 }
  0x78   :  { %996 = vmatprep.subr.bf16.mxu0 %v1545_v8  ;;  %1119 = vmatprep.subr.bf16.mxu1 %v1548_v9 }
  0x7b   :  { %997 = vmatpush1.bf16.msra.mxu0 %v1543_v10  ;;  %1120 = vmatpush1.bf16.msra.mxu1 %v1546_v11 }
  0x7c   :  { %998 = vmatprep.subr.bf16.mxu0 %v1551_v12  ;;  %1121 = vmatprep.subr.bf16.mxu1 %v1554_v13 }
  0x7f   :  { %999 = vmatpush1.bf16.msra.mxu0 %v1549_v15  ;;  %1122 = vmatpush1.bf16.msra.mxu1 %v1552_v16 }
  0x80   :  { %1009 = vmatprep.subr.bf16.mxu0 %v1557_v17  ;;  %1132 = vmatprep.subr.bf16.mxu1 %v1560_v18 }
  0x82   :  { %1001 = vmatmul.mubr.bf16.vlgmr.msra.gmra.mrb[0].mxu0 %v1814_v14  ;;  %1124 = vmatmul.mubr.bf16.vlgmr.msra.gmra.mrb[0].mxu1 %v1814_v14  ;;  %v1572_v14 = vld [vmem:[%s2065_s1 + $0x44c] ss:$16 sps:$4 sm:$0xff]  }
  0x83   :  { %1010 = vmatpush1.bf16.msra.mxu0 %v1555_v19  ;;  %1133 = vmatpush1.bf16.msra.mxu1 %v1558_v20 }
  0x84   :  { %1011 = vmatprep.subr.bf16.mxu0 %v1563_v21  ;;  %1134 = vmatprep.subr.bf16.mxu1 %v1566_v23 }
  0x85   :  { %1041 = vmatprep.mubr.bf16.mxu0 %v1587_v22  ;;  %1164 = vmatprep.mubr.bf16.mxu1 %v1587_v22  ;;  %v1578_v22 = vld [vmem:[%s2065_s1 + $0x46c] ss:$16 sps:$4 sm:$0xff]  }
  0x87   :  { %1012 = vmatpush1.bf16.msra.mxu0 %v1561_v24  ;;  %1135 = vmatpush1.bf16.msra.mxu1 %v1564_v25 }
  0x88   :  { %1013 = vmatprep.subr.bf16.mxu0 %v1569_v26  ;;  %1136 = vmatprep.subr.bf16.mxu1 %v1572_v14 }
  0x8b   :  { %1014 = vmatpush1.bf16.msra.mxu0 %v1567_v27  ;;  %1137 = vmatpush1.bf16.msra.mxu1 %v1570_v28 }
  0x8c   :  { %1015 = vmatprep.subr.bf16.mxu0 %v1575_v29  ;;  %1138 = vmatprep.subr.bf16.mxu1 %v1578_v22 }
  0x8f   :  { %1016 = vmatpush1.bf16.msra.mxu0 %v1573_v30  ;;  %1139 = vmatpush1.bf16.msra.mxu1 %v1576_v31 }
  0x92   :  { %1337 = vmatmul.mubr.msk.bf16.vlgmr.msra.gmra.mrb[0].mxu0 %vm923_vm0, %v1192_v32  ;;  %1338 = vmatmul.mubr.msk.bf16.vlgmr.msra.gmra.mrb[0].mxu1 %vm923_vm0, %v1192_v32 }
  0xac   :  { %v171_v33 = vpop.permute.xlu0 %170 }
 0x165   :  { %v1043_v34 = vpop.f32.mrb[0].mxu0  ;;  %v1166_v35 = vpop.f32.mrb[0].mxu1 }
 0x166   :  { %v1339_v36 = vadd.f32 %v1043_v34, %v171_v33  ;;  %v1341_v37 = vadd.f32 %v1166_v35, %v171_v33  ;;  %v1045_v38 = vpop.f32.mrb[1].mxu0  ;;  %v1168_v39 = vpop.f32.mrb[1].mxu1 }
 0x167   :  { %v1340_v40 = vadd.f32 %v1045_v38, %v171_v33  ;;  %v1342_v41 = vadd.f32 %v1168_v39, %v171_v33  ;;  %v1047_v42 = vpop.f32.mrb[2].mxu0  ;;  %v1170_v43 = vpop.f32.mrb[2].mxu1 }
 0x168   :  { %1579 = vtanh.f32 %v1339_v36  ;;  %v1048_v44 = vpop.f32.mrb[3].mxu0  ;;  %v1171_v45 = vpop.f32.mrb[3].mxu1 }
 0x169   :  { %1581 = vtanh.f32 %v1341_v37 }
 0x16a   :  { %1583 = vtanh.f32 %v1340_v40 }
 0x16b   :  { %1585 = vtanh.f32 %v1342_v41 }
 0x172   :  { %v1580_v46 = vpop.eup %1579 }
 0x173   :  { %v1582_v47 = vpop.eup %1581 }
 0x174   :  { %v1584_v48 = vpop.eup %1583 }
 0x175   :  { %v1586_v49 = vpop.eup %1585  ;;  %v1181_v50 = vcombine.low %v1580_v46, %v1584_v48 }
 0x176   :  { %v1182_v51 = vcombine.low %v1582_v47, %v1586_v49 }
 0x177   :  { %1185 = vst [vmem:[%s2068_s3] sm:$0xff] %v1181_v50 }
 0x178   :  { %1186 = vst [vmem:[%s2068_s3 + $0x8] sm:$0xff] %v1182_v51 }

</bundles_post_ra>
